<compile_context>
chip_gen: v6e
topology: v6e:2x2x1
jax: 0.10.0
libtpu: 0.0.40
codegen_flags: <defaults>
</compile_context>

<pallas_src>
import functools
import math

import jax
import jax.numpy as jnp
from jax import lax
from jax.experimental import pallas as pl
from jax.experimental.pallas import tpu as pltpu

LN_EPS = 1e-5  # PyTorch nn.LayerNorm default


def _layernorm(x, gamma, beta):
    mu = jnp.mean(x, axis=-1, keepdims=True)
    var = jnp.mean((x - mu) ** 2, axis=-1, keepdims=True)
    return (x - mu) * lax.rsqrt(var + LN_EPS) * gamma + beta


def _deq_matmul(x_bf16, wq_ref, scale_ref, bias_ref):
    """y = x @ dequant(w_int8) + b, f32 accumulation.

    int8 weights are cast to bf16 on the VPU (cheap next to the matmul); the
    per-output-channel dequant scale is applied together with the bias add.
    """
    acc = jnp.dot(x_bf16, wq_ref[0].astype(jnp.bfloat16),
                  preferred_element_type=jnp.float32)
    return acc * scale_ref[0] + bias_ref[0]


# ---------------------------------------------------------------------------
# Kernel 1: embedding LayerNorm + L transformer blocks (grid over layers)
# ---------------------------------------------------------------------------
def encoder_kernel(x_ref, embln_ref,
                   wqkv_ref, sqkv_ref, bqkv_ref,
                   wo_ref, so_ref, bo_ref,
                   wf1_ref, sf1_ref, bf1_ref,
                   wf2_ref, sf2_ref, bf2_ref,
                   ln_ref,
                   hid_ref, act_ref, *, B, S, E):
    l = pl.program_id(0)

    # --- embedding LayerNorm (once, before layer 0) ---
    @pl.when(l == 0)
    def _():
        act_ref[...] = _layernorm(x_ref[...].astype(jnp.float32),
                                  embln_ref[0:1, :], embln_ref[1:2, :])

    x = act_ref[...]                                   # (B*S, E) f32, VMEM resident
    xb = x.astype(jnp.bfloat16)

    # --- fused QKV projection: (B*S, E) @ (E, 3E); 1/sqrt(E) pre-folded into Q ---
    qkv = _deq_matmul(xb, wqkv_ref, sqkv_ref, bqkv_ref)            # (B*S, 3E) f32
    q = qkv[:, :E].reshape(B, S, E).astype(jnp.bfloat16)
    k = qkv[:, E:2 * E].reshape(B, S, E).astype(jnp.bfloat16)
    v = qkv[:, 2 * E:].reshape(B, S, E).astype(jnp.bfloat16)

    # --- single full-width attention head (as in the reference), per-sequence ---
    scores = lax.dot_general(q, k, (((2,), (2,)), ((0,), (0,))),
                             preferred_element_type=jnp.float32)   # (B, S, S)
    scores = scores - jnp.max(scores, axis=-1, keepdims=True)
    p = jnp.exp(scores)
    w = p / jnp.sum(p, axis=-1, keepdims=True)                     # exact softmax
    attn = lax.dot_general(w.astype(jnp.bfloat16), v,
                           (((2,), (1,)), ((0,), (0,))),
                           preferred_element_type=jnp.float32)     # (B, S, E)
    attn = _deq_matmul(attn.reshape(B * S, E).astype(jnp.bfloat16),
                       wo_ref, so_ref, bo_ref)
    # dropout -> identity (eval mode)

    x1 = _layernorm(x + attn, ln_ref[0, 0:1, :], ln_ref[0, 1:2, :])

    # --- feed forward ---
    h = _deq_matmul(x1.astype(jnp.bfloat16), wf1_ref, sf1_ref, bf1_ref)
    h = jnp.maximum(h, 0.0)                                        # ReLU
    ff = _deq_matmul(h.astype(jnp.bfloat16), wf2_ref, sf2_ref, bf2_ref)
    # dropout -> identity (eval mode)

    x2 = _layernorm(x1 + ff, ln_ref[0, 2:3, :], ln_ref[0, 3:4, :])
    act_ref[...] = x2

    # --- final hidden states out (bf16: LM-head matmul consumes bf16 anyway) ---
    @pl.when(l == pl.num_programs(0) - 1)
    def _():
        hid_ref[...] = x2.astype(hid_ref.dtype)


# ---------------------------------------------------------------------------
# Kernel 2: LM head, tiled (M, V) so lm_w never sits resident in the layer loop
# ---------------------------------------------------------------------------
def lm_head_kernel(h_ref, w_ref, b_ref, out_ref):
    out_ref[...] = (jnp.dot(h_ref[...], w_ref[...],
                            preferred_element_type=jnp.float32) + b_ref[...])


# ---------------------------------------------------------------------------
# pallas_call plumbing
# ---------------------------------------------------------------------------
def _const_spec(shape):
    # Same block every grid step -> loaded once, kept VMEM resident.
    return pl.BlockSpec(shape, lambda l: (0,) * len(shape))


def _layer_spec(shape):
    # One layer's slice of a (L, ...) stacked array, streamed per grid step.
    return pl.BlockSpec((1,) + shape, lambda l: (l,) + (0,) * len(shape))


def _nbytes(shape, dtype):
    n = 1
    for d in shape:
        n *= d
    return n * jnp.dtype(dtype).itemsize


def _vmem_limit(needed_bytes):
    # Compute the limit from actual block sizes instead of a hard-coded 32 MiB.
    try:
        cap = int(pltpu.get_tpu_info().vmem_capacity_bytes)
    except Exception:
        cap = 64 * 1024 * 1024        # v7x per-TC floor
    lo = max(2 * needed_bytes + (16 << 20), 32 << 20)   # headroom for Mosaic scratch
    hi = max(cap - (4 << 20), 32 << 20)
    return int(min(lo, hi))


def encoder_forward(x_emb, p, B, S):
    BS, E = x_emb.shape
    L = p["w_qkv"].shape[0]
    F = p["w_ff1"].shape[2]

    kernel = functools.partial(encoder_kernel, B=B, S=S, E=E)

    layer_blocks = [
        ((E, 3 * E), jnp.int8), ((1, 3 * E), jnp.float32), ((1, 3 * E), jnp.float32),
        ((E, E), jnp.int8), ((1, E), jnp.float32), ((1, E), jnp.float32),
        ((E, F), jnp.int8), ((1, F), jnp.float32), ((1, F), jnp.float32),
        ((F, E), jnp.int8), ((1, E), jnp.float32), ((1, E), jnp.float32),
        ((4, E), jnp.float32),
    ]
    per_layer = sum(_nbytes(s, d) for s, d in layer_blocks)
    const = _nbytes((BS, E), jnp.bfloat16) * 2 + _nbytes((2, E), jnp.float32)
    scratch = _nbytes((BS, E), jnp.float32)
    needed = 2 * per_layer + 2 * const + scratch          # double-buffered streams

    return pl.pallas_call(
        kernel,
        out_shape=jax.ShapeDtypeStruct((BS, E), jnp.bfloat16),
        grid=(L,),
        in_specs=[
            _const_spec((BS, E)),                              # embeddings (bf16)
            _const_spec((2, E)),                               # embed LN gamma/beta
            _layer_spec((E, 3 * E)), _layer_spec((1, 3 * E)), _layer_spec((1, 3 * E)),
            _layer_spec((E, E)),     _layer_spec((1, E)),     _layer_spec((1, E)),
            _layer_spec((E, F)),     _layer_spec((1, F)),     _layer_spec((1, F)),
            _layer_spec((F, E)),     _layer_spec((1, E)),     _layer_spec((1, E)),
            _layer_spec((4, E)),                               # norm1/norm2 params
        ],
        out_specs=_const_spec((BS, E)),
        scratch_shapes=[pltpu.VMEM((BS, E), jnp.float32)],     # resident activations
        compiler_params=pltpu.CompilerParams(
            dimension_semantics=("arbitrary",),                # layer loop is sequential
            vmem_limit_bytes=_vmem_limit(needed)),
    )(x_emb, p["emb_ln"],
      p["w_qkv"], p["s_qkv"], p["b_qkv"],
      p["w_o"], p["s_o"], p["b_o"],
      p["w_ff1"], p["s_ff1"], p["b_ff1"],
      p["w_ff2"], p["s_ff2"], p["b_ff2"],
      p["ln"])


def lm_head_forward(hidden, p, tm=128, tv=128):
    BS, E = hidden.shape
    V = p["lm_w"].shape[1]
    assert BS % tm == 0 and V % tv == 0
    return pl.pallas_call(
        lm_head_kernel,
        out_shape=jax.ShapeDtypeStruct((BS, V), jnp.float32),
        grid=(BS // tm, V // tv),
        in_specs=[pl.BlockSpec((tm, E), lambda i, j: (i, 0)),
                  pl.BlockSpec((E, tv), lambda i, j: (0, j)),
                  pl.BlockSpec((1, tv), lambda i, j: (0, j))],
        out_specs=pl.BlockSpec((tm, tv), lambda i, j: (i, j)),
        compiler_params=pltpu.CompilerParams(
            dimension_semantics=("parallel", "parallel")),
    )(hidden, p["lm_w"], p["lm_b"])


# ---------------------------------------------------------------------------
# Parameter init (deterministic, synthetic); weights pre-transposed to (in, out),
# layer-stacked, int8-quantized per output channel for the streamed layer weights.
# ---------------------------------------------------------------------------
def _quantize_int8(w):
    amax = jnp.max(jnp.abs(w), axis=-2, keepdims=True)
    scale = jnp.where(amax > 0, amax / 127.0, 1.0).astype(jnp.float32)
    q = jnp.clip(jnp.round(w / scale), -127, 127).astype(jnp.int8)
    return q, scale


def init_params(key, vocab_size, embed_dim, num_layers, max_len, ff_hidden=512):
    E, F, L, V = embed_dim, ff_hidden, num_layers, vocab_size
    keys = jax.random.split(key, 7)

    def dense(k, shape):
        return 0.02 * jax.random.normal(k, shape, jnp.float32)

    # Fold 1/sqrt(E) into the Q slice of the fused QKV projection (weight + bias).
    w_qkv = dense(keys[2], (L, E, 3 * E))
    b_qkv = jnp.zeros((L, 1, 3 * E), jnp.float32)
    att_scale = 1.0 / math.sqrt(E)
    w_qkv = w_qkv.at[:, :, :E].multiply(att_scale)
    b_qkv = b_qkv.at[:, :, :E].multiply(att_scale)

    wq_qkv, s_qkv = _quantize_int8(w_qkv)
    wq_o,   s_o   = _quantize_int8(dense(keys[3], (L, E, E)))
    wq_f1,  s_f1  = _quantize_int8(dense(keys[4], (L, E, F)))
    wq_f2,  s_f2  = _quantize_int8(dense(keys[5], (L, F, E)))

    ln = jnp.concatenate([
        jnp.ones((L, 1, E), jnp.float32), jnp.zeros((L, 1, E), jnp.float32),   # norm1
        jnp.ones((L, 1, E), jnp.float32), jnp.zeros((L, 1, E), jnp.float32),   # norm2
    ], axis=1)

    return {
        "token_embed": 0.02 * jax.random.normal(keys[0], (V, E), jnp.float32),
        "position_embed": 0.02 * jax.random.normal(keys[1], (max_len, E), jnp.float32),
        "emb_ln": jnp.concatenate([jnp.ones((1, E), jnp.float32),
                                   jnp.zeros((1, E), jnp.float32)], axis=0),
        "w_qkv": wq_qkv, "s_qkv": s_qkv, "b_qkv": b_qkv,
        "w_o": wq_o, "s_o": s_o, "b_o": jnp.zeros((L, 1, E), jnp.float32),
        "w_ff1": wq_f1, "s_ff1": s_f1, "b_ff1": jnp.zeros((L, 1, F), jnp.float32),
        "w_ff2": wq_f2, "s_ff2": s_f2, "b_ff2": jnp.zeros((L, 1, E), jnp.float32),
        "ln": ln,
        "lm_w": dense(keys[6], (E, V)).astype(jnp.bfloat16),
        "lm_b": jnp.zeros((1, V), jnp.float32),
    }


# ---------------------------------------------------------------------------
# Full forward pass
# ---------------------------------------------------------------------------
def roberta_forward(input_ids, params):
    B, S = input_ids.shape
    # Embedding gathers (glue, outside the kernel): token + position embeddings.
    tok = jnp.take(params["token_embed"], input_ids, axis=0)       # (B, S, E)
    pos = params["position_embed"][:S][None, :, :]                 # (1, S, E)
    x = (tok + pos).reshape(B * S, -1).astype(jnp.bfloat16)        # bf16 activation DMA
    hidden = encoder_forward(x, params, B, S)                      # (B*S, E) bf16
    logits = lm_head_forward(hidden, params)                       # (B*S, V) f32
    return logits.reshape(B, S, -1)


if __name__ == "__main__":
    vocab_size = 384      # multiple of 128 -> lane-dense LM-head tiles
    embed_dim = 256
    num_layers = 4
    max_len = 128
    B, S = 2, 128         # B*S = 256 tokens: fills the MXU; S multiple of 128 -> dense softmax

    key = jax.random.PRNGKey(0)
    k_param, k_ids = jax.random.split(key)
    params = init_params(k_param, vocab_size, embed_dim, num_layers, max_len)
    input_ids = jax.random.randint(k_ids, (B, S), 0, vocab_size, dtype=jnp.int32)

    fwd = jax.jit(roberta_forward)
    logits = fwd(input_ids, params)
    jax.block_until_ready(logits)
    assert logits.shape == (B, S, vocab_size)
    assert bool(jnp.all(jnp.isfinite(logits)))
    # TODO(synk): num_heads=8 is accepted but unused in the reference (attention
    # never splits heads); reproduced as a single full-width head with 1/sqrt(E).
    print("KERNEL_OK")
</pallas_src>

<mosaic_0001>
module attributes {stable_mosaic.version = 11 : i64} {
  func.func @lm_head_kernel(%arg0: i32, %arg1: i32, %arg2: memref<128x256xbf16, #tpu.memory_space<vmem>>, %arg3: memref<256x128xbf16, #tpu.memory_space<vmem>>, %arg4: memref<1x128xf32, #tpu.memory_space<vmem>>, %arg5: memref<128x128xf32, #tpu.memory_space<vmem>>) attributes {dimension_semantics = [#tpu.dimension_semantics<parallel>, #tpu.dimension_semantics<parallel>], iteration_bounds = array<i64: 2, 3>, scalar_prefetch = 0 : i64, scratch_operands = 0 : i64, tpu.core_type = #tpu.core_type<tc>, window_params = [{transform_indices = @transform_0, window_bounds = array<i64: 128, 256>}, {transform_indices = @transform_1, window_bounds = array<i64: 256, 128>}, {transform_indices = @transform_2, window_bounds = array<i64: 1, 128>}, {transform_indices = @transform_3, window_bounds = array<i64: 128, 128>}]} {
    %c0 = arith.constant 0 : index
    %c0_0 = arith.constant 0 : index
    %0 = vector.load %arg2[%c0, %c0_0] : memref<128x256xbf16, #tpu.memory_space<vmem>>, vector<128x256xbf16>
    %c0_1 = arith.constant 0 : index
    %c0_2 = arith.constant 0 : index
    %1 = vector.load %arg3[%c0_1, %c0_2] : memref<256x128xbf16, #tpu.memory_space<vmem>>, vector<256x128xbf16>
    %cst = arith.constant dense<0.000000e+00> : vector<128x128xf32>
    %2 = tpu.matmul %0, %1, %cst {dimension_numbers = #tpu.dot_dimension_numbers<[1], [0], [0], [1], [0, 0, 1, 1], [], []>} : vector<128x256xbf16>, vector<256x128xbf16>, vector<128x128xf32> -> vector<128x128xf32>
    %c0_3 = arith.constant 0 : index
    %c0_4 = arith.constant 0 : index
    %3 = vector.load %arg4[%c0_3, %c0_4] : memref<1x128xf32, #tpu.memory_space<vmem>>, vector<1x128xf32>
    %4 = vector.broadcast %3 : vector<1x128xf32> to vector<128x128xf32>
    %5 = arith.addf %2, %4 : vector<128x128xf32>
    %c0_5 = arith.constant 0 : index
    %c0_6 = arith.constant 0 : index
    %6 = vector.load %arg5[%c0_5, %c0_6] : memref<128x128xf32, #tpu.memory_space<vmem>>, vector<128x128xf32>
    tpu.vector_store %arg5[%c0_5, %c0_6], %5 {strides = array<i32>} : memref<128x128xf32, #tpu.memory_space<vmem>>, vector<128x128xf32>,
    return
  }
  func.func @transform_0(%arg0: i32, %arg1: i32) -> (i32, i32) {
    %c0_i32 = arith.constant 0 : i32
    %c0_i32_0 = arith.constant 0 : i32
    return %arg0, %c0_i32 : i32, i32
  }
  func.func @transform_1(%arg0: i32, %arg1: i32) -> (i32, i32) {
    %c0_i32 = arith.constant 0 : i32
    %c0_i32_0 = arith.constant 0 : i32
    return %c0_i32, %arg1 : i32, i32
  }
  func.func @transform_2(%arg0: i32, %arg1: i32) -> (i32, i32) {
    %c0_i32 = arith.constant 0 : i32
    %c0_i32_0 = arith.constant 0 : i32
    return %c0_i32, %arg1 : i32, i32
  }
  func.func @transform_3(%arg0: i32, %arg1: i32) -> (i32, i32) {
    %c0_i32 = arith.constant 0 : i32
    return %arg0, %arg1 : i32, i32
  }
}

module attributes {stable_mosaic.version = 11 : i64} {
  func.func @encoder_kernel(%arg0: i32, %arg1: memref<256x256xbf16, #tpu.memory_space<vmem>>, %arg2: memref<2x256xf32, #tpu.memory_space<vmem>>, %arg3: memref<1x256x768xi8, #tpu.memory_space<vmem>>, %arg4: memref<1x1x768xf32, #tpu.memory_space<vmem>>, %arg5: memref<1x1x768xf32, #tpu.memory_space<vmem>>, %arg6: memref<1x256x256xi8, #tpu.memory_space<vmem>>, %arg7: memref<1x1x256xf32, #tpu.memory_space<vmem>>, %arg8: memref<1x1x256xf32, #tpu.memory_space<vmem>>, %arg9: memref<1x256x512xi8, #tpu.memory_space<vmem>>, %arg10: memref<1x1x512xf32, #tpu.memory_space<vmem>>, %arg11: memref<1x1x512xf32, #tpu.memory_space<vmem>>, %arg12: memref<1x512x256xi8, #tpu.memory_space<vmem>>, %arg13: memref<1x1x256xf32, #tpu.memory_space<vmem>>, %arg14: memref<1x1x256xf32, #tpu.memory_space<vmem>>, %arg15: memref<1x4x256xf32, #tpu.memory_space<vmem>>, %arg16: memref<256x256xbf16, #tpu.memory_space<vmem>>, %arg17: memref<256x256xf32, #tpu.memory_space<vmem>>) attributes {dimension_semantics = [#tpu.dimension_semantics<arbitrary>], iteration_bounds = array<i64: 4>, scalar_prefetch = 0 : i64, scratch_operands = 1 : i64, tpu.core_type = #tpu.core_type<tc>, window_params = [{pipeline_mode = #tpu.pipeline_mode<synchronous>, transform_indices = @transform_0, window_bounds = array<i64: 256, 256>}, {pipeline_mode = #tpu.pipeline_mode<synchronous>, transform_indices = @transform_1, window_bounds = array<i64: 2, 256>}, {transform_indices = @transform_2, window_bounds = array<i64: 1, 256, 768>}, {transform_indices = @transform_3, window_bounds = array<i64: 1, 1, 768>}, {transform_indices = @transform_4, window_bounds = array<i64: 1, 1, 768>}, {transform_indices = @transform_5, window_bounds = array<i64: 1, 256, 256>}, {transform_indices = @transform_6, window_bounds = array<i64: 1, 1, 256>}, {transform_indices = @transform_7, window_bounds = array<i64: 1, 1, 256>}, {transform_indices = @transform_8, window_bounds = array<i64: 1, 256, 512>}, {transform_indices = @transform_9, window_bounds = array<i64: 1, 1, 512>}, {transform_indices = @transform_10, window_bounds = array<i64: 1, 1, 512>}, {transform_indices = @transform_11, window_bounds = array<i64: 1, 512, 256>}, {transform_indices = @transform_12, window_bounds = array<i64: 1, 1, 256>}, {transform_indices = @transform_13, window_bounds = array<i64: 1, 1, 256>}, {transform_indices = @transform_14, window_bounds = array<i64: 1, 4, 256>}, {pipeline_mode = #tpu.pipeline_mode<synchronous>, transform_indices = @transform_15, window_bounds = array<i64: 256, 256>}]} {
    %c0_i32 = arith.constant 0 : i32
    %0 = arith.cmpi eq, %arg0, %c0_i32 : i32
    %1 = arith.extui %0 : i1 to i32
    %c0_i32_0 = arith.constant 0 : i32
    %2 = arith.cmpi ne, %1, %c0_i32_0 : i32
    scf.if %2 {
      %c0_68 = arith.constant 0 : index
      %c0_69 = arith.constant 0 : index
      %138 = vector.load %arg1[%c0_68, %c0_69] : memref<256x256xbf16, #tpu.memory_space<vmem>>, vector<256x256xbf16>
      %139 = arith.extf %138 : vector<256x256xbf16> to vector<256x256xf32>
      %c0_70 = arith.constant 0 : index
      %c0_71 = arith.constant 0 : index
      %140 = vector.load %arg2[%c0_70, %c0_71] : memref<2x256xf32, #tpu.memory_space<vmem>>, vector<1x256xf32>
      %c1_72 = arith.constant 1 : index
      %c0_73 = arith.constant 0 : index
      %141 = vector.load %arg2[%c1_72, %c0_73] : memref<2x256xf32, #tpu.memory_space<vmem>>, vector<1x256xf32>
      %cst_74 = arith.constant dense<0.000000e+00> : vector<256xf32>
      %142 = vector.multi_reduction <add>, %139, %cst_74 [1] : vector<256x256xf32> to vector<256xf32>
      %143 = vector.shape_cast %142 : vector<256xf32> to vector<256x1xf32>
      %cst_75 = arith.constant 2.560000e+02 : f32
      %144 = vector.broadcast %cst_75 : f32 to vector<256x1xf32>
      %145 = arith.divf %143, %144 : vector<256x1xf32>
      %146 = vector.broadcast %145 : vector<256x1xf32> to vector<256x256xf32>
      %147 = arith.subf %139, %146 : vector<256x256xf32>
      %148 = arith.mulf %147, %147 : vector<256x256xf32>
      %cst_76 = arith.constant dense<0.000000e+00> : vector<256xf32>
      %149 = vector.multi_reduction <add>, %148, %cst_76 [1] : vector<256x256xf32> to vector<256xf32>
      %150 = vector.shape_cast %149 : vector<256xf32> to vector<256x1xf32>
      %cst_77 = arith.constant 2.560000e+02 : f32
      %151 = vector.broadcast %cst_77 : f32 to vector<256x1xf32>
      %152 = arith.divf %150, %151 : vector<256x1xf32>
      %153 = vector.broadcast %145 : vector<256x1xf32> to vector<256x256xf32>
      %154 = arith.subf %139, %153 : vector<256x256xf32>
      %cst_78 = arith.constant 9.99999974E-6 : f32
      %155 = vector.broadcast %cst_78 : f32 to vector<256x1xf32>
      %156 = arith.addf %152, %155 : vector<256x1xf32>
      %157 = math.rsqrt %156 : vector<256x1xf32>
      %158 = vector.broadcast %157 : vector<256x1xf32> to vector<256x256xf32>
      %159 = arith.mulf %154, %158 : vector<256x256xf32>
      %160 = vector.broadcast %140 : vector<1x256xf32> to vector<256x256xf32>
      %161 = arith.mulf %159, %160 : vector<256x256xf32>
      %162 = vector.broadcast %141 : vector<1x256xf32> to vector<256x256xf32>
      %163 = arith.addf %161, %162 : vector<256x256xf32>
      %c0_79 = arith.constant 0 : index
      %c0_80 = arith.constant 0 : index
      %164 = vector.load %arg17[%c0_79, %c0_80] : memref<256x256xf32, #tpu.memory_space<vmem>>, vector<256x256xf32>
      tpu.vector_store %arg17[%c0_79, %c0_80], %163 {strides = array<i32>} : memref<256x256xf32, #tpu.memory_space<vmem>>, vector<256x256xf32>,
    } else {
    }
    %c0 = arith.constant 0 : index
    %c0_1 = arith.constant 0 : index
    %3 = vector.load %arg17[%c0, %c0_1] : memref<256x256xf32, #tpu.memory_space<vmem>>, vector<256x256xf32>
    %4 = arith.truncf %3 : vector<256x256xf32> to vector<256x256xbf16>
    %c0_2 = arith.constant 0 : index
    %c0_3 = arith.constant 0 : index
    %c0_4 = arith.constant 0 : index
    %5 = vector.load %arg3[%c0_2, %c0_3, %c0_4] : memref<1x256x768xi8, #tpu.memory_space<vmem>>, vector<1x256x768xi8>
    %6 = vector.shape_cast %5 : vector<1x256x768xi8> to vector<256x768xi8>
    %7 = arith.sitofp %6 : vector<256x768xi8> to vector<256x768xbf16>
    %cst = arith.constant dense<0.000000e+00> : vector<256x768xf32>
    %8 = tpu.matmul %4, %7, %cst {dimension_numbers = #tpu.dot_dimension_numbers<[1], [0], [0], [1], [0, 0, 1, 1], [], []>} : vector<256x256xbf16>, vector<256x768xbf16>, vector<256x768xf32> -> vector<256x768xf32>
    %c0_5 = arith.constant 0 : index
    %c0_6 = arith.constant 0 : index
    %c0_7 = arith.constant 0 : index
    %9 = vector.load %arg4[%c0_5, %c0_6, %c0_7] : memref<1x1x768xf32, #tpu.memory_space<vmem>>, vector<1x1x768xf32>
    %10 = vector.shape_cast %9 : vector<1x1x768xf32> to vector<1x768xf32>
    %11 = vector.broadcast %10 : vector<1x768xf32> to vector<256x768xf32>
    %12 = arith.mulf %8, %11 : vector<256x768xf32>
    %c0_8 = arith.constant 0 : index
    %c0_9 = arith.constant 0 : index
    %c0_10 = arith.constant 0 : index
    %13 = vector.load %arg5[%c0_8, %c0_9, %c0_10] : memref<1x1x768xf32, #tpu.memory_space<vmem>>, vector<1x1x768xf32>
    %14 = vector.shape_cast %13 : vector<1x1x768xf32> to vector<1x768xf32>
    %15 = vector.broadcast %14 : vector<1x768xf32> to vector<256x768xf32>
    %16 = arith.addf %12, %15 : vector<256x768xf32>
    %17 = vector.extract_strided_slice %16 {offsets = [0, 0], sizes = [256, 256], strides = [1, 1]} : vector<256x768xf32> to vector<256x256xf32>
    %18 = vector.shape_cast %17 : vector<256x256xf32> to vector<2x128x256xf32>
    %19 = arith.truncf %18 : vector<2x128x256xf32> to vector<2x128x256xbf16>
    %20 = vector.extract_strided_slice %16 {offsets = [0, 256], sizes = [256, 256], strides = [1, 1]} : vector<256x768xf32> to vector<256x256xf32>
    %21 = vector.shape_cast %20 : vector<256x256xf32> to vector<2x128x256xf32>
    %22 = arith.truncf %21 : vector<2x128x256xf32> to vector<2x128x256xbf16>
    %23 = vector.extract_strided_slice %16 {offsets = [0, 512], sizes = [256, 256], strides = [1, 1]} : vector<256x768xf32> to vector<256x256xf32>
    %24 = vector.shape_cast %23 : vector<256x256xf32> to vector<2x128x256xf32>
    %25 = arith.truncf %24 : vector<2x128x256xf32> to vector<2x128x256xbf16>
    %cst_11 = arith.constant dense<0.000000e+00> : vector<2x128x128xf32>
    %26 = tpu.matmul %19, %22, %cst_11 {dimension_numbers = #tpu.dot_dimension_numbers<[2], [2], [1], [1], [0, 0, 0, 1, 1, 1], [0], [0]>} : vector<2x128x256xbf16>, vector<2x128x256xbf16>, vector<2x128x128xf32> -> vector<2x128x128xf32>
    %cst_12 = arith.constant dense<0xFF800000> : vector<2x128xf32>
    %27 = vector.multi_reduction <maximumf>, %26, %cst_12 [2] : vector<2x128x128xf32> to vector<2x128xf32>
    %28 = vector.shape_cast %27 : vector<2x128xf32> to vector<2x128x1xf32>
    %29 = vector.broadcast %28 : vector<2x128x1xf32> to vector<2x128x128xf32>
    %30 = arith.subf %26, %29 : vector<2x128x128xf32>
    %31 = math.exp %30 : vector<2x128x128xf32>
    %cst_13 = arith.constant dense<0.000000e+00> : vector<2x128xf32>
    %32 = vector.multi_reduction <add>, %31, %cst_13 [2] : vector<2x128x128xf32> to vector<2x128xf32>
    %33 = vector.shape_cast %32 : vector<2x128xf32> to vector<2x128x1xf32>
    %34 = vector.broadcast %33 : vector<2x128x1xf32> to vector<2x128x128xf32>
    %35 = arith.divf %31, %34 : vector<2x128x128xf32>
    %36 = arith.truncf %35 : vector<2x128x128xf32> to vector<2x128x128xbf16>
    %cst_14 = arith.constant dense<0.000000e+00> : vector<2x128x256xf32>
    %37 = tpu.matmul %36, %25, %cst_14 {dimension_numbers = #tpu.dot_dimension_numbers<[2], [1], [1], [2], [0, 0, 0, 1, 1, 2], [0], [0]>} : vector<2x128x128xbf16>, vector<2x128x256xbf16>, vector<2x128x256xf32> -> vector<2x128x256xf32>
    %38 = vector.shape_cast %37 : vector<2x128x256xf32> to vector<256x256xf32>
    %39 = arith.truncf %38 : vector<256x256xf32> to vector<256x256xbf16>
    %c0_15 = arith.constant 0 : index
    %c0_16 = arith.constant 0 : index
    %c0_17 = arith.constant 0 : index
    %40 = vector.load %arg6[%c0_15, %c0_16, %c0_17] : memref<1x256x256xi8, #tpu.memory_space<vmem>>, vector<1x256x256xi8>
    %41 = vector.shape_cast %40 : vector<1x256x256xi8> to vector<256x256xi8>
    %42 = arith.sitofp %41 : vector<256x256xi8> to vector<256x256xbf16>
    %cst_18 = arith.constant dense<0.000000e+00> : vector<256x256xf32>
    %43 = tpu.matmul %39, %42, %cst_18 {dimension_numbers = #tpu.dot_dimension_numbers<[1], [0], [0], [1], [0, 0, 1, 1], [], []>} : vector<256x256xbf16>, vector<256x256xbf16>, vector<256x256xf32> -> vector<256x256xf32>
    %c0_19 = arith.constant 0 : index
    %c0_20 = arith.constant 0 : index
    %c0_21 = arith.constant 0 : index
    %44 = vector.load %arg7[%c0_19, %c0_20, %c0_21] : memref<1x1x256xf32, #tpu.memory_space<vmem>>, vector<1x1x256xf32>
    %45 = vector.shape_cast %44 : vector<1x1x256xf32> to vector<1x256xf32>
    %46 = vector.broadcast %45 : vector<1x256xf32> to vector<256x256xf32>
    %47 = arith.mulf %43, %46 : vector<256x256xf32>
    %c0_22 = arith.constant 0 : index
    %c0_23 = arith.constant 0 : index
    %c0_24 = arith.constant 0 : index
    %48 = vector.load %arg8[%c0_22, %c0_23, %c0_24] : memref<1x1x256xf32, #tpu.memory_space<vmem>>, vector<1x1x256xf32>
    %49 = vector.shape_cast %48 : vector<1x1x256xf32> to vector<1x256xf32>
    %50 = vector.broadcast %49 : vector<1x256xf32> to vector<256x256xf32>
    %51 = arith.addf %47, %50 : vector<256x256xf32>
    %52 = arith.addf %3, %51 : vector<256x256xf32>
    %c0_25 = arith.constant 0 : index
    %c0_26 = arith.constant 0 : index
    %c0_27 = arith.constant 0 : index
    %53 = vector.load %arg15[%c0_25, %c0_26, %c0_27] : memref<1x4x256xf32, #tpu.memory_space<vmem>>, vector<1x1x256xf32>
    %54 = vector.shape_cast %53 : vector<1x1x256xf32> to vector<1x256xf32>
    %c0_28 = arith.constant 0 : index
    %c1 = arith.constant 1 : index
    %c0_29 = arith.constant 0 : index
    %55 = vector.load %arg15[%c0_28, %c1, %c0_29] : memref<1x4x256xf32, #tpu.memory_space<vmem>>, vector<1x1x256xf32>
    %56 = vector.shape_cast %55 : vector<1x1x256xf32> to vector<1x256xf32>
    %cst_30 = arith.constant dense<0.000000e+00> : vector<256xf32>
    %57 = vector.multi_reduction <add>, %52, %cst_30 [1] : vector<256x256xf32> to vector<256xf32>
    %58 = vector.shape_cast %57 : vector<256xf32> to vector<256x1xf32>
    %cst_31 = arith.constant 2.560000e+02 : f32
    %59 = vector.broadcast %cst_31 : f32 to vector<256x1xf32>
    %60 = arith.divf %58, %59 : vector<256x1xf32>
    %61 = vector.broadcast %60 : vector<256x1xf32> to vector<256x256xf32>
    %62 = arith.subf %52, %61 : vector<256x256xf32>
    %63 = arith.mulf %62, %62 : vector<256x256xf32>
    %cst_32 = arith.constant dense<0.000000e+00> : vector<256xf32>
    %64 = vector.multi_reduction <add>, %63, %cst_32 [1] : vector<256x256xf32> to vector<256xf32>
    %65 = vector.shape_cast %64 : vector<256xf32> to vector<256x1xf32>
    %cst_33 = arith.constant 2.560000e+02 : f32
    %66 = vector.broadcast %cst_33 : f32 to vector<256x1xf32>
    %67 = arith.divf %65, %66 : vector<256x1xf32>
    %68 = vector.broadcast %60 : vector<256x1xf32> to vector<256x256xf32>
    %69 = arith.subf %52, %68 : vector<256x256xf32>
    %cst_34 = arith.constant 9.99999974E-6 : f32
    %70 = vector.broadcast %cst_34 : f32 to vector<256x1xf32>
    %71 = arith.addf %67, %70 : vector<256x1xf32>
    %72 = math.rsqrt %71 : vector<256x1xf32>
    %73 = vector.broadcast %72 : vector<256x1xf32> to vector<256x256xf32>
    %74 = arith.mulf %69, %73 : vector<256x256xf32>
    %75 = vector.broadcast %54 : vector<1x256xf32> to vector<256x256xf32>
    %76 = arith.mulf %74, %75 : vector<256x256xf32>
    %77 = vector.broadcast %56 : vector<1x256xf32> to vector<256x256xf32>
    %78 = arith.addf %76, %77 : vector<256x256xf32>
    %79 = arith.truncf %78 : vector<256x256xf32> to vector<256x256xbf16>
    %c0_35 = arith.constant 0 : index
    %c0_36 = arith.constant 0 : index
    %c0_37 = arith.constant 0 : index
    %80 = vector.load %arg9[%c0_35, %c0_36, %c0_37] : memref<1x256x512xi8, #tpu.memory_space<vmem>>, vector<1x256x512xi8>
    %81 = vector.shape_cast %80 : vector<1x256x512xi8> to vector<256x512xi8>
    %82 = arith.sitofp %81 : vector<256x512xi8> to vector<256x512xbf16>
    %cst_38 = arith.constant dense<0.000000e+00> : vector<256x512xf32>
    %83 = tpu.matmul %79, %82, %cst_38 {dimension_numbers = #tpu.dot_dimension_numbers<[1], [0], [0], [1], [0, 0, 1, 1], [], []>} : vector<256x256xbf16>, vector<256x512xbf16>, vector<256x512xf32> -> vector<256x512xf32>
    %c0_39 = arith.constant 0 : index
    %c0_40 = arith.constant 0 : index
    %c0_41 = arith.constant 0 : index
    %84 = vector.load %arg10[%c0_39, %c0_40, %c0_41] : memref<1x1x512xf32, #tpu.memory_space<vmem>>, vector<1x1x512xf32>
    %85 = vector.shape_cast %84 : vector<1x1x512xf32> to vector<1x512xf32>
    %86 = vector.broadcast %85 : vector<1x512xf32> to vector<256x512xf32>
    %87 = arith.mulf %83, %86 : vector<256x512xf32>
    %c0_42 = arith.constant 0 : index
    %c0_43 = arith.constant 0 : index
    %c0_44 = arith.constant 0 : index
    %88 = vector.load %arg11[%c0_42, %c0_43, %c0_44] : memref<1x1x512xf32, #tpu.memory_space<vmem>>, vector<1x1x512xf32>
    %89 = vector.shape_cast %88 : vector<1x1x512xf32> to vector<1x512xf32>
    %90 = vector.broadcast %89 : vector<1x512xf32> to vector<256x512xf32>
    %91 = arith.addf %87, %90 : vector<256x512xf32>
    %cst_45 = arith.constant 0.000000e+00 : f32
    %92 = vector.broadcast %cst_45 : f32 to vector<256x512xf32>
    %93 = arith.maximumf %91, %92 : vector<256x512xf32>
    %94 = arith.truncf %93 : vector<256x512xf32> to vector<256x512xbf16>
    %c0_46 = arith.constant 0 : index
    %c0_47 = arith.constant 0 : index
    %c0_48 = arith.constant 0 : index
    %95 = vector.load %arg12[%c0_46, %c0_47, %c0_48] : memref<1x512x256xi8, #tpu.memory_space<vmem>>, vector<1x512x256xi8>
    %96 = vector.shape_cast %95 : vector<1x512x256xi8> to vector<512x256xi8>
    %97 = arith.sitofp %96 : vector<512x256xi8> to vector<512x256xbf16>
    %cst_49 = arith.constant dense<0.000000e+00> : vector<256x256xf32>
    %98 = tpu.matmul %94, %97, %cst_49 {dimension_numbers = #tpu.dot_dimension_numbers<[1], [0], [0], [1], [0, 0, 1, 1], [], []>} : vector<256x512xbf16>, vector<512x256xbf16>, vector<256x256xf32> -> vector<256x256xf32>
    %c0_50 = arith.constant 0 : index
    %c0_51 = arith.constant 0 : index
    %c0_52 = arith.constant 0 : index
    %99 = vector.load %arg13[%c0_50, %c0_51, %c0_52] : memref<1x1x256xf32, #tpu.memory_space<vmem>>, vector<1x1x256xf32>
    %100 = vector.shape_cast %99 : vector<1x1x256xf32> to vector<1x256xf32>
    %101 = vector.broadcast %100 : vector<1x256xf32> to vector<256x256xf32>
    %102 = arith.mulf %98, %101 : vector<256x256xf32>
    %c0_53 = arith.constant 0 : index
    %c0_54 = arith.constant 0 : index
    %c0_55 = arith.constant 0 : index
    %103 = vector.load %arg14[%c0_53, %c0_54, %c0_55] : memref<1x1x256xf32, #tpu.memory_space<vmem>>, vector<1x1x256xf32>
    %104 = vector.shape_cast %103 : vector<1x1x256xf32> to vector<1x256xf32>
    %105 = vector.broadcast %104 : vector<1x256xf32> to vector<256x256xf32>
    %106 = arith.addf %102, %105 : vector<256x256xf32>
    %107 = arith.addf %78, %106 : vector<256x256xf32>
    %c0_56 = arith.constant 0 : index
    %c2 = arith.constant 2 : index
    %c0_57 = arith.constant 0 : index
    %108 = vector.load %arg15[%c0_56, %c2, %c0_57] : memref<1x4x256xf32, #tpu.memory_space<vmem>>, vector<1x1x256xf32>
    %109 = vector.shape_cast %108 : vector<1x1x256xf32> to vector<1x256xf32>
    %c0_58 = arith.constant 0 : index
    %c3 = arith.constant 3 : index
    %c0_59 = arith.constant 0 : index
    %110 = vector.load %arg15[%c0_58, %c3, %c0_59] : memref<1x4x256xf32, #tpu.memory_space<vmem>>, vector<1x1x256xf32>
    %111 = vector.shape_cast %110 : vector<1x1x256xf32> to vector<1x256xf32>
    %cst_60 = arith.constant dense<0.000000e+00> : vector<256xf32>
    %112 = vector.multi_reduction <add>, %107, %cst_60 [1] : vector<256x256xf32> to vector<256xf32>
    %113 = vector.shape_cast %112 : vector<256xf32> to vector<256x1xf32>
    %cst_61 = arith.constant 2.560000e+02 : f32
    %114 = vector.broadcast %cst_61 : f32 to vector<256x1xf32>
    %115 = arith.divf %113, %114 : vector<256x1xf32>
    %116 = vector.broadcast %115 : vector<256x1xf32> to vector<256x256xf32>
    %117 = arith.subf %107, %116 : vector<256x256xf32>
    %118 = arith.mulf %117, %117 : vector<256x256xf32>
    %cst_62 = arith.constant dense<0.000000e+00> : vector<256xf32>
    %119 = vector.multi_reduction <add>, %118, %cst_62 [1] : vector<256x256xf32> to vector<256xf32>
    %120 = vector.shape_cast %119 : vector<256xf32> to vector<256x1xf32>
    %cst_63 = arith.constant 2.560000e+02 : f32
    %121 = vector.broadcast %cst_63 : f32 to vector<256x1xf32>
    %122 = arith.divf %120, %121 : vector<256x1xf32>
    %123 = vector.broadcast %115 : vector<256x1xf32> to vector<256x256xf32>
    %124 = arith.subf %107, %123 : vector<256x256xf32>
    %cst_64 = arith.constant 9.99999974E-6 : f32
    %125 = vector.broadcast %cst_64 : f32 to vector<256x1xf32>
    %126 = arith.addf %122, %125 : vector<256x1xf32>
    %127 = math.rsqrt %126 : vector<256x1xf32>
    %128 = vector.broadcast %127 : vector<256x1xf32> to vector<256x256xf32>
    %129 = arith.mulf %124, %128 : vector<256x256xf32>
    %130 = vector.broadcast %109 : vector<1x256xf32> to vector<256x256xf32>
    %131 = arith.mulf %129, %130 : vector<256x256xf32>
    %132 = vector.broadcast %111 : vector<1x256xf32> to vector<256x256xf32>
    %133 = arith.addf %131, %132 : vector<256x256xf32>
    %c0_65 = arith.constant 0 : index
    %c0_66 = arith.constant 0 : index
    %134 = vector.load %arg17[%c0_65, %c0_66] : memref<256x256xf32, #tpu.memory_space<vmem>>, vector<256x256xf32>
    tpu.vector_store %arg17[%c0_65, %c0_66], %133 {strides = array<i32>} : memref<256x256xf32, #tpu.memory_space<vmem>>, vector<256x256xf32>,
    %c3_i32 = arith.constant 3 : i32
    %135 = arith.cmpi eq, %arg0, %c3_i32 : i32
    %136 = arith.extui %135 : i1 to i32
    %c0_i32_67 = arith.constant 0 : i32
    %137 = arith.cmpi ne, %136, %c0_i32_67 : i32
    scf.if %137 {
      %138 = arith.truncf %133 : vector<256x256xf32> to vector<256x256xbf16>
      %c0_68 = arith.constant 0 : index
      %c0_69 = arith.constant 0 : index
      %139 = vector.load %arg16[%c0_68, %c0_69] : memref<256x256xbf16, #tpu.memory_space<vmem>>, vector<256x256xbf16>
      tpu.vector_store %arg16[%c0_68, %c0_69], %138 {strides = array<i32>} : memref<256x256xbf16, #tpu.memory_space<vmem>>, vector<256x256xbf16>,
    } else {
    }
    return
  }
  func.func @transform_0(%arg0: i32) -> (i32, i32) {
    %c0_i32 = arith.constant 0 : i32
    %c0_i32_0 = arith.constant 0 : i32
    %c0_i32_1 = arith.constant 0 : i32
    return %c0_i32, %c0_i32_0 : i32, i32
  }
  func.func @transform_1(%arg0: i32) -> (i32, i32) {
    %c0_i32 = arith.constant 0 : i32
    %c0_i32_0 = arith.constant 0 : i32
    %c0_i32_1 = arith.constant 0 : i32
    return %c0_i32, %c0_i32_0 : i32, i32
  }
  func.func @transform_2(%arg0: i32) -> (i32, i32, i32) {
    %c0_i32 = arith.constant 0 : i32
    %c0_i32_0 = arith.constant 0 : i32
    %c0_i32_1 = arith.constant 0 : i32
    return %arg0, %c0_i32, %c0_i32_0 : i32, i32, i32
  }
  func.func @transform_3(%arg0: i32) -> (i32, i32, i32) {
    %c0_i32 = arith.constant 0 : i32
    %c0_i32_0 = arith.constant 0 : i32
    %c0_i32_1 = arith.constant 0 : i32
    return %arg0, %c0_i32, %c0_i32_0 : i32, i32, i32
  }
  func.func @transform_4(%arg0: i32) -> (i32, i32, i32) {
    %c0_i32 = arith.constant 0 : i32
    %c0_i32_0 = arith.constant 0 : i32
    %c0_i32_1 = arith.constant 0 : i32
    return %arg0, %c0_i32, %c0_i32_0 : i32, i32, i32
  }
  func.func @transform_5(%arg0: i32) -> (i32, i32, i32) {
    %c0_i32 = arith.constant 0 : i32
    %c0_i32_0 = arith.constant 0 : i32
    %c0_i32_1 = arith.constant 0 : i32
    return %arg0, %c0_i32, %c0_i32_0 : i32, i32, i32
  }
  func.func @transform_6(%arg0: i32) -> (i32, i32, i32) {
    %c0_i32 = arith.constant 0 : i32
    %c0_i32_0 = arith.constant 0 : i32
    %c0_i32_1 = arith.constant 0 : i32
    return %arg0, %c0_i32, %c0_i32_0 : i32, i32, i32
  }
  func.func @transform_7(%arg0: i32) -> (i32, i32, i32) {
    %c0_i32 = arith.constant 0 : i32
    %c0_i32_0 = arith.constant 0 : i32
    %c0_i32_1 = arith.constant 0 : i32
    return %arg0, %c0_i32, %c0_i32_0 : i32, i32, i32
  }
  func.func @transform_8(%arg0: i32) -> (i32, i32, i32) {
    %c0_i32 = arith.constant 0 : i32
    %c0_i32_0 = arith.constant 0 : i32
    %c0_i32_1 = arith.constant 0 : i32
    return %arg0, %c0_i32, %c0_i32_0 : i32, i32, i32
  }
  func.func @transform_9(%arg0: i32) -> (i32, i32, i32) {
    %c0_i32 = arith.constant 0 : i32
    %c0_i32_0 = arith.constant 0 : i32
    %c0_i32_1 = arith.constant 0 : i32
    return %arg0, %c0_i32, %c0_i32_0 : i32, i32, i32
  }
  func.func @transform_10(%arg0: i32) -> (i32, i32, i32) {
    %c0_i32 = arith.constant 0 : i32
    %c0_i32_0 = arith.constant 0 : i32
    %c0_i32_1 = arith.constant 0 : i32
    return %arg0, %c0_i32, %c0_i32_0 : i32, i32, i32
  }
  func.func @transform_11(%arg0: i32) -> (i32, i32, i32) {
    %c0_i32 = arith.constant 0 : i32
    %c0_i32_0 = arith.constant 0 : i32
    %c0_i32_1 = arith.constant 0 : i32
    return %arg0, %c0_i32, %c0_i32_0 : i32, i32, i32
  }
  func.func @transform_12(%arg0: i32) -> (i32, i32, i32) {
    %c0_i32 = arith.constant 0 : i32
    %c0_i32_0 = arith.constant 0 : i32
    %c0_i32_1 = arith.constant 0 : i32
    return %arg0, %c0_i32, %c0_i32_0 : i32, i32, i32
  }
  func.func @transform_13(%arg0: i32) -> (i32, i32, i32) {
    %c0_i32 = arith.constant 0 : i32
    %c0_i32_0 = arith.constant 0 : i32
    %c0_i32_1 = arith.constant 0 : i32
    return %arg0, %c0_i32, %c0_i32_0 : i32, i32, i32
  }
  func.func @transform_14(%arg0: i32) -> (i32, i32, i32) {
    %c0_i32 = arith.constant 0 : i32
    %c0_i32_0 = arith.constant 0 : i32
    %c0_i32_1 = arith.constant 0 : i32
    return %arg0, %c0_i32, %c0_i32_0 : i32, i32, i32
  }
  func.func @transform_15(%arg0: i32) -> (i32, i32) {
    %c0_i32 = arith.constant 0 : i32
    %c0_i32_0 = arith.constant 0 : i32
    %c0_i32_1 = arith.constant 0 : i32
    return %c0_i32, %c0_i32_0 : i32, i32
  }
}

</mosaic_0001>

<bundles_post_ra>
// kernel: roberta_forward.3
= control target key start
LH: loop header
LB: loop body
LE: loop exit
PB: predicated region body
PF: predicated region fallthrough
CT: control target
= control target key end

     0   :  { %8 = vsyncpa [#allocation4], 0  ;;  %s1572_s0 = inlined_call_operand.vmem [shape: bf16[256,256], index: 0, kind: input, shape index: {}]   ;;  %s1573_s1 = inlined_call_operand.vmem [shape: bf16[256,384], index: 1, kind: input, shape index: {}]   ;;  %s1574_s2 = inlined_call_operand.vmem [shape: f32[1,384], index: 2, kind: input, shape index: {}]   ;;  %s1575_s3 = inlined_call_operand.hbm [shape: f32[256,384], index: 3, kind: output, shape index: {}]  }
   0x1   :  { %10 = vsyncpa [#allocation4 + $0x1], 0  ;;  %s1250_s12 = smov 0   ;;  %s1252_s13 = smov 0  }
   0x2   :  { %s1254_s14 = smov 0   ;;  %s1256_s15 = smov 0  }
   0x3   :  { %s1258_s16 = smov 0   ;;  %s1260_s17 = smov 0  }
   0x4   :  { %s1262_s18 = smov 0   ;;  %s1264_s19 = smov 0  }
   0x5   :  { %s1266_s20 = smov 0   ;;  %s1268_s21 = smov 0  }
   0x6 LB: > { %s853_s22 = sadd.s32 4294967295, %s1224_s21   ;;  %s854_s23 = sadd.s32 4294967294, %s1224_s21   ;;  %s1224_s21 = sphi %s1268_s21, %s16_s21   ;;  %s1220_s20 = sphi %s1266_s20, %s1587_s20   ;;  %s1216_s19 = sphi %s1264_s19, %s1586_s19   ;;  %s1212_s18 = sphi %s1262_s18, %s1585_s18   ;;  %s1208_s17 = sphi %s1260_s17, %s1584_s17   ;;  %s1204_s16 = sphi %s1258_s16, %s1583_s16   ;;  %s1200_s15 = sphi %s1256_s15, %s1582_s15   ;;  %s1196_s14 = sphi %s1254_s14, %s1581_s14   ;;  %s1192_s13 = sphi %s1252_s13, %s1580_s13   ;;  %s1188_s12 = sphi %s1250_s12, %s1579_s12  }
   0x7   : > { %s25_s24 = sadd.s32 1, %s1216_s19  ;;  %s28_s25 = sadd.s32 1, %s1220_s20 }
   0x8   : > { %p26_p0 = scmp.ge.s32.totalorder %s25_s24, 3  ;;  %s61_s26 = sadd.s32 1, %s1204_s16 }
   0x9   : > { %p68_p1 = scmp.ne.s32.totalorder %s1204_s16, %s1200_s15  ;;  %p69_p2 = scmp.eq.s32.totalorder %s1224_s21, 0 }
   0xa   : > { %s1589_s24 = smov (%p26_p0, %s25_s24), 0  ;;  %s1591_s25 = smov (!%p26_p0, %s28_s25), %s1220_s20 }
   0xb   : > { %s58_s27 = ssub.s32 %s1216_s19, %s1589_s24  ;;  %p1313_p3 = por %p69_p2, %p68_p1 }
   0xc   : > { %p30_p4 = scmp.ge.s32.totalorder %s1591_s25, 2  ;;  %p59_p5 = scmp.eq.s32.totalorder %s58_s27, 0 }
   0xd   : > { %s115_s29 = sadd.s32 1, %s1196_s14  ;;  %p125_p6 = scmp.ne.s32.totalorder %s1196_s14, %s1192_s13 }
   0xe   : > { %s1593_s25 = smov (%p30_p4, %s1591_s25), 0  ;;  %p126_p7 = scmp.eq.s32.totalorder %s853_s22, 5 }
   0xf   : > { %s1323_s30 = scalar_select %p59_p5, %s1204_s16, %s61_s26  }
  0x10   : > { %s110_s4 = ssub.s32 %s1220_s20, %s1593_s25  ;;  %p131_p8 = scmp.ne.s32.totalorder %s1192_s13, %s1188_s12 }
  0x11   : > { %s112_s5 = sor.u32 %s110_s4, %s58_s27  ;;  %p1329_p10 = por %p126_p7, %p125_p6 }
  0x12   : > { %p113_p9 = scmp.eq.s32.totalorder %s112_s5, 0  ;;  %p132_p11 = scmp.eq.s32.totalorder %s854_s23, 5 }
  0x13   : > { %p856_p13 = scmp.ge.s32.totalorder %s1224_s21, 6 }
  0x14   : > { %s1334_s7 = scalar_select %p113_p9, %s1196_s14, %s115_s29  }
  0x15   : > { %p1336_p12 = por %p132_p11, %p131_p8  ;;  %148 = sbr.rel (%p856_p13) target bundleno = 51 (0x33), region = 16 }
  0x1a   : > { %161 = sbr.rel (!%p1313_p3) target bundleno = 51 (0x33), region = 24  ;;  %s163_s9 = sand.u32 (%p1313_p3), 1, %s1204_s16  }
  0x1b   : > { %s858_s10 = sshll.u32 (%p1313_p3), %s1216_s19, 2  ;;  %s857_s11 = sshll.u32 (%p1313_p3), %s163_s9, 7 }
  0x1c   : > { %s1348_s23 = scalar_lea.vmem (%p1313_p3), %s1573_s1, %s858_s10  ;;  %s1352_s27 = scalar_lea.vmem (%p1313_p3), [#allocation2], %s857_s11 }
  0x1d   : > { %v184_v0 = vld [vmem:[%s1348_s23] sm:$0xf] (%p1313_p3)  ;;  %v186_v1 = vld [vmem:[%s1348_s23 + $0xc] sm:$0xf] (%p1313_p3)  ;;  %v188_v2 = vld [vmem:[%s1348_s23 + $0x18] sm:$0xf] (%p1313_p3) }
  0x1e   : > { %185 = vst [vmem:[%s1352_s27] sm:$0xf] (%p1313_p3), %v184_v0  ;;  %187 = vst [vmem:[%s1352_s27 + $0x4] sm:$0xf] (%p1313_p3), %v186_v1  ;;  %v190_v3 = vld [vmem:[%s1348_s23 + $0x24] sm:$0xf] (%p1313_p3) }
  0x1f   : > { %v192_v4 = vld [vmem:[%s1348_s23 + $0x30] sm:$0xf]  ;;  %189 = vst [vmem:[%s1352_s27 + $0x8] sm:$0xf] %v188_v2  ;;  %191 = vst [vmem:[%s1352_s27 + $0xc] sm:$0xf] %v190_v3 }
  0x20   : > { %193 = vst [vmem:[%s1352_s27 + $0x10] sm:$0xf] %v192_v4  ;;  %v194_v5 = vld [vmem:[%s1348_s23 + $0x3c] sm:$0xf]  ;;  %v196_v6 = vld [vmem:[%s1348_s23 + $0x48] sm:$0xf] }
  0x21   : > { %v198_v7 = vld [vmem:[%s1348_s23 + $0x54] sm:$0xf]  ;;  %195 = vst [vmem:[%s1352_s27 + $0x14] sm:$0xf] %v194_v5  ;;  %197 = vst [vmem:[%s1352_s27 + $0x18] sm:$0xf] %v196_v6 }
  0x22   : > { %199 = vst [vmem:[%s1352_s27 + $0x1c] sm:$0xf] %v198_v7  ;;  %v200_v8 = vld [vmem:[%s1348_s23 + $0x60] sm:$0xf]  ;;  %v202_v9 = vld [vmem:[%s1348_s23 + $0x6c] sm:$0xf] }
  0x23   : > { %v204_v10 = vld [vmem:[%s1348_s23 + $0x78] sm:$0xf]  ;;  %201 = vst [vmem:[%s1352_s27 + $0x20] sm:$0xf] %v200_v8  ;;  %203 = vst [vmem:[%s1352_s27 + $0x24] sm:$0xf] %v202_v9 }
  0x24   : > { %205 = vst [vmem:[%s1352_s27 + $0x28] sm:$0xf] %v204_v10  ;;  %v206_v11 = vld [vmem:[%s1348_s23 + $0x84] sm:$0xf]  ;;  %v208_v12 = vld [vmem:[%s1348_s23 + $0x90] sm:$0xf] }
  0x25   : > { %v210_v13 = vld [vmem:[%s1348_s23 + $0x9c] sm:$0xf]  ;;  %207 = vst [vmem:[%s1352_s27 + $0x2c] sm:$0xf] %v206_v11  ;;  %209 = vst [vmem:[%s1352_s27 + $0x30] sm:$0xf] %v208_v12 }
  0x26   : > { %211 = vst [vmem:[%s1352_s27 + $0x34] sm:$0xf] %v210_v13  ;;  %v212_v14 = vld [vmem:[%s1348_s23 + $0xa8] sm:$0xf]  ;;  %v214_v15 = vld [vmem:[%s1348_s23 + $0xb4] sm:$0xf] }
  0x27   : > { %v216_v16 = vld [vmem:[%s1348_s23 + $0xc0] sm:$0xf]  ;;  %213 = vst [vmem:[%s1352_s27 + $0x38] sm:$0xf] %v212_v14  ;;  %215 = vst [vmem:[%s1352_s27 + $0x3c] sm:$0xf] %v214_v15 }
  0x28   : > { %217 = vst [vmem:[%s1352_s27 + $0x40] sm:$0xf] %v216_v16  ;;  %v218_v17 = vld [vmem:[%s1348_s23 + $0xcc] sm:$0xf]  ;;  %v220_v18 = vld [vmem:[%s1348_s23 + $0xd8] sm:$0xf] }
  0x29   : > { %v222_v19 = vld [vmem:[%s1348_s23 + $0xe4] sm:$0xf]  ;;  %219 = vst [vmem:[%s1352_s27 + $0x44] sm:$0xf] %v218_v17  ;;  %221 = vst [vmem:[%s1352_s27 + $0x48] sm:$0xf] %v220_v18 }
  0x2a   : > { %223 = vst [vmem:[%s1352_s27 + $0x4c] sm:$0xf] %v222_v19  ;;  %v224_v20 = vld [vmem:[%s1348_s23 + $0xf0] sm:$0xf]  ;;  %v226_v21 = vld [vmem:[%s1348_s23 + $0xfc] sm:$0xf] }
  0x2b   : > { %v228_v22 = vld [vmem:[%s1348_s23 + $0x108] sm:$0xf]  ;;  %225 = vst [vmem:[%s1352_s27 + $0x50] sm:$0xf] %v224_v20  ;;  %227 = vst [vmem:[%s1352_s27 + $0x54] sm:$0xf] %v226_v21 }
  0x2c   : > { %229 = vst [vmem:[%s1352_s27 + $0x58] sm:$0xf] %v228_v22  ;;  %v230_v23 = vld [vmem:[%s1348_s23 + $0x114] sm:$0xf]  ;;  %v232_v24 = vld [vmem:[%s1348_s23 + $0x120] sm:$0xf] }
  0x2d   : > { %v234_v25 = vld [vmem:[%s1348_s23 + $0x12c] sm:$0xf]  ;;  %231 = vst [vmem:[%s1352_s27 + $0x5c] sm:$0xf] %v230_v23  ;;  %233 = vst [vmem:[%s1352_s27 + $0x60] sm:$0xf] %v232_v24 }
  0x2e   : > { %235 = vst [vmem:[%s1352_s27 + $0x64] sm:$0xf] %v234_v25  ;;  %v236_v26 = vld [vmem:[%s1348_s23 + $0x138] sm:$0xf]  ;;  %v238_v27 = vld [vmem:[%s1348_s23 + $0x144] sm:$0xf] }
  0x2f   : > { %v240_v28 = vld [vmem:[%s1348_s23 + $0x150] sm:$0xf]  ;;  %237 = vst [vmem:[%s1352_s27 + $0x68] sm:$0xf] %v236_v26  ;;  %239 = vst [vmem:[%s1352_s27 + $0x6c] sm:$0xf] %v238_v27 }
  0x30   : > { %241 = vst [vmem:[%s1352_s27 + $0x70] sm:$0xf] %v240_v28  ;;  %v242_v29 = vld [vmem:[%s1348_s23 + $0x15c] sm:$0xf]  ;;  %v244_v30 = vld [vmem:[%s1348_s23 + $0x168] sm:$0xf] }
  0x31   : > { %v246_v31 = vld [vmem:[%s1348_s23 + $0x174] sm:$0xf]  ;;  %243 = vst [vmem:[%s1352_s27 + $0x74] sm:$0xf] %v242_v29  ;;  %245 = vst [vmem:[%s1352_s27 + $0x78] sm:$0xf] %v244_v30 }
  0x32   : > { %247 = vst [vmem:[%s1352_s27 + $0x7c] sm:$0xf] %v246_v31 }
  0x33 PF: > { %p859_p0 = scmp.ge.s32.totalorder %s1224_s21, 1  ;;  %p340_p1 = scmp.lt.s32.totalorder %s1224_s21, 7 }
  0x35   : > { %p341_p2 = pnand %p859_p0, %p340_p1 }
  0x36   : > { %s347_s28 = sand.u32 (!%p341_p2), 1, %s1200_s15   ;;  %s862_s5 = sshll.u32 (!%p341_p2), %s1212_s18, 4 }
  0x37   : > { %344 = sbr.rel (%p341_p2) target bundleno = 335 (0x14f), region = 69  ;;  %s860_s29 = sshll.u32 (!%p341_p2), %s347_s28, 7 }
  0x38   : > { %s1419_s4 = scalar_lea.vmem (!%p341_p2), [#allocation2], %s860_s29  ;;  %p380_p3 = scmp.lt.s32.totalorder (!%p341_p2), %s862_s5, 31 }
  0x39   : > { %p386_p4 = scmp.lt.s32.totalorder (!%p341_p2), %s1208_s17, 2  ;;  %s376_s26 = sand.u32 (!%p341_p2), 1, %s1192_s13  }
  0x3a   : > { %s861_s29 = sshll.u32 (!%p341_p2), %s376_s26, 7  ;;  %s1226_s27 = smov (!%p341_p2), [#allocation3]  }
  0x3c   : > { %v1076_v32 = vld [vmem:[%s1419_s4 + $0x78] sm:$0xff]   ;;  %v1078_v34 = vld [vmem:[%s1419_s4 + $0x70] sm:$0xff]   ;;  %v1080_v36 = vld [vmem:[%s1419_s4 + $0x68] sm:$0xff]   ;;  %s1595_s5 = smov (!%p380_p3, %s862_s5), 31 }
  0x3d   : > { %v1077_v33 = vld [vmem:[%s1419_s4 + $0x38] sm:$0xff]   ;;  %905 = vmatprep.subr.bf16.mxu0 %v1076_v32  ;;  %969 = vmatprep.subr.bf16.mxu1 %v1076_v32  ;;  %v1079_v35 = vld [vmem:[%s1419_s4 + $0x30] sm:$0xff]   ;;  %v1081_v37 = vld [vmem:[%s1419_s4 + $0x28] sm:$0xff]   ;;  %s904_s15 = sshll.u32 %s1595_s5, 3  ;;  %s985_s5 = smul.u32 48, %s1212_s18 }
  0x3e   : > { %906 = vmatpush3.bf16.msra.mxu0 %v1077_v33  ;;  %977 = vmatpush3.bf16.msra.mxu1 %v1077_v33  ;;  %v1082_v38 = vld [vmem:[%s1419_s4 + $0x60] sm:$0xff]   ;;  %v1084_v40 = vld [vmem:[%s1419_s4 + $0x58] sm:$0xff]   ;;  %s1434_s11 = scalar_lea.vmem %s1572_s0, %s904_s15  ;;  %v1086_v42 = vld [vmem:[%s1419_s4 + $0x50] sm:$0xff]  }
  0x3f   : > { %907 = vmatprep.subr.bf16.mxu0 %v1078_v34  ;;  %970 = vmatprep.subr.bf16.mxu1 %v1078_v34  ;;  %v1083_v39 = vld [vmem:[%s1419_s4 + $0x20] sm:$0xff]   ;;  %v1085_v41 = vld [vmem:[%s1419_s4 + $0x18] sm:$0xff]   ;;  %v1087_v45 = vld [vmem:[%s1419_s4 + $0x10] sm:$0xff]   ;;  %s387_s22 = scalar_select %p386_p4, %s1208_s17, 2 }
  0x40   : > { %v1094_v43 = vld [vmem:[%s1434_s11 + $0x4] ss:$8 sps:$4 sm:$0xff]   ;;  %v1092_v50 = vld [vmem:[%s1434_s11] ss:$8 sps:$4 sm:$0xff]   ;;  %v1098_v52 = vld [vmem:[%s1434_s11 + $0x14] ss:$8 sps:$4 sm:$0xff]   ;;  %s748_s15 = sadd.s32 %s1208_s17, %s985_s5 }
  0x41   : > { %v1097_v44 = vld [vmem:[%s1434_s11 + $0x44] ss:$8 sps:$4 sm:$0xff]   ;;  %654 = vmatprep.mubr.bf16.mxu0 %v1094_v43  ;;  %v1095_v51 = vld [vmem:[%s1434_s11 + $0x40] ss:$8 sps:$4 sm:$0xff]   ;;  %v1100_v53 = vld [vmem:[%s1434_s11 + $0x54] ss:$8 sps:$4 sm:$0xff]   ;;  %s388_s28 = scalar_lea.vmem %s1574_s2, %s387_s22 }
  0x42   : > { %908 = vmatpush3.bf16.msra.mxu0 %v1079_v35  ;;  %978 = vmatpush3.bf16.msra.mxu1 %v1079_v35  ;;  %v1088_v46 = vld [vmem:[%s1419_s4 + $0x48] sm:$0xff]   ;;  %v1090_v48 = vld [vmem:[%s1419_s4 + $0x40] sm:$0xff]   ;;  %v1102_v54 = vld [vmem:[%s1434_s11 + $0x10] ss:$8 sps:$4 sm:$0xff]   ;;  %s901_s18 = sshll.u32 %s748_s15, 7  ;;  %s1515_s22 = scalar_lea.sflag [#allocation4], %s376_s26 }
  0x43   : > { %909 = vmatprep.subr.bf16.mxu0 %v1080_v36  ;;  %971 = vmatprep.subr.bf16.mxu1 %v1080_v36  ;;  %v1089_v47 = vld [vmem:[%s1419_s4 + $0x8] sm:$0xff]   ;;  %v1091_v49 = vld [vmem:[%s1419_s4] sm:$0xff]   ;;  %v1103_v55 = vld [vmem:[%s1434_s11 + $0x50] ss:$8 sps:$4 sm:$0xff]   ;;  %s1471_s4 = scalar_lea.vmem [#allocation3], %s861_s29 }
  0x44   : > { %686 = vmatprep.mubr.bf16.mxu1 %v1097_v44  ;;  %v1104_v56 = vld [vmem:[%s1434_s11 + $0x24] ss:$8 sps:$4 sm:$0xff]   ;;  %v1108_v58 = vld [vmem:[%s1434_s11 + $0x20] ss:$8 sps:$4 sm:$0xff]   ;;  %v1110_v60 = vld [vmem:[%s1434_s11 + $0x34] ss:$8 sps:$4 sm:$0xff]  }
  0x45   : > { %v1106_v57 = vld [vmem:[%s1434_s11 + $0x64] ss:$8 sps:$4 sm:$0xff]   ;;  %v1109_v59 = vld [vmem:[%s1434_s11 + $0x60] ss:$8 sps:$4 sm:$0xff]   ;;  %v1112_v61 = vld [vmem:[%s1434_s11 + $0x74] ss:$8 sps:$4 sm:$0xff]  }
  0x46   : > { %910 = vmatpush3.bf16.msra.mxu0 %v1081_v37  ;;  %979 = vmatpush3.bf16.msra.mxu1 %v1081_v37  ;;  %v1114_v62 = vld [vmem:[%s1434_s11 + $0x30] ss:$8 sps:$4 sm:$0xff]   ;;  %v1467_v2 = vld [vmem:[%s388_s28] ss:$0 sm:$0xff]  ;;  %s751_s9 = sshll.u32 %s1471_s4, 4  ;;  %s1120_s28 = sshll.u32 %s1226_s27, 4  ;;  %s1507_s9 = int_to_ptr.vmem [resolvable:$true] %s751_s9  ;;  %s1121_s28 = int_to_ptr.vmem [resolvable:$false] %s1120_s28 }
  0x47   : > { %911 = vmatprep.subr.bf16.mxu0 %v1082_v38  ;;  %972 = vmatprep.subr.bf16.mxu1 %v1082_v38  ;;  %v1115_v63 = vld [vmem:[%s1434_s11 + $0x70] ss:$8 sps:$4 sm:$0xff]   ;;  %s1505_s11 = scalar_lea.hbm %s1575_s3, %s901_s18  ;;  %s1116_s23 = scalar_lea.vmem %s1507_s9, 2048 }
  0x48   : > { %p1117_p5 = scmp.ne.s32.totalorder %s1507_s9, %s1116_s23  ;;  %s1122_s29 = scalar_lea.vmem %s1121_s28, 4096 }
  0x49   : > { %p1123_p8 = scmp.lt.s32.totalorder %s1507_s9, %s1121_s28  ;;  %p1124_p9 = scmp.lt.s32.totalorder %s1122_s29, %s1116_s23 }
  0x4a   : > { %912 = vmatpush3.bf16.msra.mxu0 %v1083_v39  ;;  %980 = vmatpush3.bf16.msra.mxu1 %v1083_v39  ;;  %p1118_p6 = pnand %p1117_p5, %p1329_p10 }
  0x4b   : > { %913 = vmatprep.subr.bf16.mxu0 %v1084_v40  ;;  %973 = vmatprep.subr.bf16.mxu1 %v1084_v40  ;;  %p1125_p11 = por %p1124_p9, %p1123_p8 }
  0x4c   : > { %p1119_p7 = pneg %p1118_p6 }
  0x4e   : > { %914 = vmatpush3.bf16.msra.mxu0 %v1085_v41  ;;  %981 = vmatpush3.bf16.msra.mxu1 %v1085_v41  ;;  %p1126_p13 = pnand %p1125_p11, %p1119_p7 }
  0x4f   : > { %915 = vmatprep.subr.bf16.mxu0 %v1086_v42  ;;  %974 = vmatprep.subr.bf16.mxu1 %v1086_v42 }
  0x52   : > { %916 = vmatpush3.bf16.msra.mxu0 %v1087_v45  ;;  %982 = vmatpush3.bf16.msra.mxu1 %v1087_v45 }
  0x53   : > { %917 = vmatprep.subr.bf16.mxu0 %v1088_v46  ;;  %975 = vmatprep.subr.bf16.mxu1 %v1088_v46 }
  0x56   : > { %918 = vmatpush3.bf16.msra.mxu0 %v1089_v47  ;;  %983 = vmatpush3.bf16.msra.mxu1 %v1089_v47 }
  0x57   : > { %919 = vmatprep.subr.bf16.mxu0 %v1090_v48  ;;  %976 = vmatprep.subr.bf16.mxu1 %v1090_v48 }
  0x5a   : > { %920 = vmatpush3.bf16.msra.mxu0 %v1091_v49  ;;  %984 = vmatpush3.bf16.msra.mxu1 %v1091_v49 }
  0x5d   : > { %655 = vmatmul.mubr.bf16.vlgmr.msra.gmra.mxu0 %v1092_v50  ;;  %687 = vmatmul.mubr.bf16.vlgmr.msra.gmra.mxu1 %v1095_v51 }
  0x5e   : > { %662 = vmatprep.mubr.bf16.mxu0 %v1098_v52  ;;  %694 = vmatprep.mubr.bf16.mxu1 %v1100_v53 }
  0x65   : > { %663 = vmatmul.mubr.bf16.gmra.mxu0 %v1102_v54  ;;  %695 = vmatmul.mubr.bf16.gmra.mxu1 %v1103_v55 }
  0x66   : > { %670 = vmatprep.mubr.bf16.mxu0 %v1104_v56  ;;  %702 = vmatprep.mubr.bf16.mxu1 %v1106_v57 }
  0x6d   : > { %671 = vmatmul.mubr.bf16.gmra.mxu0 %v1108_v58  ;;  %703 = vmatmul.mubr.bf16.gmra.mxu1 %v1109_v59 }
  0x6e   : > { %678 = vmatprep.mubr.bf16.mxu0 %v1110_v60  ;;  %710 = vmatprep.mubr.bf16.mxu1 %v1112_v61 }
  0x75   : > { %679 = vmatmul.mubr.bf16.gmra.mxu0 %v1114_v62  ;;  %711 = vmatmul.mubr.bf16.gmra.mxu1 %v1115_v63 }
 0x11d   : > { %v921_v0 = vpop.f32.mrf.mxu0  ;;  %v945_v1 = vpop.f32.mrf.mxu1 }
 0x11f   : > { %v922_v3 = vpop.f32.mrf.mxu0  ;;  %v946_v4 = vpop.f32.mrf.mxu1 }
 0x120   : > { %v923_v5 = vadd.f32 %v922_v3, %v921_v0  ;;  %v947_v6 = vadd.f32 %v946_v4, %v945_v1 }
 0x121   : > { %v924_v7 = vpop.f32.mrf.mxu0  ;;  %v948_v8 = vpop.f32.mrf.mxu1 }
 0x122   : > { %v657_v9 = vadd.f32 %v923_v5, %v1467_v2  ;;  %v689_v10 = vadd.f32 %v947_v6, %v1467_v2 }
 0x123   : > { %v925_v11 = vpop.f32.mrf.mxu0  ;;  %v949_v12 = vpop.f32.mrf.mxu1 }
 0x124   : > { %719 = vst [vmem:[%s1471_s4] sm:$0xff] %v657_v9  ;;  %727 = vst [vmem:[%s1471_s4 + $0x40] sm:$0xff] %v689_v10  ;;  %v926_v13 = vadd.f32 %v925_v11, %v924_v7  ;;  %v950_v14 = vadd.f32 %v949_v12, %v948_v8 }
 0x125   : > { %v927_v15 = vpop.f32.mrf.mxu0  ;;  %v951_v16 = vpop.f32.mrf.mxu1 }
 0x126   : > { %v660_v17 = vadd.f32 %v926_v13, %v1467_v2  ;;  %v692_v18 = vadd.f32 %v950_v14, %v1467_v2 }
 0x127   : > { %v928_v19 = vpop.f32.mrf.mxu0  ;;  %v952_v20 = vpop.f32.mrf.mxu1 }
 0x128   : > { %720 = vst [vmem:[%s1471_s4 + $0x8] sm:$0xff] %v660_v17  ;;  %728 = vst [vmem:[%s1471_s4 + $0x48] sm:$0xff] %v692_v18  ;;  %v929_v21 = vadd.f32 %v928_v19, %v927_v15  ;;  %v953_v22 = vadd.f32 %v952_v20, %v951_v16 }
 0x129   : > { %v930_v23 = vpop.f32.mrf.mxu0  ;;  %v954_v24 = vpop.f32.mrf.mxu1 }
 0x12a   : > { %v665_v25 = vadd.f32 %v929_v21, %v1467_v2  ;;  %v697_v26 = vadd.f32 %v953_v22, %v1467_v2 }
 0x12b   : > { %v931_v27 = vpop.f32.mrf.mxu0  ;;  %v955_v28 = vpop.f32.mrf.mxu1 }
 0x12c   : > { %721 = vst [vmem:[%s1471_s4 + $0x10] sm:$0xff] %v665_v25  ;;  %729 = vst [vmem:[%s1471_s4 + $0x50] sm:$0xff] %v697_v26  ;;  %v932_v29 = vadd.f32 %v931_v27, %v930_v23  ;;  %v956_v30 = vadd.f32 %v955_v28, %v954_v24 }
 0x12d   : > { %v933_v31 = vpop.f32.mrf.mxu0  ;;  %v957_v32 = vpop.f32.mrf.mxu1 }
 0x12e   : > { %v668_v33 = vadd.f32 %v932_v29, %v1467_v2  ;;  %v700_v34 = vadd.f32 %v956_v30, %v1467_v2 }
 0x12f   : > { %v934_v35 = vpop.f32.mrf.mxu0  ;;  %v958_v36 = vpop.f32.mrf.mxu1 }
 0x130   : > { %722 = vst [vmem:[%s1471_s4 + $0x18] sm:$0xff] %v668_v33  ;;  %730 = vst [vmem:[%s1471_s4 + $0x58] sm:$0xff] %v700_v34  ;;  %v935_v37 = vadd.f32 %v934_v35, %v933_v31  ;;  %v959_v38 = vadd.f32 %v958_v36, %v957_v32 }
 0x131   : > { %v936_v39 = vpop.f32.mrf.mxu0  ;;  %v960_v40 = vpop.f32.mrf.mxu1 }
 0x132   : > { %v673_v41 = vadd.f32 %v935_v37, %v1467_v2  ;;  %v705_v42 = vadd.f32 %v959_v38, %v1467_v2 }
 0x133   : > { %v937_v43 = vpop.f32.mrf.mxu0  ;;  %v961_v44 = vpop.f32.mrf.mxu1 }
 0x134   : > { %723 = vst [vmem:[%s1471_s4 + $0x20] sm:$0xff] %v673_v41  ;;  %731 = vst [vmem:[%s1471_s4 + $0x60] sm:$0xff] %v705_v42  ;;  %v938_v45 = vadd.f32 %v937_v43, %v936_v39  ;;  %v962_v46 = vadd.f32 %v961_v44, %v960_v40 }
 0x135   : > { %v939_v47 = vpop.f32.mrf.mxu0  ;;  %v963_v48 = vpop.f32.mrf.mxu1 }
 0x136   : > { %v676_v49 = vadd.f32 %v938_v45, %v1467_v2  ;;  %v708_v50 = vadd.f32 %v962_v46, %v1467_v2 }
 0x137   : > { %v940_v51 = vpop.f32.mrf.mxu0  ;;  %v964_v52 = vpop.f32.mrf.mxu1 }
 0x138   : > { %724 = vst [vmem:[%s1471_s4 + $0x28] sm:$0xff] %v676_v49  ;;  %732 = vst [vmem:[%s1471_s4 + $0x68] sm:$0xff] %v708_v50  ;;  %v941_v53 = vadd.f32 %v940_v51, %v939_v47  ;;  %v965_v54 = vadd.f32 %v964_v52, %v963_v48 }
 0x139   : > { %v942_v55 = vpop.f32.mrf.mxu0  ;;  %v966_v56 = vpop.f32.mrf.mxu1 }
 0x13a   : > { %v681_v57 = vadd.f32 %v941_v53, %v1467_v2  ;;  %v713_v58 = vadd.f32 %v965_v54, %v1467_v2 }
 0x13b   : > { %v943_v59 = vpop.f32.mrf.mxu0  ;;  %v967_v60 = vpop.f32.mrf.mxu1 }
 0x13c   : > { %725 = vst [vmem:[%s1471_s4 + $0x30] sm:$0xff] %v681_v57  ;;  %733 = vst [vmem:[%s1471_s4 + $0x70] sm:$0xff] %v713_v58  ;;  %v944_v61 = vadd.f32 %v943_v59, %v942_v55  ;;  %v968_v62 = vadd.f32 %v967_v60, %v966_v56 }
 0x13e   : > { %v684_v63 = vadd.f32 %v944_v61, %v1467_v2  ;;  %v716_v0 = vadd.f32 %v968_v62, %v1467_v2 }
 0x140   : > { %726 = vst [vmem:[%s1471_s4 + $0x38] sm:$0xff] %v684_v63  ;;  %734 = vst [vmem:[%s1471_s4 + $0x78] sm:$0xff] %v716_v0 }
 0x141   : > { %1129 = shalt.err (!%p1126_p13)
}
 0x142   : > { %s1130_s26 = scalar_lea.hbm %s1505_s11, 2048  ;;  %s1134_s15 = scalar_lea.hbm %s1575_s3, 12288 }
 0x143   : > { %p1131_p0 = scmp.ne.s32.totalorder %s1505_s11, %s1130_s26  ;;  %p1135_p3 = scmp.lt.s32.totalorder %s1505_s11, %s1575_s3 }
 0x144   : > { %p1136_p4 = scmp.lt.s32.totalorder %s1134_s15, %s1130_s26 }
 0x145   : > { %p1132_p1 = pnand %p1131_p0, %p1329_p10 }
 0x146   : > { %p1137_p5 = por %p1136_p4, %p1135_p3 }
 0x147   : > { %p1133_p2 = pneg %p1132_p1 }
 0x149   : > { %p1138_p6 = pnand %p1137_p5, %p1133_p2 }
 0x14b   : > { %1141 = shalt.err (!%p1138_p6)
}
 0x14c   : > { %s1227_s10 = smov 128   ;;  %s1228_s23 = smov 384  }
 0x14d   : > { %s1229_s27 = smov 8  }
 0x14e   : > { %986 = dma.vmem_to_hbm [thread:$0]  (%p1329_p10), %s1507_s9, 2048, %s1505_s11, %s1515_s22, %s1227_s10, %s1228_s23, %s1229_s27  }
 0x14f PF: > { %p992_p7 = scmp.ge.s32.totalorder %s1224_s21, 2  ;;  %s766_s28 = sand.u32 1, %s1188_s12  }
 0x150   : > { %s767_s29 = scalar_lea.sflag [#allocation4], %s766_s28 }
 0x151   : > { %p989_p8 = pnand %p992_p7, %p1336_p12 }
 0x153   : > { %p990_p9 = pneg %p989_p8 }
 0x155   : > { %1183 = dma.done.wait (%p990_p9), %s767_s29, 2048  }
 0x156   : > { %1185 = vsyncadd (%p990_p9), %s767_s29, 4294965248  ;;  %s16_s21 = sadd.s32 1, %s1224_s21   ;;  %s1579_s12 = smov %s1192_s13 }
 0x157   : > { %p13_p11 = scmp.ge.s32.totalorder %s16_s21, 8   ;;  %s1580_s13 = smov %s1196_s14 }
 0x158   : > { %s1581_s14 = smov %s1334_s7  ;;  %s1582_s15 = smov %s1204_s16 }
 0x159   : > { %s1583_s16 = smov %s1323_s30  ;;  %s1584_s17 = smov %s1216_s19 }
 0x15a   : > { %s1585_s18 = smov %s1220_s20  ;;  %s1586_s19 = smov %s1589_s24 }
 0x15b   : > { %s1587_s20 = smov %s1593_s25  ;;  %15 = sbr.rel (!%p13_p11) target bundleno = 6 (0x6), region = 119 }
 0x160   :  { %772 = vsyncpa [#allocation4], 1 }
 0x161   :  { %774 = vsyncpa [#allocation4 + $0x1], 1 }

// kernel: roberta_forward.2
= control target key start
LH: loop header
LB: loop body
LE: loop exit
PB: predicated region body
PF: predicated region fallthrough
CT: control target
= control target key end

     0   :  { %s8216_s18 = smov 0   ;;  %s13444_s0 = inlined_call_operand.vmem [shape: bf16[256,256], index: 0, kind: input, shape index: {}]   ;;  %s13445_s1 = inlined_call_operand.vmem [shape: f32[2,256], index: 1, kind: input, shape index: {}]   ;;  %s13446_s2 = inlined_call_operand.vmem [shape: s8[4,256,768], index: 2, kind: input, shape index: {}]   ;;  %s13447_s3 = inlined_call_operand.vmem [shape: f32[4,1,768], index: 3, kind: input, shape index: {}]   ;;  %s13448_s4 = inlined_call_operand.vmem [shape: f32[4,1,768], index: 4, kind: input, shape index: {}]   ;;  %s13449_s5 = inlined_call_operand.vmem [shape: s8[4,256,256], index: 5, kind: input, shape index: {}]   ;;  %s13450_s6 = inlined_call_operand.vmem [shape: f32[4,1,256], index: 6, kind: input, shape index: {}]   ;;  %s13451_s7 = inlined_call_operand.vmem [shape: f32[4,1,256], index: 7, kind: input, shape index: {}]   ;;  %s13452_s8 = inlined_call_operand.vmem [shape: s8[4,256,512], index: 8, kind: input, shape index: {}]   ;;  %s13453_s9 = inlined_call_operand.vmem [shape: f32[4,1,512], index: 9, kind: input, shape index: {}]   ;;  %s13454_s10 = inlined_call_operand.vmem [shape: f32[4,1,512], index: 10, kind: input, shape index: {}]   ;;  %s13455_s11 = inlined_call_operand.vmem [shape: s8[4,512,256], index: 11, kind: input, shape index: {}]   ;;  %s13456_s12 = inlined_call_operand.vmem [shape: f32[4,1,256], index: 12, kind: input, shape index: {}]   ;;  %s13457_s13 = inlined_call_operand.vmem [shape: f32[4,1,256], index: 13, kind: input, shape index: {}]   ;;  %s13458_s14 = inlined_call_operand.vmem [shape: f32[4,4,256], index: 14, kind: input, shape index: {}]   ;;  %s13459_s15 = inlined_call_operand.vmem [shape: bf16[256,256], index: 15, kind: output, shape index: {}]  }
   0x1   :  { %13737 = sst [smem:[#allocation97_spill]] %s13445_s1 }
   0x2   :  { %13738 = sst [smem:[#allocation98_spill]] %s13446_s2 }
   0x3   :  { %13739 = sst [smem:[#allocation99_spill]] %s13447_s3 }
   0x4   :  { %13740 = sst [smem:[#allocation100_spill]] %s13448_s4 }
   0x5   :  { %13741 = sst [smem:[#allocation101_spill]] %s13449_s5 }
   0x6   :  { %13742 = sst [smem:[#allocation102_spill]] %s13452_s8 }
   0x7   :  { %13743 = sst [smem:[#allocation103_spill]] %s13453_s9 }
   0x8   :  { %13744 = sst [smem:[#allocation104_spill]] %s13459_s15 }
   0x9 LB: > { %13745 = sst [smem:[#allocation3_spill]] %s8133_s18  ;;  %s8222_s19 = sadd.s32 4294967295, %s8133_s18   ;;  %s8133_s18 = sphi %s8216_s18, %s25_s18  }
   0xa   : > { %p7606_p0 = scmp.ge.s32.totalorder %s8133_s18, 1  ;;  %p544_p1 = scmp.lt.s32.totalorder %s8133_s18, 5 }
   0xc   : > { %p545_p2 = pnand %p7606_p0, %p544_p1 }
   0xe   : > { %548 = sbr.rel (%p545_p2) target bundleno = 3055 (0xbef), region = 80 }
  0x13   : > { %p639_p3 = scmp.lt.s32.totalorder %s8222_s19, 3  ;;  %s13746_s5 = sld [smem:[#allocation101_spill]] }
  0x14   : > { %s13748_s2 = sld [smem:[#allocation98_spill]]  ;;  %p7622_p4 = scmp.ne.s32.totalorder %s8222_s19, 0 }
  0x15   : > { %s640_s20 = scalar_select %p639_p3, %s8222_s19, 3 }
  0x16   : > { %s13750_s3 = sld [smem:[#allocation99_spill]] }
  0x17   : > { %s7730_s21 = smul.u32 384, %s640_s20  ;;  %s7662_s22 = sshll.u32 %s640_s20, 7 }
  0x18   : > { %s7731_s23 = smul.u32 6, %s640_s20  ;;  %s8238_s30 = sshll.u32 %s640_s20, 1 }
  0x19   : > { %s8231_s26 = scalar_lea.vmem %s13746_s5, %s7662_s22  ;;  %s13752_s4 = sld [smem:[#allocation100_spill]] }
  0x1a   : > { %13747 = sst [smem:[#allocation4_spill]] %s8231_s26  ;;  %s8236_s29 = scalar_lea.vmem %s13748_s2, %s7730_s21 }
  0x1b   : > { %13749 = sst [smem:[#allocation5_spill]] %s8236_s29  ;;  %s7663_s16 = sshll.u32 %s640_s20, 8 }
  0x1c   : > { %s8243_s18 = scalar_lea.vmem %s13750_s3, %s7731_s23  ;;  %s7614_s17 = sshll.u32 %s640_s20, 2 }
  0x1d   : > { %13751 = sst [smem:[#allocation6_spill]] %s8243_s18  ;;  %s8271_s25 = scalar_lea.vmem %s13454_s10, %s7614_s17 }
  0x1e   : > { %s13753_s8 = sld [smem:[#allocation102_spill]]  ;;  %s8276_s28 = scalar_lea.vmem %s13455_s11, %s7663_s16 }
  0x1f   : > { %s8248_s22 = scalar_lea.vmem %s13752_s4, %s7731_s23  ;;  %s13754_s9 = sld [smem:[#allocation103_spill]] }
  0x20   : > { %s686_s26 = scalar_lea.vmem %s13456_s12, %s8238_s30  ;;  %s690_s1 = scalar_lea.vmem %s13457_s13, %s8238_s30 }
  0x21   : > { %s7665_s18 = sshll.u32 %s640_s20, 3  ;;  %700 = sbr.rel (%p7622_p4) target bundleno = 426 (0x1aa), region = 84 }
  0x22   : > { %s8289_s23 = scalar_lea.vmem %s13458_s14, %s7665_s18 }
  0x24   : > { %s8261_s3 = scalar_lea.vmem %s13753_s8, %s7663_s16 }
  0x25   : > { %s8266_s15 = scalar_lea.vmem %s13754_s9, %s7614_s17 }
  0x26   : > { %v8295_v0 = vld [vmem:[%s13444_s0] sm:$0xff]  ;;  %v8300_v1 = vld [vmem:[%s13444_s0 + $0x10] sm:$0xff]  ;;  %v8305_v2 = vld [vmem:[%s13444_s0 + $0x8] sm:$0xff]  ;;  %s13821_s16 = sld [smem:[#allocation97_spill]] }
  0x27   : > { %v733_v3 = vunpack.c.l.bf16 %v8295_v0  ;;  %v734_v4 = vunpack.c.h.bf16 %v8295_v0  ;;  %v737_v5 = vunpack.c.l.bf16 %v8300_v1  ;;  %v738_v6 = vunpack.c.h.bf16 %v8300_v1  ;;  %v8314_v7 = vld [vmem:[%s13444_s0 + $0x18] sm:$0xff]  ;;  %v8319_v8 = vld [vmem:[%s13444_s0 + $0x20] sm:$0xff]  ;;  %v8328_v13 = vld [vmem:[%s13444_s0 + $0x28] sm:$0xff] }
  0x28   : > { %v735_v9 = vunpack.c.l.bf16 %v8305_v2  ;;  %v736_v10 = vunpack.c.h.bf16 %v8305_v2  ;;  %v739_v11 = vunpack.c.l.bf16 %v8314_v7  ;;  %v740_v12 = vunpack.c.h.bf16 %v8314_v7  ;;  %v8353_v22 = vld [vmem:[%s13444_s0 + $0x30] sm:$0xff]  ;;  %v8358_v23 = vld [vmem:[%s13444_s0 + $0x38] sm:$0xff]  ;;  %v8375_v30 = vld [vmem:[%s13444_s0 + $0x40] sm:$0xff] }
  0x29   : > { %v800_v14 = vadd.f32 %v734_v4, %v733_v3  ;;  %v806_v15 = vadd.f32 %v738_v6, %v737_v5  ;;  %v741_v16 = vunpack.c.l.bf16 %v8319_v8  ;;  %v742_v17 = vunpack.c.h.bf16 %v8319_v8  ;;  %v8380_v31 = vld [vmem:[%s13444_s0 + $0x48] sm:$0xff]  ;;  %v8397_v38 = vld [vmem:[%s13444_s0 + $0x50] sm:$0xff]  ;;  %v8402_v39 = vld [vmem:[%s13444_s0 + $0x58] sm:$0xff] }
  0x2a   : > { %v803_v18 = vadd.f32 %v736_v10, %v735_v9  ;;  %v809_v19 = vadd.f32 %v740_v12, %v739_v11  ;;  %v743_v20 = vunpack.c.l.bf16 %v8328_v13  ;;  %v744_v21 = vunpack.c.h.bf16 %v8328_v13  ;;  %v8419_v46 = vld [vmem:[%s13444_s0 + $0x60] sm:$0xff]  ;;  %v8424_v47 = vld [vmem:[%s13444_s0 + $0x68] sm:$0xff]  ;;  %v8441_v54 = vld [vmem:[%s13444_s0 + $0x70] sm:$0xff] }
  0x2b   : > { %801 = vadd.xlane.f32.xlu0 %v800_v14  ;;  %807 = vadd.xlane.f32.xlu1 %v806_v15  ;;  %v812_v24 = vadd.f32 %v742_v17, %v741_v16  ;;  %v745_v25 = vunpack.c.l.bf16 %v8353_v22  ;;  %v746_v27 = vunpack.c.h.bf16 %v8353_v22  ;;  %v747_v28 = vunpack.c.l.bf16 %v8358_v23  ;;  %v8446_v55 = vld [vmem:[%s13444_s0 + $0x78] sm:$0xff]  ;;  %v8463_v62 = vld [vmem:[%s13444_s0 + $0x80] sm:$0xff]  ;;  %v8468_v63 = vld [vmem:[%s13444_s0 + $0x88] sm:$0xff] }
  0x2c   : > { %v815_v26 = vadd.f32 %v744_v21, %v743_v20  ;;  %v748_v29 = vunpack.c.h.bf16 %v8358_v23  ;;  %v749_v32 = vunpack.c.l.bf16 %v8375_v30  ;;  %v750_v33 = vunpack.c.h.bf16 %v8375_v30 }
  0x2d   : > { %v818_v34 = vadd.f32 %v746_v27, %v745_v25  ;;  %v751_v36 = vunpack.c.l.bf16 %v8380_v31  ;;  %v13510_v37 = vunpack.c.h.bf16 %v8380_v31  ;;  %v13501_v41 = vunpack.c.l.bf16 %v8397_v38 }
  0x2e   : > { %v821_v35 = vadd.f32 %v748_v29, %v747_v28  ;;  %v824_v40 = vadd.f32 %v750_v33, %v749_v32  ;;  %v13496_v43 = vunpack.c.h.bf16 %v8397_v38  ;;  %v13495_v44 = vunpack.c.l.bf16 %v8402_v39 }
  0x2f   : > { %804 = vadd.xlane.f32.xlu0 %v803_v18  ;;  %810 = vadd.xlane.f32.xlu1 %v809_v19  ;;  %v827_v42 = vadd.f32 %v13510_v37, %v751_v36  ;;  %v13490_v45 = vunpack.c.h.bf16 %v8402_v39  ;;  %v13489_v48 = vunpack.c.l.bf16 %v8419_v46  ;;  %v13484_v49 = vunpack.c.h.bf16 %v8419_v46 }
  0x30   : > { %v830_v50 = vadd.f32 %v13496_v43, %v13501_v41  ;;  %v13483_v52 = vunpack.c.l.bf16 %v8424_v47  ;;  %v13478_v53 = vunpack.c.h.bf16 %v8424_v47  ;;  %v13477_v57 = vunpack.c.l.bf16 %v8441_v54  ;;  %v8617_v43 = vld [vmem:[%s13444_s0 + $0xf0] sm:$0xff] }
  0x31   : > { %v833_v51 = vadd.f32 %v13490_v45, %v13495_v44  ;;  %v836_v56 = vadd.f32 %v13484_v49, %v13489_v48  ;;  %v13472_v59 = vunpack.c.h.bf16 %v8441_v54  ;;  %v13471_v60 = vunpack.c.l.bf16 %v8446_v55  ;;  %v8573_v49 = vld [vmem:[%s13444_s0 + $0xd0] sm:$0xff]  ;;  %v8595_v45 = vld [vmem:[%s13444_s0 + $0xe0] sm:$0xff] }
  0x32   : > { %v839_v58 = vadd.f32 %v13478_v53, %v13483_v52  ;;  %v13466_v61 = vunpack.c.h.bf16 %v8446_v55  ;;  %v13470_v14 = vunpack.c.l.bf16 %v8463_v62  ;;  %v13469_v15 = vunpack.c.h.bf16 %v8463_v62  ;;  %v8551_v53 = vld [vmem:[%s13444_s0 + $0xc0] sm:$0xff] }
  0x33   : > { %813 = vadd.xlane.f32.xlu0 %v812_v24  ;;  %816 = vadd.xlane.f32.xlu1 %v815_v26  ;;  %v842_v18 = vadd.f32 %v13472_v59, %v13477_v57  ;;  %v13468_v24 = vunpack.c.l.bf16 %v8468_v63  ;;  %v13467_v26 = vunpack.c.h.bf16 %v8468_v63  ;;  %v8529_v59 = vld [vmem:[%s13444_s0 + $0xb0] sm:$0xff] }
  0x34   : > { %v845_v19 = vadd.f32 %v13466_v61, %v13471_v60  ;;  %v8507_v61 = vld [vmem:[%s13444_s0 + $0xa0] sm:$0xff] }
  0x37   : > { %819 = vadd.xlane.f32.xlu0 %v818_v34  ;;  %822 = vadd.xlane.f32.xlu1 %v821_v35  ;;  %v8485_v34 = vld [vmem:[%s13444_s0 + $0x90] sm:$0xff]  ;;  %v8490_v35 = vld [vmem:[%s13444_s0 + $0x98] sm:$0xff] }
  0x3b   : > { %825 = vadd.xlane.f32.xlu0 %v824_v40  ;;  %828 = vadd.xlane.f32.xlu1 %v827_v42  ;;  %v848_v40 = vadd.f32 %v13469_v15, %v13470_v14  ;;  %v13476_v42 = vunpack.c.l.bf16 %v8485_v34 }
  0x3f   : > { %831 = vadd.xlane.f32.xlu0 %v830_v50  ;;  %834 = vadd.xlane.f32.xlu1 %v833_v51  ;;  %v851_v50 = vadd.f32 %v13467_v26, %v13468_v24  ;;  %v13475_v51 = vunpack.c.h.bf16 %v8485_v34  ;;  %v13481_v26 = vunpack.c.h.bf16 %v8507_v61 }
  0x41   : > { %v854_v24 = vadd.f32 %v13475_v51, %v13476_v42  ;;  %v13487_v51 = vunpack.c.h.bf16 %v8529_v59 }
  0x43   : > { %837 = vadd.xlane.f32.xlu0 %v836_v56  ;;  %840 = vadd.xlane.f32.xlu1 %v839_v58  ;;  %v13474_v56 = vunpack.c.l.bf16 %v8490_v35  ;;  %v13473_v58 = vunpack.c.h.bf16 %v8490_v35 }
  0x45   : > { %v857_v15 = vadd.f32 %v13473_v58, %v13474_v56  ;;  %v13488_v58 = vunpack.c.l.bf16 %v8529_v59 }
  0x47   : > { %843 = vadd.xlane.f32.xlu0 %v842_v18  ;;  %846 = vadd.xlane.f32.xlu1 %v845_v19  ;;  %v8512_v18 = vld [vmem:[%s13444_s0 + $0xa8] sm:$0xff]  ;;  %v13482_v19 = vunpack.c.l.bf16 %v8507_v61 }
  0x48   : > { %v13480_v14 = vunpack.c.l.bf16 %v8512_v18  ;;  %v13479_v60 = vunpack.c.h.bf16 %v8512_v18 }
  0x4a   : > { %v863_v56 = vadd.f32 %v13479_v60, %v13480_v14  ;;  %v13493_v60 = vunpack.c.h.bf16 %v8551_v53  ;;  %v866_v14 = vadd.f32 %v13487_v51, %v13488_v58  ;;  %v13499_v51 = vunpack.c.h.bf16 %v8573_v49 }
  0x4b   : > { %849 = vadd.xlane.f32.xlu0 %v848_v40  ;;  %852 = vadd.xlane.f32.xlu1 %v851_v50  ;;  %v8534_v40 = vld [vmem:[%s13444_s0 + $0xb8] sm:$0xff]  ;;  %v860_v50 = vadd.f32 %v13481_v26, %v13482_v19 }
  0x4c   : > { %v13486_v42 = vunpack.c.l.bf16 %v8534_v40  ;;  %v13485_v57 = vunpack.c.h.bf16 %v8534_v40 }
  0x4e   : > { %v869_v26 = vadd.f32 %v13485_v57, %v13486_v42  ;;  %v13500_v57 = vunpack.c.l.bf16 %v8573_v49 }
  0x4f   : > { %855 = vadd.xlane.f32.xlu0 %v854_v24  ;;  %858 = vadd.xlane.f32.xlu1 %v857_v15  ;;  %v8556_v15 = vld [vmem:[%s13444_s0 + $0xc8] sm:$0xff]  ;;  %v13494_v24 = vunpack.c.l.bf16 %v8551_v53 }
  0x50   : > { %v13492_v19 = vunpack.c.l.bf16 %v8556_v15  ;;  %v13491_v52 = vunpack.c.h.bf16 %v8556_v15 }
  0x52   : > { %v875_v42 = vadd.f32 %v13491_v52, %v13492_v19  ;;  %v13502_v52 = vunpack.c.h.bf16 %v8595_v45  ;;  %v878_v19 = vadd.f32 %v13499_v51, %v13500_v57  ;;  %v13506_v51 = vunpack.c.h.bf16 %v8617_v43 }
  0x53   : > { %861 = vadd.xlane.f32.xlu0 %v860_v50  ;;  %864 = vadd.xlane.f32.xlu1 %v863_v56  ;;  %v8578_v56 = vld [vmem:[%s13444_s0 + $0xd8] sm:$0xff]  ;;  %v872_v50 = vadd.f32 %v13493_v60, %v13494_v24 }
  0x54   : > { %v13498_v58 = vunpack.c.l.bf16 %v8578_v56  ;;  %v13497_v48 = vunpack.c.h.bf16 %v8578_v56 }
  0x56   : > { %v881_v60 = vadd.f32 %v13497_v48, %v13498_v58  ;;  %v13509_v48 = vunpack.c.l.bf16 %v8617_v43 }
  0x57   : > { %867 = vadd.xlane.f32.xlu0 %v866_v14  ;;  %870 = vadd.xlane.f32.xlu1 %v869_v26  ;;  %v8600_v14 = vld [vmem:[%s13444_s0 + $0xe8] sm:$0xff]  ;;  %v13505_v26 = vunpack.c.l.bf16 %v8595_v45 }
  0x58   : > { %v13504_v24 = vunpack.c.l.bf16 %v8600_v14  ;;  %v13503_v44 = vunpack.c.h.bf16 %v8600_v14 }
  0x5a   : > { %v887_v58 = vadd.f32 %v13503_v44, %v13504_v24 }
  0x5b   : > { %873 = vadd.xlane.f32.xlu0 %v872_v50  ;;  %876 = vadd.xlane.f32.xlu1 %v875_v42  ;;  %v8622_v42 = vld [vmem:[%s13444_s0 + $0xf8] sm:$0xff]  ;;  %v884_v50 = vadd.f32 %v13502_v52, %v13505_v26  ;;  %v890_v52 = vadd.f32 %v13506_v51, %v13509_v48 }
  0x5c   : > { %v13508_v57 = vunpack.c.l.bf16 %v8622_v42  ;;  %v13507_v41 = vunpack.c.h.bf16 %v8622_v42 }
  0x5f   : > { %879 = vadd.xlane.f32.xlu0 %v878_v19  ;;  %882 = vadd.xlane.f32.xlu1 %v881_v60  ;;  %v893_v60 = vadd.f32 %v13507_v41, %v13508_v57 }
  0x63   : > { %885 = vadd.xlane.f32.xlu0 %v884_v50  ;;  %888 = vadd.xlane.f32.xlu1 %v887_v58 }
  0x67   : > { %891 = vadd.xlane.f32.xlu0 %v890_v52  ;;  %894 = vadd.xlane.f32.xlu1 %v893_v60 }
  0xb4   : > { %v802_v19 = vpop.xlane.xlu0 %801  ;;  %v808_v44 = vpop.xlane.xlu1 %807 }
  0xb5   : > { %v897_v24 = vmul.f32 0.00390625, %v802_v19  ;;  %v899_v26 = vmul.f32 0.00390625, %v808_v44 }
  0xb7   : > { %v8646_v50 = vsub.f32 %v733_v3, %v897_v24  ;;  %v8650_v58 = vsub.f32 %v734_v4, %v897_v24  ;;  %v8654_v51 = vsub.f32 %v737_v5, %v899_v26  ;;  %v8658_v52 = vsub.f32 %v738_v6, %v899_v26 }
  0xb8   : > { %v805_v60 = vpop.xlane.xlu0 %804  ;;  %v811_v41 = vpop.xlane.xlu1 %810 }
  0xb9   : > { %v898_v19 = vmul.f32 0.00390625, %v805_v60  ;;  %v900_v44 = vmul.f32 0.00390625, %v811_v41  ;;  %v993_v3 = vmul.f32 %v8646_v50, %v8646_v50  ;;  %v994_v0 = vmul.f32 %v8650_v58, %v8650_v58 }
  0xba   : > { %v997_v4 = vmul.f32 %v8654_v51, %v8654_v51  ;;  %v998_v5 = vmul.f32 %v8658_v52, %v8658_v52 }
  0xbb   : > { %v8670_v1 = vsub.f32 %v735_v9, %v898_v19  ;;  %v8674_v6 = vsub.f32 %v736_v10, %v898_v19  ;;  %v8678_v41 = vsub.f32 %v739_v11, %v900_v44  ;;  %v8682_v24 = vsub.f32 %v740_v12, %v900_v44 }
  0xbc   : > { %v814_v26 = vpop.xlane.xlu0 %813  ;;  %v1057_v60 = vadd.f32 %v994_v0, %v993_v3  ;;  %v817_v57 = vpop.xlane.xlu1 %816  ;;  %v1063_v10 = vadd.f32 %v998_v5, %v997_v4 }
  0xbd   : > { %v901_v48 = vmul.f32 0.00390625, %v814_v26  ;;  %v902_v37 = vmul.f32 0.00390625, %v817_v57  ;;  %v995_v9 = vmul.f32 %v8670_v1, %v8670_v1  ;;  %v996_v2 = vmul.f32 %v8674_v6, %v8674_v6 }
  0xbe   : > { %1058 = vadd.xlane.f32.xlu0 %v1057_v60  ;;  %v999_v11 = vmul.f32 %v8678_v41, %v8678_v41  ;;  %v1000_v7 = vmul.f32 %v8682_v24, %v8682_v24 }
  0xbf   : > { %v8694_v12 = vsub.f32 %v741_v16, %v901_v48  ;;  %v8698_v57 = vsub.f32 %v742_v17, %v901_v48  ;;  %v8702_v19 = vsub.f32 %v743_v20, %v902_v37  ;;  %v8706_v44 = vsub.f32 %v744_v21, %v902_v37 }
  0xc0   : > { %v820_v3 = vpop.xlane.xlu0 %819  ;;  %v1060_v0 = vadd.f32 %v996_v2, %v995_v9  ;;  %v823_v4 = vpop.xlane.xlu1 %822  ;;  %v1066_v17 = vadd.f32 %v1000_v7, %v999_v11 }
  0xc1   : > { %v903_v5 = vmul.f32 0.00390625, %v820_v3  ;;  %v904_v26 = vmul.f32 0.00390625, %v823_v4  ;;  %v1001_v16 = vmul.f32 %v8694_v12, %v8694_v12  ;;  %v1002_v8 = vmul.f32 %v8698_v57, %v8698_v57 }
  0xc2   : > { %1064 = vadd.xlane.f32.xlu0 %v1063_v10  ;;  %1061 = vadd.xlane.f32.xlu1 %v1060_v0  ;;  %v1003_v20 = vmul.f32 %v8702_v19, %v8702_v19  ;;  %v1004_v13 = vmul.f32 %v8706_v44, %v8706_v44  ;;  %v13755_v4 = vunpack.c.h.bf16 %v8380_v31 }
  0xc3   : > { %v8718_v21 = vsub.f32 %v745_v25, %v903_v5  ;;  %v8722_v37 = vsub.f32 %v746_v27, %v903_v5  ;;  %v8726_v48 = vsub.f32 %v747_v28, %v904_v26  ;;  %v8730_v60 = vsub.f32 %v748_v29, %v904_v26 }
  0xc4   : > { %v826_v9 = vpop.xlane.xlu0 %825  ;;  %v1069_v2 = vadd.f32 %v1002_v8, %v1001_v16  ;;  %v829_v10 = vpop.xlane.xlu1 %828  ;;  %v1072_v27 = vadd.f32 %v1004_v13, %v1003_v20  ;;  %v13756_v13 = vunpack.c.l.bf16 %v8397_v38 }
  0xc5   : > { %v905_v11 = vmul.f32 0.00390625, %v826_v9  ;;  %v906_v7 = vmul.f32 0.00390625, %v829_v10  ;;  %v1005_v25 = vmul.f32 %v8718_v21, %v8718_v21  ;;  %v1006_v22 = vmul.f32 %v8722_v37, %v8722_v37 }
  0xc6   : > { %1067 = vadd.xlane.f32.xlu1 %v1066_v17  ;;  %1070 = vadd.xlane.f32.xlu0 %v1069_v2  ;;  %v1007_v28 = vmul.f32 %v8726_v48, %v8726_v48  ;;  %v1008_v23 = vmul.f32 %v8730_v60, %v8730_v60  ;;  %v13757_v2 = vunpack.c.h.bf16 %v8397_v38 }
  0xc7   : > { %v8742_v29 = vsub.f32 %v749_v32, %v905_v11  ;;  %v8746_v3 = vsub.f32 %v750_v33, %v905_v11  ;;  %v8750_v0 = vsub.f32 %v751_v36, %v906_v7  ;;  %v8754_v5 = vsub.f32 %v13755_v4, %v906_v7 }
  0xc8   : > { %v832_v26 = vpop.xlane.xlu0 %831  ;;  %v1075_v16 = vadd.f32 %v1006_v22, %v1005_v25  ;;  %v835_v8 = vpop.xlane.xlu1 %834  ;;  %v1078_v33 = vadd.f32 %v1008_v23, %v1007_v28  ;;  %v13758_v11 = vunpack.c.l.bf16 %v8402_v39  ;;  %v13759_v25 = vunpack.c.h.bf16 %v8402_v39 }
  0xc9   : > { %v907_v17 = vmul.f32 0.00390625, %v832_v26  ;;  %v908_v20 = vmul.f32 0.00390625, %v835_v8  ;;  %v1009_v32 = vmul.f32 %v8742_v29, %v8742_v29  ;;  %v1010_v30 = vmul.f32 %v8746_v3, %v8746_v3 }
  0xca   : > { %1073 = vadd.xlane.f32.xlu1 %v1072_v27  ;;  %1076 = vadd.xlane.f32.xlu0 %v1075_v16  ;;  %v1011_v36 = vmul.f32 %v8750_v0, %v8750_v0  ;;  %v1012_v31 = vmul.f32 %v8754_v5, %v8754_v5 }
  0xcb   : > { %v8766_v9 = vsub.f32 %v13756_v13, %v907_v17  ;;  %v8770_v10 = vsub.f32 %v13757_v2, %v907_v17  ;;  %v8774_v7 = vsub.f32 %v13758_v11, %v908_v20  ;;  %v8778_v22 = vsub.f32 %v13759_v25, %v908_v20 }
  0xcc   : > { %v838_v27 = vpop.xlane.xlu0 %837  ;;  %v1081_v28 = vadd.f32 %v1010_v30, %v1009_v32  ;;  %v841_v23 = vpop.xlane.xlu1 %840  ;;  %v1084_v8 = vadd.f32 %v1012_v31, %v1011_v36  ;;  %v13760_v20 = vunpack.c.l.bf16 %v8419_v46  ;;  %v13761_v30 = vunpack.c.h.bf16 %v8419_v46 }
  0xcd   : > { %v909_v4 = vmul.f32 0.00390625, %v838_v27  ;;  %v910_v26 = vmul.f32 0.00390625, %v841_v23  ;;  %v1013_v16 = vmul.f32 %v8766_v9, %v8766_v9  ;;  %v1014_v38 = vmul.f32 %v8770_v10, %v8770_v10 }
  0xce   : > { %1079 = vadd.xlane.f32.xlu1 %v1078_v33  ;;  %1082 = vadd.xlane.f32.xlu0 %v1081_v28  ;;  %v1015_v17 = vmul.f32 %v8774_v7, %v8774_v7  ;;  %v1016_v39 = vmul.f32 %v8778_v22, %v8778_v22  ;;  %v13762_v2 = vunpack.c.l.bf16 %v8424_v47  ;;  %v13764_v33 = vunpack.c.h.bf16 %v8424_v47 }
  0xcf   : > { %v8790_v32 = vsub.f32 %v13760_v20, %v909_v4  ;;  %v8794_v13 = vsub.f32 %v13761_v30, %v909_v4  ;;  %v1087_v25 = vadd.f32 %v1014_v38, %v1013_v16  ;;  %v13767_v38 = vunpack.c.h.bf16 %v8441_v54 }
  0xd0   : > { %v8798_v11 = vsub.f32 %v13762_v2, %v910_v26  ;;  %v8802_v36 = vsub.f32 %v13764_v33, %v910_v26  ;;  %v844_v31 = vpop.xlane.xlu0 %843  ;;  %v847_v27 = vpop.xlane.xlu1 %846  ;;  %v1090_v4 = vadd.f32 %v1016_v39, %v1015_v17  ;;  %v13766_v26 = vunpack.c.l.bf16 %v8441_v54 }
  0xd1   : > { %v911_v28 = vmul.f32 0.00390625, %v844_v31  ;;  %v912_v23 = vmul.f32 0.00390625, %v847_v27  ;;  %v1017_v20 = vmul.f32 %v8790_v32, %v8790_v32  ;;  %v1018_v46 = vmul.f32 %v8794_v13, %v8794_v13 }
  0xd2   : > { %13763 = vst [vmem:[#allocation7_spill] sm:$0xff] %v8798_v11  ;;  %13765 = vst [vmem:[#allocation8_spill] sm:$0xff] %v8802_v36  ;;  %1085 = vadd.xlane.f32.xlu1 %v1084_v8  ;;  %1088 = vadd.xlane.f32.xlu0 %v1087_v25  ;;  %v1019_v30 = vmul.f32 %v8798_v11, %v8798_v11  ;;  %v1020_v47 = vmul.f32 %v8802_v36, %v8802_v36  ;;  %v13768_v33 = vunpack.c.l.bf16 %v8446_v55 }
  0xd3   : > { %v8814_v16 = vsub.f32 %v13766_v26, %v911_v28  ;;  %v8818_v2 = vsub.f32 %v13767_v38, %v911_v28  ;;  %v13770_v8 = vunpack.c.h.bf16 %v8446_v55  ;;  %v1093_v25 = vadd.f32 %v1018_v46, %v1017_v20 }
  0xd4   : > { %v8822_v31 = vsub.f32 %v13768_v33, %v912_v23  ;;  %v850_v39 = vpop.xlane.xlu0 %849  ;;  %v853_v27 = vpop.xlane.xlu1 %852  ;;  %v1096_v28 = vadd.f32 %v1020_v47, %v1019_v30  ;;  %v13773_v46 = vunpack.c.h.bf16 %v8463_v62 }
  0xd5   : > { %v8826_v17 = vsub.f32 %v13770_v8, %v912_v23  ;;  %v913_v36 = vmul.f32 0.00390625, %v850_v39  ;;  %v914_v11 = vmul.f32 0.00390625, %v853_v27  ;;  %v1021_v26 = vmul.f32 %v8814_v16, %v8814_v16 }
  0xd6   : > { %13769 = vst [vmem:[#allocation9_spill] sm:$0xff] %v8822_v31  ;;  %v1022_v54 = vmul.f32 %v8818_v2, %v8818_v2  ;;  %1091 = vadd.xlane.f32.xlu1 %v1090_v4  ;;  %1094 = vadd.xlane.f32.xlu0 %v1093_v25  ;;  %v1023_v38 = vmul.f32 %v8822_v31, %v8822_v31  ;;  %v13772_v23 = vunpack.c.l.bf16 %v8463_v62  ;;  %v13774_v8 = vunpack.c.l.bf16 %v8468_v63 }
  0xd7   : > { %13771 = vst [vmem:[#allocation10_spill] sm:$0xff] %v8826_v17  ;;  %v1024_v55 = vmul.f32 %v8826_v17, %v8826_v17  ;;  %v8842_v33 = vsub.f32 %v13773_v46, %v913_v36  ;;  %v13776_v4 = vunpack.c.h.bf16 %v8468_v63 }
  0xd8   : > { %v8838_v20 = vsub.f32 %v13772_v23, %v913_v36  ;;  %v8846_v39 = vsub.f32 %v13774_v8, %v914_v11  ;;  %v856_v47 = vpop.xlane.xlu0 %855  ;;  %v1099_v25 = vadd.f32 %v1022_v54, %v1021_v26  ;;  %v859_v27 = vpop.xlane.xlu1 %858  ;;  %v13779_v54 = vunpack.c.h.bf16 %v8485_v34 }
  0xd9   : > { %v8850_v30 = vsub.f32 %v13776_v4, %v914_v11  ;;  %v915_v17 = vmul.f32 0.00390625, %v856_v47  ;;  %v916_v31 = vmul.f32 0.00390625, %v859_v27  ;;  %v1026_v62 = vmul.f32 %v8842_v33, %v8842_v33 }
  0xda   : > { %13775 = vst [vmem:[#allocation11_spill] sm:$0xff] %v8846_v39  ;;  %v1025_v23 = vmul.f32 %v8838_v20, %v8838_v20  ;;  %1097 = vadd.xlane.f32.xlu1 %v1096_v28  ;;  %1100 = vadd.xlane.f32.xlu0 %v1099_v25  ;;  %v1102_v36 = vadd.f32 %v1024_v55, %v1023_v38  ;;  %v13778_v11 = vunpack.c.l.bf16 %v8485_v34  ;;  %v13780_v4 = vunpack.c.l.bf16 %v8490_v35 }
  0xdb   : > { %13777 = vst [vmem:[#allocation12_spill] sm:$0xff] %v8850_v30  ;;  %v1027_v46 = vmul.f32 %v8846_v39, %v8846_v39  ;;  %v1028_v63 = vmul.f32 %v8850_v30, %v8850_v30  ;;  %v8866_v8 = vsub.f32 %v13779_v54, %v915_v17  ;;  %v13782_v28 = vunpack.c.h.bf16 %v8490_v35 }
  0xdc   : > { %v8862_v26 = vsub.f32 %v13778_v11, %v915_v17  ;;  %v8870_v47 = vsub.f32 %v13780_v4, %v916_v31  ;;  %v862_v55 = vpop.xlane.xlu0 %861  ;;  %v1105_v25 = vadd.f32 %v1026_v62, %v1025_v23  ;;  %v865_v27 = vpop.xlane.xlu1 %864  ;;  %v13785_v62 = vunpack.c.h.bf16 %v8507_v61 }
  0xdd   : > { %v8874_v38 = vsub.f32 %v13782_v28, %v916_v31  ;;  %v917_v30 = vmul.f32 0.00390625, %v862_v55  ;;  %v918_v39 = vmul.f32 0.00390625, %v865_v27  ;;  %v1030_v34 = vmul.f32 %v8866_v8, %v8866_v8 }
  0xde   : > { %13781 = vst [vmem:[#allocation13_spill] sm:$0xff] %v8870_v47  ;;  %v1029_v11 = vmul.f32 %v8862_v26, %v8862_v26  ;;  %1103 = vadd.xlane.f32.xlu1 %v1102_v36  ;;  %1106 = vadd.xlane.f32.xlu0 %v1105_v25  ;;  %v1108_v17 = vadd.f32 %v1028_v63, %v1027_v46  ;;  %v13784_v31 = vunpack.c.l.bf16 %v8507_v61  ;;  %v13786_v28 = vunpack.c.l.bf16 %v8512_v18 }
  0xdf   : > { %13783 = vst [vmem:[#allocation14_spill] sm:$0xff] %v8874_v38  ;;  %v1031_v54 = vmul.f32 %v8870_v47, %v8870_v47  ;;  %v1032_v35 = vmul.f32 %v8874_v38, %v8874_v38  ;;  %v8890_v4 = vsub.f32 %v13785_v62, %v917_v30  ;;  %v13788_v36 = vunpack.c.h.bf16 %v8512_v18 }
  0xe0   : > { %v8886_v23 = vsub.f32 %v13784_v31, %v917_v30  ;;  %v8894_v55 = vsub.f32 %v13786_v28, %v918_v39  ;;  %v868_v63 = vpop.xlane.xlu0 %867  ;;  %v1111_v25 = vadd.f32 %v1030_v34, %v1029_v11  ;;  %v871_v27 = vpop.xlane.xlu1 %870  ;;  %v13791_v34 = vunpack.c.h.bf16 %v8529_v59 }
  0xe1   : > { %v8898_v46 = vsub.f32 %v13788_v36, %v918_v39  ;;  %v919_v38 = vmul.f32 0.00390625, %v868_v63  ;;  %v920_v47 = vmul.f32 0.00390625, %v871_v27  ;;  %v1034_v61 = vmul.f32 %v8890_v4, %v8890_v4 }
  0xe2   : > { %13787 = vst [vmem:[#allocation15_spill] sm:$0xff] %v8894_v55  ;;  %v1033_v31 = vmul.f32 %v8886_v23, %v8886_v23  ;;  %1109 = vadd.xlane.f32.xlu1 %v1108_v17  ;;  %1112 = vadd.xlane.f32.xlu0 %v1111_v25  ;;  %v1114_v30 = vadd.f32 %v1032_v35, %v1031_v54  ;;  %v13790_v39 = vunpack.c.l.bf16 %v8529_v59  ;;  %v13792_v36 = vunpack.c.l.bf16 %v8534_v40 }
  0xe3   : > { %13789 = vst [vmem:[#allocation16_spill] sm:$0xff] %v8898_v46  ;;  %v1035_v62 = vmul.f32 %v8894_v55, %v8894_v55  ;;  %v1036_v18 = vmul.f32 %v8898_v46, %v8898_v46  ;;  %v8914_v28 = vsub.f32 %v13791_v34, %v919_v38  ;;  %v13794_v17 = vunpack.c.h.bf16 %v8534_v40 }
  0xe4   : > { %v8910_v11 = vsub.f32 %v13790_v39, %v919_v38  ;;  %v8918_v63 = vsub.f32 %v13792_v36, %v920_v47  ;;  %v874_v35 = vpop.xlane.xlu0 %873  ;;  %v1117_v25 = vadd.f32 %v1034_v61, %v1033_v31  ;;  %v877_v27 = vpop.xlane.xlu1 %876  ;;  %v13797_v61 = vunpack.c.h.bf16 %v8551_v53 }
  0xe5   : > { %v8922_v54 = vsub.f32 %v13794_v17, %v920_v47  ;;  %v921_v46 = vmul.f32 0.00390625, %v874_v35  ;;  %v922_v55 = vmul.f32 0.00390625, %v877_v27  ;;  %v1038_v59 = vmul.f32 %v8914_v28, %v8914_v28 }
  0xe6   : > { %13793 = vst [vmem:[#allocation17_spill] sm:$0xff] %v8918_v63  ;;  %v1037_v39 = vmul.f32 %v8910_v11, %v8910_v11  ;;  %1115 = vadd.xlane.f32.xlu1 %v1114_v30  ;;  %1118 = vadd.xlane.f32.xlu0 %v1117_v25  ;;  %v1120_v38 = vadd.f32 %v1036_v18, %v1035_v62  ;;  %v13796_v47 = vunpack.c.l.bf16 %v8551_v53  ;;  %v13798_v17 = vunpack.c.l.bf16 %v8556_v15 }
  0xe7   : > { %13795 = vst [vmem:[#allocation18_spill] sm:$0xff] %v8922_v54  ;;  %v1039_v34 = vmul.f32 %v8918_v63, %v8918_v63  ;;  %v1040_v40 = vmul.f32 %v8922_v54, %v8922_v54  ;;  %v8938_v36 = vsub.f32 %v13797_v61, %v921_v46  ;;  %v13800_v30 = vunpack.c.h.bf16 %v8556_v15 }
  0xe8   : > { %v8934_v31 = vsub.f32 %v13796_v47, %v921_v46  ;;  %v8942_v35 = vsub.f32 %v13798_v17, %v922_v55  ;;  %v880_v18 = vpop.xlane.xlu0 %879  ;;  %v1123_v25 = vadd.f32 %v1038_v59, %v1037_v39  ;;  %v883_v27 = vpop.xlane.xlu1 %882  ;;  %v13803_v59 = vunpack.c.h.bf16 %v8573_v49 }
  0xe9   : > { %v8946_v62 = vsub.f32 %v13800_v30, %v922_v55  ;;  %v923_v54 = vmul.f32 0.00390625, %v880_v18  ;;  %v924_v63 = vmul.f32 0.00390625, %v883_v27  ;;  %v1042_v53 = vmul.f32 %v8938_v36, %v8938_v36 }
  0xea   : > { %13799 = vst [vmem:[#allocation19_spill] sm:$0xff] %v8942_v35  ;;  %v1041_v47 = vmul.f32 %v8934_v31, %v8934_v31  ;;  %1121 = vadd.xlane.f32.xlu1 %v1120_v38  ;;  %1124 = vadd.xlane.f32.xlu0 %v1123_v25  ;;  %v1126_v46 = vadd.f32 %v1040_v40, %v1039_v34  ;;  %v13802_v55 = vunpack.c.l.bf16 %v8573_v49  ;;  %v13804_v30 = vunpack.c.l.bf16 %v8578_v56 }
  0xeb   : > { %13801 = vst [vmem:[#allocation20_spill] sm:$0xff] %v8946_v62  ;;  %v1043_v61 = vmul.f32 %v8942_v35, %v8942_v35  ;;  %v1044_v15 = vmul.f32 %v8946_v62, %v8946_v62  ;;  %v8962_v17 = vsub.f32 %v13803_v59, %v923_v54  ;;  %v13806_v38 = vunpack.c.h.bf16 %v8578_v56 }
  0xec   : > { %v8958_v39 = vsub.f32 %v13802_v55, %v923_v54  ;;  %v8966_v18 = vsub.f32 %v13804_v30, %v924_v63  ;;  %v886_v40 = vpop.xlane.xlu0 %885  ;;  %v1129_v25 = vadd.f32 %v1042_v53, %v1041_v47  ;;  %v889_v27 = vpop.xlane.xlu1 %888  ;;  %v13809_v53 = vunpack.c.h.bf16 %v8595_v45 }
  0xed   : > { %v8970_v34 = vsub.f32 %v13806_v38, %v924_v63  ;;  %v925_v62 = vmul.f32 0.00390625, %v886_v40  ;;  %v926_v35 = vmul.f32 0.00390625, %v889_v27  ;;  %v1046_v49 = vmul.f32 %v8962_v17, %v8962_v17 }
  0xee   : > { %13805 = vst [vmem:[#allocation21_spill] sm:$0xff] %v8966_v18  ;;  %v1045_v55 = vmul.f32 %v8958_v39, %v8958_v39  ;;  %1127 = vadd.xlane.f32.xlu1 %v1126_v46  ;;  %1130 = vadd.xlane.f32.xlu0 %v1129_v25  ;;  %v1132_v54 = vadd.f32 %v1044_v15, %v1043_v61  ;;  %v13808_v63 = vunpack.c.l.bf16 %v8595_v45  ;;  %v13810_v38 = vunpack.c.l.bf16 %v8600_v14 }
  0xef   : > { %13807 = vst [vmem:[#allocation22_spill] sm:$0xff] %v8970_v34  ;;  %v1047_v59 = vmul.f32 %v8966_v18, %v8966_v18  ;;  %v1048_v56 = vmul.f32 %v8970_v34, %v8970_v34  ;;  %v8986_v30 = vsub.f32 %v13809_v53, %v925_v62  ;;  %v13811_v46 = vunpack.c.h.bf16 %v8600_v14 }
  0xf0   : > { %v8982_v47 = vsub.f32 %v13808_v63, %v925_v62  ;;  %v8990_v40 = vsub.f32 %v13810_v38, %v926_v35  ;;  %v892_v15 = vpop.xlane.xlu0 %891  ;;  %v1135_v25 = vadd.f32 %v1046_v49, %v1045_v55  ;;  %v895_v27 = vpop.xlane.xlu1 %894  ;;  %v13815_v49 = vunpack.c.h.bf16 %v8617_v43 }
  0xf1   : > { %v8994_v61 = vsub.f32 %v13811_v46, %v926_v35  ;;  %v927_v34 = vmul.f32 0.00390625, %v892_v15  ;;  %v928_v18 = vmul.f32 0.00390625, %v895_v27  ;;  %v1050_v45 = vmul.f32 %v8986_v30, %v8986_v30 }
  0xf2   : > { %v1049_v63 = vmul.f32 %v8982_v47, %v8982_v47  ;;  %1133 = vadd.xlane.f32.xlu1 %v1132_v54  ;;  %1136 = vadd.xlane.f32.xlu0 %v1135_v25  ;;  %v1138_v62 = vadd.f32 %v1048_v56, %v1047_v59  ;;  %v1051_v53 = vmul.f32 %v8990_v40, %v8990_v40  ;;  %v13813_v35 = vunpack.c.l.bf16 %v8617_v43 }
  0xf3   : > { %13812 = vst [vmem:[#allocation23_spill] sm:$0xff] %v8994_v61  ;;  %v1052_v14 = vmul.f32 %v8994_v61, %v8994_v61  ;;  %v9010_v38 = vsub.f32 %v13815_v49, %v927_v34  ;;  %v13817_v46 = vunpack.c.l.bf16 %v8622_v42  ;;  %v13819_v54 = vunpack.c.h.bf16 %v8622_v42 }
  0xf4   : > { %v9006_v55 = vsub.f32 %v13813_v35, %v927_v34  ;;  %v1141_v56 = vadd.f32 %v1050_v45, %v1049_v63 }
  0xf5   : > { %13816 = vst [vmem:[#allocation25_spill] sm:$0xff] %v9010_v38  ;;  %v9014_v15 = vsub.f32 %v13817_v46, %v928_v18  ;;  %v9018_v59 = vsub.f32 %v13819_v54, %v928_v18  ;;  %v1054_v27 = vmul.f32 %v9010_v38, %v9010_v38  ;;  %v1144_v43 = vadd.f32 %v1052_v14, %v1051_v53 }
  0xf6   : > { %13814 = vst [vmem:[#allocation24_spill] sm:$0xff] %v9006_v55  ;;  %v1053_v25 = vmul.f32 %v9006_v55, %v9006_v55  ;;  %1139 = vadd.xlane.f32.xlu1 %v1138_v62  ;;  %1142 = vadd.xlane.f32.xlu0 %v1141_v56  ;;  %v1314_v46 = vlaneseq }
  0xf7   : > { %13818 = vst [vmem:[#allocation26_spill] sm:$0xff] %v9014_v15  ;;  %13820 = vst [vmem:[#allocation27_spill] sm:$0xff] %v9018_v59  ;;  %v1055_v34 = vmul.f32 %v9014_v15, %v9014_v15  ;;  %v1056_v35 = vmul.f32 %v9018_v59, %v9018_v59 }
  0xf8   : > { %v1147_v49 = vadd.f32 %v1054_v27, %v1053_v25  ;;  %v1315_v15 = vshrl.u32 %v1314_v46, 7  ;;  %v7623_v46 = vld [vmem:[%s13821_s16 + $0x1] ss:$2 sm:$0x3] }
  0xf9   : > { %v1150_v42 = vadd.f32 %v1056_v35, %v1055_v34 }
  0xfa   : > { %1145 = vadd.xlane.f32.xlu1 %v1144_v43  ;;  %1148 = vadd.xlane.f32.xlu0 %v1147_v49  ;;  %v1316_v35 = vsub.s32 0, %v1315_v15 }
  0xfe   : > { %1151 = vadd.xlane.f32.xlu1 %v1150_v42 }
 0x147   : > { %v1059_v18 = vpop.xlane.xlu0 %1058 }
 0x148   : > { %v1153_v63 = vmul.f32 0.00390625, %v1059_v18  ;;  %v797_v18 = vld [vmem:[%s13821_s16] ss:$2 sm:$0x3] }
 0x14a   : > { %v1185_v45 = vadd.f32 1e-05, %v1153_v63  ;;  %v1320_v63 = vsub.s32 1, %v1315_v15 }
 0x14b   : > { %v1062_v54 = vpop.xlane.xlu1 %1061  ;;  %v1065_v38 = vpop.xlane.xlu0 %1064 }
 0x14c   : > { %7741 = vrsqrt.f32 %v1185_v45  ;;  %v1154_v62 = vmul.f32 0.00390625, %v1062_v54  ;;  %v1155_v53 = vmul.f32 0.00390625, %v1065_v38  ;;  %v9034_v54 = vrot.slane %v797_v18, %v1316_v35 }
 0x14e   : > { %v1186_v14 = vadd.f32 1e-05, %v1154_v62  ;;  %v1187_v56 = vadd.f32 1e-05, %v1155_v53 }
 0x14f   : > { %v1068_v55 = vpop.xlane.xlu1 %1067  ;;  %v1071_v61 = vpop.xlane.xlu0 %1070 }
 0x150   : > { %7743 = vrsqrt.f32 %v1186_v14  ;;  %v1156_v25 = vmul.f32 0.00390625, %v1068_v55  ;;  %v1157_v27 = vmul.f32 0.00390625, %v1071_v61  ;;  %v9036_v14 = vrot.slane %v797_v18, %v1320_v63 }
 0x151   : > { %7745 = vrsqrt.f32 %v1187_v56 }
 0x152   : > { %v1188_v43 = vadd.f32 1e-05, %v1156_v25  ;;  %v1189_v34 = vadd.f32 1e-05, %v1157_v27  ;;  %v9038_v27 = vrot.slane %v7623_v46, %v1316_v35 }
 0x153   : > { %v1074_v49 = vpop.xlane.xlu1 %1073  ;;  %v1077_v42 = vpop.xlane.xlu0 %1076 }
 0x154   : > { %7747 = vrsqrt.f32 %v1188_v43  ;;  %v1158_v38 = vmul.f32 0.00390625, %v1074_v49  ;;  %v1159_v45 = vmul.f32 0.00390625, %v1077_v42  ;;  %v9040_v43 = vrot.slane %v7623_v46, %v1320_v63 }
 0x155   : > { %7749 = vrsqrt.f32 %v1189_v34 }
 0x156   : > { %v1190_v61 = vadd.f32 1e-05, %v1158_v38  ;;  %v1191_v55 = vadd.f32 1e-05, %v1159_v45 }
 0x157   : > { %v1080_v62 = vpop.xlane.xlu1 %1079  ;;  %v1083_v53 = vpop.xlane.xlu0 %1082 }
 0x158   : > { %7751 = vrsqrt.f32 %v1190_v61  ;;  %v1160_v56 = vmul.f32 0.00390625, %v1080_v62  ;;  %v1161_v25 = vmul.f32 0.00390625, %v1083_v53 }
 0x159   : > { %v7742_v15 = vpop.eup %7741  ;;  %7753 = vrsqrt.f32 %v1191_v55 }
 0x15a   : > { %v1249_v49 = vmul.f32 %v7742_v15, %v8646_v50  ;;  %v1250_v34 = vmul.f32 %v7742_v15, %v8650_v58  ;;  %v1192_v42 = vadd.f32 1e-05, %v1160_v56  ;;  %v1193_v38 = vadd.f32 1e-05, %v1161_v25 }
 0x15b   : > { %v1086_v45 = vpop.xlane.xlu1 %1085  ;;  %v1089_v59 = vpop.xlane.xlu0 %1088 }
 0x15c   : > { %v1324_v18 = vmul.f32 %v9034_v54, %v1249_v49  ;;  %v1325_v61 = vmul.f32 %v9036_v14, %v1250_v34  ;;  %7755 = vrsqrt.f32 %v1192_v42  ;;  %v1162_v62 = vmul.f32 0.00390625, %v1086_v45 }
 0x15d   : > { %v7744_v53 = vpop.eup %7743  ;;  %7757 = vrsqrt.f32 %v1193_v38  ;;  %v1163_v35 = vmul.f32 0.00390625, %v1089_v59 }
 0x15e   : > { %v7746_v63 = vpop.eup %7745  ;;  %v1399_v46 = vadd.f32 %v9038_v27, %v1324_v18  ;;  %v1400_v50 = vadd.f32 %v9040_v43, %v1325_v61  ;;  %v1251_v58 = vmul.f32 %v7744_v53, %v8670_v1  ;;  %v1252_v55 = vmul.f32 %v7744_v53, %v8674_v6 }
 0x15f   : > { %v1253_v56 = vmul.f32 %v7746_v63, %v8654_v51  ;;  %v1254_v25 = vmul.f32 %v7746_v63, %v8658_v52  ;;  %v1194_v15 = vadd.f32 1e-05, %v1162_v62  ;;  %v1092_v49 = vpop.xlane.xlu1 %1091  ;;  %v1095_v34 = vpop.xlane.xlu0 %1094  ;;  %v1195_v38 = vadd.f32 1e-05, %v1163_v35 }
 0x160   : > { %1463 = vst [vmem:[#allocation2 + $0xb0] sm:$0xff] %v1399_v46  ;;  %1464 = vst [vmem:[#allocation2 + $0x1b0] sm:$0xff] %v1400_v50  ;;  %v1326_v59 = vmul.f32 %v9034_v54, %v1251_v58  ;;  %v1327_v42 = vmul.f32 %v9036_v14, %v1252_v55  ;;  %v1164_v45 = vmul.f32 0.00390625, %v1092_v49  ;;  %v1165_v51 = vmul.f32 0.00390625, %v1095_v34 }
 0x161   : > { %v7748_v18 = vpop.eup %7747  ;;  %v1328_v1 = vmul.f32 %v9034_v54, %v1253_v56  ;;  %v1329_v6 = vmul.f32 %v9036_v14, %v1254_v25  ;;  %7759 = vrsqrt.f32 %v1194_v15 }
 0x162   : > { %v7750_v61 = vpop.eup %7749  ;;  %v1401_v52 = vadd.f32 %v9038_v27, %v1326_v59  ;;  %v1402_v62 = vadd.f32 %v9040_v43, %v1327_v42  ;;  %v1255_v53 = vmul.f32 %v7748_v18, %v8678_v41  ;;  %v1256_v63 = vmul.f32 %v7748_v18, %v8682_v24 }
 0x163   : > { %v1403_v46 = vadd.f32 %v9038_v27, %v1328_v1  ;;  %v1404_v35 = vadd.f32 %v9040_v43, %v1329_v6  ;;  %v1257_v50 = vmul.f32 %v7750_v61, %v8694_v12  ;;  %v1258_v58 = vmul.f32 %v7750_v61, %v8698_v57  ;;  %v1098_v55 = vpop.xlane.xlu1 %1097  ;;  %v1101_v56 = vpop.xlane.xlu0 %1100 }
 0x164   : > { %1465 = vst [vmem:[#allocation2 + $0xd8] sm:$0xff] %v1401_v52  ;;  %1466 = vst [vmem:[#allocation2 + $0x18] sm:$0xff] %v1402_v62  ;;  %v1330_v25 = vmul.f32 %v9034_v54, %v1255_v53  ;;  %v1331_v15 = vmul.f32 %v9036_v14, %v1256_v63  ;;  %7761 = vrsqrt.f32 %v1195_v38  ;;  %v1196_v41 = vadd.f32 1e-05, %v1164_v45 }
 0x165   : > { %v7752_v49 = vpop.eup %7751  ;;  %1467 = vst [vmem:[#allocation2 + $0x50] sm:$0xff] %v1403_v46  ;;  %1468 = vst [vmem:[#allocation2 + $0x168] sm:$0xff] %v1404_v35  ;;  %v1332_v24 = vmul.f32 %v9034_v54, %v1257_v50  ;;  %v1333_v34 = vmul.f32 %v9036_v14, %v1258_v58  ;;  %v1197_v12 = vadd.f32 1e-05, %v1165_v51  ;;  %v1166_v59 = vmul.f32 0.00390625, %v1098_v55 }
 0x166   : > { %v7754_v57 = vpop.eup %7753  ;;  %v1405_v42 = vadd.f32 %v9038_v27, %v1330_v25  ;;  %v1406_v18 = vadd.f32 %v9040_v43, %v1331_v15  ;;  %v1259_v1 = vmul.f32 %v7752_v49, %v8702_v19  ;;  %v1260_v6 = vmul.f32 %v7752_v49, %v8706_v44 }
 0x167   : > { %v1407_v38 = vadd.f32 %v9038_v27, %v1332_v24  ;;  %v1408_v45 = vadd.f32 %v9040_v43, %v1333_v34  ;;  %v1261_v61 = vmul.f32 %v7754_v57, %v8718_v21  ;;  %v1262_v52 = vmul.f32 %v7754_v57, %v8722_v37  ;;  %v1104_v62 = vpop.xlane.xlu1 %1103  ;;  %v1107_v51 = vpop.xlane.xlu0 %1106 }
 0x168   : > { %1469 = vst [vmem:[#allocation2 + $0x130] sm:$0xff] %v1405_v42  ;;  %1470 = vst [vmem:[#allocation2 + $0x48] sm:$0xff] %v1406_v18  ;;  %v1334_v53 = vmul.f32 %v9034_v54, %v1259_v1  ;;  %v1335_v63 = vmul.f32 %v9036_v14, %v1260_v6  ;;  %7763 = vrsqrt.f32 %v1196_v41  ;;  %v1198_v19 = vadd.f32 1e-05, %v1166_v59 }
 0x169   : > { %v7756_v46 = vpop.eup %7755  ;;  %1471 = vst [vmem:[#allocation2 + $0x180] sm:$0xff] %v1407_v38  ;;  %1472 = vst [vmem:[#allocation2 + $0x110] sm:$0xff] %v1408_v45  ;;  %v1336_v44 = vmul.f32 %v9034_v54, %v1261_v61  ;;  %v1337_v35 = vmul.f32 %v9036_v14, %v1262_v52  ;;  %7765 = vrsqrt.f32 %v1197_v12  ;;  %v1167_v21 = vmul.f32 0.00390625, %v1101_v56 }
 0x16a   : > { %v7758_v37 = vpop.eup %7757  ;;  %v1409_v50 = vadd.f32 %v9038_v27, %v1334_v53  ;;  %v1410_v58 = vadd.f32 %v9040_v43, %v1335_v63  ;;  %v1263_v55 = vmul.f32 %v7756_v46, %v8726_v48  ;;  %v1264_v25 = vmul.f32 %v7756_v46, %v8730_v60 }
 0x16b   : > { %v1411_v15 = vadd.f32 %v9038_v27, %v1336_v44  ;;  %v1412_v41 = vadd.f32 %v9040_v43, %v1337_v35  ;;  %v1265_v49 = vmul.f32 %v7758_v37, %v8742_v29  ;;  %v1266_v24 = vmul.f32 %v7758_v37, %v8746_v3  ;;  %v1110_v34 = vpop.xlane.xlu1 %1109  ;;  %v1113_v12 = vpop.xlane.xlu0 %1112 }
 0x16c   : > { %1473 = vst [vmem:[#allocation2 + $0x118] sm:$0xff] %v1409_v50  ;;  %1474 = vst [vmem:[#allocation2 + $0x98] sm:$0xff] %v1410_v58  ;;  %v1338_v56 = vmul.f32 %v9034_v54, %v1263_v55  ;;  %v1339_v59 = vmul.f32 %v9036_v14, %v1264_v25  ;;  %7767 = vrsqrt.f32 %v1198_v19  ;;  %v1199_v48 = vadd.f32 1e-05, %v1167_v21 }
 0x16d   : > { %1475 = vst [vmem:[#allocation2 + $0x120] sm:$0xff] %v1411_v15  ;;  %1476 = vst [vmem:[#allocation2 + $0x150] sm:$0xff] %v1412_v41  ;;  %v1340_v60 = vmul.f32 %v9034_v54, %v1265_v49  ;;  %v1341_v57 = vmul.f32 %v9036_v14, %v1266_v24  ;;  %v1168_v42 = vmul.f32 0.00390625, %v1104_v62  ;;  %v1169_v29 = vmul.f32 0.00390625, %v1107_v51 }
 0x16e   : > { %v7760_v18 = vpop.eup %7759  ;;  %v1413_v3 = vadd.f32 %v9038_v27, %v1338_v56  ;;  %v1414_v1 = vadd.f32 %v9040_v43, %v1339_v59  ;;  %7769 = vrsqrt.f32 %v1199_v48  ;;  %v1170_v6 = vmul.f32 0.00390625, %v1110_v34 }
 0x16f   : > { %v1415_v38 = vadd.f32 %v9038_v27, %v1340_v60  ;;  %v1416_v45 = vadd.f32 %v9040_v43, %v1341_v57  ;;  %v1267_v61 = vmul.f32 %v7760_v18, %v8750_v0  ;;  %v1268_v52 = vmul.f32 %v7760_v18, %v8754_v5  ;;  %v1116_v53 = vpop.xlane.xlu1 %1115  ;;  %v1119_v63 = vpop.xlane.xlu0 %1118 }
 0x170   : > { %1477 = vst [vmem:[#allocation2 + $0x108] sm:$0xff] %v1413_v3  ;;  %1478 = vst [vmem:[#allocation2 + $0x60] sm:$0xff] %v1414_v1  ;;  %v1200_v62 = vadd.f32 1e-05, %v1168_v42  ;;  %v1201_v51 = vadd.f32 1e-05, %v1169_v29 }
 0x171   : > { %v1202_v19 = vadd.f32 1e-05, %v1170_v6  ;;  %v7762_v46 = vpop.eup %7761  ;;  %1479 = vst [vmem:[#allocation2 + $0xe0] sm:$0xff] %v1415_v38  ;;  %1480 = vst [vmem:[#allocation2 + $0x188] sm:$0xff] %v1416_v45  ;;  %v1342_v44 = vmul.f32 %v9034_v54, %v1267_v61  ;;  %v1343_v35 = vmul.f32 %v9036_v14, %v1268_v52  ;;  %v1171_v21 = vmul.f32 0.00390625, %v1113_v12 }
 0x172   : > { %v1172_v37 = vmul.f32 0.00390625, %v1116_v53  ;;  %v1269_v0 = vmul.f32 %v7762_v46, %v8766_v9  ;;  %v1270_v5 = vmul.f32 %v7762_v46, %v8770_v10  ;;  %7771 = vrsqrt.f32 %v1200_v62 }
 0x173   : > { %v1173_v50 = vmul.f32 0.00390625, %v1119_v63  ;;  %v1417_v58 = vadd.f32 %v9038_v27, %v1342_v44  ;;  %v1418_v55 = vadd.f32 %v9040_v43, %v1343_v35  ;;  %7773 = vrsqrt.f32 %v1201_v51  ;;  %v1122_v15 = vpop.xlane.xlu1 %1121  ;;  %v1125_v41 = vpop.xlane.xlu0 %1124  ;;  %v13822_v63 = vld [vmem:[#allocation7_spill] sm:$0xff]  ;;  %v13823_v51 = vld [vmem:[#allocation8_spill] sm:$0xff] }
 0x174   : > { %v1203_v25 = vadd.f32 1e-05, %v1171_v21  ;;  %v1344_v49 = vmul.f32 %v9034_v54, %v1269_v0  ;;  %v1345_v24 = vmul.f32 %v9036_v14, %v1270_v5  ;;  %7775 = vrsqrt.f32 %v1202_v19 }
 0x175   : > { %v1204_v34 = vadd.f32 1e-05, %v1172_v37  ;;  %v7764_v12 = vpop.eup %7763  ;;  %1481 = vst [vmem:[#allocation2 + $0x138] sm:$0xff] %v1417_v58  ;;  %1482 = vst [vmem:[#allocation2 + $0x140] sm:$0xff] %v1418_v55  ;;  %v1205_v9 = vadd.f32 1e-05, %v1173_v50 }
 0x176   : > { %7777 = vrsqrt.f32 %v1203_v25  ;;  %v1174_v10 = vmul.f32 0.00390625, %v1122_v15  ;;  %v1175_v56 = vmul.f32 0.00390625, %v1125_v41  ;;  %v7766_v59 = vpop.eup %7765  ;;  %v1419_v48 = vadd.f32 %v9038_v27, %v1344_v49 }
 0x177   : > { %v1420_v60 = vadd.f32 %v9040_v43, %v1345_v24  ;;  %v1271_v57 = vmul.f32 %v7764_v12, %v8774_v7  ;;  %v1272_v42 = vmul.f32 %v7764_v12, %v8778_v22  ;;  %v1273_v29 = vmul.f32 %v7766_v59, %v8790_v32  ;;  %v1128_v1 = vpop.xlane.xlu1 %1127  ;;  %v1131_v6 = vpop.xlane.xlu0 %1130 }
 0x178   : > { %v1274_v18 = vmul.f32 %v7766_v59, %v8794_v13  ;;  %7779 = vrsqrt.f32 %v1204_v34  ;;  %v1206_v3 = vadd.f32 1e-05, %v1174_v10  ;;  %1483 = vst [vmem:[#allocation2 + $0x80] sm:$0xff] %v1419_v48  ;;  %v1207_v61 = vadd.f32 1e-05, %v1175_v56 }
 0x179   : > { %1484 = vst [vmem:[#allocation2 + $0x1a8] sm:$0xff] %v1420_v60  ;;  %v1346_v38 = vmul.f32 %v9034_v54, %v1271_v57  ;;  %v1347_v45 = vmul.f32 %v9036_v14, %v1272_v42  ;;  %7781 = vrsqrt.f32 %v1205_v9  ;;  %v7768_v52 = vpop.eup %7767  ;;  %v1348_v7 = vmul.f32 %v9034_v54, %v1273_v29  ;;  %v13824_v57 = vld [vmem:[#allocation9_spill] sm:$0xff]  ;;  %v13825_v29 = vld [vmem:[#allocation10_spill] sm:$0xff] }
 0x17a   : > { %v1349_v22 = vmul.f32 %v9036_v14, %v1274_v18  ;;  %7783 = vrsqrt.f32 %v1206_v3  ;;  %v1176_v32 = vmul.f32 0.00390625, %v1128_v1  ;;  %v1275_v62 = vmul.f32 %v7768_v52, %v13822_v63 }
 0x17b   : > { %v1421_v13 = vadd.f32 %v9038_v27, %v1346_v38  ;;  %v1422_v53 = vadd.f32 %v9040_v43, %v1347_v45  ;;  %v1276_v19 = vmul.f32 %v7768_v52, %v13823_v51  ;;  %v7770_v46 = vpop.eup %7769  ;;  %v1423_v44 = vadd.f32 %v9038_v27, %v1348_v7  ;;  %v1134_v37 = vpop.xlane.xlu1 %1133  ;;  %v13826_v7 = vld [vmem:[#allocation11_spill] sm:$0xff] }
 0x17c   : > { %v1424_v35 = vadd.f32 %v9040_v43, %v1349_v22  ;;  %7785 = vrsqrt.f32 %v1207_v61  ;;  %v1208_v21 = vadd.f32 1e-05, %v1176_v32  ;;  %v1137_v0 = vpop.xlane.xlu0 %1136  ;;  %v1350_v5 = vmul.f32 %v9034_v54, %v1275_v62  ;;  %v13827_v32 = vld [vmem:[#allocation12_spill] sm:$0xff] }
 0x17d   : > { %1485 = vst [vmem:[#allocation2 + $0x1b8] sm:$0xff] %v1421_v13  ;;  %1486 = vst [vmem:[#allocation2 + $0x28] sm:$0xff] %v1422_v53  ;;  %v1351_v50 = vmul.f32 %v9036_v14, %v1276_v19  ;;  %v1277_v58 = vmul.f32 %v7770_v46, %v8814_v16  ;;  %v1278_v55 = vmul.f32 %v7770_v46, %v8818_v2  ;;  %v1177_v25 = vmul.f32 0.00390625, %v1131_v6 }
 0x17e   : > { %1487 = vst [vmem:[#allocation2 + $0x1e8] sm:$0xff] %v1423_v44  ;;  %1488 = vst [vmem:[#allocation2 + $0xf8] sm:$0xff] %v1424_v35  ;;  %7787 = vrsqrt.f32 %v1208_v21  ;;  %v1178_v15 = vmul.f32 0.00390625, %v1134_v37  ;;  %v1179_v41 = vmul.f32 0.00390625, %v1137_v0  ;;  %v1425_v49 = vadd.f32 %v9038_v27, %v1350_v5 }
 0x17f   : > { %v1426_v24 = vadd.f32 %v9040_v43, %v1351_v50  ;;  %v1352_v34 = vmul.f32 %v9034_v54, %v1277_v58  ;;  %v1353_v12 = vmul.f32 %v9036_v14, %v1278_v55  ;;  %v7772_v9 = vpop.eup %7771  ;;  %v1209_v10 = vadd.f32 1e-05, %v1177_v25  ;;  %v1140_v2 = vpop.xlane.xlu1 %1139  ;;  %v13828_v58 = vld [vmem:[#allocation13_spill] sm:$0xff]  ;;  %v13829_v25 = vld [vmem:[#allocation14_spill] sm:$0xff] }
 0x180   : > { %v9130_v56 = vadd.f32 1e-05, %v1178_v15  ;;  %v9132_v16 = vadd.f32 1e-05, %v1179_v41  ;;  %v7774_v59 = vpop.eup %7773  ;;  %1489 = vst [vmem:[#allocation2 + $0x160] sm:$0xff] %v1425_v49  ;;  %v1279_v42 = vmul.f32 %v7772_v9, %v13824_v57  ;;  %v1280_v18 = vmul.f32 %v7772_v9, %v13825_v29 }
 0x181   : > { %1490 = vst [vmem:[#allocation2 + $0x30] sm:$0xff] %v1426_v24  ;;  %v1427_v48 = vadd.f32 %v9038_v27, %v1352_v34  ;;  %v1428_v60 = vadd.f32 %v9040_v43, %v1353_v12  ;;  %v7776_v3 = vpop.eup %7775  ;;  %v1281_v1 = vmul.f32 %v7774_v59, %v8838_v20  ;;  %v1282_v6 = vmul.f32 %v7774_v59, %v8842_v33  ;;  %v1143_v12 = vpop.xlane.xlu0 %1142  ;;  %v13830_v59 = vld [vmem:[#allocation15_spill] sm:$0xff] }
 0x182   : > { %7789 = vrsqrt.f32 %v1209_v10  ;;  %v9140_v38 = vmul.f32 0.00390625, %v1140_v2  ;;  %v1354_v61 = vmul.f32 %v9034_v54, %v1279_v42  ;;  %v1355_v52 = vmul.f32 %v9036_v14, %v1280_v18 }
 0x183   : > { %v7778_v45 = vpop.eup %7777  ;;  %1491 = vst [vmem:[#allocation2 + $0x1e0] sm:$0xff] %v1427_v48  ;;  %1492 = vst [vmem:[#allocation2] sm:$0xff] %v1428_v60  ;;  %v1283_v22 = vmul.f32 %v7776_v3, %v13826_v7  ;;  %v1284_v13 = vmul.f32 %v7776_v3, %v13827_v32  ;;  %v1356_v53 = vmul.f32 %v9034_v54, %v1281_v1  ;;  %v13831_v60 = vld [vmem:[#allocation16_spill] sm:$0xff]  ;;  %v1146_v42 = vpop.xlane.xlu1 %1145  ;;  %7791 = vrsqrt.f32 %v9130_v56 }
 0x184   : > { %v1357_v20 = vmul.f32 %v9036_v14, %v1282_v6  ;;  %v1285_v33 = vmul.f32 %v7778_v45, %v8862_v26  ;;  %v1286_v63 = vmul.f32 %v7778_v45, %v8866_v8  ;;  %v1429_v51 = vadd.f32 %v9038_v27, %v1354_v61 }
 0x185   : > { %v7780_v62 = vpop.eup %7779  ;;  %v1430_v19 = vadd.f32 %v9040_v43, %v1355_v52  ;;  %v1358_v46 = vmul.f32 %v9034_v54, %v1283_v22  ;;  %v1359_v44 = vmul.f32 %v9036_v14, %v1284_v13  ;;  %v1431_v21 = vadd.f32 %v9038_v27, %v1356_v53  ;;  %v13832_v13 = vld [vmem:[#allocation17_spill] sm:$0xff] }
 0x186   : > { %v7782_v35 = vpop.eup %7781  ;;  %v1432_v37 = vadd.f32 %v9040_v43, %v1357_v20  ;;  %v1360_v0 = vmul.f32 %v9034_v54, %v1285_v33  ;;  %v1361_v26 = vmul.f32 %v9036_v14, %v1286_v63  ;;  %1493 = vst [vmem:[#allocation2 + $0xf0] sm:$0xff] %v1429_v51  ;;  %v1287_v55 = vmul.f32 %v7780_v62, %v13828_v58  ;;  %v13833_v20 = vld [vmem:[#allocation18_spill] sm:$0xff] }
 0x187   : > { %v7784_v5 = vpop.eup %7783  ;;  %1494 = vst [vmem:[#allocation2 + $0x8] sm:$0xff] %v1430_v19  ;;  %v1433_v8 = vadd.f32 %v9038_v27, %v1358_v46  ;;  %v1434_v50 = vadd.f32 %v9040_v43, %v1359_v44  ;;  %v1288_v15 = vmul.f32 %v7780_v62, %v13829_v25  ;;  %1495 = vst [vmem:[#allocation2 + $0x148] sm:$0xff] %v1431_v21  ;;  %v1212_v51 = vadd.f32 1e-05, %v9140_v38  ;;  %v1149_v19 = vpop.xlane.xlu0 %1148 }
 0x188   : > { %1496 = vst [vmem:[#allocation2 + $0x1d0] sm:$0xff] %v1432_v37  ;;  %v1435_v41 = vadd.f32 %v9038_v27, %v1360_v0  ;;  %v1436_v49 = vadd.f32 %v9040_v43, %v1361_v26  ;;  %v1289_v24 = vmul.f32 %v7782_v35, %v8886_v23  ;;  %v1290_v34 = vmul.f32 %v7782_v35, %v8890_v4  ;;  %v1152_v37 = vpop.xlane.xlu1 %1151 }
 0x189   : > { %v7786_v9 = vpop.eup %7785  ;;  %1497 = vst [vmem:[#allocation2 + $0x100] sm:$0xff] %v1433_v8  ;;  %1498 = vst [vmem:[#allocation2 + $0xc8] sm:$0xff] %v1434_v50  ;;  %v1362_v10 = vmul.f32 %v9034_v54, %v1287_v55  ;;  %v1363_v2 = vmul.f32 %v9036_v14, %v1288_v15  ;;  %v1291_v48 = vmul.f32 %v7784_v5, %v13830_v59  ;;  %7793 = vrsqrt.f32 %v9132_v16 }
 0x18a   : > { %v1292_v57 = vmul.f32 %v7784_v5, %v13831_v60  ;;  %1499 = vst [vmem:[#allocation2 + $0x40] sm:$0xff] %v1435_v41  ;;  %1500 = vst [vmem:[#allocation2 + $0x1f8] sm:$0xff] %v1436_v49  ;;  %v1364_v29 = vmul.f32 %v9034_v54, %v1289_v24  ;;  %v1365_v23 = vmul.f32 %v9036_v14, %v1290_v34  ;;  %v1181_v21 = vmul.f32 0.00390625, %v1143_v12  ;;  %v13834_v34 = vld [vmem:[#allocation19_spill] sm:$0xff] }
 0x18b   : > { %v1293_v4 = vmul.f32 %v7786_v9, %v8910_v11  ;;  %v1294_v18 = vmul.f32 %v7786_v9, %v8914_v28  ;;  %v7788_v3 = vpop.eup %7787  ;;  %v1437_v1 = vadd.f32 %v9038_v27, %v1362_v10  ;;  %v1438_v6 = vadd.f32 %v9040_v43, %v1363_v2  ;;  %v13835_v9 = vld [vmem:[#allocation20_spill] sm:$0xff] }
 0x18c   : > { %v1366_v45 = vmul.f32 %v9034_v54, %v1291_v48  ;;  %v1367_v61 = vmul.f32 %v9036_v14, %v1292_v57  ;;  %v1439_v52 = vadd.f32 %v9038_v27, %v1364_v29  ;;  %v1440_v7 = vadd.f32 %v9040_v43, %v1365_v23  ;;  %v13837_v23 = vld [vmem:[#allocation22_spill] sm:$0xff] }
 0x18d   : > { %v1368_v22 = vmul.f32 %v9034_v54, %v1293_v4  ;;  %v1369_v32 = vmul.f32 %v9036_v14, %v1294_v18  ;;  %1501 = vst [vmem:[#allocation2 + $0x20] sm:$0xff] %v1437_v1  ;;  %1502 = vst [vmem:[#allocation2 + $0x128] sm:$0xff] %v1438_v6  ;;  %v1295_v53 = vmul.f32 %v7788_v3, %v13832_v13  ;;  %7795 = vrsqrt.f32 %v1212_v51  ;;  %v13839_v51 = vld [vmem:[#allocation24_spill] sm:$0xff] }
 0x18e   : > { %v1441_v11 = vadd.f32 %v9038_v27, %v1366_v45  ;;  %v1442_v28 = vadd.f32 %v9040_v43, %v1367_v61  ;;  %v1296_v33 = vmul.f32 %v7788_v3, %v13833_v20  ;;  %1503 = vst [vmem:[#allocation2 + $0x1a0] sm:$0xff] %v1439_v52  ;;  %1504 = vst [vmem:[#allocation2 + $0x1f0] sm:$0xff] %v1440_v7  ;;  %v1182_v38 = vmul.f32 0.00390625, %v1146_v42  ;;  %v13836_v42 = vld [vmem:[#allocation21_spill] sm:$0xff]  ;;  %v13838_v20 = vld [vmem:[#allocation23_spill] sm:$0xff] }
 0x18f   : > { %v1443_v63 = vadd.f32 %v9038_v27, %v1368_v22  ;;  %v1444_v62 = vadd.f32 %v9040_v43, %v1369_v32  ;;  %v7790_v46 = vpop.eup %7789  ;;  %v1370_v44 = vmul.f32 %v9034_v54, %v1295_v53  ;;  %v1213_v8 = vadd.f32 1e-05, %v1181_v21 }
 0x190   : > { %1505 = vst [vmem:[#allocation2 + $0xe8] sm:$0xff] %v1441_v11  ;;  %1506 = vst [vmem:[#allocation2 + $0x78] sm:$0xff] %v1442_v28  ;;  %v1371_v35 = vmul.f32 %v9036_v14, %v1296_v33  ;;  %v1297_v0 = vmul.f32 %v7790_v46, %v8934_v31  ;;  %v1298_v56 = vmul.f32 %v7790_v46, %v8938_v36  ;;  %v1183_v50 = vmul.f32 0.00390625, %v1149_v19  ;;  %v7792_v49 = vpop.eup %7791  ;;  %v13840_v19 = vld [vmem:[#allocation25_spill] sm:$0xff] }
 0x191   : > { %1507 = vst [vmem:[#allocation2 + $0x70] sm:$0xff] %v1443_v63  ;;  %1508 = vst [vmem:[#allocation2 + $0x90] sm:$0xff] %v1444_v62  ;;  %v1445_v26 = vadd.f32 %v9038_v27, %v1370_v44  ;;  %v1214_v55 = vadd.f32 1e-05, %v1182_v38  ;;  %v1184_v25 = vmul.f32 0.00390625, %v1152_v37  ;;  %7797 = vrsqrt.f32 %v1213_v8  ;;  %v13842_v37 = vld [vmem:[#allocation27_spill] sm:$0xff] }
 0x192   : > { %v1446_v5 = vadd.f32 %v9040_v43, %v1371_v35  ;;  %v1372_v58 = vmul.f32 %v9034_v54, %v1297_v0  ;;  %v1373_v16 = vmul.f32 %v9036_v14, %v1298_v56  ;;  %v1215_v31 = vadd.f32 1e-05, %v1183_v50 }
 0x193   : > { %1509 = vst [vmem:[#allocation2 + $0x1d8] sm:$0xff] %v1445_v26  ;;  %7799 = vrsqrt.f32 %v1214_v55  ;;  %v1216_v41 = vadd.f32 1e-05, %v1184_v25  ;;  %v1299_v12 = vmul.f32 %v7792_v49, %v13834_v34  ;;  %v1300_v10 = vmul.f32 %v7792_v49, %v13835_v9 }
 0x194   : > { %1510 = vst [vmem:[#allocation2 + $0xd0] sm:$0xff] %v1446_v5  ;;  %v1447_v36 = vadd.f32 %v9038_v27, %v1372_v58  ;;  %v1448_v15 = vadd.f32 %v9040_v43, %v1373_v16  ;;  %7801 = vrsqrt.f32 %v1215_v31 }
 0x195   : > { %7803 = vrsqrt.f32 %v1216_v41  ;;  %v1374_v60 = vmul.f32 %v9034_v54, %v1299_v12  ;;  %v1375_v57 = vmul.f32 %v9036_v14, %v1300_v10 }
 0x196   : > { %1511 = vst [vmem:[#allocation2 + $0xb8] sm:$0xff] %v1447_v36  ;;  %1512 = vst [vmem:[#allocation2 + $0x88] sm:$0xff] %v1448_v15  ;;  %v7794_v24 = vpop.eup %7793 }
 0x197   : > { %v1301_v59 = vmul.f32 %v7794_v24, %v8958_v39  ;;  %v1302_v48 = vmul.f32 %v7794_v24, %v8962_v17  ;;  %v1449_v6 = vadd.f32 %v9038_v27, %v1374_v60  ;;  %v1450_v45 = vadd.f32 %v9040_v43, %v1375_v57 }
 0x199   : > { %v1376_v18 = vmul.f32 %v9034_v54, %v1301_v59  ;;  %v1377_v3 = vmul.f32 %v9036_v14, %v1302_v48  ;;  %1513 = vst [vmem:[#allocation2 + $0xa8] sm:$0xff] %v1449_v6  ;;  %1514 = vst [vmem:[#allocation2 + $0x1c8] sm:$0xff] %v1450_v45 }
 0x19a   : > { %v7796_v2 = vpop.eup %7795 }
 0x19b   : > { %v1303_v29 = vmul.f32 %v7796_v2, %v13836_v42  ;;  %v1304_v4 = vmul.f32 %v7796_v2, %v13837_v23  ;;  %v1451_v52 = vadd.f32 %v9038_v27, %v1376_v18  ;;  %v1452_v7 = vadd.f32 %v9040_v43, %v1377_v3 }
 0x19d   : > { %v1378_v39 = vmul.f32 %v9034_v54, %v1303_v29  ;;  %v1379_v17 = vmul.f32 %v9036_v14, %v1304_v4  ;;  %1515 = vst [vmem:[#allocation2 + $0x170] sm:$0xff] %v1451_v52  ;;  %1516 = vst [vmem:[#allocation2 + $0x178] sm:$0xff] %v1452_v7 }
 0x19e   : > { %v7798_v1 = vpop.eup %7797 }
 0x19f   : > { %v1305_v22 = vmul.f32 %v7798_v1, %v8982_v47  ;;  %v1306_v32 = vmul.f32 %v7798_v1, %v8986_v30  ;;  %v1453_v28 = vadd.f32 %v9038_v27, %v1378_v39  ;;  %v1454_v13 = vadd.f32 %v9040_v43, %v1379_v17 }
 0x1a0   : > { %v7800_v61 = vpop.eup %7799 }
 0x1a1   : > { %v7802_v11 = vpop.eup %7801  ;;  %v1307_v53 = vmul.f32 %v7800_v61, %v8990_v40  ;;  %v1308_v33 = vmul.f32 %v7800_v61, %v13838_v20  ;;  %v1380_v62 = vmul.f32 %v9034_v54, %v1305_v22  ;;  %v1381_v47 = vmul.f32 %v9036_v14, %v1306_v32  ;;  %1517 = vst [vmem:[#allocation2 + $0x68] sm:$0xff] %v1453_v28  ;;  %v13841_v40 = vld [vmem:[#allocation26_spill] sm:$0xff] }
 0x1a2   : > { %v7804_v63 = vpop.eup %7803  ;;  %v1309_v30 = vmul.f32 %v7802_v11, %v13839_v51  ;;  %v1310_v46 = vmul.f32 %v7802_v11, %v13840_v19  ;;  %1518 = vst [vmem:[#allocation2 + $0x190] sm:$0xff] %v1454_v13 }
 0x1a3   : > { %v1382_v44 = vmul.f32 %v9034_v54, %v1307_v53  ;;  %v1383_v35 = vmul.f32 %v9036_v14, %v1308_v33  ;;  %v1311_v21 = vmul.f32 %v7804_v63, %v13841_v40  ;;  %v1312_v0 = vmul.f32 %v7804_v63, %v13842_v37 }
 0x1a4   : > { %v1455_v56 = vadd.f32 %v9038_v27, %v1380_v62  ;;  %v1456_v38 = vadd.f32 %v9040_v43, %v1381_v47  ;;  %v1384_v26 = vmul.f32 %v9034_v54, %v1309_v30  ;;  %v1385_v5 = vmul.f32 %v9036_v14, %v1310_v46 }
 0x1a5   : > { %v1457_v8 = vadd.f32 %v9038_v27, %v1382_v44  ;;  %v1458_v50 = vadd.f32 %v9040_v43, %v1383_v35  ;;  %v1386_v58 = vmul.f32 %v9034_v54, %v1311_v21  ;;  %v1387_v16 = vmul.f32 %v9036_v14, %v1312_v0 }
 0x1a6   : > { %1519 = vst [vmem:[#allocation2 + $0x198] sm:$0xff] %v1455_v56  ;;  %1520 = vst [vmem:[#allocation2 + $0x38] sm:$0xff] %v1456_v38  ;;  %v1459_v55 = vadd.f32 %v9038_v27, %v1384_v26  ;;  %v1460_v25 = vadd.f32 %v9040_v43, %v1385_v5 }
 0x1a7   : > { %1521 = vst [vmem:[#allocation2 + $0xc0] sm:$0xff] %v1457_v8  ;;  %1522 = vst [vmem:[#allocation2 + $0x1c0] sm:$0xff] %v1458_v50  ;;  %v1461_v31 = vadd.f32 %v9038_v27, %v1386_v58  ;;  %v1462_v36 = vadd.f32 %v9040_v43, %v1387_v16 }
 0x1a8   : > { %1523 = vst [vmem:[#allocation2 + $0x158] sm:$0xff] %v1459_v55  ;;  %1524 = vst [vmem:[#allocation2 + $0x10] sm:$0xff] %v1460_v25 }
 0x1a9   : > { %1525 = vst [vmem:[#allocation2 + $0x58] sm:$0xff] %v1461_v31  ;;  %1526 = vst [vmem:[#allocation2 + $0xa0] sm:$0xff] %v1462_v36 }
 0x1aa PF: > { %s13843_s4 = sld [smem:[#allocation5_spill]]  ;;  %v1560_v12 = vld [vmem:[#allocation2 + $0x1d0] sm:$0xff]  ;;  %v1562_v9 = vld [vmem:[#allocation2 + $0xc8] sm:$0xff]  ;;  %v1530_v45 = vld [vmem:[#allocation2 + $0x18] sm:$0xff]  ;;  %s14026_s24 = scalar_lea.vmem %s13450_s6, %s8238_s30 }
 0x1ab   : > { %v9247_v59 = vpack.c.bf16 %v1562_v9, %v1560_v12  ;;  %v1528_v6 = vld [vmem:[#allocation2 + $0x1b0] sm:$0xff]  ;;  %v1559_v5 = vld [vmem:[#allocation2 + $0x148] sm:$0xff]  ;;  %v1561_v8 = vld [vmem:[#allocation2 + $0x100] sm:$0xff]  ;;  %s13867_s20 = sld [smem:[#allocation6_spill]]  ;;  %s14027_s29 = scalar_lea.vmem %s13451_s7, %s8238_s30 }
 0x1ac   : > { %v9254_v17 = vpack.c.bf16 %v1530_v45, %v1528_v6  ;;  %v1564_v16 = vld [vmem:[#allocation2 + $0x1f8] sm:$0xff]  ;;  %v1566_v55 = vld [vmem:[#allocation2 + $0x128] sm:$0xff]  ;;  %v1527_v25 = vld [vmem:[#allocation2 + $0xb0] sm:$0xff]  ;;  %v9267_v36 = vpack.c.bf16 %v1561_v8, %v1559_v5  ;;  %p7627_p5 = scmp.ne.s32.totalorder %s8222_s19, 3 }
 0x1ad   : > { %13844 = vst [vmem:[#allocation28_spill] sm:$0xff] %v9247_v59  ;;  %1879 = vmatprep.mubr.bf16.mxu1 %v9247_v59  ;;  %v1529_v31 = vld [vmem:[#allocation2 + $0xd8] sm:$0xff]  ;;  %v1563_v12 = vld [vmem:[#allocation2 + $0x40] sm:$0xff] }
 0x1ae   : > { %1799 = vmatprep.mubr.bf16.mxu0 %v9254_v17  ;;  %13845 = vst [vmem:[#allocation29_spill] sm:$0xff] %v9267_v36  ;;  %v1565_v9 = vld [vmem:[#allocation2 + $0x20] sm:$0xff] }
 0x1b0   : > { %v1642_v54 = vld [vmem:[%s13843_s4 + $0x98] sm:$0xff]  ;;  %v1641_v14 = vld [vmem:[%s13843_s4 + $0x90] sm:$0xff]  ;;  %v1636_v24 = vld [vmem:[%s13843_s4 + $0x68] sm:$0xff] }
 0x1b1   : > { %v1708_v15 = vunpack.c.l.s8.bf16 %v1642_v54  ;;  %v1714_v41 = vunpack.c.h.s8.bf16 %v1642_v54  ;;  %v1713_v49 = vunpack.c.h.s8.bf16 %v1641_v14  ;;  %v1707_v27 = vunpack.c.l.s8.bf16 %v1641_v14  ;;  %v1635_v34 = vld [vmem:[%s13843_s4 + $0x60] sm:$0xff]  ;;  %v1630_v48 = vld [vmem:[%s13843_s4 + $0x38] sm:$0xff]  ;;  %v1629_v42 = vld [vmem:[%s13843_s4 + $0x30] sm:$0xff] }
 0x1b2   : > { %v1702_v43 = vunpack.c.h.s8.bf16 %v1636_v24  ;;  %v1701_v10 = vunpack.c.h.s8.bf16 %v1635_v34  ;;  %v1696_v2 = vunpack.c.l.s8.bf16 %v1636_v24  ;;  %v1695_v60 = vunpack.c.l.s8.bf16 %v1635_v34  ;;  %v1624_v4 = vld [vmem:[%s13843_s4 + $0x8] sm:$0xff]  ;;  %v1623_v1 = vld [vmem:[%s13843_s4] sm:$0xff]  ;;  %v1666_v52 = vld [vmem:[%s13843_s4 + $0x158] sm:$0xff] }
 0x1b3   : > { %7698 = vmatprep.subr.bf16.mxu1 %v1714_v41  ;;  %1767 = vmatprep.subr.bf16.mxu0 %v1714_v41  ;;  %v1690_v57 = vunpack.c.h.s8.bf16 %v1630_v48  ;;  %v1689_v29 = vunpack.c.h.s8.bf16 %v1629_v42  ;;  %v1684_v23 = vunpack.c.l.s8.bf16 %v1630_v48  ;;  %v1683_v18 = vunpack.c.l.s8.bf16 %v1629_v42  ;;  %v1665_v32 = vld [vmem:[%s13843_s4 + $0x150] sm:$0xff]  ;;  %v1660_v13 = vld [vmem:[%s13843_s4 + $0x128] sm:$0xff]  ;;  %v1659_v33 = vld [vmem:[%s13843_s4 + $0x120] sm:$0xff] }
 0x1b4   : > { %7714 = vmatpush1.bf16.msra.mxu1 %v1713_v49  ;;  %1768 = vmatpush1.bf16.msra.mxu0 %v1713_v49  ;;  %v1678_v3 = vunpack.c.h.s8.bf16 %v1624_v4  ;;  %v1677_v39 = vunpack.c.h.s8.bf16 %v1623_v1  ;;  %v1672_v61 = vunpack.c.l.s8.bf16 %v1624_v4  ;;  %v1671_v7 = vunpack.c.l.s8.bf16 %v1623_v1  ;;  %v1654_v47 = vld [vmem:[%s13843_s4 + $0xf8] sm:$0xff]  ;;  %v1653_v19 = vld [vmem:[%s13843_s4 + $0xf0] sm:$0xff]  ;;  %v1648_v35 = vld [vmem:[%s13843_s4 + $0xc8] sm:$0xff] }
 0x1b5   : > { %7699 = vmatprep.subr.bf16.mxu1 %v1708_v15  ;;  %1769 = vmatprep.subr.bf16.mxu0 %v1708_v15  ;;  %v1762_v22 = vunpack.c.h.s8.bf16 %v1666_v52  ;;  %v1761_v11 = vunpack.c.h.s8.bf16 %v1665_v32  ;;  %v1756_v28 = vunpack.c.l.s8.bf16 %v1666_v52  ;;  %v1755_v53 = vunpack.c.l.s8.bf16 %v1665_v32  ;;  %v1647_v37 = vld [vmem:[%s13843_s4 + $0xc0] sm:$0xff]  ;;  %v1644_v38 = vld [vmem:[%s13843_s4 + $0xa8] sm:$0xff]  ;;  %v1568_v48 = vld [vmem:[#allocation2 + $0x1f0] sm:$0xff] }
 0x1b6   : > { %v1750_v20 = vunpack.c.h.s8.bf16 %v1660_v13  ;;  %v1749_v63 = vunpack.c.h.s8.bf16 %v1659_v33  ;;  %v1744_v62 = vunpack.c.l.s8.bf16 %v1660_v13  ;;  %v1743_v51 = vunpack.c.l.s8.bf16 %v1659_v33  ;;  %v1643_v58 = vld [vmem:[%s13843_s4 + $0xa0] sm:$0xff]  ;;  %v1532_v15 = vld [vmem:[#allocation2 + $0x168] sm:$0xff]  ;;  %v1533_v42 = vld [vmem:[#allocation2 + $0x130] sm:$0xff] }
 0x1b7   : > { %v1738_v30 = vunpack.c.h.s8.bf16 %v1654_v47  ;;  %v1737_v46 = vunpack.c.h.s8.bf16 %v1653_v19  ;;  %v1732_v44 = vunpack.c.l.s8.bf16 %v1654_v47  ;;  %v1731_v40 = vunpack.c.l.s8.bf16 %v1653_v19  ;;  %v1534_v41 = vld [vmem:[#allocation2 + $0x48] sm:$0xff]  ;;  %v1567_v52 = vld [vmem:[#allocation2 + $0x1a0] sm:$0xff]  ;;  %v1626_v19 = vld [vmem:[%s13843_s4 + $0x18] sm:$0xff] }
 0x1b8   : > { %7715 = vmatpush1.bf16.msra.mxu1 %v1707_v27  ;;  %1770 = vmatpush1.bf16.msra.mxu0 %v1707_v27  ;;  %v1726_v21 = vunpack.c.h.s8.bf16 %v1648_v35  ;;  %v1725_v0 = vunpack.c.h.s8.bf16 %v1647_v37  ;;  %v1720_v56 = vunpack.c.l.s8.bf16 %v1648_v35  ;;  %v1719_v26 = vunpack.c.l.s8.bf16 %v1647_v37  ;;  %v1638_v27 = vld [vmem:[%s13843_s4 + $0x78] sm:$0xff]  ;;  %v1632_v45 = vld [vmem:[%s13843_s4 + $0x48] sm:$0xff]  ;;  %v1631_v32 = vld [vmem:[%s13843_s4 + $0x40] sm:$0xff] }
 0x1b9   : > { %7700 = vmatprep.subr.bf16.mxu1 %v1702_v43  ;;  %1771 = vmatprep.subr.bf16.mxu0 %v1702_v43  ;;  %v1716_v50 = vunpack.c.h.s8.bf16 %v1644_v38  ;;  %v1715_v54 = vunpack.c.h.s8.bf16 %v1643_v58  ;;  %v9269_v14 = vpack.c.bf16 %v1566_v55, %v1564_v16  ;;  %v1710_v49 = vunpack.c.l.s8.bf16 %v1644_v38  ;;  %v1535_v13 = vld [vmem:[#allocation2 + $0x180] sm:$0xff]  ;;  %v1571_v35 = vld [vmem:[#allocation2 + $0x70] sm:$0xff] }
 0x1ba   : > { %v9271_v24 = vpack.c.bf16 %v1529_v31, %v1527_v25  ;;  %v9275_v43 = vpack.c.bf16 %v1534_v41, %v1532_v15  ;;  %v1709_v34 = vunpack.c.l.s8.bf16 %v1643_v58  ;;  %v1698_v1 = vunpack.c.l.s8.bf16 %v1638_v27  ;;  %v1542_v47 = vld [vmem:[#allocation2 + $0x60] sm:$0xff]  ;;  %v1625_v37 = vld [vmem:[%s13843_s4 + $0x10] sm:$0xff]  ;;  %v1544_v58 = vld [vmem:[#allocation2 + $0x188] sm:$0xff] }
 0x1bb   : > { %13846 = vst [vmem:[#allocation30_spill] sm:$0xff] %v9269_v14  ;;  %v1691_v33 = vunpack.c.h.s8.bf16 %v1631_v32  ;;  %v1539_v38 = vld [vmem:[#allocation2 + $0x120] sm:$0xff]  ;;  %v1679_v8 = vunpack.c.h.s8.bf16 %v1625_v37  ;;  %v1674_v55 = vunpack.c.l.s8.bf16 %v1626_v19  ;;  %v1668_v31 = vld [vmem:[%s13843_s4 + $0x168] sm:$0xff]  ;;  %v1673_v15 = vunpack.c.l.s8.bf16 %v1625_v37  ;;  %v1575_v41 = vld [vmem:[#allocation2 + $0xb8] sm:$0xff] }
 0x1bc   : > { %7716 = vmatpush1.bf16.msra.mxu1 %v1701_v10  ;;  %1772 = vmatpush1.bf16.msra.mxu0 %v1701_v10  ;;  %v1704_v10 = vunpack.c.h.s8.bf16 %v1638_v27  ;;  %v1546_v16 = vld [vmem:[#allocation2 + $0x140] sm:$0xff]  ;;  %v1764_v27 = vunpack.c.h.s8.bf16 %v1668_v31 }
 0x1bd   : > { %7701 = vmatprep.subr.bf16.mxu1 %v1696_v2  ;;  %1773 = vmatprep.subr.bf16.mxu0 %v1696_v2  ;;  %v1637_v2 = vld [vmem:[%s13843_s4 + $0x70] sm:$0xff] }
 0x1c0   : > { %7717 = vmatpush1.bf16.msra.mxu1 %v1695_v60  ;;  %1774 = vmatpush1.bf16.msra.mxu0 %v1695_v60  ;;  %v1570_v60 = vld [vmem:[#allocation2 + $0x78] sm:$0xff] }
 0x1c1   : > { %7702 = vmatprep.subr.bf16.mxu1 %v1690_v57  ;;  %1775 = vmatprep.subr.bf16.mxu0 %v1690_v57  ;;  %v1531_v57 = vld [vmem:[#allocation2 + $0x50] sm:$0xff]  ;;  %v9283_v4 = vpack.c.bf16 %v1570_v60, %v1568_v48 }
 0x1c2   : > { %v9285_v6 = vpack.c.bf16 %v1533_v42, %v1531_v57  ;;  %v1548_v42 = vld [vmem:[#allocation2 + $0x1a8] sm:$0xff] }
 0x1c3   : > { %13848 = vst [vmem:[#allocation32_spill] sm:$0xff] %v9283_v4 }
 0x1c4   : > { %7718 = vmatpush1.bf16.msra.mxu1 %v1689_v29  ;;  %1776 = vmatpush1.bf16.msra.mxu0 %v1689_v29  ;;  %v9281_v29 = vpack.c.bf16 %v1565_v9, %v1563_v12  ;;  %v1580_v12 = vld [vmem:[#allocation2 + $0x178] sm:$0xff]  ;;  %v1582_v9 = vld [vmem:[#allocation2 + $0x190] sm:$0xff] }
 0x1c5   : > { %7703 = vmatprep.subr.bf16.mxu1 %v1684_v23  ;;  %1777 = vmatprep.subr.bf16.mxu0 %v1684_v23  ;;  %v1703_v23 = vunpack.c.h.s8.bf16 %v1637_v2  ;;  %v9325_v57 = vpack.c.bf16 %v1582_v9, %v1580_v12  ;;  %v1650_v9 = vld [vmem:[%s13843_s4 + $0xd8] sm:$0xff] }
 0x1c6   : > { %13847 = vst [vmem:[#allocation31_spill] sm:$0xff] %v9281_v29 }
 0x1c7   : > { %13854 = vst [vmem:[#allocation38_spill] sm:$0xff] %v9325_v57 }
 0x1c8   : > { %7719 = vmatpush1.bf16.msra.mxu1 %v1683_v18  ;;  %1778 = vmatpush1.bf16.msra.mxu0 %v1683_v18  ;;  %v1536_v18 = vld [vmem:[#allocation2 + $0x110] sm:$0xff] }
 0x1c9   : > { %7704 = vmatprep.subr.bf16.mxu1 %v1678_v3  ;;  %1779 = vmatprep.subr.bf16.mxu0 %v1678_v3  ;;  %v1538_v3 = vld [vmem:[#allocation2 + $0x98] sm:$0xff] }
 0x1cc   : > { %7720 = vmatpush1.bf16.msra.mxu1 %v1677_v39  ;;  %1780 = vmatpush1.bf16.msra.mxu0 %v1677_v39  ;;  %v9289_v39 = vpack.c.bf16 %v1538_v3, %v1536_v18  ;;  %v1758_v18 = vunpack.c.l.s8.bf16 %v1668_v31 }
 0x1cd   : > { %7705 = vmatprep.subr.bf16.mxu1 %v1672_v61  ;;  %1781 = vmatprep.subr.bf16.mxu0 %v1672_v61  ;;  %v1697_v61 = vunpack.c.l.s8.bf16 %v1637_v2  ;;  %v1545_v2 = vld [vmem:[#allocation2 + $0x138] sm:$0xff] }
 0x1d0   : > { %7721 = vmatpush1.bf16.msra.mxu1 %v1671_v7  ;;  %1782 = vmatpush1.bf16.msra.mxu0 %v1671_v7  ;;  %v1569_v7 = vld [vmem:[#allocation2 + $0xe8] sm:$0xff] }
 0x1d1   : > { %7706 = vmatprep.subr.bf16.mxu1 %v1762_v22  ;;  %1783 = vmatprep.subr.bf16.mxu0 %v1762_v22  ;;  %v1692_v22 = vunpack.c.h.s8.bf16 %v1632_v45 }
 0x1d4   : > { %7722 = vmatpush2.bf16.msra.mxu1 %v1761_v11  ;;  %1784 = vmatpush2.bf16.msra.mxu0 %v1761_v11  ;;  %v1572_v11 = vld [vmem:[#allocation2 + $0x90] sm:$0xff] }
 0x1d5   : > { %7707 = vmatprep.subr.bf16.mxu1 %v1756_v28  ;;  %1785 = vmatprep.subr.bf16.mxu0 %v1756_v28  ;;  %v1574_v28 = vld [vmem:[#allocation2 + $0xd0] sm:$0xff] }
 0x1d8   : > { %7723 = vmatpush2.bf16.msra.mxu1 %v1755_v53  ;;  %1786 = vmatpush2.bf16.msra.mxu0 %v1755_v53  ;;  %v1537_v53 = vld [vmem:[#allocation2 + $0x118] sm:$0xff] }
 0x1d9   : > { %7708 = vmatprep.subr.bf16.mxu1 %v1750_v20  ;;  %1787 = vmatprep.subr.bf16.mxu0 %v1750_v20  ;;  %v9295_v20 = vpack.c.bf16 %v1569_v7, %v1567_v52  ;;  %v1579_v52 = vld [vmem:[#allocation2 + $0x170] sm:$0xff]  ;;  %v1581_v7 = vld [vmem:[#allocation2 + $0x68] sm:$0xff] }
 0x1db   : > { %13849 = vst [vmem:[#allocation33_spill] sm:$0xff] %v9295_v20 }
 0x1dc   : > { %7724 = vmatpush2.bf16.msra.mxu1 %v1749_v63  ;;  %1788 = vmatpush2.bf16.msra.mxu0 %v1749_v63  ;;  %v9297_v63 = vpack.c.bf16 %v1574_v28, %v1572_v11  ;;  %v1584_v11 = vld [vmem:[#allocation2 + $0x38] sm:$0xff]  ;;  %v1586_v28 = vld [vmem:[#allocation2 + $0x1c0] sm:$0xff] }
 0x1dd   : > { %7709 = vmatprep.subr.bf16.mxu1 %v1744_v62  ;;  %1789 = vmatprep.subr.bf16.mxu0 %v1744_v62  ;;  %v1540_v62 = vld [vmem:[#allocation2 + $0x150] sm:$0xff] }
 0x1de   : > { %13850 = vst [vmem:[#allocation34_spill] sm:$0xff] %v9297_v63 }
 0x1e0   : > { %7725 = vmatpush2.bf16.msra.mxu1 %v1743_v51  ;;  %1790 = vmatpush2.bf16.msra.mxu0 %v1743_v51  ;;  %v1686_v51 = vunpack.c.l.s8.bf16 %v1632_v45 }
 0x1e1   : > { %7710 = vmatprep.subr.bf16.mxu1 %v1738_v30  ;;  %1791 = vmatprep.subr.bf16.mxu0 %v1738_v30  ;;  %v9299_v30 = vpack.c.bf16 %v1537_v53, %v1535_v13  ;;  %v1547_v13 = vld [vmem:[#allocation2 + $0x80] sm:$0xff]  ;;  %v1549_v53 = vld [vmem:[#allocation2 + $0x1b8] sm:$0xff] }
 0x1e4   : > { %7726 = vmatpush2.bf16.msra.mxu1 %v1737_v46  ;;  %1792 = vmatpush2.bf16.msra.mxu0 %v1737_v46  ;;  %v9303_v46 = vpack.c.bf16 %v1542_v47, %v1540_v62  ;;  %v9339_v47 = vpack.c.bf16 %v1586_v28, %v1584_v11 }
 0x1e5   : > { %7711 = vmatprep.subr.bf16.mxu1 %v1732_v44  ;;  %1793 = vmatprep.subr.bf16.mxu0 %v1732_v44  ;;  %v1685_v44 = vunpack.c.l.s8.bf16 %v1631_v32  ;;  %v1661_v32 = vld [vmem:[%s13843_s4 + $0x130] sm:$0xff] }
 0x1e6   : > { %v1751_v62 = vunpack.c.h.s8.bf16 %v1661_v32  ;;  %13858 = vst [vmem:[#allocation42_spill] sm:$0xff] %v9339_v47  ;;  %v1745_v37 = vunpack.c.l.s8.bf16 %v1661_v32 }
 0x1e8   : > { %7727 = vmatpush2.bf16.msra.mxu1 %v1731_v40  ;;  %1794 = vmatpush2.bf16.msra.mxu0 %v1731_v40  ;;  %v1573_v40 = vld [vmem:[#allocation2 + $0x1d8] sm:$0xff] }
 0x1e9   : > { %7712 = vmatprep.subr.bf16.mxu1 %v1726_v21  ;;  %1795 = vmatprep.subr.bf16.mxu0 %v1726_v21  ;;  %v1680_v21 = vunpack.c.h.s8.bf16 %v1626_v19  ;;  %v9309_v5 = vpack.c.bf16 %v1573_v40, %v1571_v35  ;;  %v1554_v19 = vld [vmem:[#allocation2 + $0x30] sm:$0xff]  ;;  %v9341_v35 = vpack.c.bf16 %v1549_v53, %v1547_v13  ;;  %v1656_v40 = vld [vmem:[%s13843_s4 + $0x108] sm:$0xff]  ;;  %v9410_v53 = vld [vmem:[%s13867_s20] sm:$0x3f] }
 0x1eb   : > { %13851 = vst [vmem:[#allocation35_spill] sm:$0xff] %v9309_v5  ;;  %13859 = vst [vmem:[#allocation43_spill] sm:$0xff] %v9341_v35 }
 0x1ec   : > { %7728 = vmatpush2.bf16.msra.mxu1 %v1725_v0  ;;  %1796 = vmatpush2.bf16.msra.mxu0 %v1725_v0  ;;  %v1576_v0 = vld [vmem:[#allocation2 + $0x88] sm:$0xff] }
 0x1ed   : > { %7713 = vmatprep.subr.bf16.mxu1 %v1720_v56  ;;  %1797 = vmatprep.subr.bf16.mxu0 %v1720_v56  ;;  %v1578_v56 = vld [vmem:[#allocation2 + $0x1c8] sm:$0xff] }
 0x1f0   : > { %7729 = vmatpush2.bf16.msra.mxu1 %v1719_v26  ;;  %1798 = vmatpush2.bf16.msra.mxu0 %v1719_v26  ;;  %v1541_v26 = vld [vmem:[#allocation2 + $0x108] sm:$0xff] }
 0x1f1   : > { %1960 = vmatprep.subr.bf16.mxu1 %v1716_v50  ;;  %v9311_v50 = vpack.c.bf16 %v1578_v56, %v1576_v0  ;;  %v9313_v25 = vpack.c.bf16 %v1541_v26, %v1539_v38  ;;  %v1583_v0 = vld [vmem:[#allocation2 + $0x198] sm:$0xff]  ;;  %v1585_v56 = vld [vmem:[#allocation2 + $0xc0] sm:$0xff]  ;;  %v1740_v38 = vunpack.c.h.s8.bf16 %v1656_v40 }
 0x1f2   : > { %v1655_v26 = vld [vmem:[%s13843_s4 + $0x100] sm:$0xff]  ;;  %v9351_v31 = vpack.c.bf16 %v1585_v56, %v1583_v0 }
 0x1f3   : > { %1880 = vmatmul.mubr.bf16.vlgmr.msra.gmra.mxu1 %v9267_v36  ;;  %1800 = vmatmul.mubr.bf16.vlgmr.msra.gmra.mxu0 %v9271_v24  ;;  %13852 = vst [vmem:[#allocation36_spill] sm:$0xff] %v9311_v50 }
 0x1f4   : > { %1961 = vmatpush1.bf16.msra.mxu1 %v1715_v54  ;;  %1889 = vmatprep.mubr.bf16.mxu1 %v9269_v14  ;;  %v9317_v54 = vpack.c.bf16 %v1546_v16, %v1544_v58  ;;  %v1590_v58 = vld [vmem:[#allocation2 + $0xa0] sm:$0xff]  ;;  %v1551_v16 = vld [vmem:[#allocation2 + $0x1e8] sm:$0xff]  ;;  %13861 = vst [vmem:[#allocation45_spill] sm:$0xff] %v9351_v31 }
 0x1f5   : > { %1962 = vmatprep.subr.bf16.mxu1 %v1710_v49  ;;  %1809 = vmatprep.mubr.bf16.mxu0 %v9275_v43  ;;  %v1577_v49 = vld [vmem:[#allocation2 + $0xa8] sm:$0xff] }
 0x1f6   : > { %v9323_v48 = vpack.c.bf16 %v1577_v49, %v1575_v41  ;;  %v1556_v49 = vld [vmem:[#allocation2] sm:$0xff] }
 0x1f8   : > { %1963 = vmatpush1.bf16.msra.mxu1 %v1709_v34  ;;  %v1667_v34 = vld [vmem:[%s13843_s4 + $0x160] sm:$0xff]  ;;  %13853 = vst [vmem:[#allocation37_spill] sm:$0xff] %v9323_v48 }
 0x1f9   : > { %1964 = vmatprep.subr.bf16.mxu1 %v1704_v10  ;;  %v1543_v10 = vld [vmem:[#allocation2 + $0xe0] sm:$0xff]  ;;  %v1763_v60 = vunpack.c.h.s8.bf16 %v1667_v34 }
 0x1fa   : > { %v9327_v3 = vpack.c.bf16 %v1545_v2, %v1543_v10  ;;  %v1733_v2 = vunpack.c.l.s8.bf16 %v1655_v26 }
 0x1fb   : > { %1890 = vmatmul.mubr.bf16.gmra.mxu1 %v9281_v29  ;;  %1810 = vmatmul.mubr.bf16.gmra.mxu0 %v9285_v6 }
 0x1fc   : > { %1965 = vmatpush1.bf16.msra.mxu1 %v1703_v23  ;;  %1899 = vmatprep.mubr.bf16.mxu1 %v9283_v4  ;;  %v1550_v23 = vld [vmem:[#allocation2 + $0x28] sm:$0xff]  ;;  %13855 = vst [vmem:[#allocation39_spill] sm:$0xff] %v9327_v3 }
 0x1fd   : > { %1966 = vmatprep.subr.bf16.mxu1 %v1698_v1  ;;  %1819 = vmatprep.mubr.bf16.mxu0 %v9289_v39  ;;  %v1662_v1 = vld [vmem:[%s13843_s4 + $0x138] sm:$0xff]  ;;  %v9331_v45 = vpack.c.bf16 %v1550_v23, %v1548_v42  ;;  %v1728_v23 = vunpack.c.h.s8.bf16 %v1650_v9 }
 0x1fe   : > { %v1589_v42 = vld [vmem:[#allocation2 + $0x58] sm:$0xff] }
 0x1ff   : > { %13856 = vst [vmem:[#allocation40_spill] sm:$0xff] %v9331_v45 }
 0x200   : > { %1967 = vmatpush1.bf16.msra.mxu1 %v1697_v61  ;;  %v1757_v61 = vunpack.c.l.s8.bf16 %v1667_v34  ;;  %v1734_v34 = vunpack.c.l.s8.bf16 %v1656_v40 }
 0x201   : > { %1968 = vmatprep.subr.bf16.mxu1 %v1692_v22  ;;  %v1752_v22 = vunpack.c.h.s8.bf16 %v1662_v1 }
 0x203   : > { %1900 = vmatmul.mubr.bf16.gmra.mxu1 %v9295_v20  ;;  %1820 = vmatmul.mubr.bf16.gmra.mxu0 %v9299_v30 }
 0x204   : > { %1969 = vmatpush1.bf16.msra.mxu1 %v1691_v33  ;;  %1909 = vmatprep.mubr.bf16.mxu1 %v9297_v63  ;;  %v9337_v33 = vpack.c.bf16 %v1581_v7, %v1579_v52 }
 0x205   : > { %1970 = vmatprep.subr.bf16.mxu1 %v1686_v51  ;;  %1829 = vmatprep.mubr.bf16.mxu0 %v9303_v46  ;;  %v1552_v51 = vld [vmem:[#allocation2 + $0xf8] sm:$0xff] }
 0x206   : > { %13857 = vst [vmem:[#allocation41_spill] sm:$0xff] %v9337_v33 }
 0x208   : > { %1971 = vmatpush1.bf16.msra.mxu1 %v1685_v44  ;;  %v1746_v44 = vunpack.c.l.s8.bf16 %v1662_v1  ;;  %v1555_v1 = vld [vmem:[#allocation2 + $0x1e0] sm:$0xff] }
 0x209   : > { %1972 = vmatprep.subr.bf16.mxu1 %v1680_v21  ;;  %v9345_v21 = vpack.c.bf16 %v1554_v19, %v1552_v51  ;;  %v9417_v19 = vld [vmem:[%s8248_s22] sm:$0x3f] }
 0x20b   : > { %1910 = vmatmul.mubr.bf16.gmra.mxu1 %v9309_v5  ;;  %1830 = vmatmul.mubr.bf16.gmra.mxu0 %v9313_v25  ;;  %13860 = vst [vmem:[#allocation44_spill] sm:$0xff] %v9345_v21 }
 0x20c   : > { %1973 = vmatpush1.bf16.msra.mxu1 %v1679_v8  ;;  %1919 = vmatprep.mubr.bf16.mxu1 %v9311_v50  ;;  %v1588_v8 = vld [vmem:[#allocation2 + $0x10] sm:$0xff] }
 0x20d   : > { %1974 = vmatprep.subr.bf16.mxu1 %v1674_v55  ;;  %1839 = vmatprep.mubr.bf16.mxu0 %v9317_v54  ;;  %v1553_v55 = vld [vmem:[#allocation2 + $0x160] sm:$0xff]  ;;  %v9353_v41 = vpack.c.bf16 %v1590_v58, %v1588_v8 }
 0x20e   : > { %v9355_v12 = vpack.c.bf16 %v1553_v55, %v1551_v16 }
 0x20f   : > { %13862 = vst [vmem:[#allocation46_spill] sm:$0xff] %v9353_v41 }
 0x210   : > { %1975 = vmatpush1.bf16.msra.mxu1 %v1673_v15  ;;  %v1739_v15 = vunpack.c.h.s8.bf16 %v1655_v26  ;;  %13863 = vst [vmem:[#allocation47_spill] sm:$0xff] %v9355_v12 }
 0x211   : > { %1976 = vmatprep.subr.bf16.mxu1 %v1764_v27  ;;  %v1558_v27 = vld [vmem:[#allocation2 + $0x8] sm:$0xff] }
 0x212   : > { %v9359_v10 = vpack.c.bf16 %v1558_v27, %v1556_v49 }
 0x213   : > { %1920 = vmatmul.mubr.bf16.gmra.mxu1 %v9323_v48  ;;  %1840 = vmatmul.mubr.bf16.gmra.mxu0 %v9327_v3 }
 0x214   : > { %1977 = vmatpush2.bf16.msra.mxu1 %v1763_v60  ;;  %1929 = vmatprep.mubr.bf16.mxu1 %v9325_v57  ;;  %13864 = vst [vmem:[#allocation48_spill] sm:$0xff] %v9359_v10  ;;  %v1587_v60 = vld [vmem:[#allocation2 + $0x158] sm:$0xff] }
 0x215   : > { %1978 = vmatprep.subr.bf16.mxu1 %v1758_v18  ;;  %1849 = vmatprep.mubr.bf16.mxu0 %v9331_v45  ;;  %v1649_v18 = vld [vmem:[%s13843_s4 + $0xd0] sm:$0xff]  ;;  %v9365_v52 = vpack.c.bf16 %v1589_v42, %v1587_v60 }
 0x216   : > { %v1727_v7 = vunpack.c.h.s8.bf16 %v1649_v18  ;;  %v1721_v11 = vunpack.c.l.s8.bf16 %v1649_v18 }
 0x217   : > { %13865 = vst [vmem:[#allocation49_spill] sm:$0xff] %v9365_v52 }
 0x218   : > { %1979 = vmatpush2.bf16.msra.mxu1 %v1757_v61  ;;  %v1557_v61 = vld [vmem:[#allocation2 + $0xf0] sm:$0xff] }
 0x219   : > { %1980 = vmatprep.subr.bf16.mxu1 %v1752_v22  ;;  %v1722_v22 = vunpack.c.l.s8.bf16 %v1650_v9  ;;  %v9367_v32 = vpack.c.bf16 %v1557_v61, %v1555_v1 }
 0x21b   : > { %1930 = vmatmul.mubr.bf16.gmra.mxu1 %v9337_v33  ;;  %1850 = vmatmul.mubr.bf16.gmra.mxu0 %v9341_v35  ;;  %13866 = vst [vmem:[#allocation50_spill] sm:$0xff] %v9367_v32 }
 0x21c   : > { %1981 = vmatpush2.bf16.msra.mxu1 %v1751_v62  ;;  %1939 = vmatprep.mubr.bf16.mxu1 %v9339_v47 }
 0x21d   : > { %1982 = vmatprep.subr.bf16.mxu1 %v1746_v44  ;;  %1859 = vmatprep.mubr.bf16.mxu0 %v9345_v21 }
 0x220   : > { %1983 = vmatpush2.bf16.msra.mxu1 %v1745_v37 }
 0x221   : > { %1984 = vmatprep.subr.bf16.mxu1 %v1740_v38 }
 0x223   : > { %1940 = vmatmul.mubr.bf16.gmra.mxu1 %v9351_v31  ;;  %1860 = vmatmul.mubr.bf16.gmra.mxu0 %v9355_v12 }
 0x224   : > { %1985 = vmatpush2.bf16.msra.mxu1 %v1739_v15  ;;  %1949 = vmatprep.mubr.bf16.mxu1 %v9353_v41 }
 0x225   : > { %1986 = vmatprep.subr.bf16.mxu1 %v1734_v34  ;;  %1869 = vmatprep.mubr.bf16.mxu0 %v9359_v10 }
 0x228   : > { %1987 = vmatpush2.bf16.msra.mxu1 %v1733_v2 }
 0x229   : > { %1988 = vmatprep.subr.bf16.mxu1 %v1728_v23 }
 0x22b   : > { %1950 = vmatmul.mubr.bf16.gmra.mxu1 %v9365_v52  ;;  %1870 = vmatmul.mubr.bf16.gmra.mxu0 %v9367_v32 }
 0x22c   : > { %1989 = vmatpush2.bf16.msra.mxu1 %v1727_v7  ;;  %1992 = vmatprep.mubr.bf16.mxu1 %v9254_v17 }
 0x22d   : > { %1990 = vmatprep.subr.bf16.mxu1 %v1722_v22  ;;  %2185 = vmatprep.mubr.bf16.mxu0 %v9254_v17  ;;  %v2348_v17 = vlaneseq }
 0x22f   : > { %v9403_v28 = vshrl.u32 %v2348_v17, 7 }
 0x230   : > { %1991 = vmatpush2.bf16.msra.mxu1 %v1721_v11 }
 0x231   : > { %13868 = vst [vmem:[#allocation51_spill] sm:$0xff] %v9403_v28  ;;  %v9407_v13 = vsub.s32 0, %v9403_v28 }
 0x233   : > { %1993 = vmatmul.mubr.bf16.vlgmr.msra.gmra.mxu1 %v9271_v24  ;;  %13869 = vst [vmem:[#allocation52_spill] sm:$0xff] %v9407_v13  ;;  %v9414_v62 = vrot.slane %v9410_v53, %v9407_v13  ;;  %v9424_v37 = vrot.slane %v9417_v19, %v9407_v13 }
 0x234   : > { %2002 = vmatprep.mubr.bf16.mxu1 %v9275_v43 }
 0x235   : > { %13871 = vst [vmem:[#allocation54_spill] sm:$0xff] %v9424_v37 }
 0x23b   : > { %2003 = vmatmul.mubr.bf16.gmra.mxu1 %v9285_v6 }
 0x23c   : > { %2012 = vmatprep.mubr.bf16.mxu1 %v9289_v39 }
 0x243   : > { %2013 = vmatmul.mubr.bf16.gmra.mxu1 %v9299_v30 }
 0x244   : > { %2022 = vmatprep.mubr.bf16.mxu1 %v9303_v46 }
 0x24b   : > { %2023 = vmatmul.mubr.bf16.gmra.mxu1 %v9313_v25 }
 0x24c   : > { %2032 = vmatprep.mubr.bf16.mxu1 %v9317_v54 }
 0x253   : > { %2033 = vmatmul.mubr.bf16.gmra.mxu1 %v9327_v3 }
 0x254   : > { %2042 = vmatprep.mubr.bf16.mxu1 %v9331_v45 }
 0x25b   : > { %2043 = vmatmul.mubr.bf16.gmra.mxu1 %v9341_v35 }
 0x25c   : > { %2052 = vmatprep.mubr.bf16.mxu1 %v9345_v21 }
 0x263   : > { %2053 = vmatmul.mubr.bf16.gmra.mxu1 %v9355_v12 }
 0x264   : > { %2062 = vmatprep.mubr.bf16.mxu1 %v9359_v10 }
 0x26b   : > { %2063 = vmatmul.mubr.bf16.gmra.mxu1 %v9367_v32  ;;  %v1627_v32 = vld [vmem:[%s13843_s4 + $0x20] sm:$0xff] }
 0x26c   : > { %2072 = vmatprep.mubr.bf16.mxu1 %v9247_v59  ;;  %v1628_v59 = vld [vmem:[%s13843_s4 + $0x28] sm:$0xff]  ;;  %v1675_v45 = vunpack.c.l.s8.bf16 %v1627_v32 }
 0x26d   : > { %v1682_v10 = vunpack.c.h.s8.bf16 %v1628_v59 }
 0x273   : > { %2073 = vmatmul.mubr.bf16.gmra.mxu1 %v9267_v36 }
 0x274   : > { %2082 = vmatprep.mubr.bf16.mxu1 %v9269_v14 }
 0x27b   : > { %2083 = vmatmul.mubr.bf16.gmra.mxu1 %v9281_v29 }
 0x27c   : > { %2092 = vmatprep.mubr.bf16.mxu1 %v9283_v4  ;;  %v1633_v4 = vld [vmem:[%s13843_s4 + $0x50] sm:$0xff] }
 0x283   : > { %2093 = vmatmul.mubr.bf16.gmra.mxu1 %v9295_v20 }
 0x284   : > { %2102 = vmatprep.mubr.bf16.mxu1 %v9297_v63 }
 0x28b   : > { %2103 = vmatmul.mubr.bf16.gmra.mxu1 %v9309_v5 }
 0x28c   : > { %2112 = vmatprep.mubr.bf16.mxu1 %v9311_v50 }
 0x293   : > { %2113 = vmatmul.mubr.bf16.gmra.mxu1 %v9323_v48 }
 0x294   : > { %2122 = vmatprep.mubr.bf16.mxu1 %v9325_v57 }
 0x29b   : > { %2123 = vmatmul.mubr.bf16.gmra.mxu1 %v9337_v33 }
 0x29c   : > { %2132 = vmatprep.mubr.bf16.mxu1 %v9339_v47 }
 0x2a3   : > { %2133 = vmatmul.mubr.bf16.gmra.mxu1 %v9351_v31 }
 0x2a4   : > { %2142 = vmatprep.mubr.bf16.mxu1 %v9353_v41 }
 0x2ab   : > { %2143 = vmatmul.mubr.bf16.gmra.mxu1 %v9365_v52 }
 0x2b3   : > { %v1881_v51 = vpop.f32.mrf.mxu1  ;;  %v1801_v16 = vpop.f32.mrf.mxu0 }
 0x2b4   : > { %v2474_v40 = vmul.f32 %v9414_v62, %v1881_v51 }
 0x2b5   : > { %v9419_v44 = vpop.f32.mrf.mxu1 }
 0x2b6   : > { %13870 = vst [vmem:[#allocation53_spill] sm:$0xff] %v9419_v44  ;;  %v9430_v26 = vadd.f32 %v9424_v37, %v2474_v40 }
 0x2b7   : > { %v1885_v0 = vpop.f32.mrf.mxu1 }
 0x2b8   : > { %v2480_v56 = vmul.f32 %v9414_v62, %v1885_v0  ;;  %13873 = vst [vmem:[#allocation56_spill] sm:$0xff] %v9430_v26  ;;  %v1646_v26 = vld [vmem:[%s13843_s4 + $0xb8] sm:$0xff] }
 0x2b9   : > { %v9427_v38 = vpop.f32.mrf.mxu1  ;;  %v1712_v50 = vunpack.c.l.s8.bf16 %v1646_v26 }
 0x2ba   : > { %13872 = vst [vmem:[#allocation55_spill] sm:$0xff] %v9427_v38  ;;  %v9433_v8 = vadd.f32 %v9424_v37, %v2480_v56 }
 0x2bb   : > { %v1891_v58 = vpop.f32.mrf.mxu1 }
 0x2bc   : > { %13874 = vst [vmem:[#allocation57_spill] sm:$0xff] %v9433_v8  ;;  %v2486_v15 = vmul.f32 %v9414_v62, %v1891_v58 }
 0x2bd   : > { %v9437_v55 = vpop.f32.mrf.mxu1 }
 0x2be   : > { %13875 = vst [vmem:[#allocation58_spill] sm:$0xff] %v9437_v55  ;;  %v9444_v9 = vadd.f32 %v9424_v37, %v2486_v15 }
 0x2bf   : > { %v1895_v49 = vpop.f32.mrf.mxu1 }
 0x2c0   : > { %v2492_v27 = vmul.f32 %v9414_v62, %v1895_v49  ;;  %13877 = vst [vmem:[#allocation60_spill] sm:$0xff] %v9444_v9 }
 0x2c1   : > { %v9441_v34 = vpop.f32.mrf.mxu1 }
 0x2c2   : > { %13876 = vst [vmem:[#allocation59_spill] sm:$0xff] %v9441_v34  ;;  %v9447_v2 = vadd.f32 %v9424_v37, %v2492_v27  ;;  %v1639_v34 = vld [vmem:[%s13843_s4 + $0x80] sm:$0xff] }
 0x2c3   : > { %v1901_v60 = vpop.f32.mrf.mxu1  ;;  %v1699_v38 = vunpack.c.l.s8.bf16 %v1639_v34 }
 0x2c4   : > { %13878 = vst [vmem:[#allocation61_spill] sm:$0xff] %v9447_v2  ;;  %v2498_v18 = vmul.f32 %v9414_v62, %v1901_v60 }
 0x2c5   : > { %v9451_v23 = vpop.f32.mrf.mxu1 }
 0x2c6   : > { %13879 = vst [vmem:[#allocation62_spill] sm:$0xff] %v9451_v23  ;;  %v9458_v22 = vadd.f32 %v9424_v37, %v2498_v18 }
 0x2c7   : > { %v1905_v1 = vpop.f32.mrf.mxu1 }
 0x2c8   : > { %v2504_v61 = vmul.f32 %v9414_v62, %v1905_v1  ;;  %13881 = vst [vmem:[#allocation64_spill] sm:$0xff] %v9458_v22 }
 0x2c9   : > { %v9455_v7 = vpop.f32.mrf.mxu1 }
 0x2ca   : > { %13880 = vst [vmem:[#allocation63_spill] sm:$0xff] %v9455_v7  ;;  %v9461_v11 = vadd.f32 %v9424_v37, %v2504_v61 }
 0x2cb   : > { %v1911_v17 = vpop.f32.mrf.mxu1 }
 0x2cc   : > { %13882 = vst [vmem:[#allocation65_spill] sm:$0xff] %v9461_v11  ;;  %v2510_v0 = vmul.f32 %v9414_v62, %v1911_v17 }
 0x2cd   : > { %v9465_v40 = vpop.f32.mrf.mxu1 }
 0x2ce   : > { %13883 = vst [vmem:[#allocation66_spill] sm:$0xff] %v9465_v40  ;;  %v9472_v49 = vadd.f32 %v9424_v37, %v2510_v0 }
 0x2cf   : > { %v1915_v56 = vpop.f32.mrf.mxu1 }
 0x2d0   : > { %v2516_v58 = vmul.f32 %v9414_v62, %v1915_v56  ;;  %13885 = vst [vmem:[#allocation68_spill] sm:$0xff] %v9472_v49 }
 0x2d1   : > { %v9469_v15 = vpop.f32.mrf.mxu1 }
 0x2d2   : > { %13884 = vst [vmem:[#allocation67_spill] sm:$0xff] %v9469_v15  ;;  %v9475_v27 = vadd.f32 %v9424_v37, %v2516_v58 }
 0x2d3   : > { %v1921_v60 = vpop.f32.mrf.mxu1 }
 0x2d4   : > { %13886 = vst [vmem:[#allocation69_spill] sm:$0xff] %v9475_v27  ;;  %v2522_v61 = vmul.f32 %v9414_v62, %v1921_v60 }
 0x2d5   : > { %v9479_v1 = vpop.f32.mrf.mxu1 }
 0x2d6   : > { %13887 = vst [vmem:[#allocation70_spill] sm:$0xff] %v9479_v1  ;;  %v9486_v42 = vadd.f32 %v9424_v37, %v2522_v61 }
 0x2d7   : > { %v1925_v17 = vpop.f32.mrf.mxu1 }
 0x2d8   : > { %v2528_v51 = vmul.f32 %v9414_v62, %v1925_v17  ;;  %13889 = vst [vmem:[#allocation72_spill] sm:$0xff] %v9486_v42  ;;  %v9508_v42 = vsub.s32 1, %v9403_v28 }
 0x2d9   : > { %v9483_v56 = vpop.f32.mrf.mxu1 }
 0x2da   : > { %13888 = vst [vmem:[#allocation71_spill] sm:$0xff] %v9483_v56  ;;  %v9489_v0 = vadd.f32 %v9424_v37, %v2528_v51  ;;  %13895 = vst [vmem:[#allocation78_spill] sm:$0xff] %v9508_v42  ;;  %v9522_v52 = vrot.slane %v9417_v19, %v9508_v42 }
 0x2db   : > { %v1931_v58 = vpop.f32.mrf.mxu1 }
 0x2dc   : > { %13890 = vst [vmem:[#allocation73_spill] sm:$0xff] %v9489_v0  ;;  %v2534_v13 = vmul.f32 %v9414_v62, %v1931_v58  ;;  %v1803_v0 = vpop.f32.mrf.mxu0 }
 0x2dd   : > { %v9493_v18 = vpop.f32.mrf.mxu1 }
 0x2de   : > { %13891 = vst [vmem:[#allocation74_spill] sm:$0xff] %v9493_v18  ;;  %v9500_v27 = vadd.f32 %v9424_v37, %v2534_v13 }
 0x2df   : > { %v1935_v60 = vpop.f32.mrf.mxu1 }
 0x2e0   : > { %v2540_v49 = vmul.f32 %v9414_v62, %v1935_v60  ;;  %13893 = vst [vmem:[#allocation76_spill] sm:$0xff] %v9500_v27 }
 0x2e1   : > { %v9497_v17 = vpop.f32.mrf.mxu1 }
 0x2e2   : > { %13892 = vst [vmem:[#allocation75_spill] sm:$0xff] %v9497_v17  ;;  %v9503_v61 = vadd.f32 %v9424_v37, %v2540_v49  ;;  %v1805_v17 = vpop.f32.mrf.mxu0  ;;  %v9516_v49 = vrot.slane %v9410_v53, %v9508_v42 }
 0x2e3   : > { %v1941_v51 = vpop.f32.mrf.mxu1  ;;  %v2384_v22 = vmul.f32 %v9414_v62, %v1805_v17  ;;  %v9548_v17 = vsub.s32 2, %v9403_v28 }
 0x2e4   : > { %13894 = vst [vmem:[#allocation77_spill] sm:$0xff] %v9503_v61  ;;  %v2546_v60 = vmul.f32 %v9414_v62, %v1941_v51  ;;  %v1807_v61 = vpop.f32.mrf.mxu0  ;;  %v2379_v41 = vmul.f32 %v9516_v49, %v1803_v0 }
 0x2e5   : > { %v9510_v58 = vpop.f32.mrf.mxu1  ;;  %v9543_v31 = vadd.f32 %v9424_v37, %v2384_v22  ;;  %13903 = vst [vmem:[#allocation86_spill] sm:$0xff] %v9548_v17 }
 0x2e6   : > { %13896 = vst [vmem:[#allocation79_spill] sm:$0xff] %v9510_v58  ;;  %v9525_v27 = vadd.f32 %v9424_v37, %v2546_v60 }
 0x2e7   : > { %v1945_v18 = vpop.f32.mrf.mxu1  ;;  %13902 = vst [vmem:[#allocation85_spill] sm:$0xff] %v9543_v31 }
 0x2e8   : > { %v2552_v13 = vmul.f32 %v9414_v62, %v1945_v18  ;;  %13898 = vst [vmem:[#allocation81_spill] sm:$0xff] %v9525_v27  ;;  %v2378_v18 = vmul.f32 %v9414_v62, %v1801_v16 }
 0x2e9   : > { %v9518_v1 = vpop.f32.mrf.mxu1 }
 0x2ea   : > { %13897 = vst [vmem:[#allocation80_spill] sm:$0xff] %v9518_v1  ;;  %v9528_v51 = vadd.f32 %v9424_v37, %v2552_v13  ;;  %v2385_v1 = vmul.f32 %v9516_v49, %v1807_v61  ;;  %v9539_v60 = vadd.f32 %v9424_v37, %v2378_v18  ;;  %v2603_v13 = vadd.f32 %v9522_v52, %v2379_v41 }
 0x2eb   : > { %v1951_v58 = vpop.f32.mrf.mxu1 }
 0x2ec   : > { %13899 = vst [vmem:[#allocation82_spill] sm:$0xff] %v9528_v51  ;;  %13901 = vst [vmem:[#allocation84_spill] sm:$0xff] %v9539_v60  ;;  %v2609_v16 = vadd.f32 %v9522_v52, %v2385_v1  ;;  %v2558_v0 = vmul.f32 %v9414_v62, %v1951_v58  ;;  %v9563_v1 = vrot.slane %v9410_v53, %v9548_v17  ;;  %v1669_v60 = vld [vmem:[%s13843_s4 + $0x170] sm:$0xff] }
 0x2ed   : > { %v9536_v11 = vpop.f32.mrf.mxu1 }
 0x2ee   : > { %13900 = vst [vmem:[#allocation83_spill] sm:$0xff] %v9536_v11  ;;  %v2795_v27 = vpack.c.bf16 %v2609_v16, %v2603_v13  ;;  %v9556_v41 = vadd.f32 %v9424_v37, %v2558_v0 }
 0x2ef   : > { %v1955_v61 = vpop.f32.mrf.mxu1 }
 0x2f0   : > { %v2564_v18 = vmul.f32 %v9414_v62, %v1955_v61  ;;  %2922 = vmatprep.mubr.bf16.mxu1 %v2795_v27  ;;  %13905 = vst [vmem:[#allocation88_spill] sm:$0xff] %v9556_v41  ;;  %v9572_v27 = vrot.slane %v9417_v19, %v9548_v17  ;;  %v1718_v41 = vunpack.c.h.s8.bf16 %v1646_v26 }
 0x2f1   : > { %v9553_v51 = vpop.f32.mrf.mxu1 }
 0x2f2   : > { %13904 = vst [vmem:[#allocation87_spill] sm:$0xff] %v9553_v51  ;;  %v9559_v22 = vadd.f32 %v9424_v37, %v2564_v18  ;;  %2153 = vmatprep.subr.bf16.mxu0 %v1718_v41  ;;  %v1765_v37 = vunpack.c.h.s8.bf16 %v1669_v60 }
 0x2f3   : > { %v1994_v58 = vpop.f32.mrf.mxu1 }
 0x2f4   : > { %13906 = vst [vmem:[#allocation89_spill] sm:$0xff] %v9559_v22  ;;  %v2380_v16 = vmul.f32 %v9563_v1, %v1994_v58 }
 0x2f5   : > { %v9567_v13 = vpop.f32.mrf.mxu1 }
 0x2f6   : > { %v9578_v11 = vadd.f32 %v9572_v27, %v2380_v16 }
 0x2f7   : > { %v1998_v0 = vpop.f32.mrf.mxu1 }
 0x2f8   : > { %v2386_v61 = vmul.f32 %v9563_v1, %v1998_v0 }
 0x2f9   : > { %v9575_v18 = vpop.f32.mrf.mxu1 }
 0x2fa   : > { %v9581_v51 = vadd.f32 %v9572_v27, %v2386_v61 }
 0x2fb   : > { %v2004_v42 = vpop.f32.mrf.mxu1 }
 0x2fc   : > { %v2392_v17 = vmul.f32 %v9563_v1, %v2004_v42 }
 0x2fd   : > { %v9585_v58 = vpop.f32.mrf.mxu1 }
 0x2fe   : > { %v9592_v40 = vadd.f32 %v9572_v27, %v2392_v17 }
 0x2ff   : > { %v2008_v22 = vpop.f32.mrf.mxu1 }
 0x300   : > { %v2398_v56 = vmul.f32 %v9563_v1, %v2008_v22 }
 0x301   : > { %v9589_v0 = vpop.f32.mrf.mxu1 }
 0x302   : > { %v9595_v16 = vadd.f32 %v9572_v27, %v2398_v56 }
 0x303   : > { %v2014_v61 = vpop.f32.mrf.mxu1 }
 0x304   : > { %v2404_v42 = vmul.f32 %v9563_v1, %v2014_v61 }
 0x305   : > { %v9599_v47 = vpop.f32.mrf.mxu1 }
 0x306   : > { %v9606_v17 = vadd.f32 %v9572_v27, %v2404_v42  ;;  %v1645_v42 = vld [vmem:[%s13843_s4 + $0xb0] sm:$0xff] }
 0x307   : > { %v2018_v9 = vpop.f32.mrf.mxu1  ;;  %v1717_v48 = vunpack.c.h.s8.bf16 %v1645_v42 }
 0x308   : > { %v2410_v22 = vmul.f32 %v9563_v1, %v2018_v9 }
 0x309   : > { %v9603_v2 = vpop.f32.mrf.mxu1  ;;  %2154 = vmatpush1.bf16.msra.mxu0 %v1717_v48 }
 0x30a   : > { %v9609_v56 = vadd.f32 %v9572_v27, %v2410_v22  ;;  %2155 = vmatprep.subr.bf16.mxu0 %v1712_v50 }
 0x30b   : > { %v2024_v33 = vpop.f32.mrf.mxu1 }
 0x30c   : > { %v2416_v23 = vmul.f32 %v9563_v1, %v2024_v33  ;;  %v1705_v33 = vunpack.c.h.s8.bf16 %v1639_v34  ;;  %v1687_v34 = vunpack.c.l.s8.bf16 %v1633_v4 }
 0x30d   : > { %v9613_v15 = vpop.f32.mrf.mxu1 }
 0x30e   : > { %v9622_v22 = vadd.f32 %v9572_v27, %v2416_v23  ;;  %v1711_v23 = vunpack.c.l.s8.bf16 %v1645_v42  ;;  %v1634_v42 = vld [vmem:[%s13843_s4 + $0x58] sm:$0xff] }
 0x30f   : > { %v2028_v61 = vpop.f32.mrf.mxu1  ;;  %v1694_v50 = vunpack.c.h.s8.bf16 %v1634_v42  ;;  %v1688_v36 = vunpack.c.l.s8.bf16 %v1634_v42 }
 0x310   : > { %v2422_v57 = vmul.f32 %v9563_v1, %v2028_v61  ;;  %2156 = vmatpush1.bf16.msra.mxu0 %v1711_v23  ;;  %v1693_v23 = vunpack.c.h.s8.bf16 %v1633_v4 }
 0x311   : > { %v9617_v9 = vpop.f32.mrf.mxu1 }
 0x312   : > { %v9625_v8 = vadd.f32 %v9572_v27, %v2422_v57  ;;  %v1640_v57 = vld [vmem:[%s13843_s4 + $0x88] sm:$0xff] }
 0x313   : > { %v9627_v7 = vpop.f32.mrf.mxu1  ;;  %v1706_v44 = vunpack.c.h.s8.bf16 %v1640_v57  ;;  %v1700_v20 = vunpack.c.l.s8.bf16 %v1640_v57 }
 0x315   : > { %v9631_v61 = vpop.f32.mrf.mxu1  ;;  %2157 = vmatprep.subr.bf16.mxu0 %v1706_v44 }
 0x316   : > { %2158 = vmatpush1.bf16.msra.mxu0 %v1705_v33  ;;  %v9650_v33 = vsub.s32 3, %v9403_v28 }
 0x317   : > { %v9633_v55 = vpop.f32.mrf.mxu1  ;;  %2159 = vmatprep.subr.bf16.mxu0 %v1700_v20  ;;  %v1681_v20 = vunpack.c.h.s8.bf16 %v1627_v32 }
 0x318   : > { %13907 = vst [vmem:[#allocation90_spill] sm:$0xff] %v9650_v33  ;;  %v9665_v21 = vrot.slane %v9417_v19, %v9650_v33 }
 0x319   : > { %v9635_v5 = vpop.f32.mrf.mxu1 }
 0x31a   : > { %2160 = vmatpush1.bf16.msra.mxu0 %v1699_v38  ;;  %v9656_v38 = vrot.slane %v9410_v53, %v9650_v33 }
 0x31b   : > { %v9639_v63 = vpop.f32.mrf.mxu1  ;;  %2161 = vmatprep.subr.bf16.mxu0 %v1694_v50 }
 0x31d   : > { %v9641_v41 = vpop.f32.mrf.mxu1 }
 0x31e   : > { %2162 = vmatpush1.bf16.msra.mxu0 %v1693_v23 }
 0x31f   : > { %v9643_v48 = vpop.f32.mrf.mxu1  ;;  %2163 = vmatprep.subr.bf16.mxu0 %v1688_v36  ;;  %v9661_v36 = vpop.f32.mrf.mxu0 }
 0x321   : > { %v2050_v26 = vpop.f32.mrf.mxu1  ;;  %v9677_v32 = vpop.f32.mrf.mxu0 }
 0x322   : > { %2164 = vmatpush1.bf16.msra.mxu0 %v1687_v34  ;;  %v1676_v34 = vunpack.c.l.s8.bf16 %v1628_v59 }
 0x323   : > { %v9647_v29 = vpop.f32.mrf.mxu1  ;;  %2165 = vmatprep.subr.bf16.mxu0 %v1682_v10  ;;  %v1670_v10 = vld [vmem:[%s13843_s4 + $0x178] sm:$0xff] }
 0x325   : > { %v2056_v14 = vpop.f32.mrf.mxu1 }
 0x326   : > { %2166 = vmatpush1.bf16.msra.mxu0 %v1681_v20 }
 0x327   : > { %v2058_v44 = vpop.f32.mrf.mxu1  ;;  %2167 = vmatprep.subr.bf16.mxu0 %v1676_v34 }
 0x329   : > { %v2060_v57 = vpop.f32.mrf.mxu1 }
 0x32a   : > { %v2459_v42 = vmul.f32 %v9656_v38, %v2060_v57  ;;  %v2453_v57 = vmul.f32 %v9656_v38, %v2056_v14  ;;  %2168 = vmatpush1.bf16.msra.mxu0 %v1675_v45 }
 0x32b   : > { %v2064_v12 = vpop.f32.mrf.mxu1 }
 0x32c   : > { %v2464_v53 = vmul.f32 %v9563_v1, %v2064_v12  ;;  %v2683_v31 = vadd.f32 %v9665_v21, %v2459_v42  ;;  %v2677_v42 = vadd.f32 %v9665_v21, %v2453_v57  ;;  %v1760_v57 = vunpack.c.l.s8.bf16 %v1670_v10 }
 0x32d   : > { %v2066_v50 = vpop.f32.mrf.mxu1 }
 0x32e   : > { %v2465_v4 = vmul.f32 %v9656_v38, %v2066_v50  ;;  %v2688_v14 = vadd.f32 %v9572_v27, %v2464_v53  ;;  %v2839_v53 = vpack.c.bf16 %v2683_v31, %v2677_v42 }
 0x32f   : > { %v2068_v23 = vpop.f32.mrf.mxu1 }
 0x330   : > { %v2470_v28 = vmul.f32 %v9563_v1, %v2068_v23  ;;  %v1766_v23 = vunpack.c.h.s8.bf16 %v1670_v10  ;;  %v2689_v19 = vadd.f32 %v9665_v21, %v2465_v4  ;;  %v2458_v4 = vmul.f32 %v9563_v1, %v2058_v44 }
 0x331   : > { %v2070_v35 = vpop.f32.mrf.mxu1  ;;  %v1759_v44 = vunpack.c.l.s8.bf16 %v1669_v60 }
 0x332   : > { %v2471_v50 = vmul.f32 %v9656_v38, %v2070_v35  ;;  %v2694_v59 = vadd.f32 %v9572_v27, %v2470_v28  ;;  %2169 = vmatprep.subr.bf16.mxu0 %v1766_v23  ;;  %v2447_v28 = vmul.f32 %v9656_v38, %v2050_v26  ;;  %v1664_v23 = vld [vmem:[%s13843_s4 + $0x148] sm:$0xff] }
 0x333   : > { %v2074_v20 = vpop.f32.mrf.mxu1  ;;  %2170 = vmatpush2.bf16.msra.mxu0 %v1765_v37  ;;  %v1754_v31 = vunpack.c.h.s8.bf16 %v1664_v23  ;;  %v2682_v37 = vadd.f32 %v9572_v27, %v2458_v4 }
 0x334   : > { %v2695_v33 = vadd.f32 %v9665_v21, %v2471_v50  ;;  %v2476_v12 = vmul.f32 %v9563_v1, %v2074_v20  ;;  %v2840_v50 = vpack.c.bf16 %v2694_v59, %v2688_v14  ;;  %v1663_v59 = vld [vmem:[%s13843_s4 + $0x140] sm:$0xff]  ;;  %2171 = vmatprep.subr.bf16.mxu0 %v1760_v57 }
 0x335   : > { %v9680_v35 = vpop.f32.mrf.mxu1 }
 0x336   : > { %13908 = vst [vmem:[#allocation91_spill] sm:$0xff] %v9680_v35  ;;  %v2841_v34 = vpack.c.bf16 %v2695_v33, %v2689_v19  ;;  %v9686_v3 = vadd.f32 %v9572_v27, %v2476_v12  ;;  %v9689_v35 = vpop.f32.mrf.mxu0  ;;  %v2452_v33 = vmul.f32 %v9563_v1, %v9647_v29  ;;  %v2441_v19 = vmul.f32 %v9656_v38, %v9641_v41 }
 0x337   : > { %v2078_v20 = vpop.f32.mrf.mxu1  ;;  %v2671_v29 = vadd.f32 %v9665_v21, %v2447_v28  ;;  %2172 = vmatpush2.bf16.msra.mxu0 %v1759_v44  ;;  %v1753_v41 = vunpack.c.h.s8.bf16 %v1663_v59  ;;  %v2435_v28 = vmul.f32 %v9656_v38, %v9635_v5  ;;  %v1747_v5 = vunpack.c.l.s8.bf16 %v1663_v59 }
 0x338   : > { %13909 = vst [vmem:[#allocation92_spill] sm:$0xff] %v9686_v3  ;;  %v2482_v45 = vmul.f32 %v9563_v1, %v2078_v20  ;;  %2890 = vmatprep.subr.bf16.mxu1 %v2841_v34  ;;  %v9707_v42 = vpop.f32.mrf.mxu0  ;;  %v2676_v34 = vadd.f32 %v9572_v27, %v2452_v33  ;;  %2173 = vmatprep.subr.bf16.mxu0 %v1754_v31  ;;  %v1748_v31 = vunpack.c.l.s8.bf16 %v1664_v23 }
 0x339   : > { %v9693_v26 = vpop.f32.mrf.mxu1  ;;  %2891 = vmatpush1.bf16.xpose.msra.mxu1 %v2840_v50  ;;  %v2665_v4 = vadd.f32 %v9665_v21, %v2441_v19  ;;  %v2446_v20 = vmul.f32 %v9563_v1, %v9643_v48  ;;  %v2440_v19 = vmul.f32 %v9563_v1, %v9639_v63  ;;  %v1658_v48 = vld [vmem:[%s13843_s4 + $0x118] sm:$0xff]  ;;  %v2659_v63 = vadd.f32 %v9665_v21, %v2435_v28 }
 0x33a   : > { %v9700_v12 = vadd.f32 %v9572_v27, %v2482_v45  ;;  %2892 = vmatprep.subr.bf16.mxu1 %v2839_v53  ;;  %v2838_v45 = vpack.c.bf16 %v2682_v37, %v2676_v34  ;;  %v1657_v37 = vld [vmem:[%s13843_s4 + $0x110] sm:$0xff]  ;;  %v2423_v28 = vmul.f32 %v9656_v38, %v9617_v9 }
 0x33b   : > { %v2084_v10 = vpop.f32.mrf.mxu1  ;;  %v2837_v44 = vpack.c.bf16 %v2671_v29, %v2665_v4  ;;  %2174 = vmatpush2.bf16.msra.mxu0 %v1753_v41  ;;  %v1742_v29 = vunpack.c.h.s8.bf16 %v1658_v48  ;;  %v2670_v23 = vadd.f32 %v9572_v27, %v2446_v20  ;;  %v1735_v9 = vunpack.c.l.s8.bf16 %v1657_v37 }
 0x33c   : > { %13910 = vst [vmem:[#allocation93_spill] sm:$0xff] %v9700_v12  ;;  %v2488_v60 = vmul.f32 %v9563_v1, %v2084_v10  ;;  %v9721_v10 = vpop.f32.mrf.mxu0  ;;  %2175 = vmatprep.subr.bf16.mxu0 %v1748_v31 }
 0x33d   : > { %v9710_v50 = vpop.f32.mrf.mxu1 }
 0x33e   : > { %v9718_v57 = vadd.f32 %v9572_v27, %v2488_v60  ;;  %v2429_v60 = vmul.f32 %v9656_v38, %v9631_v61  ;;  %v1741_v61 = vunpack.c.h.s8.bf16 %v1657_v37 }
 0x33f   : > { %v2088_v53 = vpop.f32.mrf.mxu1  ;;  %2176 = vmatpush2.bf16.msra.mxu0 %v1747_v5 }
 0x340   : > { %13911 = vst [vmem:[#allocation94_spill] sm:$0xff] %v9718_v57  ;;  %v2494_v33 = vmul.f32 %v9563_v1, %v2088_v53  ;;  %v2664_v53 = vadd.f32 %v9572_v27, %v2440_v19  ;;  %2177 = vmatprep.subr.bf16.mxu0 %v1742_v29  ;;  %v2653_v20 = vadd.f32 %v9665_v21, %v2429_v60  ;;  %v1736_v29 = vunpack.c.l.s8.bf16 %v1658_v48 }
 0x341   : > { %v9725_v14 = vpop.f32.mrf.mxu1  ;;  %2893 = vmatpush1.bf16.xpose.msra.mxu1 %v2838_v45  ;;  %v9739_v45 = vpop.f32.mrf.mxu0  ;;  %v2428_v60 = vmul.f32 %v9563_v1, %v9627_v7  ;;  %v2647_v7 = vadd.f32 %v9665_v21, %v2423_v28 }
 0x342   : > { %v9732_v34 = vadd.f32 %v9572_v27, %v2494_v33  ;;  %2894 = vmatprep.subr.bf16.mxu1 %v2837_v44  ;;  %v2434_v44 = vmul.f32 %v9563_v1, %v9633_v55  ;;  %v2836_v31 = vpack.c.bf16 %v2670_v23, %v2664_v53  ;;  %v2835_v4 = vpack.c.bf16 %v2659_v63, %v2653_v20  ;;  %v1652_v55 = vld [vmem:[%s13843_s4 + $0xe8] sm:$0xff]  ;;  %v1651_v23 = vld [vmem:[%s13843_s4 + $0xe0] sm:$0xff] }
 0x343   : > { %v2094_v41 = vpop.f32.mrf.mxu1  ;;  %v9753_v3 = vpop.f32.mrf.mxu0  ;;  %2178 = vmatpush2.bf16.msra.mxu0 %v1741_v61  ;;  %v1730_v63 = vunpack.c.h.s8.bf16 %v1652_v55 }
 0x344   : > { %13912 = vst [vmem:[#allocation95_spill] sm:$0xff] %v9732_v34  ;;  %v2500_v59 = vmul.f32 %v9563_v1, %v2094_v41  ;;  %2179 = vmatprep.subr.bf16.mxu0 %v1736_v29  ;;  %v2658_v48 = vadd.f32 %v9572_v27, %v2434_v44  ;;  %v2411_v44 = vmul.f32 %v9656_v38, %v9603_v2 }
 0x345   : > { %v9742_v33 = vpop.f32.mrf.mxu1 }
 0x346   : > { %v9750_v5 = vadd.f32 %v9572_v27, %v2500_v59  ;;  %v2417_v59 = vmul.f32 %v9656_v38, %v9613_v15  ;;  %v1729_v15 = vunpack.c.h.s8.bf16 %v1651_v23 }
 0x347   : > { %v2098_v41 = vpop.f32.mrf.mxu1  ;;  %2180 = vmatpush2.bf16.msra.mxu0 %v1735_v9 }
 0x348   : > { %13913 = vst [vmem:[#allocation96_spill] sm:$0xff] %v9750_v5  ;;  %v2506_v19 = vmul.f32 %v9563_v1, %v2098_v41  ;;  %v2652_v41 = vadd.f32 %v9572_v27, %v2428_v60  ;;  %2181 = vmatprep.subr.bf16.mxu0 %v1730_v63  ;;  %v1724_v60 = vunpack.c.l.s8.bf16 %v1652_v55  ;;  %v1723_v63 = vunpack.c.l.s8.bf16 %v1651_v23 }
 0x349   : > { %v9757_v12 = vpop.f32.mrf.mxu1  ;;  %2895 = vmatpush1.bf16.xpose.msra.mxu1 %v2836_v31  ;;  %v9771_v31 = vpop.f32.mrf.mxu0 }
 0x34a   : > { %v9764_v53 = vadd.f32 %v9572_v27, %v2506_v19  ;;  %2896 = vmatprep.subr.bf16.mxu1 %v2835_v4  ;;  %v2641_v4 = vadd.f32 %v9665_v21, %v2417_v59  ;;  %v2834_v28 = vpack.c.bf16 %v2658_v48, %v2652_v41  ;;  %v2405_v59 = vmul.f32 %v9656_v38, %v9599_v47 }
 0x34b   : > { %v2104_v61 = vpop.f32.mrf.mxu1  ;;  %v9783_v9 = vpop.f32.mrf.mxu0  ;;  %2182 = vmatpush2.bf16.msra.mxu0 %v1729_v15 }
 0x34c   : > { %v2512_v37 = vmul.f32 %v9563_v1, %v2104_v61  ;;  %v2833_v57 = vpack.c.bf16 %v2647_v7, %v2641_v4  ;;  %2183 = vmatprep.subr.bf16.mxu0 %v1724_v60  ;;  %v2635_v7 = vadd.f32 %v9665_v21, %v2411_v44  ;;  %v2629_v23 = vadd.f32 %v9665_v21, %v2405_v59 }
 0x34d   : > { %v9774_v19 = vpop.f32.mrf.mxu1  ;;  %v9797_v55 = vpop.f32.mrf.mxu0 }
 0x34e   : > { %v9780_v20 = vadd.f32 %v9572_v27, %v2512_v37  ;;  %v2831_v41 = vpack.c.bf16 %v2635_v7, %v2629_v23  ;;  %v13915_v7 = vpack.c.bf16 %v9609_v56, %v9606_v17  ;;  %v2381_v23 = vmul.f32 %v9656_v38, %v9567_v13  ;;  %v13921_v37 = vld [vmem:[#allocation84_spill] sm:$0xff] }
 0x34f   : > { %v2108_v29 = vpop.f32.mrf.mxu1  ;;  %2184 = vmatpush2.bf16.msra.mxu0 %v1723_v63  ;;  %v9807_v4 = vpop.f32.mrf.mxu0  ;;  %v13916_v13 = vpack.c.bf16 %v9595_v16, %v9592_v40 }
 0x350   : > { %v2518_v61 = vmul.f32 %v9563_v1, %v2108_v29  ;;  %v2393_v29 = vmul.f32 %v9656_v38, %v9585_v58 }
 0x351   : > { %v9785_v34 = vpop.f32.mrf.mxu1  ;;  %2897 = vmatpush1.bf16.xpose.msra.mxu1 %v2834_v28  ;;  %v13914_v28 = vpack.c.bf16 %v9625_v8, %v9622_v22  ;;  %v2387_v8 = vmul.f32 %v9656_v38, %v9575_v18 }
 0x352   : > { %v9790_v2 = vadd.f32 %v9572_v27, %v2518_v61  ;;  %2898 = vmatprep.subr.bf16.mxu1 %v2833_v57  ;;  %2186 = vmatmul.mubr.bf16.vlgmr.msra.gmra.mxu0 %v9271_v24  ;;  %v2399_v57 = vmul.f32 %v9656_v38, %v9589_v0  ;;  %v9820_v0 = vpop.f32.mrf.mxu0  ;;  %v2617_v63 = vadd.f32 %v9665_v21, %v2393_v29 }
 0x353   : > { %v9792_v48 = vpop.f32.mrf.mxu1  ;;  %2195 = vmatprep.mubr.bf16.mxu0 %v9275_v43 }
 0x354   : > { %v2623_v24 = vadd.f32 %v9665_v21, %v2399_v57  ;;  %v9828_v59 = vpop.f32.mrf.mxu0 }
 0x355   : > { %v9799_v15 = vpop.f32.mrf.mxu1 }
 0x356   : > { %v2829_v22 = vpack.c.bf16 %v2623_v24, %v2617_v63  ;;  %v2391_v63 = vmul.f32 %v9516_v49, %v9677_v32 }
 0x357   : > { %v9802_v47 = vpop.f32.mrf.mxu1 }
 0x358   : > { %v2615_v32 = vadd.f32 %v9522_v52, %v2391_v63 }
 0x359   : > { %v9810_v44 = vpop.f32.mrf.mxu1  ;;  %2899 = vmatpush1.bf16.xpose.msra.mxu1 %v13914_v28  ;;  %v2605_v28 = vadd.f32 %v9665_v21, %v2381_v23 }
 0x35a   : > { %2900 = vmatprep.subr.bf16.mxu1 %v2831_v41  ;;  %2196 = vmatmul.mubr.bf16.gmra.mxu0 %v9285_v6  ;;  %v2611_v6 = vadd.f32 %v9665_v21, %v2387_v8  ;;  %v9837_v41 = vpop.f32.mrf.mxu0  ;;  %v2397_v8 = vmul.f32 %v9516_v49, %v9707_v42 }
 0x35b   : > { %v9817_v61 = vpop.f32.mrf.mxu1  ;;  %2205 = vmatprep.mubr.bf16.mxu0 %v9289_v39 }
 0x35c   : > { %v2827_v39 = vpack.c.bf16 %v2611_v6, %v2605_v28  ;;  %v9841_v24 = vpop.f32.mrf.mxu0  ;;  %v2621_v42 = vadd.f32 %v9522_v52, %v2397_v8 }
 0x35d   : > { %v2126_v60 = vpop.f32.mrf.mxu1 }
 0x35f   : > { %v9823_v43 = vpop.f32.mrf.mxu1 }
 0x361   : > { %v2130_v58 = vpop.f32.mrf.mxu1  ;;  %2901 = vmatpush1.bf16.xpose.msra.mxu1 %v13915_v7 }
 0x362   : > { %2902 = vmatprep.subr.bf16.mxu1 %v2829_v22  ;;  %2206 = vmatmul.mubr.bf16.gmra.mxu0 %v9299_v30  ;;  %v9851_v22 = vpop.f32.mrf.mxu0 }
 0x363   : > { %v2134_v57 = vpop.f32.mrf.mxu1  ;;  %2215 = vmatprep.mubr.bf16.mxu0 %v9303_v46 }
 0x364   : > { %v9861_v28 = vpop.f32.mrf.mxu0 }
 0x365   : > { %v2136_v18 = vpop.f32.mrf.mxu1 }
 0x366   : > { %v2549_v30 = vmul.f32 %v9656_v38, %v2136_v18 }
 0x367   : > { %v2138_v29 = vpop.f32.mrf.mxu1 }
 0x368   : > { %v2773_v18 = vadd.f32 %v9665_v21, %v2549_v30 }
 0x369   : > { %v2140_v17 = vpop.f32.mrf.mxu1  ;;  %2903 = vmatpush1.bf16.xpose.msra.mxu1 %v13916_v13  ;;  %v13917_v13 = vpack.c.bf16 %v9581_v51, %v9578_v11  ;;  %v2403_v11 = vmul.f32 %v9516_v49, %v9739_v45  ;;  %v2797_v51 = vpack.c.bf16 %v2621_v42, %v2615_v32  ;;  %v13919_v45 = vld [vmem:[#allocation54_spill] sm:$0xff]  ;;  %v13920_v42 = vld [vmem:[#allocation85_spill] sm:$0xff] }
 0x36a   : > { %2904 = vmatprep.subr.bf16.mxu1 %v2827_v39  ;;  %v2555_v23 = vmul.f32 %v9656_v38, %v2140_v17  ;;  %2216 = vmatmul.mubr.bf16.gmra.mxu0 %v9313_v25  ;;  %v13922_v5 = vpack.c.bf16 %v13920_v42, %v13921_v37 }
 0x36b   : > { %v2144_v56 = vpop.f32.mrf.mxu1  ;;  %2225 = vmatprep.mubr.bf16.mxu0 %v9317_v54  ;;  %v2390_v54 = vmul.f32 %v9414_v62, %v9661_v36  ;;  %v2537_v36 = vmul.f32 %v9656_v38, %v2126_v60 }
 0x36c   : > { %v2560_v7 = vmul.f32 %v9563_v1, %v2144_v56  ;;  %v2779_v25 = vadd.f32 %v9665_v21, %v2555_v23  ;;  %v2548_v23 = vmul.f32 %v9563_v1, %v2134_v57  ;;  %v2627_v57 = vadd.f32 %v9522_v52, %v2403_v11 }
 0x36d   : > { %v2146_v46 = vpop.f32.mrf.mxu1  ;;  %v2614_v32 = vadd.f32 %v13919_v45, %v2390_v54  ;;  %v2421_v54 = vmul.f32 %v9516_v49, %v9820_v0  ;;  %v2536_v11 = vmul.f32 %v9563_v1, %v9817_v61 }
 0x36e   : > { %v2561_v40 = vmul.f32 %v9656_v38, %v2146_v46  ;;  %v2784_v39 = vadd.f32 %v9572_v27, %v2560_v7  ;;  %v2396_v7 = vmul.f32 %v9414_v62, %v9689_v35  ;;  %v9880_v46 = vpop.f32.mrf.mxu0  ;;  %v2855_v35 = vpack.c.bf16 %v2779_v25, %v2773_v18 }
 0x36f   : > { %v2148_v16 = vpop.f32.mrf.mxu1  ;;  %v2761_v18 = vadd.f32 %v9665_v21, %v2537_v36  ;;  %v2402_v25 = vmul.f32 %v9414_v62, %v9721_v10  ;;  %v2525_v10 = vmul.f32 %v9656_v38, %v9799_v15  ;;  %v2645_v36 = vadd.f32 %v9522_v52, %v2421_v54 }
 0x370   : > { %v2566_v6 = vmul.f32 %v9563_v1, %v2148_v16  ;;  %v2785_v56 = vadd.f32 %v9665_v21, %v2561_v40  ;;  %v2554_v40 = vmul.f32 %v9563_v1, %v2138_v29  ;;  %v9894_v29 = vpop.f32.mrf.mxu0  ;;  %v2620_v37 = vadd.f32 %v13919_v45, %v2396_v7 }
 0x371   : > { %v2150_v17 = vpop.f32.mrf.mxu1  ;;  %2905 = vmatpush1.bf16.xpose.msra.mxu1 %v13917_v13  ;;  %v2542_v7 = vmul.f32 %v9563_v1, %v9823_v43  ;;  %v2626_v0 = vadd.f32 %v13919_v45, %v2402_v25  ;;  %v2760_v15 = vadd.f32 %v9572_v27, %v2536_v11 }
 0x372   : > { %v2790_v63 = vadd.f32 %v9572_v27, %v2566_v6  ;;  %v2567_v8 = vmul.f32 %v9656_v38, %v2150_v17  ;;  %v2409_v6 = vmul.f32 %v9516_v49, %v9771_v31  ;;  %v2543_v17 = vmul.f32 %v9656_v38, %v2130_v58 }
 0x373   : > { %v2772_v31 = vadd.f32 %v9572_v27, %v2548_v23  ;;  %v2778_v60 = vadd.f32 %v9572_v27, %v2554_v40  ;;  %v2796_v40 = vpack.c.bf16 %v2620_v37, %v2614_v32  ;;  %v2414_v32 = vmul.f32 %v9414_v62, %v9783_v9 }
 0x374   : > { %v2791_v30 = vadd.f32 %v9665_v21, %v2567_v8  ;;  %v2856_v16 = vpack.c.bf16 %v2790_v63, %v2784_v39  ;;  %v13918_v8 = vld [vmem:[#allocation39_spill] sm:$0xff]  ;;  %v2633_v58 = vadd.f32 %v9522_v52, %v2409_v6  ;;  %v2767_v39 = vadd.f32 %v9665_v21, %v2543_v17  ;;  %v13925_v17 = vld [vmem:[#allocation44_spill] sm:$0xff] }
 0x375   : > { %2226 = vmatmul.mubr.bf16.gmra.mxu0 %v13918_v8  ;;  %v2415_v63 = vmul.f32 %v9516_v49, %v9797_v55  ;;  %v13924_v6 = vld [vmem:[#allocation43_spill] sm:$0xff]  ;;  %v2513_v37 = vmul.f32 %v9656_v38, %v9774_v19  ;;  %v2519_v9 = vmul.f32 %v9656_v38, %v9785_v34 }
 0x376   : > { %v2857_v13 = vpack.c.bf16 %v2791_v30, %v2785_v56  ;;  %v2408_v56 = vmul.f32 %v9414_v62, %v9753_v3  ;;  %v1857_v30 = vpop.f32.mrf.mxu0  ;;  %v2799_v23 = vpack.c.bf16 %v2633_v58, %v2627_v57  ;;  %v2531_v3 = vmul.f32 %v9656_v38, %v9810_v44 }
 0x377   : > { %v2853_v55 = vpack.c.bf16 %v2767_v39, %v2761_v18  ;;  %v2639_v43 = vadd.f32 %v9522_v52, %v2415_v63  ;;  %v2766_v44 = vadd.f32 %v9572_v27, %v2542_v7  ;;  %v2427_v57 = vmul.f32 %v9516_v49, %v9837_v41 }
 0x378   : > { %2923 = vmatmul.mubr.bf16.vlgmr.msra.gmra.mxu1 %v13922_v5  ;;  %2987 = vmatprep.subr.bf16.mxu1 %v2857_v13  ;;  %v13923_v5 = vld [vmem:[#allocation40_spill] sm:$0xff]  ;;  %v2632_v61 = vadd.f32 %v13919_v45, %v2408_v56  ;;  %v2749_v13 = vadd.f32 %v9665_v21, %v2525_v10  ;;  %v2530_v58 = vmul.f32 %v9563_v1, %v9802_v47  ;;  %v13926_v56 = vld [vmem:[#allocation47_spill] sm:$0xff] }
 0x379   : > { %2988 = vmatpush1.bf16.xpose.msra.mxu1 %v2856_v16  ;;  %2930 = vmatprep.mubr.bf16.mxu1 %v2797_v51  ;;  %v2854_v51 = vpack.c.bf16 %v2778_v60, %v2772_v31  ;;  %v9919_v16 = vpop.f32.mrf.mxu0  ;;  %v2801_v31 = vpack.c.bf16 %v2645_v36, %v2639_v43  ;;  %v2524_v60 = vmul.f32 %v9563_v1, %v9792_v48  ;;  %v13927_v48 = vld [vmem:[#allocation48_spill] sm:$0xff] }
 0x37a   : > { %2989 = vmatprep.subr.bf16.mxu1 %v2855_v35  ;;  %2235 = vmatprep.mubr.bf16.mxu0 %v13923_v5  ;;  %v2755_v35 = vadd.f32 %v9665_v21, %v2531_v3  ;;  %v2798_v42 = vpack.c.bf16 %v2632_v61, %v2626_v0  ;;  %v2852_v18 = vpack.c.bf16 %v2766_v44, %v2760_v15  ;;  %v13929_v43 = vld [vmem:[#allocation28_spill] sm:$0xff] }
 0x37b   : > { %v1863_v8 = vpop.f32.mrf.mxu0  ;;  %v2433_v39 = vmul.f32 %v9516_v49, %v9851_v22  ;;  %v2420_v41 = vmul.f32 %v9414_v62, %v9807_v4  ;;  %v2651_v1 = vadd.f32 %v9522_v52, %v2427_v57  ;;  %v2748_v47 = vadd.f32 %v9572_v27, %v2524_v60 }
 0x37c   : > { %v2851_v5 = vpack.c.bf16 %v2755_v35, %v2749_v13  ;;  %v2754_v22 = vadd.f32 %v9572_v27, %v2530_v58  ;;  %v2737_v19 = vadd.f32 %v9665_v21, %v2513_v37  ;;  %v2743_v4 = vadd.f32 %v9665_v21, %v2519_v9 }
 0x37d   : > { %2236 = vmatmul.mubr.bf16.gmra.mxu0 %v13924_v6  ;;  %v1865_v25 = vpop.f32.mrf.mxu0  ;;  %v2657_v34 = vadd.f32 %v9522_v52, %v2433_v39  ;;  %v2638_v63 = vadd.f32 %v13919_v45, %v2414_v32  ;;  %v2644_v54 = vadd.f32 %v13919_v45, %v2420_v41  ;;  %v2445_v27 = vmul.f32 %v9516_v49, %v1857_v30  ;;  %v13928_v6 = vld [vmem:[#allocation50_spill] sm:$0xff] }
 0x37e   : > { %2245 = vmatprep.mubr.bf16.mxu0 %v13925_v17  ;;  %v2850_v7 = vpack.c.bf16 %v2754_v22, %v2748_v47  ;;  %v2426_v10 = vmul.f32 %v9414_v62, %v9828_v59  ;;  %v2432_v3 = vmul.f32 %v9414_v62, %v9841_v24  ;;  %v2501_v61 = vmul.f32 %v9656_v38, %v9742_v33 }
 0x37f   : > { %v1867_v11 = vpop.f32.mrf.mxu0  ;;  %v2669_v24 = vadd.f32 %v9522_v52, %v2445_v27  ;;  %v2438_v32 = vmul.f32 %v9414_v62, %v9861_v28  ;;  %v2489_v60 = vmul.f32 %v9656_v38, %v9710_v50  ;;  %v2495_v58 = vmul.f32 %v9656_v38, %v9725_v14 }
 0x380   : > { %2931 = vmatmul.mubr.bf16.gmra.mxu1 %v2796_v40  ;;  %v2800_v40 = vpack.c.bf16 %v2644_v54, %v2638_v63  ;;  %v2650_v30 = vadd.f32 %v13919_v45, %v2426_v10  ;;  %v2656_v36 = vadd.f32 %v13919_v45, %v2432_v3  ;;  %v2725_v33 = vadd.f32 %v9665_v21, %v2501_v61  ;;  %v13935_v63 = vld [vmem:[#allocation32_spill] sm:$0xff] }
 0x381   : > { %2990 = vmatpush1.bf16.xpose.msra.mxu1 %v2854_v51  ;;  %2938 = vmatprep.mubr.bf16.mxu1 %v2799_v23  ;;  %v2439_v51 = vmul.f32 %v9516_v49, %v9880_v46  ;;  %v2803_v23 = vpack.c.bf16 %v2657_v34, %v2651_v1  ;;  %v1871_v0 = vpop.f32.mrf.mxu0  ;;  %v2507_v46 = vmul.f32 %v9656_v38, %v9757_v12  ;;  %v13933_v34 = vld [vmem:[#allocation31_spill] sm:$0xff]  ;;  %v13936_v54 = vld [vmem:[#allocation96_spill] sm:$0xff] }
 0x382   : > { %2991 = vmatprep.subr.bf16.mxu1 %v2853_v55  ;;  %v2849_v55 = vpack.c.bf16 %v2743_v4, %v2737_v19  ;;  %v2451_v12 = vmul.f32 %v9516_v49, %v1863_v8  ;;  %v2457_v13 = vmul.f32 %v9516_v49, %v1867_v11  ;;  %v2802_v35 = vpack.c.bf16 %v2656_v36, %v2650_v30  ;;  %v13934_v19 = vld [vmem:[#allocation91_spill] sm:$0xff] }
 0x383   : > { %v2663_v59 = vadd.f32 %v9522_v52, %v2439_v51  ;;  %v1873_v17 = vpop.f32.mrf.mxu0  ;;  %v2731_v15 = vadd.f32 %v9665_v21, %v2507_v46  ;;  %v13932_v39 = vpack.c.bf16 %v9790_v2, %v9780_v20  ;;  %v2662_v37 = vadd.f32 %v13919_v45, %v2438_v32  ;;  %v13949_v32 = vld [vmem:[#allocation93_spill] sm:$0xff] }
 0x384   : > { %v2675_v28 = vadd.f32 %v9522_v52, %v2451_v12  ;;  %v2450_v14 = vmul.f32 %v9414_v62, %v9919_v16  ;;  %v2456_v41 = vmul.f32 %v9414_v62, %v1865_v25  ;;  %v2719_v20 = vadd.f32 %v9665_v21, %v2495_v58  ;;  %v13946_v12 = vld [vmem:[#allocation35_spill] sm:$0xff] }
 0x385   : > { %2246 = vmatmul.mubr.bf16.gmra.mxu0 %v13926_v56  ;;  %v2805_v44 = vpack.c.bf16 %v2669_v24, %v2663_v59  ;;  %v1875_v57 = vpop.f32.mrf.mxu0  ;;  %v2847_v8 = vpack.c.bf16 %v2731_v15, %v2725_v33  ;;  %v2463_v2 = vmul.f32 %v9516_v49, %v1873_v17  ;;  %v2477_v16 = vmul.f32 %v9656_v38, %v13934_v19  ;;  %v13941_v59 = vld [vmem:[#allocation53_spill] sm:$0xff]  ;;  %v13943_v24 = vld [vmem:[#allocation94_spill] sm:$0xff]  ;;  %v13945_v33 = vld [vmem:[#allocation59_spill] sm:$0xff] }
 0x386   : > { %2255 = vmatprep.mubr.bf16.mxu0 %v13927_v48  ;;  %v2674_v47 = vadd.f32 %v13919_v45, %v2450_v14  ;;  %v2680_v22 = vadd.f32 %v13919_v45, %v2456_v41  ;;  %v2483_v25 = vmul.f32 %v9656_v38, %v9693_v26  ;;  %v13937_v11 = vpack.c.bf16 %v9764_v53, %v13936_v54  ;;  %v13952_v58 = vld [vmem:[#allocation63_spill] sm:$0xff]  ;;  %v13965_v19 = vld [vmem:[#allocation66_spill] sm:$0xff] }
 0x387   : > { %v1877_v9 = vpop.f32.mrf.mxu0  ;;  %v2701_v27 = vadd.f32 %v9665_v21, %v2477_v16  ;;  %v2462_v38 = vmul.f32 %v9414_v62, %v1871_v0  ;;  %v2468_v26 = vmul.f32 %v9414_v62, %v1875_v57  ;;  %v13942_v0 = vld [vmem:[#allocation95_spill] sm:$0xff]  ;;  %v2511_v16 = vmul.f32 %v9516_v49, %v13965_v19 }
 0x388   : > { %2939 = vmatmul.mubr.bf16.gmra.mxu1 %v2798_v42  ;;  %v2444_v42 = vmul.f32 %v9414_v62, %v9894_v29  ;;  %v2681_v29 = vadd.f32 %v9522_v52, %v2457_v13  ;;  %v2469_v1 = vmul.f32 %v9516_v49, %v1877_v9  ;;  %v2707_v10 = vadd.f32 %v9665_v21, %v2483_v25  ;;  %v13948_v13 = vld [vmem:[#allocation58_spill] sm:$0xff] }
 0x389   : > { %2992 = vmatpush1.bf16.xpose.msra.mxu1 %v2852_v18  ;;  %2946 = vmatprep.mubr.bf16.mxu1 %v2801_v31  ;;  %v13930_v31 = vld [vmem:[#allocation29_spill] sm:$0xff]  ;;  %v13931_v18 = vld [vmem:[#allocation30_spill] sm:$0xff]  ;;  %v2692_v61 = vadd.f32 %v13919_v45, %v2468_v26  ;;  %v13944_v62 = vpack.c.bf16 %v13942_v0, %v13943_v24 }
 0x38a   : > { %2993 = vmatprep.subr.bf16.mxu1 %v2851_v5  ;;  %v2668_v50 = vadd.f32 %v13919_v45, %v2444_v42  ;;  %v2713_v5 = vadd.f32 %v9665_v21, %v2489_v60  ;;  %v2807_v56 = vpack.c.bf16 %v2681_v29, %v2675_v28  ;;  %v2693_v51 = vadd.f32 %v9522_v52, %v2469_v1  ;;  %v13950_v42 = vld [vmem:[#allocation92_spill] sm:$0xff]  ;;  %v13954_v28 = vld [vmem:[#allocation57_spill] sm:$0xff]  ;;  %v13958_v9 = vld [vmem:[#allocation62_spill] sm:$0xff] }
 0x38b   : > { %v2843_v46 = vpack.c.bf16 %v2707_v10, %v2701_v27  ;;  %v2475_v21 = vmul.f32 %v9516_v49, %v13941_v59  ;;  %v13951_v57 = vpack.c.bf16 %v13949_v32, %v13950_v42  ;;  %v13955_v29 = vld [vmem:[#allocation56_spill] sm:$0xff]  ;;  %v2499_v14 = vmul.f32 %v9516_v49, %v13958_v9  ;;  %v13960_v1 = vld [vmem:[#allocation41_spill] sm:$0xff]  ;;  %v13971_v10 = vld [vmem:[#allocation46_spill] sm:$0xff] }
 0x38c   : > { %v2804_v48 = vpack.c.bf16 %v2668_v50, %v2662_v37  ;;  %v2845_v4 = vpack.c.bf16 %v2719_v20, %v2713_v5  ;;  %v13956_v37 = vpack.c.bf16 %v13954_v28, %v13955_v29  ;;  %v13957_v50 = vld [vmem:[#allocation38_spill] sm:$0xff]  ;;  %v13959_v20 = vld [vmem:[#allocation67_spill] sm:$0xff] }
 0x38d   : > { %2256 = vmatmul.mubr.bf16.gmra.mxu0 %v13928_v6  ;;  %v2686_v6 = vadd.f32 %v13919_v45, %v2462_v38  ;;  %v2699_v17 = vadd.f32 %v9522_v52, %v2475_v21  ;;  %v2493_v45 = vmul.f32 %v9516_v49, %v13945_v33  ;;  %v2723_v5 = vadd.f32 %v9522_v52, %v2499_v14  ;;  %v13972_v38 = vld [vmem:[#allocation70_spill] sm:$0xff]  ;;  %v13980_v33 = vld [vmem:[#allocation73_spill] sm:$0xff]  ;;  %v13984_v32 = vld [vmem:[#allocation87_spill] sm:$0xff] }
 0x38e   : > { %2265 = vmatprep.mubr.bf16.mxu0 %v13929_v43  ;;  %v13940_v43 = vld [vmem:[#allocation34_spill] sm:$0xff]  ;;  %v2523_v26 = vmul.f32 %v9516_v49, %v13972_v38  ;;  %v2565_v42 = vmul.f32 %v9516_v49, %v13984_v32  ;;  %v13992_v14 = vld [vmem:[#allocation89_spill] sm:$0xff] }
 0x38f   : > { %v2808_v36 = vpack.c.bf16 %v2692_v61, %v2686_v6  ;;  %v13974_v61 = vld [vmem:[#allocation49_spill] sm:$0xff]  ;;  %v13978_v21 = vld [vmem:[#allocation74_spill] sm:$0xff] }
 0x390   : > { %2947 = vmatmul.mubr.bf16.gmra.mxu1 %v2800_v40  ;;  %v13938_v40 = vld [vmem:[#allocation55_spill] sm:$0xff]  ;;  %v2535_v0 = vmul.f32 %v9516_v49, %v13978_v21 }
 0x391   : > { %2994 = vmatpush1.bf16.xpose.msra.mxu1 %v2850_v7  ;;  %2954 = vmatprep.mubr.bf16.mxu1 %v2803_v23  ;;  %v2687_v7 = vadd.f32 %v9522_v52, %v2463_v2  ;;  %v2806_v23 = vpack.c.bf16 %v2680_v22, %v2674_v47  ;;  %v2481_v53 = vmul.f32 %v9516_v49, %v13938_v40  ;;  %v13962_v47 = vld [vmem:[#allocation60_spill] sm:$0xff] }
 0x392   : > { %2995 = vmatprep.subr.bf16.mxu1 %v2849_v55  ;;  %v13939_v55 = vld [vmem:[#allocation33_spill] sm:$0xff]  ;;  %v2517_v2 = vmul.f32 %v9516_v49, %v13959_v20  ;;  %v2747_v40 = vadd.f32 %v9522_v52, %v2523_v26  ;;  %v13995_v20 = vld [vmem:[#allocation51_spill] sm:$0xff] }
 0x393   : > { %v2809_v3 = vpack.c.bf16 %v2693_v51, %v2687_v7  ;;  %v2705_v30 = vadd.f32 %v9522_v52, %v2481_v53  ;;  %v13967_v7 = vld [vmem:[#allocation45_spill] sm:$0xff]  ;;  %v13973_v53 = vld [vmem:[#allocation75_spill] sm:$0xff] }
 0x394   : > { %v2741_v25 = vadd.f32 %v9522_v52, %v2517_v2  ;;  %v13968_v51 = vld [vmem:[#allocation65_spill] sm:$0xff]  ;;  %v2366_v2 = vsub.s32 4, %v13995_v20 }
 0x395   : > { %2266 = vmatmul.mubr.bf16.gmra.mxu0 %v13930_v31  ;;  %v2811_v15 = vpack.c.bf16 %v2705_v30, %v2699_v17  ;;  %v2717_v31 = vadd.f32 %v9522_v52, %v2493_v45  ;;  %v13979_v30 = vld [vmem:[#allocation80_spill] sm:$0xff] }
 0x396   : > { %2275 = vmatprep.mubr.bf16.mxu0 %v13931_v18  ;;  %v13981_v45 = vld [vmem:[#allocation72_spill] sm:$0xff] }
 0x398   : > { %2955 = vmatmul.mubr.bf16.gmra.mxu1 %v2802_v35  ;;  %v2487_v35 = vmul.f32 %v9516_v49, %v13948_v13 }
 0x399   : > { %2996 = vmatpush1.bf16.xpose.msra.mxu1 %v13932_v39  ;;  %2962 = vmatprep.mubr.bf16.mxu1 %v2805_v44  ;;  %v13947_v44 = vld [vmem:[#allocation36_spill] sm:$0xff]  ;;  %v13953_v39 = vld [vmem:[#allocation37_spill] sm:$0xff] }
 0x39a   : > { %2997 = vmatprep.subr.bf16.mxu1 %v2847_v8  ;;  %v2711_v60 = vadd.f32 %v9522_v52, %v2487_v35  ;;  %v2505_v8 = vmul.f32 %v9516_v49, %v13952_v58 }
 0x39c   : > { %v2813_v18 = vpack.c.bf16 %v2717_v31, %v2711_v60  ;;  %v2729_v41 = vadd.f32 %v9522_v52, %v2505_v8  ;;  %v13985_v31 = vld [vmem:[#allocation77_spill] sm:$0xff]  ;;  %v13986_v60 = vld [vmem:[#allocation76_spill] sm:$0xff]  ;;  %v13988_v8 = vld [vmem:[#allocation83_spill] sm:$0xff] }
 0x39d   : > { %2276 = vmatmul.mubr.bf16.gmra.mxu0 %v13933_v34  ;;  %v13964_v34 = vld [vmem:[#allocation42_spill] sm:$0xff]  ;;  %v13987_v58 = vpack.c.bf16 %v13985_v31, %v13986_v60 }
 0x39e   : > { %2285 = vmatprep.mubr.bf16.mxu0 %v13935_v63  ;;  %v13966_v63 = vld [vmem:[#allocation71_spill] sm:$0xff] }
 0x39f   : > { %v2529_v54 = vmul.f32 %v9516_v49, %v13966_v63 }
 0x3a0   : > { %2963 = vmatmul.mubr.bf16.gmra.mxu1 %v2804_v48  ;;  %v13961_v48 = vld [vmem:[#allocation61_spill] sm:$0xff] }
 0x3a1   : > { %2998 = vmatpush1.bf16.xpose.msra.mxu1 %v13937_v11  ;;  %2970 = vmatprep.mubr.bf16.mxu1 %v2807_v56  ;;  %v2815_v56 = vpack.c.bf16 %v2729_v41, %v2723_v5  ;;  %v13963_v22 = vpack.c.bf16 %v13961_v48, %v13962_v47  ;;  %v13993_v41 = vld [vmem:[#allocation88_spill] sm:$0xff] }
 0x3a2   : > { %2999 = vmatprep.subr.bf16.mxu1 %v2845_v4  ;;  %v2735_v4 = vadd.f32 %v9522_v52, %v2511_v16  ;;  %v13994_v5 = vpack.c.bf16 %v13992_v14, %v13993_v41  ;;  %v10121_v47 = vld [vmem:[%s8248_s22] sm:$0x3f]  ;;  %s14013_s22 = sld [smem:[#allocation4_spill]] }
 0x3a4   : > { %v2817_v11 = vpack.c.bf16 %v2741_v25, %v2735_v4 }
 0x3a5   : > { %2286 = vmatmul.mubr.bf16.gmra.mxu0 %v13939_v55  ;;  %v2541_v55 = vmul.f32 %v9516_v49, %v13973_v53 }
 0x3a6   : > { %2295 = vmatprep.mubr.bf16.mxu0 %v13940_v43  ;;  %v13976_v43 = vld [vmem:[#allocation68_spill] sm:$0xff] }
 0x3a7   : > { %v2765_v24 = vadd.f32 %v9522_v52, %v2541_v55 }
 0x3a8   : > { %2971 = vmatmul.mubr.bf16.gmra.mxu1 %v2806_v23  ;;  %v13969_v23 = vld [vmem:[#allocation64_spill] sm:$0xff] }
 0x3a9   : > { %3000 = vmatpush1.bf16.xpose.msra.mxu1 %v13944_v62  ;;  %2978 = vmatprep.mubr.bf16.mxu1 %v2809_v3  ;;  %v13970_v27 = vpack.c.bf16 %v13968_v51, %v13969_v23  ;;  %v2753_v3 = vadd.f32 %v9522_v52, %v2529_v54  ;;  %v2759_v62 = vadd.f32 %v9522_v52, %v2535_v0 }
 0x3aa   : > { %3001 = vmatprep.subr.bf16.mxu1 %v2843_v46  ;;  %v13975_v46 = vld [vmem:[#allocation69_spill] sm:$0xff] }
 0x3ab   : > { %v2819_v6 = vpack.c.bf16 %v2753_v3, %v2747_v40  ;;  %v13977_v59 = vpack.c.bf16 %v13975_v46, %v13976_v43  ;;  %v2821_v17 = vpack.c.bf16 %v2765_v24, %v2759_v62 }
 0x3ad   : > { %2296 = vmatmul.mubr.bf16.gmra.mxu0 %v13946_v12  ;;  %v13983_v12 = vld [vmem:[#allocation79_spill] sm:$0xff] }
 0x3ae   : > { %2305 = vmatprep.mubr.bf16.mxu0 %v13947_v44  ;;  %v2547_v44 = vmul.f32 %v9516_v49, %v13983_v12 }
 0x3b0   : > { %2979 = vmatmul.mubr.bf16.gmra.mxu1 %v2808_v36  ;;  %v2553_v36 = vmul.f32 %v9516_v49, %v13979_v30  ;;  %v2771_v35 = vadd.f32 %v9522_v52, %v2547_v44 }
 0x3b1   : > { %3002 = vmatpush1.bf16.xpose.msra.mxu1 %v13951_v57  ;;  %3019 = vmatprep.mubr.bf16.mxu1 %v2811_v15  ;;  %v13982_v15 = vpack.c.bf16 %v13980_v33, %v13981_v45 }
 0x3b2   : > { %v2777_v13 = vadd.f32 %v9522_v52, %v2553_v36 }
 0x3b4   : > { %v2823_v57 = vpack.c.bf16 %v2777_v13, %v2771_v35 }
 0x3b5   : > { %2306 = vmatmul.mubr.bf16.gmra.mxu0 %v13953_v39  ;;  %v2789_v39 = vadd.f32 %v9522_v52, %v2565_v42 }
 0x3b6   : > { %2315 = vmatprep.mubr.bf16.mxu0 %v13957_v50  ;;  %v13990_v50 = vld [vmem:[#allocation81_spill] sm:$0xff] }
 0x3b8   : > { %3020 = vmatmul.mubr.bf16.vlgmr.msra.gmra.mxu1 %v13956_v37  ;;  %v13989_v37 = vld [vmem:[#allocation82_spill] sm:$0xff] }
 0x3b9   : > { %3027 = vmatprep.mubr.bf16.mxu1 %v2813_v18  ;;  %v2559_v18 = vmul.f32 %v9516_v49, %v13988_v8  ;;  %v13991_v9 = vpack.c.bf16 %v13989_v37, %v13990_v50 }
 0x3bb   : > { %v2783_v28 = vadd.f32 %v9522_v52, %v2559_v18 }
 0x3bd   : > { %2316 = vmatmul.mubr.bf16.gmra.mxu0 %v13960_v1  ;;  %v2825_v29 = vpack.c.bf16 %v2789_v39, %v2783_v28  ;;  %v10112_v1 = vld [vmem:[%s13867_s20] sm:$0x3f]  ;;  %v2370_v39 = vsub.s32 5, %v13995_v20 }
 0x3be   : > { %2325 = vmatprep.mubr.bf16.mxu0 %v13964_v34  ;;  %v10115_v49 = vrot.slane %v10112_v1, %v2366_v2 }
 0x3c0   : > { %3028 = vmatmul.mubr.bf16.gmra.mxu1 %v13963_v22  ;;  %v10124_v22 = vrot.slane %v10121_v47, %v2366_v2 }
 0x3c1   : > { %3035 = vmatprep.mubr.bf16.mxu1 %v2815_v56 }
 0x3c5   : > { %2326 = vmatmul.mubr.bf16.gmra.mxu0 %v13967_v7 }
 0x3c6   : > { %2335 = vmatprep.mubr.bf16.mxu0 %v13971_v10 }
 0x3c8   : > { %3036 = vmatmul.mubr.bf16.gmra.mxu1 %v13970_v27 }
 0x3c9   : > { %3043 = vmatprep.mubr.bf16.mxu1 %v2817_v11 }
 0x3cd   : > { %2336 = vmatmul.mubr.bf16.gmra.mxu0 %v13974_v61 }
 0x3d0   : > { %3044 = vmatmul.mubr.bf16.gmra.mxu1 %v13977_v59 }
 0x3d1   : > { %3051 = vmatprep.mubr.bf16.mxu1 %v2819_v6 }
 0x3d8   : > { %3052 = vmatmul.mubr.bf16.gmra.mxu1 %v13982_v15 }
 0x3d9   : > { %3059 = vmatprep.mubr.bf16.mxu1 %v2821_v17 }
 0x3e0   : > { %3060 = vmatmul.mubr.bf16.gmra.mxu1 %v13987_v58 }
 0x3e1   : > { %3067 = vmatprep.mubr.bf16.mxu1 %v2823_v57 }
 0x3e8   : > { %3068 = vmatmul.mubr.bf16.gmra.mxu1 %v13991_v9  ;;  %v10198_v9 = vrot.slane %v10112_v1, %v2370_v39 }
 0x3e9   : > { %3075 = vmatprep.mubr.bf16.mxu1 %v2825_v29 }
 0x3f0   : > { %3076 = vmatmul.mubr.bf16.gmra.mxu1 %v13994_v5 }
 0x412   : > { %v2187_v56 = vpop.f32.mrf.mxu0 }
 0x413   : > { %v2382_v52 = vmul.f32 %v10115_v49, %v2187_v56 }
 0x414   : > { %v10118_v48 = vpop.f32.mrf.mxu0 }
 0x415   : > { %v10127_v19 = vadd.f32 %v10124_v22, %v2382_v52  ;;  %v10206_v52 = vrot.slane %v10121_v47, %v2370_v39 }
 0x416   : > { %v2191_v34 = vpop.f32.mrf.mxu0 }
 0x417   : > { %v2388_v16 = vmul.f32 %v10115_v49, %v2191_v34 }
 0x418   : > { %v10130_v25 = vpop.f32.mrf.mxu0 }
 0x419   : > { %v10133_v4 = vadd.f32 %v10124_v22, %v2388_v16 }
 0x41a   : > { %v2197_v63 = vpop.f32.mrf.mxu0 }
 0x41b   : > { %v2858_v54 = vpack.c.bf16 %v10133_v4, %v10127_v19  ;;  %v2394_v11 = vmul.f32 %v10115_v49, %v2197_v63 }
 0x41c   : > { %v10138_v7 = vpop.f32.mrf.mxu0 }
 0x41d   : > { %v10141_v23 = vadd.f32 %v10124_v22, %v2394_v11 }
 0x41e   : > { %v2201_v51 = vpop.f32.mrf.mxu0 }
 0x41f   : > { %v2400_v27 = vmul.f32 %v10115_v49, %v2201_v51 }
 0x420   : > { %v10144_v10 = vpop.f32.mrf.mxu0 }
 0x421   : > { %v10147_v38 = vadd.f32 %v10124_v22, %v2400_v27 }
 0x422   : > { %v10149_v26 = vpop.f32.mrf.mxu0 }
 0x423   : > { %v2860_v3 = vpack.c.bf16 %v10147_v38, %v10141_v23 }
 0x424   : > { %v10153_v40 = vpop.f32.mrf.mxu0 }
 0x426   : > { %v10155_v53 = vpop.f32.mrf.mxu0 }
 0x428   : > { %v10157_v55 = vpop.f32.mrf.mxu0 }
 0x42a   : > { %v10159_v6 = vpop.f32.mrf.mxu0 }
 0x42c   : > { %v10161_v61 = vpop.f32.mrf.mxu0 }
 0x42e   : > { %v10163_v46 = vpop.f32.mrf.mxu0 }
 0x430   : > { %v10165_v43 = vpop.f32.mrf.mxu0 }
 0x435   : > { %v10167_v59 = vpop.f32.mrf.mxu0 }
 0x437   : > { %v10172_v0 = vpop.f32.mrf.mxu0 }
 0x438   : > { %v10169_v21 = vpop.f32.mrf.mxu1 }
 0x439   : > { %3084 = vmax.xlane.f32.xlu0 %v10169_v21  ;;  %v10174_v62 = vpop.f32.mrf.mxu0 }
 0x43a   : > { %v2926_v24 = vpop.f32.mrf.mxu1 }
 0x43b   : > { %v10179_v36 = vpop.f32.mrf.mxu0 }
 0x43c   : > { %v10176_v30 = vpop.f32.mrf.mxu1 }
 0x43d   : > { %3086 = vmax.xlane.f32.xlu0 %v10176_v30  ;;  %v2237_v33 = vpop.f32.mrf.mxu0 }
 0x43e   : > { %v2929_v17 = vpop.f32.mrf.mxu1 }
 0x43f   : > { %v2239_v15 = vpop.f32.mrf.mxu0 }
 0x440   : > { %v10181_v45 = vpop.f32.mrf.mxu1 }
 0x441   : > { %3088 = vmax.xlane.f32.xlu1 %v10181_v45  ;;  %v2241_v44 = vpop.f32.mrf.mxu0 }
 0x442   : > { %v2934_v12 = vpop.f32.mrf.mxu1 }
 0x443   : > { %v2243_v32 = vpop.f32.mrf.mxu0 }
 0x444   : > { %v10184_v13 = vpop.f32.mrf.mxu1 }
 0x445   : > { %3090 = vmax.xlane.f32.xlu1 %v10184_v13  ;;  %v2247_v57 = vpop.f32.mrf.mxu0 }
 0x446   : > { %v2937_v35 = vpop.f32.mrf.mxu1  ;;  %v2454_v51 = vmul.f32 %v10115_v49, %v2247_v57  ;;  %v2442_v57 = vmul.f32 %v10115_v49, %v2237_v33  ;;  %v2430_v33 = vmul.f32 %v10115_v49, %v10167_v59 }
 0x447   : > { %v2249_v60 = vpop.f32.mrf.mxu0 }
 0x448   : > { %v10187_v42 = vpop.f32.mrf.mxu1  ;;  %v2455_v47 = vmul.f32 %v10198_v9, %v2249_v60 }
 0x449   : > { %3092 = vmax.xlane.f32.xlu0 %v10187_v42  ;;  %v2251_v8 = vpop.f32.mrf.mxu0 }
 0x44a   : > { %v2942_v31 = vpop.f32.mrf.mxu1  ;;  %v2460_v27 = vmul.f32 %v10115_v49, %v2251_v8  ;;  %v2443_v8 = vmul.f32 %v10198_v9, %v2239_v15  ;;  %v2431_v15 = vmul.f32 %v10198_v9, %v10172_v0 }
 0x44b   : > { %v2253_v28 = vpop.f32.mrf.mxu0 }
 0x44c   : > { %v10190_v58 = vpop.f32.mrf.mxu1  ;;  %v2461_v12 = vmul.f32 %v10198_v9, %v2253_v28  ;;  %v2684_v60 = vadd.f32 %v10124_v22, %v2460_v27 }
 0x44d   : > { %3094 = vmax.xlane.f32.xlu1 %v10190_v58  ;;  %v2257_v37 = vpop.f32.mrf.mxu0 }
 0x44e   : > { %v2945_v18 = vpop.f32.mrf.mxu1  ;;  %v2466_v56 = vmul.f32 %v10115_v49, %v2257_v37  ;;  %v2448_v37 = vmul.f32 %v10115_v49, %v2241_v44 }
 0x44f   : > { %v2259_v14 = vpop.f32.mrf.mxu0 }
 0x450   : > { %v10194_v29 = vpop.f32.mrf.mxu1  ;;  %v2467_v34 = vmul.f32 %v10198_v9, %v2259_v14  ;;  %v2690_v24 = vadd.f32 %v10124_v22, %v2466_v56  ;;  %v2449_v14 = vmul.f32 %v10198_v9, %v2243_v32  ;;  %v2436_v32 = vmul.f32 %v10115_v49, %v10174_v62 }
 0x451   : > { %3096 = vmax.xlane.f32.xlu0 %v10194_v29  ;;  %v2261_v5 = vpop.f32.mrf.mxu0  ;;  %v2418_v62 = vmul.f32 %v10115_v49, %v10159_v6 }
 0x452   : > { %v2950_v50 = vpop.f32.mrf.mxu1  ;;  %v2472_v20 = vmul.f32 %v10115_v49, %v2261_v5  ;;  %v2691_v35 = vadd.f32 %v10206_v52, %v2467_v34  ;;  %v2679_v5 = vadd.f32 %v10206_v52, %v2455_v47  ;;  %v2666_v34 = vadd.f32 %v10124_v22, %v2442_v57 }
 0x453   : > { %v2263_v16 = vpop.f32.mrf.mxu0  ;;  %v2678_v50 = vadd.f32 %v10124_v22, %v2454_v51  ;;  %v2667_v51 = vadd.f32 %v10206_v52, %v2443_v8  ;;  %v2673_v59 = vadd.f32 %v10206_v52, %v2449_v14  ;;  %v2654_v47 = vadd.f32 %v10124_v22, %v2430_v33 }
 0x454   : > { %v10200_v41 = vpop.f32.mrf.mxu1  ;;  %v2473_v1 = vmul.f32 %v10198_v9, %v2263_v16  ;;  %v2696_v17 = vadd.f32 %v10124_v22, %v2472_v20  ;;  %v2672_v16 = vadd.f32 %v10124_v22, %v2448_v37  ;;  %v2655_v57 = vadd.f32 %v10206_v52, %v2431_v15 }
 0x455   : > { %3098 = vmax.xlane.f32.xlu1 %v10200_v41  ;;  %v2869_v8 = vpack.c.bf16 %v2673_v59, %v2667_v51  ;;  %v2413_v14 = vmul.f32 %v10198_v9, %v10157_v55  ;;  %v2401_v55 = vmul.f32 %v10198_v9, %v10144_v10  ;;  %v2389_v59 = vmul.f32 %v10198_v9, %v10130_v25 }
 0x456   : > { %v2953_v2 = vpop.f32.mrf.mxu1  ;;  %v2697_v31 = vadd.f32 %v10206_v52, %v2473_v1  ;;  %v2872_v28 = vpack.c.bf16 %v2696_v17, %v2690_v24  ;;  %v2870_v1 = vpack.c.bf16 %v2684_v60, %v2678_v50  ;;  %v2419_v24 = vmul.f32 %v10198_v9, %v10161_v61 }
 0x457   : > { %v2685_v2 = vadd.f32 %v10206_v52, %v2461_v12  ;;  %v2660_v12 = vadd.f32 %v10124_v22, %v2436_v32  ;;  %v2642_v50 = vadd.f32 %v10124_v22, %v2418_v62 }
 0x458   : > { %v10209_v63 = vpop.f32.mrf.mxu1  ;;  %v2873_v56 = vpack.c.bf16 %v2697_v31, %v2691_v35  ;;  %v2868_v35 = vpack.c.bf16 %v2672_v16, %v2666_v34  ;;  %v2425_v31 = vmul.f32 %v10198_v9, %v10165_v43  ;;  %v2412_v43 = vmul.f32 %v10115_v49, %v10155_v53 }
 0x459   : > { %3100 = vmax.xlane.f32.xlu0 %v10209_v63  ;;  %v2871_v27 = vpack.c.bf16 %v2685_v2, %v2679_v5  ;;  %v2643_v5 = vadd.f32 %v10206_v52, %v2419_v24  ;;  %v2637_v34 = vadd.f32 %v10206_v52, %v2413_v14 }
 0x45a   : > { %v2958_v11 = vpop.f32.mrf.mxu1  ;;  %3388 = vmatprep.subr.bf16.mxu0 %v2873_v56  ;;  %v2395_v56 = vmul.f32 %v10198_v9, %v10138_v7  ;;  %v2636_v15 = vadd.f32 %v10124_v22, %v2412_v43 }
 0x45b   : > { %3389 = vmatpush1.bf16.msra.mxu0 %v2872_v28  ;;  %v2437_v11 = vmul.f32 %v10198_v9, %v10179_v36  ;;  %v2424_v36 = vmul.f32 %v10115_v49, %v10163_v46  ;;  %v2406_v46 = vmul.f32 %v10115_v49, %v10149_v26  ;;  %v2866_v28 = vpack.c.bf16 %v2660_v12, %v2654_v47 }
 0x45c   : > { %v10221_v18 = vpop.f32.mrf.mxu1  ;;  %3390 = vmatprep.subr.bf16.mxu0 %v2871_v27  ;;  %v2649_v26 = vadd.f32 %v10206_v52, %v2425_v31  ;;  %v2619_v10 = vadd.f32 %v10206_v52, %v2395_v56  ;;  %v2625_v27 = vadd.f32 %v10206_v52, %v2401_v55 }
 0x45d   : > { %3102 = vmax.xlane.f32.xlu1 %v10221_v18  ;;  %v2661_v6 = vadd.f32 %v10206_v52, %v2437_v11  ;;  %v2648_v60 = vadd.f32 %v10124_v22, %v2424_v36  ;;  %v2630_v33 = vadd.f32 %v10124_v22, %v2406_v46  ;;  %v2383_v11 = vmul.f32 %v10198_v9, %v10118_v48 }
 0x45e   : > { %v2961_v39 = vpop.f32.mrf.mxu1  ;;  %v2865_v16 = vpack.c.bf16 %v2649_v26, %v2643_v5  ;;  %v2613_v48 = vadd.f32 %v10206_v52, %v2389_v59  ;;  %v2861_v47 = vpack.c.bf16 %v2625_v27, %v2619_v10 }
 0x45f   : > { %3391 = vmatpush1.bf16.msra.mxu0 %v2870_v1  ;;  %v2407_v39 = vmul.f32 %v10198_v9, %v10153_v40  ;;  %v2867_v2 = vpack.c.bf16 %v2661_v6, %v2655_v57  ;;  %v2862_v51 = vpack.c.bf16 %v2636_v15, %v2630_v33  ;;  %v2607_v36 = vadd.f32 %v10206_v52, %v2383_v11 }
 0x460   : > { %v10232_v20 = vpop.f32.mrf.mxu1  ;;  %3392 = vmatprep.subr.bf16.mxu0 %v2869_v8 }
 0x461   : > { %3104 = vmax.xlane.f32.xlu0 %v10232_v20  ;;  %v2631_v32 = vadd.f32 %v10206_v52, %v2407_v39 }
 0x462   : > { %v2966_v44 = vpop.f32.mrf.mxu1 }
 0x463   : > { %3393 = vmatpush1.bf16.msra.mxu0 %v2868_v35  ;;  %v2864_v44 = vpack.c.bf16 %v2648_v60, %v2642_v50  ;;  %v2863_v62 = vpack.c.bf16 %v2637_v34, %v2631_v32  ;;  %v2859_v35 = vpack.c.bf16 %v2613_v48, %v2607_v36  ;;  %v2267_v32 = vpop.f32.mrf.mxu0 }
 0x464   : > { %v10247_v0 = vpop.f32.mrf.mxu1  ;;  %3394 = vmatprep.subr.bf16.mxu0 %v2867_v2 }
 0x465   : > { %3106 = vmax.xlane.f32.xlu1 %v10247_v0 }
 0x466   : > { %v2969_v17 = vpop.f32.mrf.mxu1 }
 0x467   : > { %3395 = vmatpush1.bf16.msra.mxu0 %v2866_v28 }
 0x468   : > { %v10262_v61 = vpop.f32.mrf.mxu1  ;;  %3396 = vmatprep.subr.bf16.mxu0 %v2865_v16  ;;  %v2478_v16 = vmul.f32 %v10115_v49, %v2267_v32 }
 0x469   : > { %3108 = vmax.xlane.f32.xlu0 %v10262_v61 }
 0x46a   : > { %v2974_v37 = vpop.f32.mrf.mxu1  ;;  %v10352_v10 = vadd.f32 %v10124_v22, %v2478_v16 }
 0x46b   : > { %3397 = vmatpush1.bf16.msra.mxu0 %v2864_v44 }
 0x46c   : > { %v10277_v40 = vpop.f32.mrf.mxu1  ;;  %3398 = vmatprep.subr.bf16.mxu0 %v2863_v62 }
 0x46d   : > { %3110 = vmax.xlane.f32.xlu1 %v10277_v40 }
 0x46e   : > { %v2977_v53 = vpop.f32.mrf.mxu1 }
 0x46f   : > { %3399 = vmatpush1.bf16.msra.mxu0 %v2862_v51 }
 0x470   : > { %v10288_v1 = vpop.f32.mrf.mxu1  ;;  %3400 = vmatprep.subr.bf16.mxu0 %v2861_v47 }
 0x471   : > { %3112 = vmax.xlane.f32.xlu0 %v10288_v1 }
 0x472   : > { %v2982_v7 = vpop.f32.mrf.mxu1 }
 0x473   : > { %3401 = vmatpush1.bf16.msra.mxu0 %v2860_v3  ;;  %v10347_v7 = vpop.f32.mrf.mxu0 }
 0x474   : > { %v10297_v24 = vpop.f32.mrf.mxu1  ;;  %3402 = vmatprep.subr.bf16.mxu0 %v2859_v35 }
 0x475   : > { %3114 = vmax.xlane.f32.xlu1 %v10297_v24  ;;  %v2271_v51 = vpop.f32.mrf.mxu0 }
 0x476   : > { %v2985_v17 = vpop.f32.mrf.mxu1  ;;  %v2484_v27 = vmul.f32 %v10115_v49, %v2271_v51 }
 0x477   : > { %3403 = vmatpush1.bf16.msra.mxu0 %v2858_v54  ;;  %v10355_v62 = vpop.f32.mrf.mxu0 }
 0x478   : > { %v10302_v12 = vpop.f32.mrf.mxu1  ;;  %v10358_v17 = vadd.f32 %v10124_v22, %v2484_v27 }
 0x479   : > { %3116 = vmax.xlane.f32.xlu0 %v10302_v12  ;;  %v2277_v36 = vpop.f32.mrf.mxu0 }
 0x47a   : > { %v3023_v25 = vpop.f32.mrf.mxu1  ;;  %v2490_v47 = vmul.f32 %v10115_v49, %v2277_v36 }
 0x47b   : > { %v10363_v25 = vpop.f32.mrf.mxu0 }
 0x47c   : > { %v10308_v31 = vpop.f32.mrf.mxu1 }
 0x47d   : > { %3118 = vmax.xlane.f32.xlu1 %v10308_v31  ;;  %v2281_v35 = vpop.f32.mrf.mxu0 }
 0x47e   : > { %v3026_v57 = vpop.f32.mrf.mxu1 }
 0x47f   : > { %v10366_v57 = vadd.f32 %v10124_v22, %v2490_v47 }
 0x480   : > { %v10314_v6 = vpop.f32.mrf.mxu1 }
 0x481   : > { %3120 = vmax.xlane.f32.xlu0 %v10314_v6 }
 0x482   : > { %v3031_v8 = vpop.f32.mrf.mxu1 }
 0x483   : > { %v2496_v8 = vmul.f32 %v10115_v49, %v2281_v35 }
 0x484   : > { %v10317_v46 = vpop.f32.mrf.mxu1 }
 0x485   : > { %3122 = vmax.xlane.f32.xlu1 %v10317_v46 }
 0x486   : > { %v3034_v23 = vpop.f32.mrf.mxu1 }
 0x487   : > { %v10370_v23 = vadd.f32 %v10124_v22, %v2496_v8 }
 0x488   : > { %v10320_v38 = vpop.f32.mrf.mxu1 }
 0x489   : > { %3124 = vmax.xlane.f32.xlu0 %v10320_v38 }
 0x48a   : > { %v3039_v3 = vpop.f32.mrf.mxu1 }
 0x48c   : > { %v10323_v39 = vpop.f32.mrf.mxu1 }
 0x48d   : > { %3126 = vmax.xlane.f32.xlu1 %v10323_v39 }
 0x48e   : > { %v3042_v19 = vpop.f32.mrf.mxu1 }
 0x490   : > { %v10326_v4 = vpop.f32.mrf.mxu1 }
 0x491   : > { %3128 = vmax.xlane.f32.xlu0 %v10326_v4 }
 0x492   : > { %v3047_v54 = vpop.f32.mrf.mxu1 }
 0x494   : > { %v10329_v37 = vpop.f32.mrf.mxu1 }
 0x495   : > { %3130 = vmax.xlane.f32.xlu1 %v10329_v37 }
 0x496   : > { %v3050_v43 = vpop.f32.mrf.mxu1 }
 0x498   : > { %v10332_v50 = vpop.f32.mrf.mxu1 }
 0x49a   : > { %v3055_v60 = vpop.f32.mrf.mxu1 }
 0x49c   : > { %v10334_v28 = vpop.f32.mrf.mxu1 }
 0x49e   : > { %v3058_v14 = vpop.f32.mrf.mxu1 }
 0x4a0   : > { %v10336_v5 = vpop.f32.mrf.mxu1 }
 0x4a2   : > { %v3063_v26 = vpop.f32.mrf.mxu1 }
 0x4a4   : > { %v10338_v2 = vpop.f32.mrf.mxu1 }
 0x4a6   : > { %v3066_v53 = vpop.f32.mrf.mxu1 }
 0x4a7   : > { %v10376_v53 = vpop.f32.mrf.mxu0 }
 0x4a8   : > { %v10340_v56 = vpop.f32.mrf.mxu1 }
 0x4a9   : > { %v10379_v32 = vpop.f32.mrf.mxu0 }
 0x4aa   : > { %v3071_v33 = vpop.f32.mrf.mxu1 }
 0x4ab   : > { %v10381_v16 = vpop.f32.mrf.mxu0 }
 0x4ac   : > { %v10342_v15 = vpop.f32.mrf.mxu1 }
 0x4ad   : > { %13996 = vst [vmem:[#allocation39_spill] sm:$0xff] %v10342_v15 }
 0x4ae   : > { %v3074_v44 = vpop.f32.mrf.mxu1 }
 0x4b0   : > { %v10344_v55 = vpop.f32.mrf.mxu1 }
 0x4b1   : > { %13997 = vst [vmem:[#allocation54_spill] sm:$0xff] %v10344_v55 }
 0x4b2   : > { %v3079_v34 = vpop.f32.mrf.mxu1 }
 0x4b4   : > { %v10349_v11 = vpop.f32.mrf.mxu1 }
 0x4b5   : > { %13998 = vst [vmem:[#allocation85_spill] sm:$0xff] %v10349_v11 }
 0x4b6   : > { %v3082_v59 = vpop.f32.mrf.mxu1 }
 0x4b7   : > { %v10384_v59 = vpop.f32.mrf.mxu0 }
 0x4b9   : > { %v10386_v36 = vpop.f32.mrf.mxu0 }
 0x4c2   : > { %v3085_v3 = vpop.xlane.xlu0 %3084 }
 0x4c3   : > { %v3148_v54 = vsub.f32 %v10169_v21, %v3085_v3 }
 0x4c5   : > { %v3180_v43 = vmul.f32 1.442695, %v3148_v54 }
 0x4c6   : > { %v3087_v60 = vpop.xlane.xlu0 %3086 }
 0x4c7   : > { %7805 = vpow2.f32 %v3180_v43  ;;  %v3149_v14 = vsub.f32 %v10176_v30, %v3087_v60 }
 0x4c9   : > { %v3182_v26 = vmul.f32 1.442695, %v3149_v14 }
 0x4ca   : > { %v3089_v33 = vpop.xlane.xlu1 %3088 }
 0x4cb   : > { %7807 = vpow2.f32 %v3182_v26  ;;  %v3150_v44 = vsub.f32 %v10181_v45, %v3089_v33  ;;  %v10391_v45 = vpop.f32.mrf.mxu0 }
 0x4cd   : > { %v3184_v34 = vmul.f32 1.442695, %v3150_v44  ;;  %v10394_v54 = vpop.f32.mrf.mxu0 }
 0x4ce   : > { %v3091_v51 = vpop.xlane.xlu1 %3090 }
 0x4cf   : > { %7809 = vpow2.f32 %v3184_v34  ;;  %v3151_v21 = vsub.f32 %v10184_v13, %v3091_v51  ;;  %v10399_v60 = vpop.f32.mrf.mxu0 }
 0x4d1   : > { %v3186_v27 = vmul.f32 1.442695, %v3151_v21  ;;  %v10403_v26 = vpop.f32.mrf.mxu0 }
 0x4d2   : > { %v3093_v30 = vpop.xlane.xlu0 %3092 }
 0x4d3   : > { %7811 = vpow2.f32 %v3186_v27  ;;  %v3152_v47 = vsub.f32 %v10187_v42, %v3093_v30  ;;  %v10408_v34 = vpop.f32.mrf.mxu0 }
 0x4d4   : > { %v10389_v35 = vpop.eup %7805 }
 0x4d5   : > { %v3188_v8 = vmul.f32 1.442695, %v3152_v47  ;;  %3244 = vadd.xlane.f32.xlu0 %v10389_v35  ;;  %v10412_v21 = vpop.f32.mrf.mxu0 }
 0x4d6   : > { %v3095_v3 = vpop.xlane.xlu1 %3094 }
 0x4d7   : > { %7813 = vpow2.f32 %v3188_v8  ;;  %v3153_v13 = vsub.f32 %v10190_v58, %v3095_v3  ;;  %v10417_v47 = vpop.f32.mrf.mxu0 }
 0x4d8   : > { %v10397_v43 = vpop.eup %7807 }
 0x4d9   : > { %v3190_v14 = vmul.f32 1.442695, %v3153_v13  ;;  %3246 = vadd.xlane.f32.xlu1 %v10397_v43  ;;  %3132 = vmax.xlane.f32.xlu0 %v10332_v50  ;;  %v10421_v3 = vpop.f32.mrf.mxu0 }
 0x4da   : > { %v3097_v42 = vpop.xlane.xlu0 %3096 }
 0x4db   : > { %7815 = vpow2.f32 %v3190_v14  ;;  %v3154_v33 = vsub.f32 %v10194_v29, %v3097_v42  ;;  %v10426_v42 = vpop.f32.mrf.mxu0 }
 0x4dc   : > { %v10406_v44 = vpop.eup %7809 }
 0x4dd   : > { %13999 = vst [vmem:[#allocation84_spill] sm:$0xff] %v10406_v44  ;;  %v3192_v58 = vmul.f32 1.442695, %v3154_v33  ;;  %3248 = vadd.xlane.f32.xlu0 %v10406_v44  ;;  %3134 = vmax.xlane.f32.xlu1 %v10334_v28 }
 0x4de   : > { %v3099_v51 = vpop.xlane.xlu1 %3098 }
 0x4df   : > { %7817 = vpow2.f32 %v3192_v58  ;;  %v3155_v27 = vsub.f32 %v10200_v41, %v3099_v51  ;;  %v10430_v58 = vpop.f32.mrf.mxu0 }
 0x4e0   : > { %v10415_v30 = vpop.eup %7811 }
 0x4e1   : > { %14000 = vst [vmem:[#allocation40_spill] sm:$0xff] %v10415_v30  ;;  %v3194_v29 = vmul.f32 1.442695, %v3155_v27  ;;  %3250 = vadd.xlane.f32.xlu1 %v10415_v30  ;;  %3136 = vmax.xlane.f32.xlu0 %v10336_v5 }
 0x4e2   : > { %v3101_v8 = vpop.xlane.xlu0 %3100 }
 0x4e3   : > { %7819 = vpow2.f32 %v3194_v29  ;;  %v3156_v13 = vsub.f32 %v10209_v63, %v3101_v8  ;;  %v10435_v29 = vpop.f32.mrf.mxu0 }
 0x4e4   : > { %v10424_v14 = vpop.eup %7813 }
 0x4e5   : > { %14001 = vst [vmem:[#allocation43_spill] sm:$0xff] %v10424_v14  ;;  %v3196_v41 = vmul.f32 1.442695, %v3156_v13  ;;  %3252 = vadd.xlane.f32.xlu0 %v10424_v14  ;;  %3138 = vmax.xlane.f32.xlu1 %v10338_v2  ;;  %v10439_v13 = vpop.f32.mrf.mxu0 }
 0x4e6   : > { %v3103_v33 = vpop.xlane.xlu1 %3102 }
 0x4e7   : > { %7821 = vpow2.f32 %v3196_v41  ;;  %v3157_v51 = vsub.f32 %v10221_v18, %v3103_v33  ;;  %v2327_v41 = vpop.f32.mrf.mxu0 }
 0x4e8   : > { %v10433_v27 = vpop.eup %7815 }
 0x4e9   : > { %14002 = vst [vmem:[#allocation44_spill] sm:$0xff] %v10433_v27  ;;  %v3198_v63 = vmul.f32 1.442695, %v3157_v51  ;;  %3254 = vadd.xlane.f32.xlu1 %v10433_v27  ;;  %3140 = vmax.xlane.f32.xlu0 %v10340_v56  ;;  %v2329_v33 = vpop.f32.mrf.mxu0 }
 0x4ea   : > { %v3105_v8 = vpop.xlane.xlu0 %3104 }
 0x4eb   : > { %7823 = vpow2.f32 %v3198_v63  ;;  %v3158_v48 = vsub.f32 %v10232_v20, %v3105_v8  ;;  %v2331_v30 = vpop.f32.mrf.mxu0 }
 0x4ec   : > { %v10442_v19 = vpop.eup %7817 }
 0x4ed   : > { %14003 = vst [vmem:[#allocation47_spill] sm:$0xff] %v10442_v19  ;;  %v3200_v14 = vmul.f32 1.442695, %v3158_v48  ;;  %3256 = vadd.xlane.f32.xlu0 %v10442_v19  ;;  %3142 = vmax.xlane.f32.xlu1 %v10342_v15  ;;  %v2333_v63 = vpop.f32.mrf.mxu0 }
 0x4ee   : > { %v3107_v18 = vpop.xlane.xlu1 %3106 }
 0x4ef   : > { %7825 = vpow2.f32 %v3200_v14  ;;  %v3159_v51 = vsub.f32 %v10247_v0, %v3107_v18  ;;  %v2337_v19 = vpop.f32.mrf.mxu0  ;;  %v13600_v14 = vmov 0  }
 0x4f0   : > { %v10447_v27 = vpop.eup %7819  ;;  %3420 = vmatprep.mubr.bf16.mxu0 %v13600_v14  ;;  %3533 = vmatprep.mubr.bf16.mxu1 %v13600_v14 }
 0x4f1   : > { %14004 = vst [vmem:[#allocation48_spill] sm:$0xff] %v10447_v27  ;;  %v3202_v44 = vmul.f32 1.442695, %v3159_v51  ;;  %3258 = vadd.xlane.f32.xlu1 %v10447_v27  ;;  %3144 = vmax.xlane.f32.xlu0 %v10344_v55  ;;  %v2339_v18 = vpop.f32.mrf.mxu0 }
 0x4f2   : > { %v3109_v20 = vpop.xlane.xlu0 %3108 }
 0x4f3   : > { %7827 = vpow2.f32 %v3202_v44  ;;  %v3160_v48 = vsub.f32 %v10262_v61, %v3109_v20  ;;  %v2341_v20 = vpop.f32.mrf.mxu0 }
 0x4f4   : > { %v10452_v8 = vpop.eup %7821 }
 0x4f5   : > { %14005 = vst [vmem:[#allocation50_spill] sm:$0xff] %v10452_v8  ;;  %v3204_v15 = vmul.f32 1.442695, %v3160_v48  ;;  %3260 = vadd.xlane.f32.xlu0 %v10452_v8  ;;  %3146 = vmax.xlane.f32.xlu1 %v10349_v11  ;;  %v2562_v11 = vmul.f32 %v10115_v49, %v2337_v19 }
 0x4f6   : > { %v3111_v0 = vpop.xlane.xlu1 %3110 }
 0x4f7   : > { %7829 = vpow2.f32 %v3204_v15  ;;  %v3161_v44 = vsub.f32 %v10277_v40, %v3111_v0  ;;  %v2568_v15 = vmul.f32 %v10115_v49, %v2341_v20  ;;  %v2343_v40 = vpop.f32.mrf.mxu0  ;;  %v2786_v19 = vadd.f32 %v10124_v22, %v2562_v11 }
 0x4f8   : > { %v10459_v51 = vpop.eup %7823  ;;  %v2550_v20 = vmul.f32 %v10115_v49, %v2327_v41  ;;  %v2527_v41 = vmul.f32 %v10198_v9, %v10412_v21 }
 0x4f9   : > { %14006 = vst [vmem:[#allocation28_spill] sm:$0xff] %v10459_v51  ;;  %v3206_v61 = vmul.f32 1.442695, %v3161_v44  ;;  %3262 = vadd.xlane.f32.xlu1 %v10459_v51  ;;  %v2563_v44 = vmul.f32 %v10198_v9, %v2339_v18  ;;  %v2556_v18 = vmul.f32 %v10115_v49, %v2331_v30  ;;  %v2545_v30 = vmul.f32 %v10198_v9, %v10439_v13 }
 0x4fa   : > { %v3113_v48 = vpop.xlane.xlu0 %3112  ;;  %v2774_v21 = vadd.f32 %v10124_v22, %v2550_v20  ;;  %v2526_v20 = vmul.f32 %v10115_v49, %v10408_v34 }
 0x4fb   : > { %7831 = vpow2.f32 %v3206_v61  ;;  %v3162_v8 = vsub.f32 %v10288_v1, %v3113_v48  ;;  %v2551_v1 = vmul.f32 %v10198_v9, %v2329_v33  ;;  %v2557_v61 = vmul.f32 %v10198_v9, %v2333_v63 }
 0x4fc   : > { %v10463_v27 = vpop.eup %7825  ;;  %v2787_v11 = vadd.f32 %v10206_v52, %v2563_v44  ;;  %v2544_v44 = vmul.f32 %v10115_v49, %v10435_v29  ;;  %v2780_v13 = vadd.f32 %v10124_v22, %v2556_v18 }
 0x4fd   : > { %14007 = vst [vmem:[#allocation29_spill] sm:$0xff] %v10463_v27  ;;  %v3208_v55 = vmul.f32 1.442695, %v3162_v8  ;;  %3264 = vadd.xlane.f32.xlu0 %v10463_v27  ;;  %v2569_v8 = vmul.f32 %v10198_v9, %v2343_v40  ;;  %v2775_v33 = vadd.f32 %v10206_v52, %v2551_v1  ;;  %v2781_v63 = vadd.f32 %v10206_v52, %v2557_v61 }
 0x4fe   : > { %v3115_v0 = vpop.xlane.xlu1 %3114  ;;  %v2538_v40 = vmul.f32 %v10115_v49, %v10426_v42 }
 0x4ff   : > { %7833 = vpow2.f32 %v3208_v55  ;;  %v3163_v14 = vsub.f32 %v10297_v24, %v3115_v0  ;;  %v2792_v55 = vadd.f32 %v10124_v22, %v2568_v15  ;;  %v2539_v0 = vmul.f32 %v10198_v9, %v10430_v58 }
 0x500   : > { %v10470_v51 = vpop.eup %7827  ;;  %v2533_v58 = vmul.f32 %v10198_v9, %v10421_v3  ;;  %v2793_v1 = vadd.f32 %v10206_v52, %v2569_v8  ;;  %v2769_v3 = vadd.f32 %v10206_v52, %v2545_v30  ;;  %v2887_v42 = vpack.c.bf16 %v2781_v63, %v2775_v33 }
 0x501   : > { %14008 = vst [vmem:[#allocation30_spill] sm:$0xff] %v10470_v51  ;;  %v3210_v48 = vmul.f32 1.442695, %v3163_v14  ;;  %3266 = vadd.xlane.f32.xlu1 %v10470_v51  ;;  %v2888_v61 = vpack.c.bf16 %v2792_v55, %v2786_v19  ;;  %v2515_v8 = vmul.f32 %v10198_v9, %v10394_v54  ;;  %v2532_v19 = vmul.f32 %v10115_v49, %v10417_v47 }
 0x502   : > { %v3117_v24 = vpop.xlane.xlu0 %3116  ;;  %v2889_v51 = vpack.c.bf16 %v2793_v1, %v2787_v11  ;;  %v2762_v55 = vadd.f32 %v10124_v22, %v2538_v40  ;;  %v2521_v54 = vmul.f32 %v10198_v9, %v10403_v26  ;;  %v2751_v63 = vadd.f32 %v10206_v52, %v2527_v41 }
 0x503   : > { %7835 = vpow2.f32 %v3210_v48  ;;  %v3164_v14 = vsub.f32 %v10302_v12, %v3117_v24  ;;  %v2763_v24 = vadd.f32 %v10206_v52, %v2539_v0  ;;  %v2768_v0 = vadd.f32 %v10124_v22, %v2544_v44 }
 0x504   : > { %v10490_v15 = vpop.eup %7829  ;;  %3501 = vmatprep.subr.bf16.mxu1 %v2889_v51  ;;  %v2757_v34 = vadd.f32 %v10206_v52, %v2533_v58  ;;  %v2514_v30 = vmul.f32 %v10115_v49, %v10391_v45  ;;  %v2520_v26 = vmul.f32 %v10115_v49, %v10399_v60  ;;  %v2750_v41 = vadd.f32 %v10124_v22, %v2526_v20 }
 0x505   : > { %v3212_v12 = vmul.f32 1.442695, %v3164_v14  ;;  %3268 = vadd.xlane.f32.xlu0 %v10490_v15  ;;  %3502 = vmatpush1.bf16.msra.mxu1 %v2888_v61  ;;  %v2885_v47 = vpack.c.bf16 %v2769_v3, %v2763_v24  ;;  %v2503_v14 = vmul.f32 %v10198_v9, %v10381_v16  ;;  %v2756_v58 = vadd.f32 %v10124_v22, %v2532_v19 }
 0x506   : > { %v3119_v48 = vpop.xlane.xlu1 %3118  ;;  %3503 = vmatprep.subr.bf16.mxu1 %v2887_v42  ;;  %v2884_v44 = vpack.c.bf16 %v2768_v0, %v2762_v55  ;;  %v2509_v1 = vmul.f32 %v10198_v9, %v10386_v36  ;;  %v2739_v16 = vadd.f32 %v10206_v52, %v2515_v8  ;;  %v2745_v45 = vadd.f32 %v10206_v52, %v2521_v54 }
 0x507   : > { %7837 = vpow2.f32 %v3212_v12  ;;  %v3165_v29 = vsub.f32 %v10308_v31, %v3119_v48  ;;  %v2886_v31 = vpack.c.bf16 %v2780_v13, %v2774_v21  ;;  %v2883_v12 = vpack.c.bf16 %v2757_v34, %v2751_v63 }
 0x508   : > { %v10505_v27 = vpop.eup %7831  ;;  %v2491_v13 = vmul.f32 %v10198_v9, %v10363_v25  ;;  %v2502_v61 = vmul.f32 %v10115_v49, %v10379_v32  ;;  %v2508_v36 = vmul.f32 %v10115_v49, %v10384_v59  ;;  %v2738_v24 = vadd.f32 %v10124_v22, %v2514_v30 }
 0x509   : > { %v3214_v18 = vmul.f32 1.442695, %v3165_v29  ;;  %3270 = vadd.xlane.f32.xlu1 %v10505_v27  ;;  %3504 = vmatpush1.bf16.msra.mxu1 %v2886_v31  ;;  %v2744_v3 = vadd.f32 %v10124_v22, %v2520_v26  ;;  %v2882_v42 = vpack.c.bf16 %v2756_v58, %v2750_v41  ;;  %v2497_v29 = vmul.f32 %v10198_v9, %v10376_v53 }
 0x50a   : > { %v3121_v33 = vpop.xlane.xlu0 %3120  ;;  %3505 = vmatprep.subr.bf16.mxu1 %v2885_v47  ;;  %v2727_v25 = vadd.f32 %v10206_v52, %v2503_v14  ;;  %v2733_v32 = vadd.f32 %v10206_v52, %v2509_v1  ;;  %v2881_v8 = vpack.c.bf16 %v2745_v45, %v2739_v16  ;;  %v2479_v20 = vmul.f32 %v10198_v9, %v10347_v7 }
 0x50b   : > { %7839 = vpow2.f32 %v3214_v18  ;;  %v3166_v51 = vsub.f32 %v10314_v6, %v3121_v33  ;;  %v2726_v18 = vadd.f32 %v10124_v22, %v2502_v61  ;;  %v2732_v53 = vadd.f32 %v10124_v22, %v2508_v36 }
 0x50c   : > { %v10521_v11 = vpop.eup %7833  ;;  %v2880_v55 = vpack.c.bf16 %v2744_v3, %v2738_v24  ;;  %v2485_v31 = vmul.f32 %v10198_v9, %v10355_v62  ;;  %v2721_v33 = vadd.f32 %v10206_v52, %v2497_v29  ;;  %v2879_v54 = vpack.c.bf16 %v2733_v32, %v2727_v25 }
 0x50d   : > { %v3216_v40 = vmul.f32 1.442695, %v3166_v51  ;;  %3272 = vadd.xlane.f32.xlu0 %v10521_v11  ;;  %3506 = vmatpush1.bf16.msra.mxu1 %v2884_v44  ;;  %v2878_v22 = vpack.c.bf16 %v2732_v53, %v2726_v18  ;;  %v2703_v51 = vadd.f32 %v10206_v52, %v2479_v20 }
 0x50e   : > { %v3123_v6 = vpop.xlane.xlu1 %3122  ;;  %3507 = vmatprep.subr.bf16.mxu1 %v2883_v12  ;;  %v2709_v9 = vadd.f32 %v10206_v52, %v2485_v31 }
 0x50f   : > { %7841 = vpow2.f32 %v3216_v40  ;;  %v3167_v60 = vsub.f32 %v10317_v46, %v3123_v6  ;;  %v14010_v6 = vpack.c.bf16 %v10358_v17, %v10352_v10 }
 0x510   : > { %v10537_v21 = vpop.eup %7835  ;;  %v2875_v40 = vpack.c.bf16 %v2709_v9, %v2703_v51  ;;  %v14016_v9 = vld [vmem:[#allocation54_spill] sm:$0xff] }
 0x511   : > { %v3218_v48 = vmul.f32 1.442695, %v3167_v60  ;;  %3274 = vadd.xlane.f32.xlu1 %v10537_v21  ;;  %3508 = vmatpush1.bf16.msra.mxu1 %v2882_v42 }
 0x512   : > { %v3125_v46 = vpop.xlane.xlu0 %3124  ;;  %3509 = vmatprep.subr.bf16.mxu1 %v2881_v8 }
 0x513   : > { %7843 = vpow2.f32 %v3218_v48  ;;  %v3168_v49 = vsub.f32 %v10320_v38, %v3125_v46  ;;  %v2715_v38 = vadd.f32 %v10206_v52, %v2491_v13 }
 0x514   : > { %v10553_v59 = vpop.eup %7837 }
 0x515   : > { %v3220_v19 = vmul.f32 1.442695, %v3168_v49  ;;  %3276 = vadd.xlane.f32.xlu0 %v10553_v59  ;;  %3510 = vmatpush1.bf16.msra.mxu1 %v2880_v55  ;;  %v2877_v62 = vpack.c.bf16 %v2721_v33, %v2715_v38 }
 0x516   : > { %v3127_v0 = vpop.xlane.xlu1 %3126  ;;  %3511 = vmatprep.subr.bf16.mxu1 %v2879_v54 }
 0x517   : > { %7845 = vpow2.f32 %v3220_v19  ;;  %v3169_v7 = vsub.f32 %v10323_v39, %v3127_v0  ;;  %v14011_v0 = vmov 0  }
 0x518   : > { %v10565_v63 = vpop.eup %7839 }
 0x519   : > { %v3222_v34 = vmul.f32 1.442695, %v3169_v7  ;;  %3278 = vadd.xlane.f32.xlu1 %v10565_v63  ;;  %3512 = vmatpush1.bf16.msra.mxu1 %v2878_v22 }
 0x51a   : > { %v3129_v47 = vpop.xlane.xlu0 %3128  ;;  %3513 = vmatprep.subr.bf16.mxu1 %v2877_v62 }
 0x51b   : > { %7847 = vpow2.f32 %v3222_v34  ;;  %v3170_v14 = vsub.f32 %v10326_v4, %v3129_v47  ;;  %v14009_v4 = vpack.c.bf16 %v10370_v23, %v10366_v57  ;;  %v14014_v34 = vld [vmem:[#allocation84_spill] sm:$0xff] }
 0x51c   : > { %v10571_v30 = vpop.eup %7841  ;;  %v14015_v47 = vld [vmem:[#allocation40_spill] sm:$0xff] }
 0x51d   : > { %v3224_v39 = vmul.f32 1.442695, %v3170_v14  ;;  %3280 = vadd.xlane.f32.xlu0 %v10571_v30  ;;  %3514 = vmatpush1.bf16.msra.mxu1 %v14009_v4  ;;  %v3652_v4 = vld [vmem:[%s14013_s22 + $0x30] sm:$0xff] }
 0x51e   : > { %v3131_v26 = vpop.xlane.xlu1 %3130  ;;  %3515 = vmatprep.subr.bf16.mxu1 %v2875_v40  ;;  %v3653_v40 = vld [vmem:[%s14013_s22 + $0x38] sm:$0xff] }
 0x51f   : > { %7849 = vpow2.f32 %v3224_v39  ;;  %v3171_v41 = vsub.f32 %v10329_v37, %v3131_v26 }
 0x520   : > { %v10575_v58 = vpop.eup %7843 }
 0x521   : > { %v3226_v52 = vmul.f32 1.442695, %v3171_v41  ;;  %3282 = vadd.xlane.f32.xlu1 %v10575_v58  ;;  %3516 = vmatpush1.bf16.msra.mxu1 %v14010_v6 }
 0x523   : > { %7851 = vpow2.f32 %v3226_v52  ;;  %v3677_v52 = vunpack.c.h.s8.bf16 %v3653_v40 }
 0x524   : > { %v10581_v44 = vpop.eup %7845 }
 0x525   : > { %3284 = vadd.xlane.f32.xlu0 %v10581_v44  ;;  %3694 = vmatprep.subr.bf16.mxu0 %v3677_v52 }
 0x528   : > { %v10587_v37 = vpop.eup %7847 }
 0x529   : > { %3286 = vadd.xlane.f32.xlu1 %v10587_v37 }
 0x52c   : > { %v10590_v1 = vpop.eup %7849 }
 0x52d   : > { %3288 = vadd.xlane.f32.xlu0 %v10590_v1 }
 0x530   : > { %v10593_v57 = vpop.eup %7851 }
 0x531   : > { %3290 = vadd.xlane.f32.xlu1 %v10593_v57 }
 0x55e   : > { %v3245_v23 = vpop.xlane.xlu0 %3244 }
 0x55f   : > { %7853 = vrcp.f32 %v3245_v23 }
 0x562   : > { %v3247_v16 = vpop.xlane.xlu1 %3246  ;;  %v3133_v45 = vpop.xlane.xlu0 %3132 }
 0x563   : > { %7855 = vrcp.f32 %v3247_v16  ;;  %v3172_v10 = vsub.f32 %v10332_v50, %v3133_v45  ;;  %v14017_v16 = vld [vmem:[#allocation85_spill] sm:$0xff] }
 0x565   : > { %v3228_v17 = vmul.f32 1.442695, %v3172_v10  ;;  %v3676_v10 = vunpack.c.h.s8.bf16 %v3652_v4 }
 0x566   : > { %v3249_v12 = vpop.xlane.xlu0 %3248  ;;  %v3135_v60 = vpop.xlane.xlu1 %3134 }
 0x567   : > { %7857 = vpow2.f32 %v3228_v17  ;;  %v3173_v13 = vsub.f32 %v10334_v28, %v3135_v60 }
 0x568   : > { %7859 = vrcp.f32 %v3249_v12 }
 0x569   : > { %v3230_v61 = vmul.f32 1.442695, %v3173_v13 }
 0x56a   : > { %v3251_v36 = vpop.xlane.xlu1 %3250  ;;  %v3137_v48 = vpop.xlane.xlu0 %3136 }
 0x56b   : > { %7861 = vpow2.f32 %v3230_v61  ;;  %v3174_v24 = vsub.f32 %v10336_v5, %v3137_v48  ;;  %v14018_v61 = vld [vmem:[#allocation43_spill] sm:$0xff]  ;;  %v14019_v48 = vld [vmem:[#allocation44_spill] sm:$0xff] }
 0x56c   : > { %7863 = vrcp.f32 %v3251_v36  ;;  %v7854_v42 = vpop.eup %7853 }
 0x56d   : > { %v3232_v3 = vmul.f32 1.442695, %v3174_v24  ;;  %v3309_v8 = vmul.f32 %v7854_v42, %v10389_v35  ;;  %v3674_v42 = vunpack.c.l.s8.bf16 %v3652_v4 }
 0x56e   : > { %v3253_v46 = vpop.xlane.xlu0 %3252  ;;  %v3139_v29 = vpop.xlane.xlu1 %3138 }
 0x56f   : > { %7865 = vpow2.f32 %v3232_v3  ;;  %v3175_v50 = vsub.f32 %v10338_v2, %v3139_v29  ;;  %v3675_v3 = vunpack.c.l.s8.bf16 %v3653_v40 }
 0x570   : > { %v7856_v25 = vpop.eup %7855  ;;  %7867 = vrcp.f32 %v3253_v46 }
 0x571   : > { %v3234_v32 = vmul.f32 1.442695, %v3175_v50  ;;  %v3311_v28 = vmul.f32 %v7856_v25, %v10397_v43  ;;  %v14012_v43 = vld [vmem:[#allocation39_spill] sm:$0xff]  ;;  %v3651_v50 = vld [vmem:[%s14013_s22 + $0x28] sm:$0xff] }
 0x572   : > { %v3255_v49 = vpop.xlane.xlu1 %3254  ;;  %v3141_v20 = vpop.xlane.xlu0 %3140 }
 0x573   : > { %7869 = vpow2.f32 %v3234_v32  ;;  %v3176_v5 = vsub.f32 %v10340_v56, %v3141_v20  ;;  %v3372_v19 = vpack.c.bf16 %v3311_v28, %v3309_v8  ;;  %v3673_v32 = vunpack.c.h.s8.bf16 %v3651_v50  ;;  %v3650_v8 = vld [vmem:[%s14013_s22 + $0x20] sm:$0xff] }
 0x574   : > { %v10603_v18 = vpop.eup %7857  ;;  %7871 = vrcp.f32 %v3255_v49  ;;  %v3672_v49 = vunpack.c.h.s8.bf16 %v3650_v8 }
 0x575   : > { %v3236_v53 = vmul.f32 1.442695, %v3176_v5  ;;  %3292 = vadd.xlane.f32.xlu0 %v10603_v18  ;;  %3421 = vmatmul.mubr.bf16.vlgmr.msra.gmra.mxu0 %v3372_v19  ;;  %v7860_v35 = vpop.eup %7859 }
 0x576   : > { %v3257_v2 = vpop.xlane.xlu0 %3256  ;;  %v3143_v55 = vpop.xlane.xlu1 %3142  ;;  %3430 = vmatprep.mubr.bf16.mxu0 %v14011_v0  ;;  %v3313_v22 = vmul.f32 %v7860_v35, %v14014_v34  ;;  %3695 = vmatpush1.bf16.msra.mxu0 %v3676_v10 }
 0x577   : > { %7873 = vpow2.f32 %v3236_v53  ;;  %v3177_v31 = vsub.f32 %v14012_v43, %v3143_v55  ;;  %3696 = vmatprep.subr.bf16.mxu0 %v3675_v3  ;;  %v14020_v53 = vld [vmem:[#allocation47_spill] sm:$0xff]  ;;  %v14021_v55 = vld [vmem:[#allocation48_spill] sm:$0xff]  ;;  %v3671_v43 = vunpack.c.l.s8.bf16 %v3651_v50 }
 0x578   : > { %v10608_v38 = vpop.eup %7861  ;;  %7875 = vrcp.f32 %v3257_v2 }
 0x579   : > { %v7864_v56 = vpop.eup %7863  ;;  %v3238_v33 = vmul.f32 1.442695, %v3177_v31  ;;  %3294 = vadd.xlane.f32.xlu1 %v10608_v38  ;;  %v3670_v31 = vunpack.c.l.s8.bf16 %v3650_v8  ;;  %v3660_v8 = vld [vmem:[%s14013_s22 + $0x70] sm:$0xff] }
 0x57a   : > { %v3259_v54 = vpop.xlane.xlu1 %3258  ;;  %v3145_v7 = vpop.xlane.xlu0 %3144  ;;  %v3315_v51 = vmul.f32 %v7864_v56, %v14015_v47  ;;  %3697 = vmatpush1.bf16.msra.mxu0 %v3674_v42 }
 0x57b   : > { %7877 = vpow2.f32 %v3238_v33  ;;  %v3178_v62 = vsub.f32 %v14016_v9, %v3145_v7  ;;  %3698 = vmatprep.subr.bf16.mxu0 %v3673_v32  ;;  %v3661_v32 = vld [vmem:[%s14013_s22 + $0x78] sm:$0xff] }
 0x57c   : > { %v10614_v14 = vpop.eup %7865  ;;  %7879 = vrcp.f32 %v3259_v54  ;;  %v3373_v39 = vpack.c.bf16 %v3315_v51, %v3313_v22  ;;  %v3649_v54 = vld [vmem:[%s14013_s22 + $0x18] sm:$0xff]  ;;  %v3648_v22 = vld [vmem:[%s14013_s22 + $0x10] sm:$0xff] }
 0x57d   : > { %v3240_v26 = vmul.f32 1.442695, %v3178_v62  ;;  %3296 = vadd.xlane.f32.xlu0 %v10614_v14  ;;  %v7868_v6 = vpop.eup %7867  ;;  %v3669_v34 = vunpack.c.h.s8.bf16 %v3649_v54  ;;  %v3668_v51 = vunpack.c.h.s8.bf16 %v3648_v22  ;;  %v3667_v4 = vunpack.c.l.s8.bf16 %v3649_v54  ;;  %v3659_v54 = vld [vmem:[%s14013_s22 + $0x68] sm:$0xff] }
 0x57e   : > { %3431 = vmatmul.mubr.bf16.gmra.mxu0 %v3373_v39  ;;  %v3147_v41 = vpop.xlane.xlu1 %3146  ;;  %v3261_v23 = vpop.xlane.xlu0 %3260  ;;  %v3317_v36 = vmul.f32 %v7868_v6, %v14018_v61  ;;  %v3666_v6 = vunpack.c.l.s8.bf16 %v3648_v22 }
 0x57f   : > { %7881 = vpow2.f32 %v3240_v26  ;;  %v3179_v45 = vsub.f32 %v14017_v16, %v3147_v41  ;;  %3440 = vmatprep.mubr.bf16.mxu0 %v14011_v0  ;;  %3699 = vmatpush1.bf16.msra.mxu0 %v3672_v49  ;;  %v14022_v26 = vld [vmem:[#allocation50_spill] sm:$0xff]  ;;  %v14023_v41 = vld [vmem:[#allocation28_spill] sm:$0xff]  ;;  %v3647_v16 = vld [vmem:[%s14013_s22 + $0x8] sm:$0xff] }
 0x580   : > { %v10621_v17 = vpop.eup %7869  ;;  %7883 = vrcp.f32 %v3261_v23  ;;  %3700 = vmatprep.subr.bf16.mxu0 %v3671_v43  ;;  %v3690_v43 = vunpack.c.l.s8.bf16 %v3660_v8 }
 0x581   : > { %v7872_v12 = vpop.eup %7871  ;;  %v3242_v60 = vmul.f32 1.442695, %v3179_v45  ;;  %3298 = vadd.xlane.f32.xlu1 %v10621_v17 }
 0x582   : > { %v3263_v13 = vpop.xlane.xlu1 %3262  ;;  %v3319_v24 = vmul.f32 %v7872_v12, %v14019_v48  ;;  %v3665_v12 = vunpack.c.h.s8.bf16 %v3647_v16 }
 0x583   : > { %7885 = vpow2.f32 %v3242_v60  ;;  %3701 = vmatpush1.bf16.msra.mxu0 %v3670_v31  ;;  %v3646_v60 = vld [vmem:[%s14013_s22] sm:$0xff] }
 0x584   : > { %v10626_v46 = vpop.eup %7873  ;;  %7887 = vrcp.f32 %v3263_v13  ;;  %v3374_v29 = vpack.c.bf16 %v3319_v24, %v3317_v36  ;;  %3702 = vmatprep.subr.bf16.mxu0 %v3669_v34  ;;  %v3664_v13 = vunpack.c.h.s8.bf16 %v3646_v60  ;;  %v14024_v36 = vld [vmem:[#allocation29_spill] sm:$0xff]  ;;  %v14025_v24 = vld [vmem:[#allocation30_spill] sm:$0xff] }
 0x585   : > { %3300 = vadd.xlane.f32.xlu0 %v10626_v46  ;;  %v7876_v28 = vpop.eup %7875 }
 0x586   : > { %3441 = vmatmul.mubr.bf16.gmra.mxu0 %v3374_v29  ;;  %v3265_v25 = vpop.xlane.xlu0 %3264  ;;  %v3321_v2 = vmul.f32 %v7876_v28, %v14020_v53  ;;  %v3663_v29 = vunpack.c.l.s8.bf16 %v3647_v16  ;;  %v3691_v53 = vunpack.c.l.s8.bf16 %v3661_v32 }
 0x587   : > { %3450 = vmatprep.mubr.bf16.mxu0 %v14011_v0  ;;  %7889 = vrcp.f32 %v3265_v25  ;;  %3703 = vmatpush1.bf16.msra.mxu0 %v3668_v51  ;;  %v3662_v25 = vunpack.c.l.s8.bf16 %v3646_v60 }
 0x588   : > { %v10632_v20 = vpop.eup %7877  ;;  %3704 = vmatprep.subr.bf16.mxu0 %v3667_v4  ;;  %v3656_v4 = vld [vmem:[%s14013_s22 + $0x50] sm:$0xff] }
 0x589   : > { %v7880_v5 = vpop.eup %7879  ;;  %3302 = vadd.xlane.f32.xlu1 %v10632_v20  ;;  %v3682_v60 = vunpack.c.l.s8.bf16 %v3656_v4 }
 0x58a   : > { %v3267_v19 = vpop.xlane.xlu1 %3266  ;;  %v3323_v35 = vmul.f32 %v7880_v5, %v14021_v55  ;;  %v3693_v5 = vunpack.c.h.s8.bf16 %v3661_v32 }
 0x58b   : > { %7891 = vrcp.f32 %v3267_v19  ;;  %3705 = vmatpush1.bf16.msra.mxu0 %v3666_v6  ;;  %v3692_v19 = vunpack.c.h.s8.bf16 %v3660_v8 }
 0x58c   : > { %v10637_v56 = vpop.eup %7881  ;;  %v3375_v33 = vpack.c.bf16 %v3323_v35, %v3321_v2  ;;  %3706 = vmatprep.subr.bf16.mxu0 %v3665_v12 }
 0x58d   : > { %3304 = vadd.xlane.f32.xlu0 %v10637_v56  ;;  %v7884_v47 = vpop.eup %7883 }
 0x58e   : > { %3451 = vmatmul.mubr.bf16.gmra.mxu0 %v3375_v33  ;;  %v3269_v7 = vpop.xlane.xlu0 %3268  ;;  %v3325_v40 = vmul.f32 %v7884_v47, %v14022_v26  ;;  %v3689_v47 = vunpack.c.h.s8.bf16 %v3659_v54 }
 0x58f   : > { %3460 = vmatprep.mubr.bf16.mxu0 %v14011_v0  ;;  %7893 = vrcp.f32 %v3269_v7  ;;  %3707 = vmatpush1.bf16.msra.mxu0 %v3664_v13  ;;  %v3658_v7 = vld [vmem:[%s14013_s22 + $0x60] sm:$0xff] }
 0x590   : > { %v10643_v9 = vpop.eup %7885  ;;  %3708 = vmatprep.subr.bf16.mxu0 %v3663_v29  ;;  %v3688_v51 = vunpack.c.h.s8.bf16 %v3658_v7  ;;  %v3686_v26 = vunpack.c.l.s8.bf16 %v3658_v7 }
 0x591   : > { %v7888_v62 = vpop.eup %7887  ;;  %3306 = vadd.xlane.f32.xlu1 %v10643_v9 }
 0x592   : > { %v3271_v39 = vpop.xlane.xlu1 %3270  ;;  %v3327_v52 = vmul.f32 %v7888_v62, %v14023_v41  ;;  %v3687_v62 = vunpack.c.l.s8.bf16 %v3659_v54 }
 0x593   : > { %7895 = vrcp.f32 %v3271_v39  ;;  %3709 = vmatpush1.bf16.msra.mxu0 %v3662_v25 }
 0x594   : > { %v3376_v23 = vpack.c.bf16 %v3327_v52, %v3325_v40  ;;  %v7890_v45 = vpop.eup %7889  ;;  %3710 = vmatprep.subr.bf16.mxu0 %v3693_v5  ;;  %v3657_v52 = vld [vmem:[%s14013_s22 + $0x58] sm:$0xff] }
 0x595   : > { %v3329_v48 = vmul.f32 %v7890_v45, %v14024_v36  ;;  %v3685_v16 = vunpack.c.h.s8.bf16 %v3657_v52  ;;  %v3684_v45 = vunpack.c.h.s8.bf16 %v3656_v4  ;;  %v3655_v36 = vld [vmem:[%s14013_s22 + $0x48] sm:$0xff] }
 0x596   : > { %3461 = vmatmul.mubr.bf16.gmra.mxu0 %v3376_v23  ;;  %v3273_v10 = vpop.xlane.xlu0 %3272  ;;  %v3679_v32 = vunpack.c.l.s8.bf16 %v3655_v36 }
 0x597   : > { %3470 = vmatprep.mubr.bf16.mxu0 %v14011_v0  ;;  %7897 = vrcp.f32 %v3273_v10  ;;  %3711 = vmatpush2.bf16.msra.mxu0 %v3692_v19  ;;  %v3683_v10 = vunpack.c.l.s8.bf16 %v3657_v52 }
 0x598   : > { %v7892_v61 = vpop.eup %7891  ;;  %3712 = vmatprep.subr.bf16.mxu0 %v3691_v53 }
 0x599   : > { %v3331_v3 = vmul.f32 %v7892_v61, %v14025_v24 }
 0x59a   : > { %v3275_v42 = vpop.xlane.xlu1 %3274 }
 0x59b   : > { %7899 = vrcp.f32 %v3275_v42  ;;  %v3377_v50 = vpack.c.bf16 %v3331_v3, %v3329_v48  ;;  %3713 = vmatpush2.bf16.msra.mxu0 %v3690_v43  ;;  %v3681_v3 = vunpack.c.h.s8.bf16 %v3655_v36  ;;  %v3654_v42 = vld [vmem:[%s14013_s22 + $0x40] sm:$0xff] }
 0x59c   : > { %v7894_v28 = vpop.eup %7893  ;;  %3714 = vmatprep.subr.bf16.mxu0 %v3689_v47 }
 0x59d   : > { %v3333_v55 = vmul.f32 %v7894_v28, %v10490_v15  ;;  %v3678_v28 = vunpack.c.l.s8.bf16 %v3654_v42 }
 0x59e   : > { %3471 = vmatmul.mubr.bf16.gmra.mxu0 %v3377_v50  ;;  %v3277_v49 = vpop.xlane.xlu0 %3276 }
 0x59f   : > { %3480 = vmatprep.mubr.bf16.mxu0 %v14011_v0  ;;  %7901 = vrcp.f32 %v3277_v49  ;;  %3715 = vmatpush2.bf16.msra.mxu0 %v3688_v51 }
 0x5a0   : > { %v7896_v2 = vpop.eup %7895  ;;  %3716 = vmatprep.subr.bf16.mxu0 %v3687_v62 }
 0x5a1   : > { %v3335_v35 = vmul.f32 %v7896_v2, %v10505_v27 }
 0x5a2   : > { %v3279_v31 = vpop.xlane.xlu1 %3278 }
 0x5a3   : > { %7903 = vrcp.f32 %v3279_v31  ;;  %v3378_v33 = vpack.c.bf16 %v3335_v35, %v3333_v55  ;;  %3717 = vmatpush2.bf16.msra.mxu0 %v3686_v26 }
 0x5a4   : > { %v7898_v34 = vpop.eup %7897  ;;  %3718 = vmatprep.subr.bf16.mxu0 %v3685_v16 }
 0x5a5   : > { %v3337_v15 = vmul.f32 %v7898_v34, %v10521_v11 }
 0x5a6   : > { %3481 = vmatmul.mubr.bf16.gmra.mxu0 %v3378_v33  ;;  %v3281_v22 = vpop.xlane.xlu0 %3280 }
 0x5a7   : > { %3490 = vmatprep.mubr.bf16.mxu0 %v14011_v0  ;;  %7905 = vrcp.f32 %v3281_v22  ;;  %3719 = vmatpush2.bf16.msra.mxu0 %v3684_v45 }
 0x5a8   : > { %v7900_v27 = vpop.eup %7899  ;;  %3720 = vmatprep.subr.bf16.mxu0 %v3683_v10 }
 0x5a9   : > { %v3339_v39 = vmul.f32 %v7900_v27, %v10537_v21 }
 0x5aa   : > { %v3283_v40 = vpop.xlane.xlu1 %3282 }
 0x5ab   : > { %7907 = vrcp.f32 %v3283_v40  ;;  %v3379_v41 = vpack.c.bf16 %v3339_v39, %v3337_v15  ;;  %3721 = vmatpush2.bf16.msra.mxu0 %v3682_v60 }
 0x5ac   : > { %v7902_v6 = vpop.eup %7901  ;;  %3722 = vmatprep.subr.bf16.mxu0 %v3681_v3 }
 0x5ad   : > { %v3341_v11 = vmul.f32 %v7902_v6, %v10553_v59  ;;  %v3680_v59 = vunpack.c.h.s8.bf16 %v3654_v42 }
 0x5ae   : > { %3491 = vmatmul.mubr.bf16.gmra.mxu0 %v3379_v41  ;;  %v3285_v23 = vpop.xlane.xlu0 %3284 }
 0x5af   : > { %7909 = vrcp.f32 %v3285_v23  ;;  %3723 = vmatpush2.bf16.msra.mxu0 %v3680_v59 }
 0x5b0   : > { %v7904_v12 = vpop.eup %7903  ;;  %3724 = vmatprep.subr.bf16.mxu0 %v3679_v32 }
 0x5b1   : > { %v3343_v21 = vmul.f32 %v7904_v12, %v10565_v63 }
 0x5b2   : > { %v3287_v13 = vpop.xlane.xlu1 %3286 }
 0x5b3   : > { %7911 = vrcp.f32 %v3287_v13  ;;  %v3380_v61 = vpack.c.bf16 %v3343_v21, %v3341_v11  ;;  %3725 = vmatpush2.bf16.msra.mxu0 %v3678_v28 }
 0x5b4   : > { %v7906_v48 = vpop.eup %7905 }
 0x5b5   : > { %3534 = vmatmul.mubr.bf16.vlgmr.msra.gmra.mxu1 %v3380_v61  ;;  %v3345_v63 = vmul.f32 %v7906_v48, %v10571_v30 }
 0x5b6   : > { %v3289_v24 = vpop.xlane.xlu0 %3288  ;;  %3543 = vmatprep.mubr.bf16.mxu1 %v14011_v0 }
 0x5b7   : > { %7913 = vrcp.f32 %v3289_v24 }
 0x5b8   : > { %v7908_v29 = vpop.eup %7907 }
 0x5b9   : > { %v3347_v50 = vmul.f32 %v7908_v29, %v10575_v58 }
 0x5ba   : > { %v3291_v25 = vpop.xlane.xlu1 %3290 }
 0x5bb   : > { %7915 = vrcp.f32 %v3291_v25  ;;  %v3381_v8 = vpack.c.bf16 %v3347_v50, %v3345_v63 }
 0x5bc   : > { %v7910_v49 = vpop.eup %7909 }
 0x5bd   : > { %3544 = vmatmul.mubr.bf16.gmra.mxu1 %v3381_v8  ;;  %v3349_v19 = vmul.f32 %v7910_v49, %v10581_v44 }
 0x5be   : > { %3553 = vmatprep.mubr.bf16.mxu1 %v14011_v0 }
 0x5c0   : > { %v7912_v5 = vpop.eup %7911 }
 0x5c1   : > { %v3351_v53 = vmul.f32 %v7912_v5, %v10587_v37 }
 0x5c3   : > { %v3382_v30 = vpack.c.bf16 %v3351_v53, %v3349_v19 }
 0x5c4   : > { %v7914_v58 = vpop.eup %7913 }
 0x5c5   : > { %3554 = vmatmul.mubr.bf16.gmra.mxu1 %v3382_v30  ;;  %v3353_v55 = vmul.f32 %v7914_v58, %v10590_v1 }
 0x5c6   : > { %3563 = vmatprep.mubr.bf16.mxu1 %v14011_v0 }
 0x5c8   : > { %v7916_v2 = vpop.eup %7915 }
 0x5c9   : > { %v3355_v35 = vmul.f32 %v7916_v2, %v10593_v57 }
 0x5cb   : > { %v3383_v43 = vpack.c.bf16 %v3355_v35, %v3353_v55 }
 0x5cd   : > { %3564 = vmatmul.mubr.bf16.gmra.mxu1 %v3383_v43 }
 0x5ce   : > { %3573 = vmatprep.mubr.bf16.mxu1 %v14011_v0 }
 0x5fe   : > { %v3293_v31 = vpop.xlane.xlu0 %3292 }
 0x5ff   : > { %7917 = vrcp.f32 %v3293_v31 }
 0x602   : > { %v3295_v33 = vpop.xlane.xlu1 %3294 }
 0x603   : > { %7919 = vrcp.f32 %v3295_v33 }
 0x606   : > { %v3297_v44 = vpop.xlane.xlu0 %3296 }
 0x607   : > { %7921 = vrcp.f32 %v3297_v44 }
 0x60a   : > { %v3299_v37 = vpop.xlane.xlu1 %3298 }
 0x60b   : > { %7923 = vrcp.f32 %v3299_v37 }
 0x60c   : > { %v7918_v54 = vpop.eup %7917 }
 0x60d   : > { %v3357_v1 = vmul.f32 %v7918_v54, %v10603_v18 }
 0x60e   : > { %v3301_v7 = vpop.xlane.xlu0 %3300 }
 0x60f   : > { %7925 = vrcp.f32 %v3301_v7 }
 0x610   : > { %v7920_v34 = vpop.eup %7919 }
 0x611   : > { %v3359_v57 = vmul.f32 %v7920_v34, %v10608_v38 }
 0x612   : > { %v3303_v22 = vpop.xlane.xlu1 %3302 }
 0x613   : > { %7927 = vrcp.f32 %v3303_v22  ;;  %v3384_v47 = vpack.c.bf16 %v3359_v57, %v3357_v1 }
 0x614   : > { %v7922_v51 = vpop.eup %7921 }
 0x615   : > { %3574 = vmatmul.mubr.bf16.gmra.mxu1 %v3384_v47  ;;  %v3361_v15 = vmul.f32 %v7922_v51, %v10614_v14 }
 0x616   : > { %v3305_v62 = vpop.xlane.xlu0 %3304  ;;  %3583 = vmatprep.mubr.bf16.mxu1 %v14011_v0 }
 0x617   : > { %7929 = vrcp.f32 %v3305_v62 }
 0x618   : > { %v7924_v27 = vpop.eup %7923 }
 0x619   : > { %v3363_v39 = vmul.f32 %v7924_v27, %v10621_v17 }
 0x61a   : > { %v3307_v26 = vpop.xlane.xlu1 %3306 }
 0x61b   : > { %7931 = vrcp.f32 %v3307_v26  ;;  %v3385_v40 = vpack.c.bf16 %v3363_v39, %v3361_v15 }
 0x61c   : > { %v7926_v18 = vpop.eup %7925 }
 0x61d   : > { %3584 = vmatmul.mubr.bf16.gmra.mxu1 %v3385_v40  ;;  %v3365_v41 = vmul.f32 %v7926_v18, %v10626_v46 }
 0x61e   : > { %3593 = vmatprep.mubr.bf16.mxu1 %v14011_v0 }
 0x620   : > { %v7928_v38 = vpop.eup %7927 }
 0x621   : > { %v3367_v52 = vmul.f32 %v7928_v38, %v10632_v20 }
 0x623   : > { %v3386_v4 = vpack.c.bf16 %v3367_v52, %v3365_v41 }
 0x624   : > { %v7930_v6 = vpop.eup %7929 }
 0x625   : > { %3594 = vmatmul.mubr.bf16.gmra.mxu1 %v3386_v4  ;;  %v3369_v17 = vmul.f32 %v7930_v6, %v10637_v56 }
 0x626   : > { %3603 = vmatprep.mubr.bf16.mxu1 %v14011_v0 }
 0x628   : > { %v7932_v14 = vpop.eup %7931 }
 0x629   : > { %v3371_v23 = vmul.f32 %v7932_v14, %v10643_v9 }
 0x62b   : > { %v3387_v16 = vpack.c.bf16 %v3371_v23, %v3369_v17 }
 0x62d   : > { %3604 = vmatmul.mubr.bf16.gmra.mxu1 %v3387_v16 }
 0x635   : > { %v3422_v45 = vpop.f32.mrf.mxu0 }
 0x637   : > { %v3424_v10 = vpop.f32.mrf.mxu0 }
 0x639   : > { %v3426_v12 = vpop.f32.mrf.mxu0 }
 0x63a   : > { %v3614_v46 = vpack.c.bf16 %v3426_v12, %v3422_v45 }
 0x63b   : > { %v3428_v11 = vpop.f32.mrf.mxu0 }
 0x63c   : > { %v3615_v21 = vpack.c.bf16 %v3428_v11, %v3424_v10 }
 0x63e   : > { %v3432_v60 = vpop.f32.mrf.mxu0  ;;  %3726 = vmatprep.mubr.bf16.mxu0 %v3615_v21 }
 0x63f   : > { %3727 = vmatmul.mubr.bf16.vlgmr.msra.gmra.mxu0 %v3614_v46 }
 0x640   : > { %v3434_v20 = vpop.f32.mrf.mxu0 }
 0x642   : > { %v3436_v13 = vpop.f32.mrf.mxu0 }
 0x643   : > { %v3616_v36 = vpack.c.bf16 %v3436_v13, %v3432_v60 }
 0x644   : > { %v3438_v61 = vpop.f32.mrf.mxu0 }
 0x645   : > { %v3617_v0 = vpack.c.bf16 %v3438_v61, %v3434_v20 }
 0x646   : > { %v3442_v48 = vpop.f32.mrf.mxu0 }
 0x647   : > { %3736 = vmatprep.mubr.bf16.mxu0 %v3617_v0 }
 0x648   : > { %v3444_v56 = vpop.f32.mrf.mxu0  ;;  %3737 = vmatmul.mubr.bf16.gmra.mxu0 %v3616_v36 }
 0x64a   : > { %v3446_v9 = vpop.f32.mrf.mxu0 }
 0x64b   : > { %v3618_v42 = vpack.c.bf16 %v3446_v9, %v3442_v48 }
 0x64c   : > { %v3448_v24 = vpop.f32.mrf.mxu0 }
 0x64d   : > { %v3619_v3 = vpack.c.bf16 %v3448_v24, %v3444_v56 }
 0x64e   : > { %v3452_v59 = vpop.f32.mrf.mxu0 }
 0x64f   : > { %3746 = vmatprep.mubr.bf16.mxu0 %v3619_v3 }
 0x650   : > { %v3454_v29 = vpop.f32.mrf.mxu0  ;;  %3747 = vmatmul.mubr.bf16.gmra.mxu0 %v3618_v42 }
 0x652   : > { %v3456_v63 = vpop.f32.mrf.mxu0 }
 0x653   : > { %v3620_v32 = vpack.c.bf16 %v3456_v63, %v3452_v59 }
 0x654   : > { %v3458_v50 = vpop.f32.mrf.mxu0 }
 0x655   : > { %v3621_v25 = vpack.c.bf16 %v3458_v50, %v3454_v29 }
 0x656   : > { %v3462_v8 = vpop.f32.mrf.mxu0 }
 0x657   : > { %3756 = vmatprep.mubr.bf16.mxu0 %v3621_v25 }
 0x658   : > { %v3464_v28 = vpop.f32.mrf.mxu0  ;;  %3757 = vmatmul.mubr.bf16.gmra.mxu0 %v3620_v32 }
 0x65a   : > { %v3466_v49 = vpop.f32.mrf.mxu0 }
 0x65b   : > { %v3622_v53 = vpack.c.bf16 %v3466_v49, %v3462_v8 }
 0x65c   : > { %v3468_v5 = vpop.f32.mrf.mxu0 }
 0x65d   : > { %v3623_v19 = vpack.c.bf16 %v3468_v5, %v3464_v28 }
 0x65e   : > { %v3472_v30 = vpop.f32.mrf.mxu0 }
 0x65f   : > { %3766 = vmatprep.mubr.bf16.mxu0 %v3623_v19 }
 0x660   : > { %v3474_v58 = vpop.f32.mrf.mxu0  ;;  %3767 = vmatmul.mubr.bf16.gmra.mxu0 %v3622_v53 }
 0x662   : > { %v3476_v2 = vpop.f32.mrf.mxu0 }
 0x663   : > { %v3624_v43 = vpack.c.bf16 %v3476_v2, %v3472_v30  ;;  %v3887_v2 = vld [vmem:[%s14026_s24] sm:$0x3] }
 0x664   : > { %v3478_v55 = vpop.f32.mrf.mxu0 }
 0x665   : > { %v3625_v35 = vpack.c.bf16 %v3478_v55, %v3474_v58  ;;  %v3963_v55 = vld [vmem:[%s14027_s29] sm:$0x3] }
 0x666   : > { %v3482_v31 = vpop.f32.mrf.mxu0 }
 0x667   : > { %3776 = vmatprep.mubr.bf16.mxu0 %v3625_v35  ;;  %v14028_v35 = vld [vmem:[#allocation52_spill] sm:$0xff] }
 0x668   : > { %v3484_v33 = vpop.f32.mrf.mxu0  ;;  %3777 = vmatmul.mubr.bf16.gmra.mxu0 %v3624_v43  ;;  %v10701_v43 = vrot.slane %v3887_v2, %v14028_v35 }
 0x66a   : > { %v3486_v44 = vpop.f32.mrf.mxu0 }
 0x66b   : > { %v3626_v7 = vpack.c.bf16 %v3486_v44, %v3482_v31  ;;  %v10704_v31 = vrot.slane %v3963_v55, %v14028_v35 }
 0x66c   : > { %v3488_v37 = vpop.f32.mrf.mxu0 }
 0x66d   : > { %v3627_v54 = vpack.c.bf16 %v3488_v37, %v3484_v33  ;;  %v14029_v33 = vld [vmem:[#allocation78_spill] sm:$0xff] }
 0x66e   : > { %v3492_v34 = vpop.f32.mrf.mxu0  ;;  %v10707_v44 = vrot.slane %v3887_v2, %v14029_v33 }
 0x66f   : > { %3786 = vmatprep.mubr.bf16.mxu0 %v3627_v54 }
 0x670   : > { %v3494_v1 = vpop.f32.mrf.mxu0  ;;  %3787 = vmatmul.mubr.bf16.gmra.mxu0 %v3626_v7  ;;  %v10711_v7 = vrot.slane %v3963_v55, %v14029_v33  ;;  %v8072_v55 = vld [vmem:[#allocation2 + $0x110] sm:$0xff] }
 0x671   : > { %v4803_v33 = vld [vmem:[%s8261_s3 + $0x10] sm:$0xff] }
 0x672   : > { %v3496_v57 = vpop.f32.mrf.mxu0 }
 0x673   : > { %v3628_v62 = vpack.c.bf16 %v3496_v57, %v3492_v34 }
 0x674   : > { %v3498_v22 = vpop.f32.mrf.mxu0 }
 0x675   : > { %v3629_v47 = vpack.c.bf16 %v3498_v22, %v3494_v1  ;;  %v3535_v51 = vpop.f32.mrf.mxu1 }
 0x677   : > { %3796 = vmatprep.mubr.bf16.mxu0 %v3629_v47  ;;  %v3537_v27 = vpop.f32.mrf.mxu1 }
 0x678   : > { %3797 = vmatmul.mubr.bf16.gmra.mxu0 %v3628_v62 }
 0x679   : > { %v3539_v15 = vpop.f32.mrf.mxu1 }
 0x67a   : > { %v3630_v18 = vpack.c.bf16 %v3539_v15, %v3535_v51 }
 0x67b   : > { %v3541_v39 = vpop.f32.mrf.mxu1 }
 0x67c   : > { %v3631_v26 = vpack.c.bf16 %v3541_v39, %v3537_v27  ;;  %v8063_v39 = vld [vmem:[#allocation2 + $0xb0] sm:$0xff] }
 0x67d   : > { %v3545_v40 = vpop.f32.mrf.mxu1 }
 0x67e   : > { %3806 = vmatprep.mubr.bf16.mxu0 %v3631_v26 }
 0x67f   : > { %v3547_v38 = vpop.f32.mrf.mxu1 }
 0x680   : > { %3807 = vmatmul.mubr.bf16.gmra.mxu0 %v3630_v18 }
 0x681   : > { %v3549_v41 = vpop.f32.mrf.mxu1 }
 0x682   : > { %v3632_v14 = vpack.c.bf16 %v3549_v41, %v3545_v40  ;;  %v8064_v40 = vld [vmem:[#allocation2 + $0x1b0] sm:$0xff] }
 0x683   : > { %v3551_v52 = vpop.f32.mrf.mxu1 }
 0x684   : > { %v3633_v4 = vpack.c.bf16 %v3551_v52, %v3547_v38 }
 0x685   : > { %v3555_v6 = vpop.f32.mrf.mxu1 }
 0x686   : > { %3816 = vmatprep.mubr.bf16.mxu0 %v3633_v4 }
 0x687   : > { %v3557_v17 = vpop.f32.mrf.mxu1 }
 0x688   : > { %3817 = vmatmul.mubr.bf16.gmra.mxu0 %v3632_v14  ;;  %v8065_v14 = vld [vmem:[#allocation2 + $0xd8] sm:$0xff] }
 0x689   : > { %v3559_v23 = vpop.f32.mrf.mxu1 }
 0x68a   : > { %v3634_v12 = vpack.c.bf16 %v3559_v23, %v3555_v6  ;;  %v8066_v23 = vld [vmem:[#allocation2 + $0x18] sm:$0xff] }
 0x68b   : > { %v3561_v16 = vpop.f32.mrf.mxu1 }
 0x68c   : > { %v3635_v45 = vpack.c.bf16 %v3561_v16, %v3557_v17 }
 0x68d   : > { %v3565_v10 = vpop.f32.mrf.mxu1 }
 0x68e   : > { %3826 = vmatprep.mubr.bf16.mxu0 %v3635_v45 }
 0x68f   : > { %v3567_v11 = vpop.f32.mrf.mxu1 }
 0x690   : > { %3827 = vmatmul.mubr.bf16.gmra.mxu0 %v3634_v12 }
 0x691   : > { %v3569_v21 = vpop.f32.mrf.mxu1 }
 0x692   : > { %v3636_v20 = vpack.c.bf16 %v3569_v21, %v3565_v10 }
 0x693   : > { %v3571_v46 = vpop.f32.mrf.mxu1 }
 0x694   : > { %v3637_v60 = vpack.c.bf16 %v3571_v46, %v3567_v11 }
 0x696   : > { %3836 = vmatprep.mubr.bf16.mxu0 %v3637_v60 }
 0x698   : > { %3837 = vmatmul.mubr.bf16.gmra.mxu0 %v3636_v20 }
 0x6d5   : > { %v3575_v13 = vpop.f32.mrf.mxu1 }
 0x6d7   : > { %v3577_v61 = vpop.f32.mrf.mxu1 }
 0x6d9   : > { %v3579_v0 = vpop.f32.mrf.mxu1 }
 0x6da   : > { %v3638_v56 = vpack.c.bf16 %v3579_v0, %v3575_v13 }
 0x6db   : > { %v3581_v36 = vpop.f32.mrf.mxu1 }
 0x6dc   : > { %v3639_v48 = vpack.c.bf16 %v3581_v36, %v3577_v61  ;;  %v8067_v61 = vld [vmem:[#allocation2 + $0x50] sm:$0xff]  ;;  %v8068_v36 = vld [vmem:[#allocation2 + $0x168] sm:$0xff] }
 0x6dd   : > { %v3585_v9 = vpop.f32.mrf.mxu1 }
 0x6de   : > { %3846 = vmatprep.mubr.bf16.mxu0 %v3639_v48 }
 0x6df   : > { %v3587_v24 = vpop.f32.mrf.mxu1  ;;  %3847 = vmatmul.mubr.bf16.gmra.mxu0 %v3638_v56 }
 0x6e1   : > { %v3589_v3 = vpop.f32.mrf.mxu1 }
 0x6e2   : > { %v3640_v29 = vpack.c.bf16 %v3589_v3, %v3585_v9 }
 0x6e3   : > { %v3591_v42 = vpop.f32.mrf.mxu1 }
 0x6e4   : > { %v3641_v59 = vpack.c.bf16 %v3591_v42, %v3587_v24 }
 0x6e5   : > { %v3595_v63 = vpop.f32.mrf.mxu1 }
 0x6e6   : > { %3856 = vmatprep.mubr.bf16.mxu0 %v3641_v59 }
 0x6e7   : > { %v3597_v50 = vpop.f32.mrf.mxu1  ;;  %3857 = vmatmul.mubr.bf16.gmra.mxu0 %v3640_v29 }
 0x6e9   : > { %v3599_v25 = vpop.f32.mrf.mxu1 }
 0x6ea   : > { %v3642_v28 = vpack.c.bf16 %v3599_v25, %v3595_v63  ;;  %v8069_v63 = vld [vmem:[#allocation2 + $0x130] sm:$0xff]  ;;  %v8070_v25 = vld [vmem:[#allocation2 + $0x48] sm:$0xff] }
 0x6eb   : > { %v3601_v32 = vpop.f32.mrf.mxu1 }
 0x6ec   : > { %v3643_v8 = vpack.c.bf16 %v3601_v32, %v3597_v50 }
 0x6ed   : > { %v3605_v49 = vpop.f32.mrf.mxu1 }
 0x6ee   : > { %3866 = vmatprep.mubr.bf16.mxu0 %v3643_v8 }
 0x6ef   : > { %v3607_v5 = vpop.f32.mrf.mxu1  ;;  %3867 = vmatmul.mubr.bf16.gmra.mxu0 %v3642_v28 }
 0x6f1   : > { %v3609_v19 = vpop.f32.mrf.mxu1 }
 0x6f2   : > { %v3644_v58 = vpack.c.bf16 %v3609_v19, %v3605_v49 }
 0x6f3   : > { %v3611_v53 = vpop.f32.mrf.mxu1 }
 0x6f4   : > { %v3645_v30 = vpack.c.bf16 %v3611_v53, %v3607_v5 }
 0x6f6   : > { %3876 = vmatprep.mubr.bf16.mxu0 %v3645_v30 }
 0x6f7   : > { %3877 = vmatmul.mubr.bf16.gmra.mxu0 %v3644_v58  ;;  %v8071_v58 = vld [vmem:[#allocation2 + $0x180] sm:$0xff] }
 0x6ff   : > { %v3728_v37 = vpop.f32.mrf.mxu0 }
 0x700   : > { %v3899_v54 = vmul.f32 %v10701_v43, %v3728_v37 }
 0x701   : > { %v3730_v34 = vpop.f32.mrf.mxu0 }
 0x702   : > { %v3975_v1 = vadd.f32 %v10704_v31, %v3899_v54  ;;  %v3900_v57 = vmul.f32 %v10707_v44, %v3730_v34 }
 0x703   : > { %v3732_v22 = vpop.f32.mrf.mxu0 }
 0x704   : > { %v3976_v47 = vadd.f32 %v10711_v7, %v3900_v57  ;;  %v3901_v51 = vmul.f32 %v10701_v43, %v3732_v22  ;;  %v10719_v26 = vadd.f32 %v8063_v39, %v3975_v1 }
 0x705   : > { %v3734_v62 = vpop.f32.mrf.mxu0 }
 0x706   : > { %v3977_v27 = vadd.f32 %v10704_v31, %v3901_v51  ;;  %v3902_v15 = vmul.f32 %v10707_v44, %v3734_v62  ;;  %v10721_v18 = vadd.f32 %v8064_v40, %v3976_v47  ;;  %v8073_v62 = vld [vmem:[#allocation2 + $0x118] sm:$0xff] }
 0x708   : > { %v3978_v38 = vadd.f32 %v10711_v7, %v3902_v15  ;;  %v3738_v41 = vpop.f32.mrf.mxu0  ;;  %v4106_v52 = vadd.f32 %v10721_v18, %v10719_v26  ;;  %v10727_v17 = vadd.f32 %v8065_v14, %v3977_v27  ;;  %v8074_v15 = vld [vmem:[#allocation2 + $0x98] sm:$0xff] }
 0x709   : > { %v3903_v4 = vmul.f32 %v10701_v43, %v3738_v41 }
 0x70a   : > { %v3740_v6 = vpop.f32.mrf.mxu0  ;;  %4107 = vadd.xlane.f32.xlu0 %v4106_v52  ;;  %v10729_v16 = vadd.f32 %v8066_v23, %v3978_v38  ;;  %v8075_v23 = vld [vmem:[#allocation2 + $0x120] sm:$0xff] }
 0x70b   : > { %v3979_v45 = vadd.f32 %v10704_v31, %v3903_v4  ;;  %v3904_v10 = vmul.f32 %v10707_v44, %v3740_v6 }
 0x70c   : > { %v3742_v12 = vpop.f32.mrf.mxu0  ;;  %v4109_v11 = vadd.f32 %v10729_v16, %v10727_v17 }
 0x70d   : > { %v3980_v21 = vadd.f32 %v10711_v7, %v3904_v10  ;;  %v3905_v46 = vmul.f32 %v10701_v43, %v3742_v12  ;;  %v10739_v0 = vadd.f32 %v8067_v61, %v3979_v45  ;;  %v8076_v10 = vld [vmem:[#allocation2 + $0x150] sm:$0xff] }
 0x70e   : > { %v3744_v60 = vpop.f32.mrf.mxu0  ;;  %4110 = vadd.xlane.f32.xlu1 %v4109_v11 }
 0x70f   : > { %v3981_v20 = vadd.f32 %v10704_v31, %v3905_v46  ;;  %v3906_v13 = vmul.f32 %v10707_v44, %v3744_v60  ;;  %v10741_v48 = vadd.f32 %v8068_v36, %v3980_v21  ;;  %v8077_v36 = vld [vmem:[#allocation2 + $0x108] sm:$0xff] }
 0x710   : > { %v3748_v56 = vpop.f32.mrf.mxu0 }
 0x711   : > { %v3982_v9 = vadd.f32 %v10711_v7, %v3906_v13  ;;  %v3907_v24 = vmul.f32 %v10701_v43, %v3748_v56  ;;  %v4112_v3 = vadd.f32 %v10741_v48, %v10739_v0  ;;  %v10749_v50 = vadd.f32 %v8069_v63, %v3981_v20 }
 0x712   : > { %v3750_v42 = vpop.f32.mrf.mxu0 }
 0x713   : > { %v3983_v59 = vadd.f32 %v10704_v31, %v3907_v24  ;;  %v3908_v29 = vmul.f32 %v10707_v44, %v3750_v42  ;;  %4113 = vadd.xlane.f32.xlu0 %v4112_v3  ;;  %v10751_v32 = vadd.f32 %v8070_v25, %v3982_v9  ;;  %v8078_v9 = vld [vmem:[#allocation2 + $0x60] sm:$0xff] }
 0x714   : > { %v3752_v8 = vpop.f32.mrf.mxu0 }
 0x715   : > { %v3984_v28 = vadd.f32 %v10711_v7, %v3908_v29  ;;  %v3909_v49 = vmul.f32 %v10701_v43, %v3752_v8  ;;  %v4115_v5 = vadd.f32 %v10751_v32, %v10749_v50  ;;  %v10759_v2 = vadd.f32 %v8071_v58, %v3983_v59 }
 0x716   : > { %v3754_v19 = vpop.f32.mrf.mxu0 }
 0x717   : > { %v3985_v53 = vadd.f32 %v10704_v31, %v3909_v49  ;;  %v3910_v30 = vmul.f32 %v10707_v44, %v3754_v19  ;;  %4116 = vadd.xlane.f32.xlu1 %v4115_v5  ;;  %v10761_v37 = vadd.f32 %v8072_v55, %v3984_v28  ;;  %v8079_v28 = vld [vmem:[#allocation2 + $0xe0] sm:$0xff]  ;;  %v8080_v5 = vld [vmem:[#allocation2 + $0x188] sm:$0xff] }
 0x718   : > { %v3758_v54 = vpop.f32.mrf.mxu0 }
 0x719   : > { %v3986_v34 = vadd.f32 %v10711_v7, %v3910_v30  ;;  %v3911_v1 = vmul.f32 %v10701_v43, %v3758_v54  ;;  %v4118_v57 = vadd.f32 %v10761_v37, %v10759_v2  ;;  %v10769_v27 = vadd.f32 %v8073_v62, %v3985_v53 }
 0x71a   : > { %v3760_v22 = vpop.f32.mrf.mxu0 }
 0x71b   : > { %v3987_v47 = vadd.f32 %v10704_v31, %v3911_v1  ;;  %v3912_v51 = vmul.f32 %v10707_v44, %v3760_v22  ;;  %4119 = vadd.xlane.f32.xlu0 %v4118_v57  ;;  %v10771_v39 = vadd.f32 %v8074_v15, %v3986_v34  ;;  %v8081_v57 = vld [vmem:[#allocation2 + $0x138] sm:$0xff] }
 0x71c   : > { %v3762_v40 = vpop.f32.mrf.mxu0 }
 0x71d   : > { %v3988_v38 = vadd.f32 %v10711_v7, %v3912_v51  ;;  %v3913_v41 = vmul.f32 %v10701_v43, %v3762_v40  ;;  %v4121_v52 = vadd.f32 %v10771_v39, %v10769_v27  ;;  %v10779_v45 = vadd.f32 %v8075_v23, %v3987_v47  ;;  %v8082_v47 = vld [vmem:[#allocation2 + $0x140] sm:$0xff]  ;;  %v8084_v23 = vld [vmem:[#allocation2 + $0x1a8] sm:$0xff] }
 0x71e   : > { %v3764_v4 = vpop.f32.mrf.mxu0 }
 0x71f   : > { %v3989_v6 = vadd.f32 %v10704_v31, %v3913_v41  ;;  %v3914_v14 = vmul.f32 %v10707_v44, %v3764_v4  ;;  %4122 = vadd.xlane.f32.xlu1 %v4121_v52  ;;  %v10781_v12 = vadd.f32 %v8076_v10, %v3988_v38 }
 0x720   : > { %v3768_v11 = vpop.f32.mrf.mxu0 }
 0x721   : > { %v3990_v21 = vadd.f32 %v10711_v7, %v3914_v14  ;;  %v3915_v46 = vmul.f32 %v10701_v43, %v3768_v11  ;;  %v4124_v60 = vadd.f32 %v10781_v12, %v10779_v45  ;;  %v10789_v56 = vadd.f32 %v8077_v36, %v3989_v6  ;;  %v8083_v6 = vld [vmem:[#allocation2 + $0x80] sm:$0xff]  ;;  %v8085_v36 = vld [vmem:[#allocation2 + $0x1b8] sm:$0xff] }
 0x722   : > { %v3770_v20 = vpop.f32.mrf.mxu0 }
 0x723   : > { %v3991_v13 = vadd.f32 %v10704_v31, %v3915_v46  ;;  %v3916_v61 = vmul.f32 %v10707_v44, %v3770_v20  ;;  %4125 = vadd.xlane.f32.xlu0 %v4124_v60  ;;  %v10791_v24 = vadd.f32 %v8078_v9, %v3990_v21 }
 0x724   : > { %v3772_v3 = vpop.f32.mrf.mxu0 }
 0x725   : > { %v3992_v42 = vadd.f32 %v10711_v7, %v3916_v61  ;;  %v3917_v59 = vmul.f32 %v10701_v43, %v3772_v3  ;;  %v4127_v29 = vadd.f32 %v10791_v24, %v10789_v56  ;;  %v10799_v49 = vadd.f32 %v8079_v28, %v3991_v13  ;;  %v8086_v3 = vld [vmem:[#allocation2 + $0x28] sm:$0xff] }
 0x726   : > { %v3774_v63 = vpop.f32.mrf.mxu0 }
 0x727   : > { %v3993_v25 = vadd.f32 %v10704_v31, %v3917_v59  ;;  %v3918_v8 = vmul.f32 %v10707_v44, %v3774_v63  ;;  %4128 = vadd.xlane.f32.xlu1 %v4127_v29  ;;  %v10801_v19 = vadd.f32 %v8080_v5, %v3992_v42 }
 0x728   : > { %v3778_v53 = vpop.f32.mrf.mxu0 }
 0x729   : > { %v3994_v30 = vadd.f32 %v10711_v7, %v3918_v8  ;;  %v3919_v58 = vmul.f32 %v10701_v43, %v3778_v53  ;;  %v4130_v55 = vadd.f32 %v10801_v19, %v10799_v49  ;;  %v10809_v22 = vadd.f32 %v8081_v57, %v3993_v25  ;;  %v8087_v53 = vld [vmem:[#allocation2 + $0x1e8] sm:$0xff] }
 0x72a   : > { %v3780_v54 = vpop.f32.mrf.mxu0 }
 0x72b   : > { %v3995_v34 = vadd.f32 %v10704_v31, %v3919_v58  ;;  %v3920_v1 = vmul.f32 %v10707_v44, %v3780_v54  ;;  %4131 = vadd.xlane.f32.xlu0 %v4130_v55  ;;  %v10811_v51 = vadd.f32 %v8082_v47, %v3994_v30  ;;  %v8088_v58 = vld [vmem:[#allocation2 + $0xf8] sm:$0xff] }
 0x72c   : > { %v3782_v62 = vpop.f32.mrf.mxu0 }
 0x72d   : > { %v3996_v15 = vadd.f32 %v10711_v7, %v3920_v1  ;;  %v3921_v40 = vmul.f32 %v10701_v43, %v3782_v62  ;;  %v4133_v38 = vadd.f32 %v10811_v51, %v10809_v22  ;;  %v10819_v14 = vadd.f32 %v8083_v6, %v3995_v34 }
 0x72e   : > { %v3784_v41 = vpop.f32.mrf.mxu0 }
 0x72f   : > { %v3997_v52 = vadd.f32 %v10704_v31, %v3921_v40  ;;  %v3922_v4 = vmul.f32 %v10707_v44, %v3784_v41  ;;  %4134 = vadd.xlane.f32.xlu1 %v4133_v38  ;;  %v10821_v10 = vadd.f32 %v8084_v23, %v3996_v15  ;;  %v8089_v40 = vld [vmem:[#allocation2 + $0x160] sm:$0xff]  ;;  %v8090_v41 = vld [vmem:[#allocation2 + $0x30] sm:$0xff] }
 0x730   : > { %v3788_v11 = vpop.f32.mrf.mxu0 }
 0x731   : > { %v3998_v21 = vadd.f32 %v10711_v7, %v3922_v4  ;;  %v3923_v46 = vmul.f32 %v10701_v43, %v3788_v11  ;;  %v4136_v60 = vadd.f32 %v10821_v10, %v10819_v14  ;;  %v10829_v9 = vadd.f32 %v8085_v36, %v3997_v52 }
 0x732   : > { %v3790_v20 = vpop.f32.mrf.mxu0 }
 0x733   : > { %v3999_v13 = vadd.f32 %v10704_v31, %v3923_v46  ;;  %v3924_v61 = vmul.f32 %v10707_v44, %v3790_v20  ;;  %4137 = vadd.xlane.f32.xlu0 %v4136_v60  ;;  %v10831_v42 = vadd.f32 %v8086_v3, %v3998_v21  ;;  %v8091_v20 = vld [vmem:[#allocation2 + $0x1e0] sm:$0xff] }
 0x734   : > { %v3792_v59 = vpop.f32.mrf.mxu0 }
 0x735   : > { %v4000_v29 = vadd.f32 %v10711_v7, %v3924_v61  ;;  %v3925_v63 = vmul.f32 %v10701_v43, %v3792_v59  ;;  %v4139_v25 = vadd.f32 %v10831_v42, %v10829_v9  ;;  %v10839_v30 = vadd.f32 %v8087_v53, %v3999_v13  ;;  %v8092_v61 = vld [vmem:[#allocation2] sm:$0xff] }
 0x736   : > { %v3794_v8 = vpop.f32.mrf.mxu0 }
 0x737   : > { %v4001_v28 = vadd.f32 %v10704_v31, %v3925_v63  ;;  %v3926_v5 = vmul.f32 %v10707_v44, %v3794_v8  ;;  %4140 = vadd.xlane.f32.xlu1 %v4139_v25  ;;  %v10841_v55 = vadd.f32 %v8088_v58, %v4000_v29  ;;  %v8094_v58 = vld [vmem:[#allocation2 + $0x8] sm:$0xff] }
 0x738   : > { %v3798_v54 = vpop.f32.mrf.mxu0 }
 0x739   : > { %v4002_v34 = vadd.f32 %v10711_v7, %v3926_v5  ;;  %v3927_v1 = vmul.f32 %v10701_v43, %v3798_v54  ;;  %v4142_v57 = vadd.f32 %v10841_v55, %v10839_v30  ;;  %v10849_v38 = vadd.f32 %v8089_v40, %v4001_v28  ;;  %v8093_v5 = vld [vmem:[#allocation2 + $0xf0] sm:$0xff] }
 0x73a   : > { %v3800_v47 = vpop.f32.mrf.mxu0 }
 0x73b   : > { %v4003_v62 = vadd.f32 %v10704_v31, %v3927_v1  ;;  %v3928_v15 = vmul.f32 %v10707_v44, %v3800_v47  ;;  %4143 = vadd.xlane.f32.xlu0 %v4142_v57  ;;  %v10851_v52 = vadd.f32 %v8090_v41, %v4002_v34  ;;  %v8095_v41 = vld [vmem:[#allocation2 + $0x148] sm:$0xff] }
 0x73c   : > { %v3802_v4 = vpop.f32.mrf.mxu0 }
 0x73d   : > { %v4004_v6 = vadd.f32 %v10711_v7, %v3928_v15  ;;  %v3929_v23 = vmul.f32 %v10701_v43, %v3802_v4  ;;  %v4145_v11 = vadd.f32 %v10851_v52, %v10849_v38  ;;  %v10859_v13 = vadd.f32 %v8091_v20, %v4003_v62 }
 0x73e   : > { %v3804_v21 = vpop.f32.mrf.mxu0 }
 0x73f   : > { %v4005_v46 = vadd.f32 %v10704_v31, %v3929_v23  ;;  %v3930_v60 = vmul.f32 %v10707_v44, %v3804_v21  ;;  %4146 = vadd.xlane.f32.xlu1 %v4145_v11  ;;  %v10861_v36 = vadd.f32 %v8092_v61, %v4004_v6  ;;  %v8096_v6 = vld [vmem:[#allocation2 + $0x1d0] sm:$0xff] }
 0x740   : > { %v3808_v3 = vpop.f32.mrf.mxu0 }
 0x741   : > { %v4006_v59 = vadd.f32 %v10711_v7, %v3930_v60  ;;  %v3931_v29 = vmul.f32 %v10701_v43, %v3808_v3  ;;  %v4148_v63 = vadd.f32 %v10861_v36, %v10859_v13  ;;  %v10869_v53 = vadd.f32 %v8093_v5, %v4005_v46 }
 0x742   : > { %v3810_v25 = vpop.f32.mrf.mxu0 }
 0x743   : > { %v4007_v8 = vadd.f32 %v10704_v31, %v3931_v29  ;;  %v3932_v28 = vmul.f32 %v10707_v44, %v3810_v25  ;;  %4149 = vadd.xlane.f32.xlu0 %v4148_v63  ;;  %v10871_v54 = vadd.f32 %v8094_v58, %v4006_v59  ;;  %v8097_v59 = vld [vmem:[#allocation2 + $0x100] sm:$0xff]  ;;  %v8098_v63 = vld [vmem:[#allocation2 + $0xc8] sm:$0xff] }
 0x744   : > { %v3812_v34 = vpop.f32.mrf.mxu0 }
 0x745   : > { %v4008_v1 = vadd.f32 %v10711_v7, %v3932_v28  ;;  %v3933_v57 = vmul.f32 %v10701_v43, %v3812_v34  ;;  %v4151_v47 = vadd.f32 %v10871_v54, %v10869_v53  ;;  %v10879_v4 = vadd.f32 %v8095_v41, %v4007_v8 }
 0x746   : > { %v3814_v62 = vpop.f32.mrf.mxu0 }
 0x747   : > { %v4009_v15 = vadd.f32 %v10704_v31, %v3933_v57  ;;  %v3934_v40 = vmul.f32 %v10707_v44, %v3814_v62  ;;  %4152 = vadd.xlane.f32.xlu1 %v4151_v47  ;;  %v10881_v23 = vadd.f32 %v8096_v6, %v4008_v1  ;;  %v8099_v47 = vld [vmem:[#allocation2 + $0x40] sm:$0xff] }
 0x748   : > { %v3818_v11 = vpop.f32.mrf.mxu0 }
 0x749   : > { %v4010_v21 = vadd.f32 %v10711_v7, %v3934_v40  ;;  %v3935_v46 = vmul.f32 %v10701_v43, %v3818_v11  ;;  %v4154_v60 = vadd.f32 %v10881_v23, %v10879_v4  ;;  %v10889_v29 = vadd.f32 %v8097_v59, %v4009_v15  ;;  %v8100_v15 = vld [vmem:[#allocation2 + $0x1f8] sm:$0xff]  ;;  %v8101_v11 = vld [vmem:[#allocation2 + $0x20] sm:$0xff] }
 0x74a   : > { %v3820_v20 = vpop.f32.mrf.mxu0  ;;  %v4813_v59 = vld [vmem:[%s8261_s3 + $0x60] sm:$0xff] }
 0x74b   : > { %v4011_v61 = vadd.f32 %v10704_v31, %v3935_v46  ;;  %v3936_v3 = vmul.f32 %v10707_v44, %v3820_v20  ;;  %4155 = vadd.xlane.f32.xlu0 %v4154_v60  ;;  %v10891_v25 = vadd.f32 %v8098_v63, %v4010_v21  ;;  %v8102_v46 = vld [vmem:[#allocation2 + $0x128] sm:$0xff] }
 0x74c   : > { %v3822_v8 = vpop.f32.mrf.mxu0 }
 0x74d   : > { %v4012_v28 = vadd.f32 %v10711_v7, %v3936_v3  ;;  %v3937_v5 = vmul.f32 %v10701_v43, %v3822_v8  ;;  %v4157_v58 = vadd.f32 %v10891_v25, %v10889_v29  ;;  %v10899_v62 = vadd.f32 %v8099_v47, %v4011_v61  ;;  %v4814_v61 = vld [vmem:[%s8261_s3 + $0x68] sm:$0xff]  ;;  %v4816_v3 = vld [vmem:[%s8261_s3 + $0x78] sm:$0xff] }
 0x74e   : > { %v3824_v34 = vpop.f32.mrf.mxu0  ;;  %v4862_v63 = vunpack.c.h.s8.bf16 %v4814_v61  ;;  %v4864_v8 = vunpack.c.h.s8.bf16 %v4816_v3  ;;  %v4812_v47 = vld [vmem:[%s8261_s3 + $0x58] sm:$0xff] }
 0x74f   : > { %v4013_v1 = vadd.f32 %v10704_v31, %v3937_v5  ;;  %v3938_v57 = vmul.f32 %v10707_v44, %v3824_v34  ;;  %4158 = vadd.xlane.f32.xlu1 %v4157_v58  ;;  %v10901_v40 = vadd.f32 %v8100_v15, %v4012_v28  ;;  %v4861_v28 = vunpack.c.h.s8.bf16 %v4813_v59  ;;  %v4815_v5 = vld [vmem:[%s8261_s3 + $0x70] sm:$0xff] }
 0x750   : > { %v4858_v58 = vunpack.c.l.s8.bf16 %v4814_v61  ;;  %v4863_v34 = vunpack.c.h.s8.bf16 %v4815_v5  ;;  %4897 = vmatprep.subr.bf16.mxu1 %v4862_v63  ;;  %5090 = vmatprep.subr.bf16.mxu0 %v4864_v8  ;;  %v4857_v15 = vunpack.c.l.s8.bf16 %v4813_v59  ;;  %v4852_v8 = vunpack.c.l.s8.bf16 %v4812_v47  ;;  %v4806_v59 = vld [vmem:[%s8261_s3 + $0x28] sm:$0xff] }
 0x751   : > { %v4014_v41 = vadd.f32 %v10711_v7, %v3938_v57  ;;  %v4160_v6 = vadd.f32 %v10901_v40, %v10899_v62  ;;  %v10906_v21 = vadd.f32 %v8101_v11, %v4013_v1  ;;  %v4860_v1 = vunpack.c.l.s8.bf16 %v4816_v3  ;;  %v4810_v57 = vld [vmem:[%s8261_s3 + $0x48] sm:$0xff]  ;;  %4898 = vmatpush1.bf16.msra.mxu1 %v4861_v28  ;;  %v4808_v28 = vld [vmem:[%s8261_s3 + $0x38] sm:$0xff] }
 0x752   : > { %5091 = vmatpush1.bf16.msra.mxu0 %v4863_v34  ;;  %4899 = vmatprep.subr.bf16.mxu1 %v4858_v58  ;;  %v4856_v11 = vunpack.c.h.s8.bf16 %v4812_v47  ;;  %v4850_v63 = vunpack.c.l.s8.bf16 %v4810_v57  ;;  %v4846_v34 = vunpack.c.h.s8.bf16 %v4806_v59  ;;  %v4844_v47 = vunpack.c.l.s8.bf16 %v4808_v28 }
 0x753   : > { %4161 = vadd.xlane.f32.xlu0 %v4160_v6  ;;  %14030 = vst [vmem:[#allocation31_spill] sm:$0xff] %v10906_v21  ;;  %v10908_v60 = vadd.f32 %v8102_v46, %v4014_v41  ;;  %v4859_v41 = vunpack.c.l.s8.bf16 %v4815_v5  ;;  %5092 = vmatprep.subr.bf16.mxu0 %v4860_v1  ;;  %v4854_v6 = vunpack.c.h.s8.bf16 %v4810_v57  ;;  %v4809_v46 = vld [vmem:[%s8261_s3 + $0x40] sm:$0xff]  ;;  %v4848_v1 = vunpack.c.h.s8.bf16 %v4808_v28 }
 0x754   : > { %v4853_v61 = vunpack.c.h.s8.bf16 %v4809_v46  ;;  %v4849_v5 = vunpack.c.l.s8.bf16 %v4809_v46  ;;  %v4842_v57 = vunpack.c.l.s8.bf16 %v4806_v59  ;;  %v4802_v46 = vld [vmem:[%s8261_s3 + $0x8] sm:$0xff]  ;;  %v4839_v28 = vunpack.c.h.s8.bf16 %v4803_v33 }
 0x755   : > { %14031 = vst [vmem:[#allocation91_spill] sm:$0xff] %v10908_v60  ;;  %v4163_v20 = vadd.f32 %v10908_v60, %v10906_v21  ;;  %4900 = vmatpush1.bf16.msra.mxu1 %v4857_v15  ;;  %v4805_v15 = vld [vmem:[%s8261_s3 + $0x20] sm:$0xff] }
 0x756   : > { %5093 = vmatpush1.bf16.msra.mxu0 %v4859_v41  ;;  %4901 = vmatprep.subr.bf16.mxu1 %v4854_v6  ;;  %v4807_v41 = vld [vmem:[%s8261_s3 + $0x30] sm:$0xff]  ;;  %v4845_v6 = vunpack.c.h.s8.bf16 %v4805_v15 }
 0x757   : > { %4164 = vadd.xlane.f32.xlu1 %v4163_v20  ;;  %v4811_v20 = vld [vmem:[%s8261_s3 + $0x50] sm:$0xff]  ;;  %5094 = vmatprep.subr.bf16.mxu0 %v4856_v11  ;;  %v4847_v11 = vunpack.c.h.s8.bf16 %v4807_v41 }
 0x758   : > { %v4855_v3 = vunpack.c.h.s8.bf16 %v4811_v20  ;;  %v4851_v58 = vunpack.c.l.s8.bf16 %v4811_v20  ;;  %v3828_v20 = vpop.f32.mrf.mxu0 }
 0x759   : > { %4902 = vmatpush1.bf16.msra.mxu1 %v4853_v61  ;;  %v4804_v61 = vld [vmem:[%s8261_s3 + $0x18] sm:$0xff] }
 0x75a   : > { %5095 = vmatpush1.bf16.msra.mxu0 %v4855_v3  ;;  %4903 = vmatprep.subr.bf16.mxu1 %v4850_v63  ;;  %v4841_v3 = vunpack.c.l.s8.bf16 %v4805_v15  ;;  %v4843_v63 = vunpack.c.l.s8.bf16 %v4807_v41  ;;  %v10932_v15 = vld [vmem:[%s8261_s3 + $0xf8] sm:$0xff] }
 0x75b   : > { %5096 = vmatprep.subr.bf16.mxu0 %v4852_v8  ;;  %v4838_v8 = vunpack.c.h.s8.bf16 %v4802_v46 }
 0x75d   : > { %4904 = vmatpush1.bf16.msra.mxu1 %v4849_v5  ;;  %v4840_v5 = vunpack.c.h.s8.bf16 %v4804_v61 }
 0x75e   : > { %5097 = vmatpush1.bf16.msra.mxu0 %v4851_v58  ;;  %4905 = vmatprep.subr.bf16.mxu1 %v4846_v34  ;;  %v4801_v58 = vld [vmem:[%s8261_s3] sm:$0xff]  ;;  %v3830_v34 = vpop.f32.mrf.mxu0 }
 0x75f   : > { %5098 = vmatprep.subr.bf16.mxu0 %v4848_v1  ;;  %v4837_v59 = vunpack.c.h.s8.bf16 %v4801_v58  ;;  %v4834_v1 = vunpack.c.l.s8.bf16 %v4802_v46 }
 0x760   : > { %v3832_v41 = vpop.f32.mrf.mxu0 }
 0x761   : > { %4906 = vmatpush1.bf16.msra.mxu1 %v4845_v6  ;;  %v4836_v6 = vunpack.c.l.s8.bf16 %v4804_v61  ;;  %v3940_v61 = vmul.f32 %v10707_v44, %v3830_v34  ;;  %v3941_v34 = vmul.f32 %v10701_v43, %v3832_v41 }
 0x762   : > { %5099 = vmatpush1.bf16.msra.mxu0 %v4847_v11  ;;  %4907 = vmatprep.subr.bf16.mxu1 %v4842_v57  ;;  %v10929_v11 = vld [vmem:[%s8261_s3 + $0xe8] sm:$0xff]  ;;  %v4833_v57 = vunpack.c.l.s8.bf16 %v4801_v58  ;;  %v3834_v35 = vpop.f32.mrf.mxu0 }
 0x763   : > { %5100 = vmatprep.subr.bf16.mxu0 %v4844_v47  ;;  %v4835_v47 = vunpack.c.l.s8.bf16 %v4803_v33  ;;  %v4016_v33 = vadd.f32 %v10711_v7, %v3940_v61 }
 0x764   : > { %v3838_v46 = vpop.f32.mrf.mxu0 }
 0x765   : > { %4908 = vmatpush1.bf16.msra.mxu1 %v4841_v3  ;;  %v4894_v3 = vunpack.c.h.s8.bf16 %v10929_v11 }
 0x766   : > { %5101 = vmatpush1.bf16.msra.mxu0 %v4843_v63  ;;  %4909 = vmatprep.subr.bf16.mxu1 %v4838_v8  ;;  %v4896_v63 = vunpack.c.h.s8.bf16 %v10932_v15  ;;  %v3840_v8 = vpop.f32.mrf.mxu0 }
 0x767   : > { %5102 = vmatprep.subr.bf16.mxu0 %v4840_v5  ;;  %v3939_v5 = vmul.f32 %v10701_v43, %v3828_v20 }
 0x769   : > { %4910 = vmatpush1.bf16.msra.mxu1 %v4837_v59 }
 0x76a   : > { %5103 = vmatpush1.bf16.msra.mxu0 %v4839_v28  ;;  %4911 = vmatprep.subr.bf16.mxu1 %v4834_v1  ;;  %v3842_v28 = vpop.f32.mrf.mxu0  ;;  %v3942_v1 = vmul.f32 %v10707_v44, %v3834_v35  ;;  %v8103_v35 = vld [vmem:[#allocation2 + $0x1f0] sm:$0xff] }
 0x76b   : > { %5104 = vmatprep.subr.bf16.mxu0 %v4836_v6  ;;  %v10952_v60 = vadd.f32 %v8103_v35, %v4016_v33 }
 0x76d   : > { %4912 = vmatpush1.bf16.msra.mxu1 %v4833_v57 }
 0x76e   : > { %5105 = vmatpush1.bf16.msra.mxu0 %v4835_v47  ;;  %4913 = vmatprep.subr.bf16.mxu1 %v4894_v3  ;;  %v4015_v47 = vadd.f32 %v10704_v31, %v3939_v5 }
 0x76f   : > { %5106 = vmatprep.subr.bf16.mxu0 %v4896_v63 }
 0x793   : > { %v4108_v59 = vpop.xlane.xlu0 %4107 }
 0x794   : > { %v4203_v58 = vmul.f32 0.00390625, %v4108_v59  ;;  %v3844_v59 = vpop.f32.mrf.mxu0 }
 0x795   : > { %v3946_v33 = vmul.f32 %v10707_v44, %v3844_v59 }
 0x796   : > { %v10941_v6 = vsub.f32 %v10719_v26, %v4203_v58  ;;  %v10944_v57 = vsub.f32 %v10721_v18, %v4203_v58  ;;  %v4018_v26 = vadd.f32 %v10711_v7, %v3942_v1  ;;  %v4017_v58 = vadd.f32 %v10704_v31, %v3941_v34 }
 0x797   : > { %v4111_v3 = vpop.xlane.xlu1 %4110  ;;  %v3945_v34 = vmul.f32 %v10701_v43, %v3842_v28  ;;  %v4022_v28 = vadd.f32 %v10711_v7, %v3946_v33 }
 0x798   : > { %14032 = vst [vmem:[#allocation32_spill] sm:$0xff] %v10941_v6  ;;  %14033 = vst [vmem:[#allocation96_spill] sm:$0xff] %v10944_v57  ;;  %v4204_v63 = vmul.f32 0.00390625, %v4111_v3  ;;  %v4299_v20 = vmul.f32 %v10941_v6, %v10941_v6  ;;  %v4300_v61 = vmul.f32 %v10944_v57, %v10944_v57  ;;  %v3944_v3 = vmul.f32 %v10707_v44, %v3840_v8  ;;  %v8104_v6 = vld [vmem:[#allocation2 + $0x1a0] sm:$0xff] }
 0x799   : > { %v10963_v21 = vadd.f32 %v8104_v6, %v4015_v47  ;;  %v3943_v57 = vmul.f32 %v10701_v43, %v3838_v46  ;;  %v8105_v6 = vld [vmem:[#allocation2 + $0x78] sm:$0xff] }
 0x79a   : > { %v10956_v18 = vsub.f32 %v10727_v17, %v4204_v63  ;;  %v10959_v5 = vsub.f32 %v10729_v16, %v4204_v63  ;;  %v4363_v41 = vadd.f32 %v4300_v61, %v4299_v20  ;;  %v10974_v47 = vadd.f32 %v8105_v6, %v4018_v26 }
 0x79b   : > { %v4166_v8 = vadd.f32 %v10952_v60, %v10963_v21  ;;  %v4020_v46 = vadd.f32 %v10711_v7, %v3944_v3  ;;  %v4021_v3 = vadd.f32 %v10704_v31, %v3945_v34 }
 0x79c   : > { %14034 = vst [vmem:[#allocation55_spill] sm:$0xff] %v10956_v18  ;;  %14035 = vst [vmem:[#allocation33_spill] sm:$0xff] %v10959_v5  ;;  %v4114_v35 = vpop.xlane.xlu0 %4113  ;;  %4364 = vadd.xlane.f32.xlu0 %v4363_v41  ;;  %v4301_v17 = vmul.f32 %v10956_v18, %v10956_v18  ;;  %v4302_v16 = vmul.f32 %v10959_v5, %v10959_v5  ;;  %v4019_v41 = vadd.f32 %v10704_v31, %v3943_v57  ;;  %v8109_v5 = vld [vmem:[#allocation2 + $0xd0] sm:$0xff] }
 0x79d   : > { %v4205_v1 = vmul.f32 0.00390625, %v4114_v35  ;;  %14036 = vst [vmem:[#allocation34_spill] sm:$0xff] %v10974_v47  ;;  %v11007_v18 = vadd.f32 %v8109_v5, %v4022_v28  ;;  %v8110_v28 = vld [vmem:[#allocation2 + $0x1d8] sm:$0xff] }
 0x79e   : > { %v4366_v63 = vadd.f32 %v4302_v16, %v4301_v17  ;;  %v8106_v17 = vld [vmem:[#allocation2 + $0xe8] sm:$0xff] }
 0x79f   : > { %v10978_v20 = vsub.f32 %v10739_v0, %v4205_v1  ;;  %v10981_v61 = vsub.f32 %v10741_v48, %v4205_v1  ;;  %v3848_v59 = vpop.f32.mrf.mxu0  ;;  %v10985_v16 = vadd.f32 %v8106_v17, %v4017_v58  ;;  %v8107_v17 = vld [vmem:[#allocation2 + $0x90] sm:$0xff] }
 0x7a0   : > { %v4117_v35 = vpop.xlane.xlu1 %4116  ;;  %4367 = vadd.xlane.f32.xlu1 %v4366_v63  ;;  %4167 = vadd.xlane.f32.xlu0 %v4166_v8  ;;  %v3947_v57 = vmul.f32 %v10701_v43, %v3848_v59 }
 0x7a1   : > { %14037 = vst [vmem:[#allocation53_spill] sm:$0xff] %v10978_v20  ;;  %14038 = vst [vmem:[#allocation95_spill] sm:$0xff] %v10981_v61  ;;  %v4206_v26 = vmul.f32 0.00390625, %v4117_v35  ;;  %v3850_v6 = vpop.f32.mrf.mxu0  ;;  %v4303_v0 = vmul.f32 %v10978_v20, %v10978_v20  ;;  %v4304_v48 = vmul.f32 %v10981_v61, %v10981_v61  ;;  %v4169_v58 = vadd.f32 %v10974_v47, %v10985_v16  ;;  %v11013_v47 = vld [vmem:[%s8261_s3 + $0xf0] sm:$0xff] }
 0x7a2   : > { %v3948_v33 = vmul.f32 %v10707_v44, %v3850_v6  ;;  %v11002_v20 = vadd.f32 %v8107_v17, %v4020_v46  ;;  %v8108_v6 = vld [vmem:[#allocation2 + $0x70] sm:$0xff] }
 0x7a3   : > { %v10997_v1 = vsub.f32 %v10749_v50, %v4206_v26  ;;  %v11000_v63 = vsub.f32 %v10751_v32, %v4206_v26  ;;  %v3852_v8 = vpop.f32.mrf.mxu0  ;;  %v4369_v35 = vadd.f32 %v4304_v48, %v4303_v0  ;;  %v11005_v61 = vadd.f32 %v8108_v6, %v4019_v41  ;;  %v11010_v50 = vld [vmem:[%s8261_s3 + $0xe0] sm:$0xff] }
 0x7a4   : > { %v4024_v34 = vadd.f32 %v10711_v7, %v3948_v33  ;;  %v4120_v59 = vpop.xlane.xlu0 %4119  ;;  %4170 = vadd.xlane.f32.xlu1 %v4169_v58  ;;  %v4893_v48 = vunpack.c.h.s8.bf16 %v11010_v50  ;;  %v4023_v41 = vadd.f32 %v10704_v31, %v3947_v57  ;;  %v11022_v33 = vadd.f32 %v8110_v28, %v4021_v3 }
 0x7a5   : > { %14039 = vst [vmem:[#allocation94_spill] sm:$0xff] %v10997_v1  ;;  %14040 = vst [vmem:[#allocation59_spill] sm:$0xff] %v11000_v63  ;;  %v4207_v32 = vmul.f32 0.00390625, %v4120_v59  ;;  %4370 = vadd.xlane.f32.xlu0 %v4369_v35  ;;  %v3854_v26 = vpop.f32.mrf.mxu0  ;;  %v4305_v46 = vmul.f32 %v10997_v1, %v10997_v1  ;;  %v4306_v0 = vmul.f32 %v11000_v63, %v11000_v63  ;;  %v4895_v58 = vunpack.c.h.s8.bf16 %v11013_v47  ;;  %v8111_v63 = vld [vmem:[#allocation2 + $0x88] sm:$0xff] }
 0x7a6   : > { %v3950_v5 = vmul.f32 %v10707_v44, %v3854_v26  ;;  %v4172_v1 = vadd.f32 %v11002_v20, %v11005_v61  ;;  %4914 = vmatpush2.bf16.msra.mxu1 %v4893_v48  ;;  %v3949_v57 = vmul.f32 %v10701_v43, %v3852_v8  ;;  %v4175_v28 = vadd.f32 %v11007_v18, %v11022_v33 }
 0x7a7   : > { %v11026_v35 = vsub.f32 %v10759_v2, %v4207_v32  ;;  %v11029_v17 = vsub.f32 %v10761_v37, %v4207_v32  ;;  %v3858_v59 = vpop.f32.mrf.mxu0  ;;  %v4372_v6 = vadd.f32 %v4306_v0, %v4305_v46  ;;  %v11037_v2 = vadd.f32 %v8111_v63, %v4024_v34  ;;  %5107 = vmatpush2.bf16.msra.mxu0 %v4895_v58  ;;  %v8112_v63 = vld [vmem:[#allocation2 + $0xb8] sm:$0xff] }
 0x7a8   : > { %v4123_v26 = vpop.xlane.xlu1 %4122  ;;  %v3951_v3 = vmul.f32 %v10701_v43, %v3858_v59  ;;  %v4890_v0 = vunpack.c.l.s8.bf16 %v10929_v11  ;;  %v4026_v48 = vadd.f32 %v10711_v7, %v3950_v5  ;;  %v11046_v34 = vadd.f32 %v8112_v63, %v4023_v41  ;;  %v11057_v5 = vld [vmem:[%s8261_s3 + $0xc8] sm:$0xff] }
 0x7a9   : > { %14041 = vst [vmem:[#allocation35_spill] sm:$0xff] %v11026_v35  ;;  %14042 = vst [vmem:[#allocation36_spill] sm:$0xff] %v11029_v17  ;;  %v4208_v37 = vmul.f32 0.00390625, %v4123_v26  ;;  %4373 = vadd.xlane.f32.xlu1 %v4372_v6  ;;  %4173 = vadd.xlane.f32.xlu0 %v4172_v1  ;;  %v3860_v32 = vpop.f32.mrf.mxu0  ;;  %v4307_v46 = vmul.f32 %v11026_v35, %v11026_v35  ;;  %v4308_v8 = vmul.f32 %v11029_v17, %v11029_v17 }
 0x7aa   : > { %14043 = vst [vmem:[#allocation58_spill] sm:$0xff] %v11037_v2  ;;  %v3952_v59 = vmul.f32 %v10707_v44, %v3860_v32  ;;  %14044 = vst [vmem:[#allocation93_spill] sm:$0xff] %v11046_v34  ;;  %v4892_v1 = vunpack.c.l.s8.bf16 %v10932_v15  ;;  %4915 = vmatprep.subr.bf16.mxu1 %v4890_v0  ;;  %v4889_v11 = vunpack.c.l.s8.bf16 %v11010_v50  ;;  %v4025_v32 = vadd.f32 %v10704_v31, %v3949_v57 }
 0x7ab   : > { %v11050_v58 = vsub.f32 %v10769_v27, %v4208_v37  ;;  %v11053_v6 = vsub.f32 %v10771_v39, %v4208_v37  ;;  %v3862_v26 = vpop.f32.mrf.mxu0  ;;  %v4375_v35 = vadd.f32 %v4308_v8, %v4307_v46  ;;  %v4027_v41 = vadd.f32 %v10704_v31, %v3951_v3  ;;  %v11065_v39 = vld [vmem:[%s8261_s3 + $0xd8] sm:$0xff] }
 0x7ac   : > { %v4126_v63 = vpop.xlane.xlu0 %4125  ;;  %v3953_v15 = vmul.f32 %v10701_v43, %v3862_v26  ;;  %v4178_v27 = vadd.f32 %v11037_v2, %v11046_v34  ;;  %5108 = vmatprep.subr.bf16.mxu0 %v4892_v1  ;;  %v4891_v3 = vunpack.c.l.s8.bf16 %v11013_v47  ;;  %v4028_v8 = vadd.f32 %v10711_v7, %v3952_v59  ;;  %v8113_v1 = vld [vmem:[#allocation2 + $0x1c8] sm:$0xff]  ;;  %4916 = vmatpush2.bf16.msra.mxu1 %v4889_v11 }
 0x7ad   : > { %14045 = vst [vmem:[#allocation92_spill] sm:$0xff] %v11050_v58  ;;  %14046 = vst [vmem:[#allocation63_spill] sm:$0xff] %v11053_v6  ;;  %v4209_v37 = vmul.f32 0.00390625, %v4126_v63  ;;  %4376 = vadd.xlane.f32.xlu0 %v4375_v35  ;;  %4176 = vadd.xlane.f32.xlu1 %v4175_v28  ;;  %v3864_v50 = vpop.f32.mrf.mxu0  ;;  %v4309_v46 = vmul.f32 %v11050_v58, %v11050_v58  ;;  %v4310_v57 = vmul.f32 %v11053_v6, %v11053_v6  ;;  %v11078_v28 = vld [vmem:[%s8261_s3 + $0xc0] sm:$0xff] }
 0x7ae   : > { %v3954_v0 = vmul.f32 %v10707_v44, %v3864_v50  ;;  %v11074_v26 = vadd.f32 %v8113_v1, %v4026_v48  ;;  %v4886_v35 = vunpack.c.h.s8.bf16 %v11057_v5  ;;  %5109 = vmatpush2.bf16.msra.mxu0 %v4891_v3  ;;  %v4888_v59 = vunpack.c.h.s8.bf16 %v11065_v39  ;;  %v11088_v50 = vld [vmem:[%s8261_s3 + $0xd0] sm:$0xff] }
 0x7af   : > { %v11081_v63 = vsub.f32 %v10779_v45, %v4209_v37  ;;  %v11084_v58 = vsub.f32 %v10781_v12, %v4209_v37  ;;  %v3868_v6 = vpop.f32.mrf.mxu0  ;;  %v4378_v47 = vadd.f32 %v4310_v57, %v4309_v46  ;;  %v8114_v48 = vld [vmem:[#allocation2 + $0x170] sm:$0xff]  ;;  %v4029_v11 = vadd.f32 %v10704_v31, %v3953_v15  ;;  %v8115_v45 = vld [vmem:[#allocation2 + $0xa8] sm:$0xff]  ;;  %v8116_v15 = vld [vmem:[#allocation2 + $0x178] sm:$0xff] }
 0x7b0   : > { %v11090_v1 = vadd.f32 %v8114_v48, %v4027_v41  ;;  %v4030_v17 = vadd.f32 %v10711_v7, %v3954_v0  ;;  %v4129_v2 = vpop.xlane.xlu1 %4128  ;;  %v11094_v34 = vadd.f32 %v8115_v45, %v4025_v32  ;;  %4917 = vmatprep.subr.bf16.mxu1 %v4886_v35  ;;  %v4885_v57 = vunpack.c.h.s8.bf16 %v11078_v28  ;;  %5110 = vmatprep.subr.bf16.mxu0 %v4888_v59  ;;  %v8117_v45 = vld [vmem:[#allocation2 + $0x68] sm:$0xff] }
 0x7b1   : > { %14047 = vst [vmem:[#allocation37_spill] sm:$0xff] %v11081_v63  ;;  %14048 = vst [vmem:[#allocation57_spill] sm:$0xff] %v11084_v58  ;;  %v4210_v12 = vmul.f32 0.00390625, %v4129_v2  ;;  %4379 = vadd.xlane.f32.xlu1 %v4378_v47  ;;  %4179 = vadd.xlane.f32.xlu0 %v4178_v27  ;;  %v3870_v37 = vpop.f32.mrf.mxu0  ;;  %v4311_v46 = vmul.f32 %v11081_v63, %v11081_v63  ;;  %v4312_v41 = vmul.f32 %v11084_v58, %v11084_v58 }
 0x7b2   : > { %v11101_v3 = vadd.f32 %v8116_v15, %v4028_v8  ;;  %v3956_v0 = vmul.f32 %v10707_v44, %v3870_v37  ;;  %v4181_v32 = vadd.f32 %v11074_v26, %v11094_v34  ;;  %v4887_v2 = vunpack.c.h.s8.bf16 %v11088_v50  ;;  %4918 = vmatpush2.bf16.msra.mxu1 %v4885_v57  ;;  %v8118_v37 = vld [vmem:[#allocation2 + $0x190] sm:$0xff]  ;;  %v11131_v57 = vld [vmem:[%s8261_s3 + $0xa8] sm:$0xff] }
 0x7b3   : > { %v11108_v27 = vsub.f32 %v10789_v56, %v4210_v12  ;;  %v11111_v35 = vsub.f32 %v10791_v24, %v4210_v12  ;;  %v3872_v47 = vpop.f32.mrf.mxu0  ;;  %v4381_v48 = vadd.f32 %v4312_v41, %v4311_v46  ;;  %v4882_v8 = vunpack.c.l.s8.bf16 %v11057_v5 }
 0x7b4   : > { %v11114_v15 = vadd.f32 %v8117_v45, %v4029_v11  ;;  %v11116_v63 = vadd.f32 %v8118_v37, %v4030_v17  ;;  %v3955_v59 = vmul.f32 %v10701_v43, %v3868_v6  ;;  %v4132_v58 = vpop.xlane.xlu0 %4131  ;;  %v3957_v56 = vmul.f32 %v10701_v43, %v3872_v47  ;;  %5111 = vmatpush2.bf16.msra.mxu0 %v4887_v2 }
 0x7b5   : > { %14049 = vst [vmem:[#allocation56_spill] sm:$0xff] %v11108_v27  ;;  %14050 = vst [vmem:[#allocation38_spill] sm:$0xff] %v11111_v35  ;;  %v4211_v24 = vmul.f32 0.00390625, %v4132_v58  ;;  %4382 = vadd.xlane.f32.xlu0 %v4381_v48  ;;  %4182 = vadd.xlane.f32.xlu1 %v4181_v32  ;;  %v3874_v12 = vpop.f32.mrf.mxu0  ;;  %v4313_v5 = vmul.f32 %v11108_v27, %v11108_v27  ;;  %v4314_v11 = vmul.f32 %v11111_v35, %v11111_v35  ;;  %v11141_v48 = vld [vmem:[%s8261_s3 + $0xb8] sm:$0xff] }
 0x7b6   : > { %14051 = vst [vmem:[#allocation62_spill] sm:$0xff] %v11116_v63  ;;  %v4884_v17 = vunpack.c.l.s8.bf16 %v11065_v39  ;;  %v4032_v6 = vadd.f32 %v10711_v7, %v3956_v0  ;;  %v3958_v46 = vmul.f32 %v10707_v44, %v3874_v12  ;;  %v4184_v41 = vadd.f32 %v11101_v3, %v11090_v1  ;;  %4919 = vmatprep.subr.bf16.mxu1 %v4882_v8 }
 0x7b7   : > { %v4881_v58 = vunpack.c.l.s8.bf16 %v11078_v28  ;;  %v11134_v32 = vsub.f32 %v10799_v49, %v4211_v24  ;;  %v11137_v2 = vsub.f32 %v10801_v19, %v4211_v24  ;;  %v3878_v39 = vpop.f32.mrf.mxu0  ;;  %v4384_v47 = vadd.f32 %v4314_v11, %v4313_v5  ;;  %v11149_v19 = vld [vmem:[%s8261_s3 + $0xa0] sm:$0xff]  ;;  %v8119_v5 = vld [vmem:[#allocation2 + $0x38] sm:$0xff] }
 0x7b8   : > { %5112 = vmatprep.subr.bf16.mxu0 %v4884_v17  ;;  %v4883_v0 = vunpack.c.l.s8.bf16 %v11088_v50  ;;  %v4031_v8 = vadd.f32 %v10704_v31, %v3955_v59  ;;  %v4033_v45 = vadd.f32 %v10704_v31, %v3957_v56  ;;  %v4034_v28 = vadd.f32 %v10711_v7, %v3958_v46  ;;  %v4135_v37 = vpop.xlane.xlu1 %4134 }
 0x7b9   : > { %14052 = vst [vmem:[#allocation67_spill] sm:$0xff] %v11134_v32  ;;  %14053 = vst [vmem:[#allocation41_spill] sm:$0xff] %v11137_v2  ;;  %v4187_v49 = vadd.f32 %v11116_v63, %v11114_v15  ;;  %4920 = vmatpush2.bf16.msra.mxu1 %v4881_v58  ;;  %v4315_v24 = vmul.f32 %v11134_v32, %v11134_v32  ;;  %v4316_v50 = vmul.f32 %v11137_v2, %v11137_v2  ;;  %v3880_v59 = vpop.f32.mrf.mxu0  ;;  %v4823_v32 = vld [vmem:[%s8261_s3 + $0xb0] sm:$0xff] }
 0x7ba   : > { %v4212_v12 = vmul.f32 0.00390625, %v4135_v37  ;;  %4385 = vadd.xlane.f32.xlu1 %v4384_v47  ;;  %4185 = vadd.xlane.f32.xlu0 %v4184_v41  ;;  %v4878_v56 = vunpack.c.h.s8.bf16 %v11131_v57  ;;  %v11156_v11 = vadd.f32 %v8119_v5, %v4032_v6  ;;  %v3959_v17 = vmul.f32 %v10701_v43, %v3878_v39  ;;  %v8120_v5 = vld [vmem:[#allocation2 + $0x198] sm:$0xff]  ;;  %v8121_v39 = vld [vmem:[#allocation2 + $0xc0] sm:$0xff] }
 0x7bb   : > { %v3960_v46 = vmul.f32 %v10707_v44, %v3880_v59  ;;  %5113 = vmatpush2.bf16.msra.mxu0 %v4883_v0  ;;  %v4880_v58 = vunpack.c.h.s8.bf16 %v11141_v48  ;;  %v3882_v41 = vpop.f32.mrf.mxu0  ;;  %v4387_v37 = vadd.f32 %v4316_v50, %v4315_v24  ;;  %v4877_v6 = vunpack.c.h.s8.bf16 %v11149_v19  ;;  %v8122_v0 = vld [vmem:[#allocation2 + $0x1c0] sm:$0xff] }
 0x7bc   : > { %v11163_v27 = vsub.f32 %v10809_v22, %v4212_v12  ;;  %v11166_v47 = vsub.f32 %v10811_v51, %v4212_v12  ;;  %4921 = vmatprep.subr.bf16.mxu1 %v4878_v56  ;;  %v11169_v2 = vadd.f32 %v8120_v5, %v4031_v8  ;;  %v11171_v59 = vadd.f32 %v8121_v39, %v4033_v45  ;;  %v4138_v63 = vpop.xlane.xlu0 %4137  ;;  %v4820_v5 = vld [vmem:[%s8261_s3 + $0x98] sm:$0xff]  ;;  %v8123_v39 = vld [vmem:[#allocation2 + $0x10] sm:$0xff] }
 0x7bd   : > { %v11173_v35 = vadd.f32 %v8122_v0, %v4034_v28  ;;  %v4036_v22 = vadd.f32 %v10711_v7, %v3960_v46  ;;  %5114 = vmatprep.subr.bf16.mxu0 %v4880_v58  ;;  %v4213_v50 = vmul.f32 0.00390625, %v4138_v63  ;;  %v3884_v8 = vpop.f32.mrf.mxu0  ;;  %v4879_v45 = vunpack.c.h.s8.bf16 %v4823_v32  ;;  %4922 = vmatpush2.bf16.msra.mxu1 %v4877_v6 }
 0x7be   : > { %v4317_v51 = vmul.f32 %v11163_v27, %v11163_v27  ;;  %v4318_v24 = vmul.f32 %v11166_v47, %v11166_v47  ;;  %4388 = vadd.xlane.f32.xlu0 %v4387_v37  ;;  %4188 = vadd.xlane.f32.xlu1 %v4187_v49  ;;  %v4035_v28 = vadd.f32 %v10704_v31, %v3959_v17  ;;  %v4874_v46 = vunpack.c.l.s8.bf16 %v11131_v57  ;;  %v4818_v17 = vld [vmem:[%s8261_s3 + $0x88] sm:$0xff] }
 0x7bf   : > { %v3962_v12 = vmul.f32 %v10707_v44, %v3884_v8  ;;  %v4190_v56 = vadd.f32 %v11156_v11, %v11169_v2  ;;  %v11186_v58 = vsub.f32 %v10819_v14, %v4213_v50  ;;  %v11189_v63 = vsub.f32 %v10821_v10, %v4213_v50  ;;  %5115 = vmatpush2.bf16.msra.mxu0 %v4879_v45  ;;  %v4817_v44 = vld [vmem:[%s8261_s3 + $0x80] sm:$0xff]  ;;  %v4819_v50 = vld [vmem:[%s8261_s3 + $0x90] sm:$0xff] }
 0x7c0   : > { %v4390_v49 = vadd.f32 %v4318_v24, %v4317_v51  ;;  %v4876_v37 = vunpack.c.l.s8.bf16 %v11141_v48  ;;  %v11195_v0 = vadd.f32 %v8123_v39, %v4036_v22  ;;  %v3961_v6 = vmul.f32 %v10701_v43, %v3882_v41  ;;  %v4141_v57 = vpop.xlane.xlu1 %4140  ;;  %4923 = vmatprep.subr.bf16.mxu1 %v4874_v46 }
 0x7c1   : > { %14054 = vst [vmem:[#allocation61_spill] sm:$0xff] %v11186_v58  ;;  %v4193_v14 = vadd.f32 %v11173_v35, %v11171_v59  ;;  %v4873_v10 = vunpack.c.l.s8.bf16 %v11149_v19  ;;  %v4319_v51 = vmul.f32 %v11186_v58, %v11186_v58  ;;  %v4320_v48 = vmul.f32 %v11189_v63, %v11189_v63 }
 0x7c2   : > { %v4214_v24 = vmul.f32 0.00390625, %v4141_v57  ;;  %4391 = vadd.xlane.f32.xlu1 %v4390_v49  ;;  %4191 = vadd.xlane.f32.xlu0 %v4190_v56  ;;  %v4875_v22 = vunpack.c.l.s8.bf16 %v4823_v32  ;;  %v4038_v43 = vadd.f32 %v10711_v7, %v3962_v12  ;;  %v4870_v41 = vunpack.c.h.s8.bf16 %v4818_v17  ;;  %v8124_v57 = vld [vmem:[#allocation2 + $0x158] sm:$0xff] }
 0x7c3   : > { %5116 = vmatprep.subr.bf16.mxu0 %v4876_v37  ;;  %4924 = vmatpush2.bf16.msra.mxu1 %v4873_v10  ;;  %v4872_v8 = vunpack.c.h.s8.bf16 %v4820_v5  ;;  %v4869_v45 = vunpack.c.h.s8.bf16 %v4817_v44  ;;  %v4393_v39 = vadd.f32 %v4320_v48, %v4319_v51  ;;  %v4871_v58 = vunpack.c.h.s8.bf16 %v4819_v50  ;;  %v8125_v10 = vld [vmem:[#allocation2 + $0xa0] sm:$0xff] }
 0x7c4   : > { %v11208_v19 = vsub.f32 %v10829_v9, %v4214_v24  ;;  %v11211_v46 = vsub.f32 %v10831_v42, %v4214_v24  ;;  %5117 = vmatpush2.bf16.msra.mxu0 %v4875_v22  ;;  %v11213_v49 = vadd.f32 %v8124_v57, %v4035_v28  ;;  %v4144_v32 = vpop.xlane.xlu0 %4143  ;;  %4925 = vmatprep.subr.bf16.mxu1 %v4870_v41  ;;  %v4866_v7 = vunpack.c.l.s8.bf16 %v4818_v17 }
 0x7c5   : > { %5118 = vmatprep.subr.bf16.mxu0 %v4872_v8  ;;  %v4868_v12 = vunpack.c.l.s8.bf16 %v4820_v5  ;;  %v4037_v56 = vadd.f32 %v10704_v31, %v3961_v6  ;;  %v4215_v37 = vmul.f32 0.00390625, %v4144_v32  ;;  %v11220_v51 = vadd.f32 %v8125_v10, %v4038_v43 }
 0x7c6   : > { %v4321_v9 = vmul.f32 %v11208_v19, %v11208_v19  ;;  %v4322_v42 = vmul.f32 %v11211_v46, %v11211_v46  ;;  %4394 = vadd.xlane.f32.xlu0 %v4393_v39  ;;  %4194 = vadd.xlane.f32.xlu1 %v4193_v14  ;;  %v4196_v28 = vadd.f32 %v11195_v0, %v11213_v49  ;;  %v4865_v17 = vunpack.c.l.s8.bf16 %v4817_v44  ;;  %v8126_v14 = vld [vmem:[#allocation2 + $0x58] sm:$0xff] }
 0x7c7   : > { %4926 = vmatpush2.bf16.msra.mxu1 %v4869_v45  ;;  %v11225_v5 = vsub.f32 %v10839_v30, %v4215_v37  ;;  %v11228_v31 = vsub.f32 %v10841_v55, %v4215_v37  ;;  %v4867_v48 = vunpack.c.l.s8.bf16 %v4819_v50  ;;  %v11230_v22 = vadd.f32 %v8126_v14, %v4037_v56 }
 0x7c8   : > { %v4396_v6 = vadd.f32 %v4322_v42, %v4321_v9  ;;  %5119 = vmatpush2.bf16.msra.mxu0 %v4871_v58  ;;  %4927 = vmatprep.subr.bf16.mxu1 %v4866_v7  ;;  %v4147_v24 = vpop.xlane.xlu1 %4146 }
 0x7c9   : > { %5120 = vmatprep.subr.bf16.mxu0 %v4868_v12  ;;  %v4323_v43 = vmul.f32 %v11225_v5, %v11225_v5  ;;  %v4324_v44 = vmul.f32 %v11228_v31, %v11228_v31  ;;  %v4216_v30 = vmul.f32 0.00390625, %v4147_v24  ;;  %v4199_v41 = vadd.f32 %v11220_v51, %v11230_v22 }
 0x7ca   : > { %4397 = vadd.xlane.f32.xlu1 %v4396_v6  ;;  %4197 = vadd.xlane.f32.xlu0 %v4196_v28 }
 0x7cb   : > { %4928 = vmatpush2.bf16.msra.mxu1 %v4865_v17  ;;  %v11237_v55 = vsub.f32 %v10849_v38, %v4216_v30  ;;  %v11240_v58 = vsub.f32 %v10851_v52, %v4216_v30  ;;  %v4399_v50 = vadd.f32 %v4324_v44, %v4323_v43 }
 0x7cc   : > { %5121 = vmatpush2.bf16.msra.mxu0 %v4867_v48  ;;  %v4150_v8 = vpop.xlane.xlu0 %4149 }
 0x7cd   : > { %v4325_v45 = vmul.f32 %v11237_v55, %v11237_v55  ;;  %v4326_v39 = vmul.f32 %v11240_v58, %v11240_v58  ;;  %v4217_v57 = vmul.f32 0.00390625, %v4150_v8 }
 0x7ce   : > { %4400 = vadd.xlane.f32.xlu0 %v4399_v50  ;;  %4200 = vadd.xlane.f32.xlu1 %v4199_v41 }
 0x7cf   : > { %v11249_v38 = vsub.f32 %v10859_v13, %v4217_v57  ;;  %v11252_v52 = vsub.f32 %v10861_v36, %v4217_v57  ;;  %v4402_v32 = vadd.f32 %v4326_v39, %v4325_v45 }
 0x7d0   : > { %v4153_v7 = vpop.xlane.xlu1 %4152 }
 0x7d1   : > { %v4327_v12 = vmul.f32 %v11249_v38, %v11249_v38  ;;  %v4328_v56 = vmul.f32 %v11252_v52, %v11252_v52  ;;  %v4218_v9 = vmul.f32 0.00390625, %v4153_v7 }
 0x7d2   : > { %4403 = vadd.xlane.f32.xlu1 %v4402_v32 }
 0x7d3   : > { %v11259_v42 = vsub.f32 %v10869_v53, %v4218_v9  ;;  %v11262_v37 = vsub.f32 %v10871_v54, %v4218_v9  ;;  %v4405_v13 = vadd.f32 %v4328_v56, %v4327_v12  ;;  %v14055_v12 = vld [vmem:[#allocation31_spill] sm:$0xff] }
 0x7d4   : > { %v4156_v10 = vpop.xlane.xlu0 %4155  ;;  %v14056_v9 = vld [vmem:[#allocation91_spill] sm:$0xff] }
 0x7d5   : > { %v4329_v36 = vmul.f32 %v11259_v42, %v11259_v42  ;;  %v4330_v28 = vmul.f32 %v11262_v37, %v11262_v37  ;;  %v4219_v17 = vmul.f32 0.00390625, %v4156_v10  ;;  %4406 = vadd.xlane.f32.xlu0 %v4405_v13 }
 0x7d7   : > { %v11269_v6 = vsub.f32 %v10879_v4, %v4219_v17  ;;  %v11272_v48 = vsub.f32 %v10881_v23, %v4219_v17  ;;  %v4408_v53 = vadd.f32 %v4330_v28, %v4329_v36 }
 0x7d8   : > { %v4159_v24 = vpop.xlane.xlu1 %4158 }
 0x7d9   : > { %v4331_v54 = vmul.f32 %v11269_v6, %v11269_v6  ;;  %v4332_v14 = vmul.f32 %v11272_v48, %v11272_v48  ;;  %v4220_v43 = vmul.f32 0.00390625, %v4159_v24  ;;  %4409 = vadd.xlane.f32.xlu1 %v4408_v53 }
 0x7db   : > { %v11279_v44 = vsub.f32 %v10889_v29, %v4220_v43  ;;  %v11282_v30 = vsub.f32 %v10891_v25, %v4220_v43  ;;  %v4411_v4 = vadd.f32 %v4332_v14, %v4331_v54 }
 0x7dc   : > { %v4162_v50 = vpop.xlane.xlu0 %4161 }
 0x7dd   : > { %v4333_v23 = vmul.f32 %v11279_v44, %v11279_v44  ;;  %v4334_v41 = vmul.f32 %v11282_v30, %v11282_v30  ;;  %v4221_v8 = vmul.f32 0.00390625, %v4162_v50  ;;  %4412 = vadd.xlane.f32.xlu0 %v4411_v4 }
 0x7df   : > { %v11289_v45 = vsub.f32 %v10899_v62, %v4221_v8  ;;  %v11292_v39 = vsub.f32 %v10901_v40, %v4221_v8  ;;  %v4414_v29 = vadd.f32 %v4334_v41, %v4333_v23 }
 0x7e0   : > { %v4165_v57 = vpop.xlane.xlu1 %4164 }
 0x7e1   : > { %v4335_v25 = vmul.f32 %v11289_v45, %v11289_v45  ;;  %v4336_v32 = vmul.f32 %v11292_v39, %v11292_v39  ;;  %v4222_v7 = vmul.f32 0.00390625, %v4165_v57  ;;  %4415 = vadd.xlane.f32.xlu1 %v4414_v29 }
 0x7e3   : > { %v11299_v56 = vsub.f32 %v14055_v12, %v4222_v7  ;;  %v11302_v13 = vsub.f32 %v14056_v9, %v4222_v7  ;;  %v4417_v62 = vadd.f32 %v4336_v32, %v4335_v25 }
 0x7e5   : > { %v4337_v40 = vmul.f32 %v11299_v56, %v11299_v56  ;;  %v4338_v10 = vmul.f32 %v11302_v13, %v11302_v13  ;;  %4418 = vadd.xlane.f32.xlu0 %v4417_v62 }
 0x7e7   : > { %v4420_v36 = vadd.f32 %v4338_v10, %v4337_v40 }
 0x7e9   : > { %4421 = vadd.xlane.f32.xlu1 %v4420_v36 }
 0x825   : > { %v4365_v28 = vpop.xlane.xlu0 %4364 }
 0x826   : > { %v4459_v17 = vmul.f32 0.00390625, %v4365_v28  ;;  %v4103_v28 = vld [vmem:[%s8289_s23] ss:$4 sm:$0x3] }
 0x828   : > { %v4491_v53 = vadd.f32 1e-05, %v4459_v17 }
 0x829   : > { %v4368_v24 = vpop.xlane.xlu1 %4367  ;;  %v4168_v54 = vpop.xlane.xlu0 %4167 }
 0x82a   : > { %7933 = vrsqrt.f32 %v4491_v53  ;;  %v4460_v14 = vmul.f32 0.00390625, %v4368_v24  ;;  %v4223_v43 = vmul.f32 0.00390625, %v4168_v54 }
 0x82c   : > { %v4492_v4 = vadd.f32 1e-05, %v4460_v14  ;;  %v11309_v50 = vsub.f32 %v10963_v21, %v4223_v43  ;;  %v11312_v23 = vsub.f32 %v10952_v60, %v4223_v43  ;;  %v14057_v21 = vld [vmem:[#allocation34_spill] sm:$0xff]  ;;  %v14060_v43 = vld [vmem:[#allocation52_spill] sm:$0xff] }
 0x82d   : > { %v4171_v41 = vpop.xlane.xlu1 %4170 }
 0x82e   : > { %7935 = vrsqrt.f32 %v4492_v4  ;;  %v4339_v8 = vmul.f32 %v11309_v50, %v11309_v50  ;;  %v4340_v29 = vmul.f32 %v11312_v23, %v11312_v23  ;;  %v4371_v57 = vpop.xlane.xlu0 %4370  ;;  %v4224_v25 = vmul.f32 0.00390625, %v4171_v41 }
 0x82f   : > { %v4461_v32 = vmul.f32 0.00390625, %v4371_v57  ;;  %v11336_v4 = vrot.slane %v4103_v28, %v14060_v43  ;;  %v14061_v57 = vld [vmem:[#allocation78_spill] sm:$0xff] }
 0x830   : > { %v11319_v7 = vsub.f32 %v10985_v16, %v4224_v25  ;;  %v11322_v12 = vsub.f32 %v14057_v21, %v4224_v25  ;;  %v4423_v60 = vadd.f32 %v4340_v29, %v4339_v8  ;;  %v7624_v29 = vld [vmem:[%s8289_s23 + $0x1] ss:$4 sm:$0x3]  ;;  %v11340_v25 = vrot.slane %v4103_v28, %v14061_v57 }
 0x831   : > { %v4493_v9 = vadd.f32 1e-05, %v4461_v32 }
 0x832   : > { %v4341_v62 = vmul.f32 %v11319_v7, %v11319_v7  ;;  %v4342_v40 = vmul.f32 %v11322_v12, %v11322_v12  ;;  %v4374_v10 = vpop.xlane.xlu1 %4373  ;;  %v4174_v36 = vpop.xlane.xlu0 %4173  ;;  %4424 = vadd.xlane.f32.xlu0 %v4423_v60  ;;  %v14062_v60 = vld [vmem:[#allocation32_spill] sm:$0xff] }
 0x833   : > { %7937 = vrsqrt.f32 %v4493_v9  ;;  %v4462_v17 = vmul.f32 0.00390625, %v4374_v10  ;;  %v4225_v16 = vmul.f32 0.00390625, %v4174_v36 }
 0x834   : > { %v4426_v53 = vadd.f32 %v4342_v40, %v4341_v62  ;;  %v14063_v40 = vld [vmem:[#allocation96_spill] sm:$0xff] }
 0x835   : > { %v4494_v24 = vadd.f32 1e-05, %v4462_v17  ;;  %v11330_v54 = vsub.f32 %v11005_v61, %v4225_v16  ;;  %v11333_v14 = vsub.f32 %v11002_v20, %v4225_v16  ;;  %v11349_v16 = vrot.slane %v7624_v29, %v14060_v43 }
 0x836   : > { %v4377_v41 = vpop.xlane.xlu0 %4376  ;;  %v4177_v8 = vpop.xlane.xlu1 %4176  ;;  %4427 = vadd.xlane.f32.xlu1 %v4426_v53 }
 0x837   : > { %14058 = vst [vmem:[#allocation60_spill] sm:$0xff] %v11330_v54  ;;  %14059 = vst [vmem:[#allocation42_spill] sm:$0xff] %v11333_v14  ;;  %v7934_v32 = vpop.eup %7933  ;;  %7939 = vrsqrt.f32 %v4494_v24  ;;  %v4343_v21 = vmul.f32 %v11330_v54, %v11330_v54  ;;  %v4344_v61 = vmul.f32 %v11333_v14, %v11333_v14  ;;  %v4463_v20 = vmul.f32 0.00390625, %v4377_v41  ;;  %v14070_v14 = vld [vmem:[#allocation58_spill] sm:$0xff] }
 0x838   : > { %v4555_v9 = vmul.f32 %v7934_v32, %v14062_v60  ;;  %v4226_v62 = vmul.f32 0.00390625, %v4177_v8  ;;  %v4556_v10 = vmul.f32 %v7934_v32, %v14063_v40  ;;  %v11359_v60 = vrot.slane %v7624_v29, %v14061_v57  ;;  %v14067_v40 = vld [vmem:[#allocation33_spill] sm:$0xff] }
 0x839   : > { %v4495_v36 = vadd.f32 1e-05, %v4463_v20  ;;  %v4429_v17 = vadd.f32 %v4344_v61, %v4343_v21  ;;  %v14066_v20 = vld [vmem:[#allocation55_spill] sm:$0xff]  ;;  %v14068_v29 = vld [vmem:[#allocation93_spill] sm:$0xff] }
 0x83a   : > { %v11352_v28 = vsub.f32 %v11022_v33, %v4226_v62  ;;  %v11355_v53 = vsub.f32 %v11007_v18, %v4226_v62  ;;  %v4380_v24 = vpop.xlane.xlu1 %4379  ;;  %v4180_v54 = vpop.xlane.xlu0 %4179  ;;  %v4631_v41 = vmul.f32 %v11340_v25, %v4556_v10  ;;  %v4630_v32 = vmul.f32 %v11336_v4, %v4555_v9 }
 0x83b   : > { %v7936_v8 = vpop.eup %7935  ;;  %7941 = vrsqrt.f32 %v4495_v36  ;;  %v4464_v21 = vmul.f32 0.00390625, %v4380_v24  ;;  %v4227_v61 = vmul.f32 0.00390625, %v4180_v54  ;;  %4430 = vadd.xlane.f32.xlu0 %v4429_v17 }
 0x83c   : > { %14064 = vst [vmem:[#allocation66_spill] sm:$0xff] %v11352_v28  ;;  %14065 = vst [vmem:[#allocation71_spill] sm:$0xff] %v11355_v53  ;;  %v4557_v33 = vmul.f32 %v7936_v8, %v14066_v20  ;;  %v4345_v18 = vmul.f32 %v11352_v28, %v11352_v28  ;;  %v4346_v62 = vmul.f32 %v11355_v53, %v11355_v53 }
 0x83d   : > { %v4558_v10 = vmul.f32 %v7936_v8, %v14067_v40  ;;  %v4496_v43 = vadd.f32 1e-05, %v4464_v21  ;;  %v11369_v57 = vsub.f32 %v14068_v29, %v4227_v61  ;;  %v11372_v9 = vsub.f32 %v14070_v14, %v4227_v61 }
 0x83e   : > { %v4632_v54 = vmul.f32 %v11336_v4, %v4557_v33  ;;  %v4383_v36 = vpop.xlane.xlu0 %4382  ;;  %v4183_v17 = vpop.xlane.xlu1 %4182  ;;  %v4432_v24 = vadd.f32 %v4346_v62, %v4345_v18  ;;  %v11377_v28 = vadd.f32 %v11359_v60, %v4631_v41  ;;  %v11387_v18 = vadd.f32 %v11349_v16, %v4630_v32 }
 0x83f   : > { %14069 = vst [vmem:[#allocation45_spill] sm:$0xff] %v11369_v57  ;;  %v4633_v20 = vmul.f32 %v11340_v25, %v4558_v10  ;;  %7943 = vrsqrt.f32 %v4496_v43  ;;  %v4347_v8 = vmul.f32 %v11369_v57, %v11369_v57  ;;  %v4348_v21 = vmul.f32 %v11372_v9, %v11372_v9  ;;  %v14075_v10 = vld [vmem:[#allocation95_spill] sm:$0xff]  ;;  %v14076_v57 = vld [vmem:[#allocation53_spill] sm:$0xff] }
 0x840   : > { %14071 = vst [vmem:[#allocation65_spill] sm:$0xff] %v11377_v28  ;;  %v4465_v40 = vmul.f32 0.00390625, %v4383_v36  ;;  %v7938_v14 = vpop.eup %7937  ;;  %v4228_v61 = vmul.f32 0.00390625, %v4183_v17  ;;  %4433 = vadd.xlane.f32.xlu1 %v4432_v24  ;;  %14073 = vst [vmem:[#allocation46_spill] sm:$0xff] %v11387_v18  ;;  %v11390_v41 = vadd.f32 %v11349_v16, %v4632_v54 }
 0x841   : > { %v11384_v33 = vadd.f32 %v11359_v60, %v4633_v20  ;;  %v4435_v62 = vadd.f32 %v4348_v21, %v4347_v8  ;;  %v4560_v29 = vmul.f32 %v7938_v14, %v14075_v10  ;;  %v4559_v53 = vmul.f32 %v7938_v14, %v14076_v57 }
 0x842   : > { %14074 = vst [vmem:[#allocation70_spill] sm:$0xff] %v11390_v41  ;;  %v4497_v43 = vadd.f32 1e-05, %v4465_v40  ;;  %v11395_v36 = vsub.f32 %v11094_v34, %v4228_v61  ;;  %v11398_v17 = vsub.f32 %v11074_v26, %v4228_v61  ;;  %v4769_v54 = vpack.c.bf16 %v11390_v41, %v11387_v18 }
 0x843   : > { %14072 = vst [vmem:[#allocation64_spill] sm:$0xff] %v11384_v33  ;;  %v4386_v24 = vpop.xlane.xlu1 %4385  ;;  %v4186_v20 = vpop.xlane.xlu0 %4185  ;;  %v4770_v32 = vpack.c.bf16 %v11384_v33, %v11377_v28  ;;  %4436 = vadd.xlane.f32.xlu0 %v4435_v62  ;;  %v4635_v57 = vmul.f32 %v11340_v25, %v4560_v29  ;;  %v4634_v14 = vmul.f32 %v11336_v4, %v4559_v53  ;;  %v14079_v62 = vld [vmem:[#allocation59_spill] sm:$0xff] }
 0x844   : > { %7945 = vrsqrt.f32 %v4497_v43  ;;  %v4466_v8 = vmul.f32 0.00390625, %v4386_v24  ;;  %v4229_v21 = vmul.f32 0.00390625, %v4186_v20  ;;  %v7940_v40 = vpop.eup %7939  ;;  %v4349_v34 = vmul.f32 %v11395_v36, %v11395_v36 }
 0x845   : > { %v4350_v26 = vmul.f32 %v11398_v17, %v11398_v17  ;;  %4929 = vmatprep.mubr.bf16.mxu1 %v4770_v32  ;;  %5122 = vmatprep.mubr.bf16.mxu0 %v4770_v32  ;;  %v4562_v29 = vmul.f32 %v7940_v40, %v14079_v62  ;;  %v11418_v41 = vadd.f32 %v11359_v60, %v4635_v57  ;;  %v14081_v32 = vld [vmem:[#allocation94_spill] sm:$0xff] }
 0x846   : > { %v4498_v61 = vadd.f32 1e-05, %v4466_v8  ;;  %v11411_v10 = vsub.f32 %v11090_v1, %v4229_v21  ;;  %v11414_v43 = vsub.f32 %v11101_v3, %v4229_v21  ;;  %4930 = vmatmul.mubr.bf16.vlgmr.msra.gmra.mxu1 %v4769_v54  ;;  %5123 = vmatmul.mubr.bf16.vlgmr.msra.gmra.mxu0 %v4769_v54  ;;  %v4561_v28 = vmul.f32 %v7940_v40, %v14081_v32  ;;  %v14084_v32 = vld [vmem:[#allocation35_spill] sm:$0xff] }
 0x847   : > { %v4389_v24 = vpop.xlane.xlu0 %4388  ;;  %v4189_v20 = vpop.xlane.xlu1 %4188  ;;  %v4438_v33 = vadd.f32 %v4350_v26, %v4349_v34  ;;  %14080 = vst [vmem:[#allocation69_spill] sm:$0xff] %v11418_v41  ;;  %v4637_v21 = vmul.f32 %v11340_v25, %v4562_v29  ;;  %v11428_v57 = vadd.f32 %v11349_v16, %v4634_v14 }
 0x848   : > { %14077 = vst [vmem:[#allocation75_spill] sm:$0xff] %v11411_v10  ;;  %14078 = vst [vmem:[#allocation49_spill] sm:$0xff] %v11414_v43  ;;  %7947 = vrsqrt.f32 %v4498_v61  ;;  %v4351_v1 = vmul.f32 %v11411_v10, %v11411_v10  ;;  %v4352_v3 = vmul.f32 %v11414_v43, %v11414_v43  ;;  %v4467_v53 = vmul.f32 0.00390625, %v4389_v24  ;;  %v7942_v8 = vpop.eup %7941  ;;  %v14083_v61 = vld [vmem:[#allocation36_spill] sm:$0xff]  ;;  %v14085_v24 = vld [vmem:[#allocation62_spill] sm:$0xff] }
 0x849   : > { %v4230_v54 = vmul.f32 0.00390625, %v4189_v20  ;;  %4439 = vadd.xlane.f32.xlu1 %v4438_v33  ;;  %v4636_v34 = vmul.f32 %v11336_v4, %v4561_v28  ;;  %14082 = vst [vmem:[#allocation68_spill] sm:$0xff] %v11428_v57  ;;  %v4564_v62 = vmul.f32 %v7942_v8, %v14083_v61  ;;  %v4563_v18 = vmul.f32 %v7942_v8, %v14084_v32  ;;  %v14089_v61 = vld [vmem:[#allocation63_spill] sm:$0xff] }
 0x84a   : > { %v4499_v26 = vadd.f32 1e-05, %v4467_v53  ;;  %v4441_v40 = vadd.f32 %v4352_v3, %v4351_v1  ;;  %v11439_v29 = vadd.f32 %v11359_v60, %v4637_v21 }
 0x84b   : > { %v11433_v10 = vsub.f32 %v11114_v15, %v4230_v54  ;;  %v11436_v43 = vsub.f32 %v14085_v24, %v4230_v54  ;;  %v4392_v33 = vpop.xlane.xlu1 %4391  ;;  %v4192_v20 = vpop.xlane.xlu0 %4191  ;;  %v11442_v28 = vadd.f32 %v11349_v16, %v4636_v34  ;;  %v4639_v3 = vmul.f32 %v11340_v25, %v4564_v62 }
 0x84c   : > { %14086 = vst [vmem:[#allocation74_spill] sm:$0xff] %v11439_v29  ;;  %7949 = vrsqrt.f32 %v4499_v26  ;;  %v4468_v14 = vmul.f32 0.00390625, %v4392_v33  ;;  %v4231_v1 = vmul.f32 0.00390625, %v4192_v20  ;;  %4442 = vadd.xlane.f32.xlu0 %v4441_v40  ;;  %v7944_v53 = vpop.eup %7943  ;;  %v4772_v54 = vpack.c.bf16 %v11439_v29, %v11418_v41  ;;  %v14091_v29 = vld [vmem:[#allocation92_spill] sm:$0xff] }
 0x84d   : > { %14087 = vst [vmem:[#allocation80_spill] sm:$0xff] %v11442_v28  ;;  %v4353_v15 = vmul.f32 %v11433_v10, %v11433_v10  ;;  %v4354_v8 = vmul.f32 %v11436_v43, %v11436_v43  ;;  %v4771_v21 = vpack.c.bf16 %v11442_v28, %v11428_v57  ;;  %v4566_v62 = vmul.f32 %v7944_v53, %v14089_v61  ;;  %v14093_v28 = vld [vmem:[#allocation37_spill] sm:$0xff] }
 0x84e   : > { %v4500_v34 = vadd.f32 1e-05, %v4468_v14  ;;  %v11454_v26 = vsub.f32 %v11169_v2, %v4231_v1  ;;  %v11457_v40 = vsub.f32 %v11156_v11, %v4231_v1  ;;  %4939 = vmatprep.mubr.bf16.mxu1 %v4772_v54  ;;  %5132 = vmatprep.mubr.bf16.mxu0 %v4772_v54  ;;  %v11461_v20 = vadd.f32 %v11359_v60, %v4639_v3 }
 0x84f   : > { %v4395_v32 = vpop.xlane.xlu0 %4394  ;;  %v4195_v24 = vpop.xlane.xlu1 %4194  ;;  %v4444_v33 = vadd.f32 %v4354_v8, %v4353_v15  ;;  %v4565_v41 = vmul.f32 %v7944_v53, %v14091_v29  ;;  %4940 = vmatmul.mubr.bf16.gmra.mxu1 %v4771_v21  ;;  %5133 = vmatmul.mubr.bf16.gmra.mxu0 %v4771_v21  ;;  %v4641_v15 = vmul.f32 %v11340_v25, %v4566_v62 }
 0x850   : > { %14088 = vst [vmem:[#allocation73_spill] sm:$0xff] %v11454_v26  ;;  %14090 = vst [vmem:[#allocation72_spill] sm:$0xff] %v11461_v20  ;;  %7951 = vrsqrt.f32 %v4500_v34  ;;  %v4355_v2 = vmul.f32 %v11454_v26, %v11454_v26  ;;  %v4356_v11 = vmul.f32 %v11457_v40, %v11457_v40  ;;  %v4469_v14 = vmul.f32 0.00390625, %v4395_v32  ;;  %v14092_v34 = vld [vmem:[#allocation57_spill] sm:$0xff] }
 0x851   : > { %v7946_v1 = vpop.eup %7945  ;;  %v4232_v54 = vmul.f32 0.00390625, %v4195_v24  ;;  %4445 = vadd.xlane.f32.xlu1 %v4444_v33  ;;  %v4638_v3 = vmul.f32 %v11336_v4, %v4563_v18  ;;  %v4640_v8 = vmul.f32 %v11336_v4, %v4565_v41  ;;  %v11480_v62 = vadd.f32 %v11359_v60, %v4641_v15 }
 0x852   : > { %v4501_v29 = vadd.f32 1e-05, %v4469_v14  ;;  %v4447_v53 = vadd.f32 %v4356_v11, %v4355_v2  ;;  %v4568_v61 = vmul.f32 %v7946_v1, %v14092_v34  ;;  %v4567_v57 = vmul.f32 %v7946_v1, %v14093_v28  ;;  %v14098_v34 = vld [vmem:[#allocation38_spill] sm:$0xff] }
 0x853   : > { %v11474_v26 = vsub.f32 %v11171_v59, %v4232_v54  ;;  %v11477_v21 = vsub.f32 %v11173_v35, %v4232_v54  ;;  %v4398_v32 = vpop.xlane.xlu1 %4397  ;;  %v4198_v24 = vpop.xlane.xlu0 %4197  ;;  %14094 = vst [vmem:[#allocation79_spill] sm:$0xff] %v11480_v62  ;;  %v11483_v18 = vadd.f32 %v11349_v16, %v4638_v3  ;;  %v11486_v28 = vadd.f32 %v11349_v16, %v4640_v8 }
 0x854   : > { %7953 = vrsqrt.f32 %v4501_v29  ;;  %v4470_v41 = vmul.f32 0.00390625, %v4398_v32  ;;  %v4233_v33 = vmul.f32 0.00390625, %v4198_v24  ;;  %4448 = vadd.xlane.f32.xlu0 %v4447_v53  ;;  %v4774_v11 = vpack.c.bf16 %v11480_v62, %v11461_v20  ;;  %v14101_v62 = vld [vmem:[#allocation41_spill] sm:$0xff]  ;;  %v14102_v20 = vld [vmem:[#allocation67_spill] sm:$0xff] }
 0x855   : > { %14095 = vst [vmem:[#allocation87_spill] sm:$0xff] %v11483_v18  ;;  %14096 = vst [vmem:[#allocation77_spill] sm:$0xff] %v11486_v28  ;;  %v7948_v59 = vpop.eup %7947  ;;  %v4357_v35 = vmul.f32 %v11474_v26, %v11474_v26  ;;  %v4358_v2 = vmul.f32 %v11477_v21, %v11477_v21  ;;  %v4643_v14 = vmul.f32 %v11340_v25, %v4568_v61 }
 0x856   : > { %v4502_v1 = vadd.f32 1e-05, %v4470_v41  ;;  %v11496_v54 = vsub.f32 %v11213_v49, %v4233_v33  ;;  %v11499_v15 = vsub.f32 %v11195_v0, %v4233_v33  ;;  %v4773_v3 = vpack.c.bf16 %v11486_v28, %v11483_v18  ;;  %4949 = vmatprep.mubr.bf16.mxu1 %v4774_v11  ;;  %5142 = vmatprep.mubr.bf16.mxu0 %v4774_v11 }
 0x857   : > { %v4401_v8 = vpop.xlane.xlu0 %4400  ;;  %v4201_v29 = vpop.xlane.xlu1 %4200  ;;  %v4450_v53 = vadd.f32 %v4358_v2, %v4357_v35  ;;  %v4570_v32 = vmul.f32 %v7948_v59, %v14098_v34  ;;  %v11505_v24 = vadd.f32 %v11359_v60, %v4643_v14  ;;  %v14100_v2 = vld [vmem:[#allocation56_spill] sm:$0xff]  ;;  %v4642_v14 = vmul.f32 %v11336_v4, %v4567_v57 }
 0x858   : > { %14097 = vst [vmem:[#allocation76_spill] sm:$0xff] %v11496_v54  ;;  %7955 = vrsqrt.f32 %v4502_v1  ;;  %v4359_v49 = vmul.f32 %v11496_v54, %v11496_v54  ;;  %v4360_v0 = vmul.f32 %v11499_v15, %v11499_v15  ;;  %4950 = vmatmul.mubr.bf16.gmra.mxu1 %v4773_v3  ;;  %5143 = vmatmul.mubr.bf16.gmra.mxu0 %v4773_v3  ;;  %v4471_v61 = vmul.f32 0.00390625, %v4401_v8 }
 0x859   : > { %14099 = vst [vmem:[#allocation83_spill] sm:$0xff] %v11505_v24  ;;  %v7950_v41 = vpop.eup %7949  ;;  %v4234_v33 = vmul.f32 0.00390625, %v4201_v29  ;;  %4451 = vadd.xlane.f32.xlu1 %v4450_v53  ;;  %v4645_v35 = vmul.f32 %v11340_v25, %v4570_v32  ;;  %v4569_v11 = vmul.f32 %v7948_v59, %v14100_v2  ;;  %v5781_v2 = vld [vmem:[%s8276_s28 + $0x30] sm:$0xff] }
 0x85a   : > { %v4503_v1 = vadd.f32 1e-05, %v4471_v61  ;;  %v4453_v34 = vadd.f32 %v4360_v0, %v4359_v49  ;;  %v4572_v28 = vmul.f32 %v7950_v41, %v14101_v62  ;;  %v4571_v18 = vmul.f32 %v7950_v41, %v14102_v20  ;;  %v5782_v62 = vld [vmem:[%s8276_s28 + $0x38] sm:$0xff] }
 0x85b   : > { %v11517_v54 = vsub.f32 %v11230_v22, %v4234_v33  ;;  %v11520_v3 = vsub.f32 %v11220_v51, %v4234_v33  ;;  %v4404_v8 = vpop.xlane.xlu1 %4403  ;;  %v11523_v29 = vadd.f32 %v11359_v60, %v4645_v35  ;;  %v4644_v59 = vmul.f32 %v11336_v4, %v4569_v11  ;;  %v5798_v35 = vld [vmem:[%s8276_s28 + $0xb8] sm:$0xff]  ;;  %v5797_v11 = vld [vmem:[%s8276_s28 + $0xb0] sm:$0xff] }
 0x85c   : > { %7957 = vrsqrt.f32 %v4503_v1  ;;  %v4472_v57 = vmul.f32 0.00390625, %v4404_v8  ;;  %4454 = vadd.xlane.f32.xlu0 %v4453_v34  ;;  %v11527_v20 = vadd.f32 %v11349_v16, %v4642_v14  ;;  %v4647_v22 = vmul.f32 %v11340_v25, %v4572_v28 }
 0x85d   : > { %14103 = vst [vmem:[#allocation82_spill] sm:$0xff] %v11523_v29  ;;  %v7952_v51 = vpop.eup %7951  ;;  %v4361_v53 = vmul.f32 %v11517_v54, %v11517_v54  ;;  %v4362_v32 = vmul.f32 %v11520_v3, %v11520_v3  ;;  %v4776_v49 = vpack.c.bf16 %v11523_v29, %v11505_v24  ;;  %v11538_v0 = vadd.f32 %v11349_v16, %v4644_v59  ;;  %v5796_v24 = vld [vmem:[%s8276_s28 + $0xa8] sm:$0xff] }
 0x85e   : > { %14104 = vst [vmem:[#allocation81_spill] sm:$0xff] %v11527_v20  ;;  %v4504_v61 = vadd.f32 1e-05, %v4472_v57  ;;  %v4574_v41 = vmul.f32 %v7952_v51, %v11166_v47  ;;  %v11542_v33 = vadd.f32 %v11359_v60, %v4647_v22  ;;  %v4573_v28 = vmul.f32 %v7952_v51, %v11163_v27  ;;  %v4407_v1 = vpop.xlane.xlu0 %4406 }
 0x85f   : > { %14105 = vst [vmem:[#allocation89_spill] sm:$0xff] %v11538_v0  ;;  %4959 = vmatprep.mubr.bf16.mxu1 %v4776_v49  ;;  %5152 = vmatprep.mubr.bf16.mxu0 %v4776_v49  ;;  %v4775_v14 = vpack.c.bf16 %v11538_v0, %v11527_v20  ;;  %v4456_v34 = vadd.f32 %v4362_v32, %v4361_v53  ;;  %v5822_v59 = vunpack.c.h.s8.bf16 %v5782_v62  ;;  %v4473_v47 = vmul.f32 0.00390625, %v4407_v1  ;;  %v14107_v1 = vld [vmem:[#allocation61_spill] sm:$0xff]  ;;  %v11569_v20 = vld [vmem:[%s8276_s28 + $0x20] sm:$0xff] }
 0x860   : > { %v4646_v8 = vmul.f32 %v11336_v4, %v4571_v18  ;;  %7959 = vrsqrt.f32 %v4504_v61  ;;  %v4649_v57 = vmul.f32 %v11340_v25, %v4574_v41  ;;  %v4648_v27 = vmul.f32 %v11336_v4, %v4573_v28  ;;  %v5780_v28 = vld [vmem:[%s8276_s28 + $0x28] sm:$0xff] }
 0x861   : > { %v7954_v22 = vpop.eup %7953  ;;  %4960 = vmatmul.mubr.bf16.gmra.mxu1 %v4775_v14  ;;  %5153 = vmatmul.mubr.bf16.gmra.mxu0 %v4775_v14  ;;  %v5854_v49 = vunpack.c.h.s8.bf16 %v5798_v35  ;;  %v5821_v29 = vunpack.c.h.s8.bf16 %v5781_v2  ;;  %v5853_v53 = vunpack.c.h.s8.bf16 %v5797_v11  ;;  %v4505_v32 = vadd.f32 1e-05, %v4473_v47 }
 0x862   : > { %v11554_v51 = vadd.f32 %v11349_v16, %v4646_v8  ;;  %4457 = vadd.xlane.f32.xlu1 %v4456_v34  ;;  %v11557_v18 = vadd.f32 %v11359_v60, %v4649_v57  ;;  %v11560_v61 = vadd.f32 %v11349_v16, %v4648_v27  ;;  %v4576_v41 = vmul.f32 %v7954_v22, %v11189_v63  ;;  %v4410_v14 = vpop.xlane.xlu1 %4409  ;;  %v11572_v63 = vld [vmem:[%s8276_s28 + $0xa0] sm:$0xff] }
 0x863   : > { %5871 = vmatprep.subr.bf16.mxu1 %v5822_v59  ;;  %v4575_v8 = vmul.f32 %v7954_v22, %v14107_v1  ;;  %6064 = vmatprep.subr.bf16.mxu0 %v5854_v49  ;;  %v5820_v0 = vunpack.c.l.s8.bf16 %v5782_v62  ;;  %v5852_v47 = vunpack.c.l.s8.bf16 %v5798_v35  ;;  %v5819_v34 = vunpack.c.l.s8.bf16 %v5781_v2 }
 0x864   : > { %14106 = vst [vmem:[#allocation88_spill] sm:$0xff] %v11557_v18  ;;  %5872 = vmatpush1.bf16.msra.mxu1 %v5821_v29  ;;  %7961 = vrsqrt.f32 %v4505_v32  ;;  %v4474_v57 = vmul.f32 0.00390625, %v4410_v14  ;;  %v4778_v27 = vpack.c.bf16 %v11557_v18, %v11542_v33  ;;  %6065 = vmatpush1.bf16.msra.mxu0 %v5853_v53  ;;  %v4777_v22 = vpack.c.bf16 %v11560_v61, %v11554_v51 }
 0x865   : > { %v7956_v59 = vpop.eup %7955  ;;  %v4651_v29 = vmul.f32 %v11340_v25, %v4576_v41  ;;  %5873 = vmatprep.subr.bf16.mxu1 %v5820_v0  ;;  %6066 = vmatprep.subr.bf16.mxu0 %v5852_v47  ;;  %v5851_v62 = vunpack.c.l.s8.bf16 %v5797_v11  ;;  %v5818_v35 = vunpack.c.h.s8.bf16 %v5780_v28  ;;  %v5850_v32 = vunpack.c.h.s8.bf16 %v5796_v24 }
 0x866   : > { %v4506_v2 = vadd.f32 1e-05, %v4474_v57  ;;  %4969 = vmatprep.mubr.bf16.mxu1 %v4778_v27  ;;  %5162 = vmatprep.mubr.bf16.mxu0 %v4778_v27  ;;  %v4578_v49 = vmul.f32 %v7956_v59, %v11211_v46  ;;  %v4577_v53 = vmul.f32 %v7956_v59, %v11208_v19  ;;  %v4413_v14 = vpop.xlane.xlu0 %4412  ;;  %v4650_v1 = vmul.f32 %v11336_v4, %v4575_v8 }
 0x867   : > { %v5817_v18 = vunpack.c.h.s8.bf16 %v11569_v20  ;;  %v5849_v41 = vunpack.c.h.s8.bf16 %v11572_v63  ;;  %v4475_v0 = vmul.f32 0.00390625, %v4413_v14  ;;  %v11585_v19 = vadd.f32 %v11359_v60, %v4651_v29  ;;  %v5777_v14 = vld [vmem:[%s8276_s28 + $0x10] sm:$0xff] }
 0x868   : > { %5874 = vmatpush1.bf16.msra.mxu1 %v5819_v34  ;;  %7963 = vrsqrt.f32 %v4506_v2  ;;  %v4653_v11 = vmul.f32 %v11340_v25, %v4578_v49  ;;  %v4652_v47 = vmul.f32 %v11336_v4, %v4577_v53  ;;  %6067 = vmatpush1.bf16.msra.mxu0 %v5851_v62  ;;  %v5816_v8 = vunpack.c.l.s8.bf16 %v5780_v28  ;;  %v5778_v62 = vld [vmem:[%s8276_s28 + $0x18] sm:$0xff] }
 0x869   : > { %5875 = vmatprep.subr.bf16.mxu1 %v5818_v35  ;;  %v7958_v46 = vpop.eup %7957  ;;  %4970 = vmatmul.mubr.bf16.gmra.mxu1 %v4777_v22  ;;  %v5848_v34 = vunpack.c.l.s8.bf16 %v5796_v24  ;;  %v4507_v57 = vadd.f32 1e-05, %v4475_v0  ;;  %v11596_v35 = vadd.f32 %v11349_v16, %v4650_v1  ;;  %v5815_v24 = vunpack.c.l.s8.bf16 %v11569_v20  ;;  %v5794_v49 = vld [vmem:[%s8276_s28 + $0x98] sm:$0xff]  ;;  %v11606_v0 = vld [vmem:[%s8276_s28 + $0x90] sm:$0xff] }
 0x86a   : > { %5163 = vmatmul.mubr.bf16.gmra.mxu0 %v4777_v22  ;;  %v11588_v27 = vadd.f32 %v11359_v60, %v4653_v11  ;;  %v11591_v59 = vadd.f32 %v11349_v16, %v4652_v47  ;;  %v4580_v2 = vmul.f32 %v7958_v46, %v11228_v31  ;;  %6068 = vmatprep.subr.bf16.mxu0 %v5850_v32  ;;  %v4416_v22 = vpop.xlane.xlu1 %4415  ;;  %v5847_v29 = vunpack.c.l.s8.bf16 %v11572_v63 }
 0x86b   : > { %v4579_v28 = vmul.f32 %v7958_v46, %v11225_v5  ;;  %7965 = vrsqrt.f32 %v4507_v57  ;;  %v4476_v53 = vmul.f32 0.00390625, %v4416_v22  ;;  %v5814_v32 = vunpack.c.h.s8.bf16 %v5778_v62 }
 0x86c   : > { %5876 = vmatpush1.bf16.msra.mxu1 %v5817_v18  ;;  %v4780_v31 = vpack.c.bf16 %v11588_v27, %v11585_v19  ;;  %6069 = vmatpush1.bf16.msra.mxu0 %v5849_v41  ;;  %v4779_v5 = vpack.c.bf16 %v11591_v59, %v11596_v35  ;;  %v4655_v20 = vmul.f32 %v11340_v25, %v4580_v2  ;;  %v5846_v41 = vunpack.c.h.s8.bf16 %v5794_v49 }
 0x86d   : > { %5877 = vmatprep.subr.bf16.mxu1 %v5816_v8  ;;  %v7960_v1 = vpop.eup %7959  ;;  %6070 = vmatprep.subr.bf16.mxu0 %v5848_v34  ;;  %v4508_v18 = vadd.f32 1e-05, %v4476_v53  ;;  %v4654_v46 = vmul.f32 %v11336_v4, %v4579_v28  ;;  %v5813_v8 = vunpack.c.h.s8.bf16 %v5777_v14  ;;  %v5845_v57 = vunpack.c.h.s8.bf16 %v11606_v0 }
 0x86e   : > { %4979 = vmatprep.mubr.bf16.mxu1 %v4780_v31  ;;  %5172 = vmatprep.mubr.bf16.mxu0 %v4780_v31  ;;  %v4582_v63 = vmul.f32 %v7960_v1, %v11240_v58  ;;  %v4581_v11 = vmul.f32 %v7960_v1, %v11237_v55  ;;  %v4419_v47 = vpop.xlane.xlu0 %4418  ;;  %v5812_v22 = vunpack.c.l.s8.bf16 %v5778_v62  ;;  %v11618_v58 = vadd.f32 %v11359_v60, %v4655_v20 }
 0x86f   : > { %7967 = vrsqrt.f32 %v4508_v18  ;;  %v4477_v2 = vmul.f32 0.00390625, %v4419_v47  ;;  %v5844_v28 = vunpack.c.l.s8.bf16 %v5794_v49  ;;  %v5811_v20 = vunpack.c.l.s8.bf16 %v5777_v14 }
 0x870   : > { %5878 = vmatpush1.bf16.msra.mxu1 %v5815_v24  ;;  %v4657_v34 = vmul.f32 %v11340_v25, %v4582_v63  ;;  %v4656_v53 = vmul.f32 %v11336_v4, %v4581_v11  ;;  %6071 = vmatpush1.bf16.msra.mxu0 %v5847_v29  ;;  %v11621_v24 = vld [vmem:[%s8276_s28 + $0x8] sm:$0xff]  ;;  %v5843_v63 = vunpack.c.l.s8.bf16 %v11606_v0 }
 0x871   : > { %5879 = vmatprep.subr.bf16.mxu1 %v5814_v32  ;;  %v7962_v55 = vpop.eup %7961  ;;  %4980 = vmatmul.mubr.bf16.gmra.mxu1 %v4779_v5  ;;  %v4509_v31 = vadd.f32 1e-05, %v4477_v2  ;;  %v5792_v32 = vld [vmem:[%s8276_s28 + $0x88] sm:$0xff] }
 0x872   : > { %5173 = vmatmul.mubr.bf16.gmra.mxu0 %v4779_v5  ;;  %v11624_v62 = vadd.f32 %v11359_v60, %v4657_v34  ;;  %v11627_v1 = vadd.f32 %v11349_v16, %v4656_v53  ;;  %v4584_v29 = vmul.f32 %v7962_v55, %v11252_v52  ;;  %6072 = vmatprep.subr.bf16.mxu0 %v5846_v41  ;;  %v4422_v18 = vpop.xlane.xlu1 %4421  ;;  %v5810_v52 = vunpack.c.h.s8.bf16 %v11621_v24  ;;  %v5775_v41 = vld [vmem:[%s8276_s28] sm:$0xff] }
 0x873   : > { %v11632_v5 = vadd.f32 %v11349_v16, %v4654_v46  ;;  %v4583_v49 = vmul.f32 %v7962_v55, %v11249_v38  ;;  %7969 = vrsqrt.f32 %v4509_v31  ;;  %v4478_v11 = vmul.f32 0.00390625, %v4422_v18 }
 0x874   : > { %5880 = vmatpush1.bf16.msra.mxu1 %v5813_v8  ;;  %v4782_v47 = vpack.c.bf16 %v11624_v62, %v11618_v58  ;;  %6073 = vmatpush1.bf16.msra.mxu0 %v5845_v57  ;;  %v5842_v38 = vunpack.c.h.s8.bf16 %v5792_v32  ;;  %v5791_v8 = vld [vmem:[%s8276_s28 + $0x80] sm:$0xff]  ;;  %v4659_v34 = vmul.f32 %v11340_v25, %v4584_v29  ;;  %v5809_v53 = vunpack.c.h.s8.bf16 %v5775_v41 }
 0x875   : > { %5881 = vmatprep.subr.bf16.mxu1 %v5812_v22  ;;  %v7964_v2 = vpop.eup %7963  ;;  %v4781_v46 = vpack.c.bf16 %v11627_v1, %v11632_v5  ;;  %6074 = vmatprep.subr.bf16.mxu0 %v5844_v28  ;;  %v4510_v14 = vadd.f32 1e-05, %v4478_v11  ;;  %v4658_v22 = vmul.f32 %v11336_v4, %v4583_v49  ;;  %v5841_v31 = vunpack.c.h.s8.bf16 %v5791_v8 }
 0x876   : > { %4989 = vmatprep.mubr.bf16.mxu1 %v4782_v47  ;;  %5182 = vmatprep.mubr.bf16.mxu0 %v4782_v47  ;;  %v4586_v0 = vmul.f32 %v7964_v2, %v11262_v37  ;;  %v4585_v57 = vmul.f32 %v7964_v2, %v11259_v42  ;;  %v5808_v37 = vunpack.c.l.s8.bf16 %v11621_v24  ;;  %v5840_v29 = vunpack.c.l.s8.bf16 %v5792_v32  ;;  %v5790_v42 = vld [vmem:[%s8276_s28 + $0x78] sm:$0xff] }
 0x877   : > { %7971 = vrsqrt.f32 %v4510_v14  ;;  %v11652_v49 = vadd.f32 %v11359_v60, %v4659_v34  ;;  %v11662_v47 = vadd.f32 %v11349_v16, %v4658_v22  ;;  %v5807_v32 = vunpack.c.l.s8.bf16 %v5775_v41 }
 0x878   : > { %5882 = vmatpush1.bf16.msra.mxu1 %v5811_v20  ;;  %v4661_v55 = vmul.f32 %v11340_v25, %v4586_v0  ;;  %v4660_v28 = vmul.f32 %v11336_v4, %v4585_v57  ;;  %6075 = vmatpush1.bf16.msra.mxu0 %v5843_v63  ;;  %v7966_v18 = vpop.eup %7965  ;;  %v5838_v14 = vunpack.c.h.s8.bf16 %v5790_v42  ;;  %v5789_v0 = vld [vmem:[%s8276_s28 + $0x70] sm:$0xff] }
 0x879   : > { %5883 = vmatprep.subr.bf16.mxu1 %v5810_v52  ;;  %4990 = vmatmul.mubr.bf16.gmra.mxu1 %v4781_v46  ;;  %v4588_v63 = vmul.f32 %v7966_v18, %v11272_v48  ;;  %v4587_v24 = vmul.f32 %v7966_v18, %v11269_v6  ;;  %v5806_v52 = vld [vmem:[%s8276_s28 + $0xf8] sm:$0xff] }
 0x87a   : > { %5183 = vmatmul.mubr.bf16.gmra.mxu0 %v4781_v46  ;;  %v11655_v20 = vadd.f32 %v11359_v60, %v4661_v55  ;;  %v11658_v11 = vadd.f32 %v11349_v16, %v4660_v28  ;;  %6076 = vmatprep.subr.bf16.mxu0 %v5842_v38  ;;  %v5839_v46 = vunpack.c.l.s8.bf16 %v5791_v8  ;;  %v5805_v38 = vld [vmem:[%s8276_s28 + $0xf0] sm:$0xff]  ;;  %v5870_v22 = vunpack.c.h.s8.bf16 %v5806_v52 }
 0x87b   : > { %v4663_v41 = vmul.f32 %v11340_v25, %v4588_v63  ;;  %v4662_v8 = vmul.f32 %v11336_v4, %v4587_v24 }
 0x87c   : > { %5884 = vmatpush1.bf16.msra.mxu1 %v5809_v53  ;;  %v4784_v2 = vpack.c.bf16 %v11655_v20, %v11652_v49  ;;  %6077 = vmatpush1.bf16.msra.mxu0 %v5841_v31  ;;  %v7968_v34 = vpop.eup %7967  ;;  %v4783_v48 = vpack.c.bf16 %v11658_v11, %v11662_v47  ;;  %v5837_v53 = vunpack.c.h.s8.bf16 %v5789_v0  ;;  %v5869_v31 = vunpack.c.h.s8.bf16 %v5805_v38 }
 0x87d   : > { %5885 = vmatprep.subr.bf16.mxu1 %v5808_v37  ;;  %6078 = vmatprep.subr.bf16.mxu0 %v5840_v29  ;;  %v4590_v6 = vmul.f32 %v7968_v34, %v11282_v30  ;;  %v4589_v57 = vmul.f32 %v7968_v34, %v11279_v44  ;;  %v5836_v30 = vunpack.c.l.s8.bf16 %v5790_v42  ;;  %v5868_v37 = vunpack.c.l.s8.bf16 %v5806_v52  ;;  %v5788_v44 = vld [vmem:[%s8276_s28 + $0x68] sm:$0xff] }
 0x87e   : > { %4999 = vmatprep.mubr.bf16.mxu1 %v4784_v2  ;;  %5192 = vmatprep.mubr.bf16.mxu0 %v4784_v2  ;;  %v11680_v29 = vadd.f32 %v11359_v60, %v4663_v41  ;;  %v11690_v2 = vadd.f32 %v11349_v16, %v4662_v8  ;;  %v5835_v52 = vunpack.c.l.s8.bf16 %v5789_v0  ;;  %v5867_v34 = vunpack.c.l.s8.bf16 %v5805_v38 }
 0x87f   : > { %v4665_v55 = vmul.f32 %v11340_v25, %v4590_v6  ;;  %v4664_v28 = vmul.f32 %v11336_v4, %v4589_v57  ;;  %v5787_v6 = vld [vmem:[%s8276_s28 + $0x60] sm:$0xff] }
 0x880   : > { %5886 = vmatpush1.bf16.msra.mxu1 %v5807_v32  ;;  %6079 = vmatpush1.bf16.msra.mxu0 %v5839_v46  ;;  %v7970_v18 = vpop.eup %7969  ;;  %v5804_v46 = vld [vmem:[%s8276_s28 + $0xe8] sm:$0xff]  ;;  %v5803_v57 = vld [vmem:[%s8276_s28 + $0xe0] sm:$0xff] }
 0x881   : > { %5887 = vmatprep.subr.bf16.mxu1 %v5838_v14  ;;  %5000 = vmatmul.mubr.bf16.gmra.mxu1 %v4783_v48  ;;  %v11683_v63 = vadd.f32 %v11359_v60, %v4665_v55  ;;  %v11686_v24 = vadd.f32 %v11349_v16, %v4664_v28  ;;  %v4592_v32 = vmul.f32 %v7970_v18, %v11292_v39  ;;  %v5866_v8 = vunpack.c.h.s8.bf16 %v5804_v46 }
 0x882   : > { %5193 = vmatmul.mubr.bf16.gmra.mxu0 %v4783_v48  ;;  %6080 = vmatprep.subr.bf16.mxu0 %v5870_v22  ;;  %v4591_v42 = vmul.f32 %v7970_v18, %v11289_v45  ;;  %v5834_v48 = vunpack.c.h.s8.bf16 %v5788_v44  ;;  %v5832_v18 = vunpack.c.l.s8.bf16 %v5788_v44  ;;  %v5831_v44 = vunpack.c.l.s8.bf16 %v5787_v6 }
 0x883   : > { %v4786_v14 = vpack.c.bf16 %v11683_v63, %v11680_v29  ;;  %v4785_v39 = vpack.c.bf16 %v11686_v24, %v11690_v2  ;;  %v4667_v0 = vmul.f32 %v11340_v25, %v4592_v32  ;;  %v5786_v32 = vld [vmem:[%s8276_s28 + $0x58] sm:$0xff] }
 0x884   : > { %5888 = vmatpush2.bf16.msra.mxu1 %v5837_v53  ;;  %6081 = vmatpush2.bf16.msra.mxu0 %v5869_v31  ;;  %v7972_v41 = vpop.eup %7971  ;;  %v4666_v38 = vmul.f32 %v11336_v4, %v4591_v42  ;;  %v5833_v53 = vunpack.c.h.s8.bf16 %v5787_v6  ;;  %v5865_v31 = vunpack.c.h.s8.bf16 %v5803_v57 }
 0x885   : > { %5889 = vmatprep.subr.bf16.mxu1 %v5836_v30  ;;  %6082 = vmatprep.subr.bf16.mxu0 %v5868_v37  ;;  %v4594_v45 = vmul.f32 %v7972_v41, %v11302_v13  ;;  %v4593_v22 = vmul.f32 %v7972_v41, %v11299_v56  ;;  %v5864_v13 = vunpack.c.l.s8.bf16 %v5804_v46  ;;  %v11707_v56 = vadd.f32 %v11359_v60, %v4667_v0 }
 0x886   : > { %5009 = vmatprep.mubr.bf16.mxu1 %v4786_v14  ;;  %5202 = vmatprep.mubr.bf16.mxu0 %v4786_v14  ;;  %v11717_v42 = vadd.f32 %v11349_v16, %v4666_v38  ;;  %v5863_v14 = vunpack.c.l.s8.bf16 %v5803_v57  ;;  %v5800_v38 = vld [vmem:[%s8276_s28 + $0xc8] sm:$0xff] }
 0x887   : > { %v4669_v55 = vmul.f32 %v11340_v25, %v4594_v45  ;;  %v4668_v28 = vmul.f32 %v11336_v4, %v4593_v22  ;;  %v5828_v22 = vunpack.c.l.s8.bf16 %v5786_v32 }
 0x888   : > { %5890 = vmatpush2.bf16.msra.mxu1 %v5835_v52  ;;  %6083 = vmatpush2.bf16.msra.mxu0 %v5867_v34  ;;  %v5802_v52 = vld [vmem:[%s8276_s28 + $0xd8] sm:$0xff]  ;;  %v5830_v34 = vunpack.c.h.s8.bf16 %v5786_v32 }
 0x889   : > { %5891 = vmatprep.subr.bf16.mxu1 %v5834_v48  ;;  %5010 = vmatmul.mubr.bf16.gmra.mxu1 %v4785_v39  ;;  %v11710_v30 = vadd.f32 %v11359_v60, %v4669_v55  ;;  %v11713_v37 = vadd.f32 %v11349_v16, %v4668_v28  ;;  %v5785_v48 = vld [vmem:[%s8276_s28 + $0x50] sm:$0xff]  ;;  %v5862_v45 = vunpack.c.h.s8.bf16 %v5802_v52  ;;  %v5860_v57 = vunpack.c.l.s8.bf16 %v5802_v52 }
 0x88a   : > { %5203 = vmatmul.mubr.bf16.gmra.mxu0 %v4785_v39  ;;  %6084 = vmatprep.subr.bf16.mxu0 %v5866_v8  ;;  %v5801_v39 = vld [vmem:[%s8276_s28 + $0xd0] sm:$0xff]  ;;  %v5829_v6 = vunpack.c.h.s8.bf16 %v5785_v48  ;;  %v5784_v8 = vld [vmem:[%s8276_s28 + $0x48] sm:$0xff]  ;;  %v5856_v52 = vunpack.c.l.s8.bf16 %v5800_v38 }
 0x88b   : > { %v4788_v46 = vpack.c.bf16 %v11710_v30, %v11707_v56  ;;  %v4787_v41 = vpack.c.bf16 %v11713_v37, %v11717_v42  ;;  %v5861_v0 = vunpack.c.h.s8.bf16 %v5801_v39  ;;  %v5859_v55 = vunpack.c.l.s8.bf16 %v5801_v39 }
 0x88c   : > { %5892 = vmatpush2.bf16.msra.mxu1 %v5833_v53  ;;  %6085 = vmatpush2.bf16.msra.mxu0 %v5865_v31  ;;  %v5827_v53 = vunpack.c.l.s8.bf16 %v5785_v48  ;;  %v5826_v28 = vunpack.c.h.s8.bf16 %v5784_v8  ;;  %v5783_v31 = vld [vmem:[%s8276_s28 + $0x40] sm:$0xff] }
 0x88d   : > { %5893 = vmatprep.subr.bf16.mxu1 %v5832_v18  ;;  %6086 = vmatprep.subr.bf16.mxu0 %v5864_v13  ;;  %v5858_v18 = vunpack.c.h.s8.bf16 %v5800_v38  ;;  %v5799_v13 = vld [vmem:[%s8276_s28 + $0xc0] sm:$0xff] }
 0x88e   : > { %5019 = vmatprep.mubr.bf16.mxu1 %v4788_v46  ;;  %5212 = vmatprep.mubr.bf16.mxu0 %v4788_v46  ;;  %v5857_v32 = vunpack.c.h.s8.bf16 %v5799_v13  ;;  %v5824_v46 = vunpack.c.l.s8.bf16 %v5784_v8 }
 0x890   : > { %5894 = vmatpush2.bf16.msra.mxu1 %v5831_v44  ;;  %6087 = vmatpush2.bf16.msra.mxu0 %v5863_v14  ;;  %v5825_v44 = vunpack.c.h.s8.bf16 %v5783_v31  ;;  %v5823_v14 = vunpack.c.l.s8.bf16 %v5783_v31 }
 0x891   : > { %5895 = vmatprep.subr.bf16.mxu1 %v5830_v34  ;;  %5020 = vmatmul.mubr.bf16.gmra.mxu1 %v4787_v41  ;;  %v5855_v34 = vunpack.c.l.s8.bf16 %v5799_v13 }
 0x892   : > { %5213 = vmatmul.mubr.bf16.gmra.mxu0 %v4787_v41  ;;  %6088 = vmatprep.subr.bf16.mxu0 %v5862_v45 }
 0x894   : > { %5896 = vmatpush2.bf16.msra.mxu1 %v5829_v6  ;;  %6089 = vmatpush2.bf16.msra.mxu0 %v5861_v0 }
 0x895   : > { %5897 = vmatprep.subr.bf16.mxu1 %v5828_v22  ;;  %6090 = vmatprep.subr.bf16.mxu0 %v5860_v57 }
 0x898   : > { %5898 = vmatpush2.bf16.msra.mxu1 %v5827_v53  ;;  %6091 = vmatpush2.bf16.msra.mxu0 %v5859_v55 }
 0x899   : > { %5899 = vmatprep.subr.bf16.mxu1 %v5826_v28  ;;  %6092 = vmatprep.subr.bf16.mxu0 %v5858_v18 }
 0x89c   : > { %5900 = vmatpush2.bf16.msra.mxu1 %v5825_v44  ;;  %6093 = vmatpush2.bf16.msra.mxu0 %v5857_v32 }
 0x89d   : > { %5901 = vmatprep.subr.bf16.mxu1 %v5824_v46  ;;  %6094 = vmatprep.subr.bf16.mxu0 %v5856_v52 }
 0x8a0   : > { %5902 = vmatpush2.bf16.msra.mxu1 %v5823_v14  ;;  %6095 = vmatpush2.bf16.msra.mxu0 %v5855_v34 }
 0x8bb   : > { %v4425_v48 = vpop.xlane.xlu0 %4424 }
 0x8bc   : > { %v4479_v41 = vmul.f32 0.00390625, %v4425_v48 }
 0x8be   : > { %v4511_v39 = vadd.f32 1e-05, %v4479_v41 }
 0x8bf   : > { %v4428_v45 = vpop.xlane.xlu1 %4427 }
 0x8c0   : > { %7973 = vrsqrt.f32 %v4511_v39  ;;  %v4480_v6 = vmul.f32 0.00390625, %v4428_v45 }
 0x8c2   : > { %v4512_v0 = vadd.f32 1e-05, %v4480_v6 }
 0x8c4   : > { %7975 = vrsqrt.f32 %v4512_v0  ;;  %v4431_v22 = vpop.xlane.xlu0 %4430 }
 0x8c5   : > { %v4481_v57 = vmul.f32 0.00390625, %v4431_v22 }
 0x8c7   : > { %v4513_v8 = vadd.f32 1e-05, %v4481_v57 }
 0x8c9   : > { %7977 = vrsqrt.f32 %v4513_v8  ;;  %v4434_v38 = vpop.xlane.xlu1 %4433 }
 0x8ca   : > { %v4482_v53 = vmul.f32 0.00390625, %v4434_v38 }
 0x8cc   : > { %v4514_v55 = vadd.f32 1e-05, %v4482_v53  ;;  %v4437_v28 = vpop.xlane.xlu0 %4436  ;;  %v14108_v53 = vld [vmem:[#allocation42_spill] sm:$0xff] }
 0x8cd   : > { %v7974_v31 = vpop.eup %7973  ;;  %v4483_v18 = vmul.f32 0.00390625, %v4437_v28 }
 0x8ce   : > { %7979 = vrsqrt.f32 %v4514_v55  ;;  %v4596_v13 = vmul.f32 %v7974_v31, %v11312_v23  ;;  %v4595_v44 = vmul.f32 %v7974_v31, %v11309_v50 }
 0x8cf   : > { %v4515_v32 = vadd.f32 1e-05, %v4483_v18  ;;  %v14109_v18 = vld [vmem:[#allocation60_spill] sm:$0xff] }
 0x8d0   : > { %v4671_v14 = vmul.f32 %v11340_v25, %v4596_v13  ;;  %v4670_v39 = vmul.f32 %v11336_v4, %v4595_v44 }
 0x8d1   : > { %v7976_v46 = vpop.eup %7975  ;;  %7981 = vrsqrt.f32 %v4515_v32 }
 0x8d2   : > { %v4440_v52 = vpop.xlane.xlu1 %4439  ;;  %v4598_v48 = vmul.f32 %v7976_v46, %v11322_v12  ;;  %v4597_v41 = vmul.f32 %v7976_v46, %v11319_v7  ;;  %v11739_v22 = vadd.f32 %v11359_v60, %v4671_v14  ;;  %v11745_v12 = vadd.f32 %v11349_v16, %v4670_v39  ;;  %v14111_v39 = vld [vmem:[#allocation66_spill] sm:$0xff] }
 0x8d3   : > { %v4484_v34 = vmul.f32 0.00390625, %v4440_v52 }
 0x8d4   : > { %v4673_v0 = vmul.f32 %v11340_v25, %v4598_v48  ;;  %v4672_v23 = vmul.f32 %v11336_v4, %v4597_v41  ;;  %v14110_v48 = vld [vmem:[#allocation71_spill] sm:$0xff] }
 0x8d5   : > { %v4516_v45 = vadd.f32 1e-05, %v4484_v34  ;;  %v4443_v6 = vpop.xlane.xlu0 %4442 }
 0x8d6   : > { %v4485_v50 = vmul.f32 0.00390625, %v4443_v6  ;;  %v7978_v57 = vpop.eup %7977  ;;  %v11742_v8 = vadd.f32 %v11359_v60, %v4673_v0  ;;  %v11748_v7 = vadd.f32 %v11349_v16, %v4672_v23 }
 0x8d7   : > { %7983 = vrsqrt.f32 %v4516_v45  ;;  %v4600_v55 = vmul.f32 %v7978_v57, %v14108_v53  ;;  %v4599_v13 = vmul.f32 %v7978_v57, %v14109_v18 }
 0x8d8   : > { %v4517_v38 = vadd.f32 1e-05, %v4485_v50  ;;  %v4790_v28 = vpack.c.bf16 %v11742_v8, %v11739_v22  ;;  %v4789_v31 = vpack.c.bf16 %v11748_v7, %v11745_v12 }
 0x8d9   : > { %v4675_v52 = vmul.f32 %v11340_v25, %v4600_v55  ;;  %v4674_v6 = vmul.f32 %v11336_v4, %v4599_v13  ;;  %v14116_v13 = vld [vmem:[#allocation45_spill] sm:$0xff] }
 0x8da   : > { %7985 = vrsqrt.f32 %v4517_v38  ;;  %v4446_v44 = vpop.xlane.xlu1 %4445  ;;  %5029 = vmatprep.mubr.bf16.mxu1 %v4790_v28  ;;  %5222 = vmatprep.mubr.bf16.mxu0 %v4790_v28 }
 0x8db   : > { %v4486_v32 = vmul.f32 0.00390625, %v4446_v44  ;;  %v7980_v46 = vpop.eup %7979  ;;  %5030 = vmatmul.mubr.bf16.gmra.mxu1 %v4789_v31  ;;  %5223 = vmatmul.mubr.bf16.gmra.mxu0 %v4789_v31  ;;  %v11763_v53 = vadd.f32 %v11359_v60, %v4675_v52  ;;  %v11770_v31 = vadd.f32 %v11349_v16, %v4674_v6 }
 0x8dc   : > { %v4602_v41 = vmul.f32 %v7980_v46, %v14110_v48  ;;  %v4601_v45 = vmul.f32 %v7980_v46, %v14111_v39 }
 0x8dd   : > { %v4518_v14 = vadd.f32 1e-05, %v4486_v32  ;;  %v4449_v34 = vpop.xlane.xlu0 %4448  ;;  %14112 = vst [vmem:[#allocation51_spill] sm:$0xff] %v11763_v53  ;;  %14114 = vst [vmem:[#allocation84_spill] sm:$0xff] %v11770_v31 }
 0x8de   : > { %v4487_v0 = vmul.f32 0.00390625, %v4449_v34  ;;  %v7982_v23 = vpop.eup %7981  ;;  %v4677_v50 = vmul.f32 %v11340_v25, %v4602_v41  ;;  %v4676_v57 = vmul.f32 %v11336_v4, %v4601_v45 }
 0x8df   : > { %7987 = vrsqrt.f32 %v4518_v14  ;;  %v4604_v55 = vmul.f32 %v7982_v23, %v11372_v9  ;;  %v4603_v44 = vmul.f32 %v7982_v23, %v14116_v13  ;;  %v14118_v13 = vld [vmem:[#allocation49_spill] sm:$0xff] }
 0x8e0   : > { %v4519_v38 = vadd.f32 1e-05, %v4487_v0  ;;  %v11767_v28 = vadd.f32 %v11359_v60, %v4677_v50  ;;  %v11773_v18 = vadd.f32 %v11349_v16, %v4676_v57 }
 0x8e1   : > { %v4679_v34 = vmul.f32 %v11340_v25, %v4604_v55  ;;  %v4678_v6 = vmul.f32 %v11336_v4, %v4603_v44 }
 0x8e2   : > { %14113 = vst [vmem:[#allocation39_spill] sm:$0xff] %v11767_v28  ;;  %14115 = vst [vmem:[#allocation40_spill] sm:$0xff] %v11773_v18  ;;  %7989 = vrsqrt.f32 %v4519_v38  ;;  %v4452_v32 = vpop.xlane.xlu1 %4451  ;;  %v4792_v52 = vpack.c.bf16 %v11767_v28, %v11763_v53  ;;  %v4791_v9 = vpack.c.bf16 %v11773_v18, %v11770_v31 }
 0x8e3   : > { %v4488_v46 = vmul.f32 0.00390625, %v4452_v32  ;;  %v11787_v55 = vadd.f32 %v11359_v60, %v4679_v34 }
 0x8e4   : > { %v7984_v14 = vpop.eup %7983  ;;  %5039 = vmatprep.mubr.bf16.mxu1 %v4792_v52  ;;  %5232 = vmatprep.mubr.bf16.mxu0 %v4792_v52 }
 0x8e5   : > { %v4520_v48 = vadd.f32 1e-05, %v4488_v46  ;;  %v4455_v41 = vpop.xlane.xlu0 %4454  ;;  %v4606_v39 = vmul.f32 %v7984_v14, %v11398_v17  ;;  %v4605_v45 = vmul.f32 %v7984_v14, %v11395_v36  ;;  %5040 = vmatmul.mubr.bf16.gmra.mxu1 %v4791_v9  ;;  %5233 = vmatmul.mubr.bf16.gmra.mxu0 %v4791_v9  ;;  %14117 = vst [vmem:[#allocation54_spill] sm:$0xff] %v11787_v55  ;;  %v14122_v46 = vld [vmem:[#allocation75_spill] sm:$0xff] }
 0x8e6   : > { %v4489_v0 = vmul.f32 0.00390625, %v4455_v41  ;;  %v11794_v36 = vadd.f32 %v11349_v16, %v4678_v6 }
 0x8e7   : > { %v7986_v23 = vpop.eup %7985  ;;  %7991 = vrsqrt.f32 %v4520_v48  ;;  %v4681_v50 = vmul.f32 %v11340_v25, %v4606_v39  ;;  %v4680_v57 = vmul.f32 %v11336_v4, %v4605_v45 }
 0x8e8   : > { %v4521_v38 = vadd.f32 1e-05, %v4489_v0  ;;  %v4608_v32 = vmul.f32 %v7986_v23, %v14118_v13  ;;  %14120 = vst [vmem:[#allocation43_spill] sm:$0xff] %v11794_v36  ;;  %v4607_v52 = vmul.f32 %v7986_v23, %v14122_v46 }
 0x8e9   : > { %v11791_v17 = vadd.f32 %v11359_v60, %v4681_v50  ;;  %v11797_v44 = vadd.f32 %v11349_v16, %v4680_v57 }
 0x8ea   : > { %7993 = vrsqrt.f32 %v4521_v38  ;;  %v4683_v39 = vmul.f32 %v11340_v25, %v4608_v32  ;;  %v4682_v0 = vmul.f32 %v11336_v4, %v4607_v52  ;;  %v14127_v52 = vld [vmem:[#allocation73_spill] sm:$0xff] }
 0x8eb   : > { %14119 = vst [vmem:[#allocation85_spill] sm:$0xff] %v11791_v17  ;;  %14121 = vst [vmem:[#allocation44_spill] sm:$0xff] %v11797_v44  ;;  %v4458_v9 = vpop.xlane.xlu1 %4457  ;;  %v4794_v14 = vpack.c.bf16 %v11791_v17, %v11787_v55  ;;  %v4793_v34 = vpack.c.bf16 %v11797_v44, %v11794_v36 }
 0x8ec   : > { %v7988_v48 = vpop.eup %7987  ;;  %v4490_v41 = vmul.f32 0.00390625, %v4458_v9  ;;  %v11811_v13 = vadd.f32 %v11359_v60, %v4683_v39 }
 0x8ed   : > { %5049 = vmatprep.mubr.bf16.mxu1 %v4794_v14  ;;  %5242 = vmatprep.mubr.bf16.mxu0 %v4794_v14  ;;  %v4610_v45 = vmul.f32 %v7988_v48, %v11436_v43  ;;  %v4609_v6 = vmul.f32 %v7988_v48, %v11433_v10  ;;  %v11818_v10 = vadd.f32 %v11349_v16, %v4682_v0 }
 0x8ee   : > { %v4522_v23 = vadd.f32 1e-05, %v4490_v41  ;;  %5050 = vmatmul.mubr.bf16.gmra.mxu1 %v4793_v34  ;;  %5243 = vmatmul.mubr.bf16.gmra.mxu0 %v4793_v34  ;;  %14123 = vst [vmem:[#allocation47_spill] sm:$0xff] %v11811_v13 }
 0x8ef   : > { %v7990_v50 = vpop.eup %7989  ;;  %v4685_v57 = vmul.f32 %v11340_v25, %v4610_v45  ;;  %v4684_v38 = vmul.f32 %v11336_v4, %v4609_v6  ;;  %14125 = vst [vmem:[#allocation50_spill] sm:$0xff] %v11818_v10 }
 0x8f0   : > { %7995 = vrsqrt.f32 %v4522_v23  ;;  %v4612_v32 = vmul.f32 %v7990_v50, %v11457_v40  ;;  %v4611_v9 = vmul.f32 %v7990_v50, %v14127_v52 }
 0x8f1   : > { %v11815_v43 = vadd.f32 %v11359_v60, %v4685_v57  ;;  %v11821_v46 = vadd.f32 %v11349_v16, %v4684_v38 }
 0x8f2   : > { %v4687_v40 = vmul.f32 %v11340_v25, %v4612_v32  ;;  %v4686_v45 = vmul.f32 %v11336_v4, %v4611_v9  ;;  %v14132_v32 = vld [vmem:[#allocation76_spill] sm:$0xff] }
 0x8f3   : > { %14124 = vst [vmem:[#allocation48_spill] sm:$0xff] %v11815_v43  ;;  %14126 = vst [vmem:[#allocation28_spill] sm:$0xff] %v11821_v46  ;;  %v4796_v14 = vpack.c.bf16 %v11815_v43, %v11811_v13  ;;  %v4795_v34 = vpack.c.bf16 %v11821_v46, %v11818_v10 }
 0x8f4   : > { %v7992_v48 = vpop.eup %7991  ;;  %v11835_v50 = vadd.f32 %v11359_v60, %v4687_v40  ;;  %v11841_v38 = vadd.f32 %v11349_v16, %v4686_v45 }
 0x8f5   : > { %5059 = vmatprep.mubr.bf16.mxu1 %v4796_v14  ;;  %5252 = vmatprep.mubr.bf16.mxu0 %v4796_v14  ;;  %v4614_v41 = vmul.f32 %v7992_v48, %v11477_v21  ;;  %v4613_v39 = vmul.f32 %v7992_v48, %v11474_v26 }
 0x8f6   : > { %5060 = vmatmul.mubr.bf16.gmra.mxu1 %v4795_v34  ;;  %5253 = vmatmul.mubr.bf16.gmra.mxu0 %v4795_v34  ;;  %14128 = vst [vmem:[#allocation29_spill] sm:$0xff] %v11835_v50  ;;  %14130 = vst [vmem:[#allocation31_spill] sm:$0xff] %v11841_v38 }
 0x8f7   : > { %v7994_v6 = vpop.eup %7993  ;;  %v4689_v0 = vmul.f32 %v11340_v25, %v4614_v41  ;;  %v4688_v23 = vmul.f32 %v11336_v4, %v4613_v39 }
 0x8f8   : > { %v4616_v21 = vmul.f32 %v7994_v6, %v11499_v15  ;;  %v4615_v52 = vmul.f32 %v7994_v6, %v14132_v32 }
 0x8f9   : > { %v11838_v57 = vadd.f32 %v11359_v60, %v4689_v0  ;;  %v11844_v26 = vadd.f32 %v11349_v16, %v4688_v23 }
 0x8fa   : > { %v4691_v48 = vmul.f32 %v11340_v25, %v4616_v21  ;;  %v4690_v41 = vmul.f32 %v11336_v4, %v4615_v52 }
 0x8fb   : > { %14129 = vst [vmem:[#allocation30_spill] sm:$0xff] %v11838_v57  ;;  %14131 = vst [vmem:[#allocation91_spill] sm:$0xff] %v11844_v26  ;;  %v4798_v9 = vpack.c.bf16 %v11838_v57, %v11835_v50  ;;  %v4797_v14 = vpack.c.bf16 %v11844_v26, %v11841_v38 }
 0x8fc   : > { %v11859_v6 = vadd.f32 %v11359_v60, %v4691_v48  ;;  %v11865_v23 = vadd.f32 %v11349_v16, %v4690_v41  ;;  %v14140_v48 = vld [vmem:[#allocation86_spill] sm:$0xff] }
 0x8fd   : > { %v7996_v34 = vpop.eup %7995  ;;  %5069 = vmatprep.mubr.bf16.mxu1 %v4798_v9  ;;  %5262 = vmatprep.mubr.bf16.mxu0 %v4798_v9  ;;  %v14138_v9 = vld [vmem:[#allocation90_spill] sm:$0xff] }
 0x8fe   : > { %5070 = vmatmul.mubr.bf16.gmra.mxu1 %v4797_v14  ;;  %5263 = vmatmul.mubr.bf16.gmra.mxu0 %v4797_v14  ;;  %v4618_v40 = vmul.f32 %v7996_v34, %v11520_v3  ;;  %v4617_v15 = vmul.f32 %v7996_v34, %v11517_v54  ;;  %14133 = vst [vmem:[#allocation34_spill] sm:$0xff] %v11859_v6  ;;  %14135 = vst [vmem:[#allocation96_spill] sm:$0xff] %v11865_v23 }
 0x900   : > { %v4693_v39 = vmul.f32 %v11340_v25, %v4618_v40  ;;  %v4692_v45 = vmul.f32 %v11336_v4, %v4617_v15  ;;  %v5283_v4 = vld [vmem:[%s8266_s15] sm:$0xf] }
 0x901   : > { %v11879_v14 = vrot.slane %v5283_v4, %v14138_v9  ;;  %v11885_v40 = vrot.slane %v5283_v4, %v14140_v48  ;;  %v5433_v15 = vld [vmem:[%s8271_s25] sm:$0xf] }
 0x902   : > { %v11862_v0 = vadd.f32 %v11359_v60, %v4693_v39  ;;  %v11868_v3 = vadd.f32 %v11349_v16, %v4692_v45  ;;  %v14137_v60 = vld [vmem:[#allocation78_spill] sm:$0xff]  ;;  %v14139_v16 = vld [vmem:[#allocation52_spill] sm:$0xff]  ;;  %v11902_v26 = vrot.slane %v5433_v15, %v14140_v48 }
 0x903   : > { %v11876_v52 = vrot.slane %v5283_v4, %v14137_v60  ;;  %v11882_v34 = vrot.slane %v5283_v4, %v14139_v16  ;;  %v11898_v4 = vrot.slane %v5433_v15, %v14139_v16 }
 0x904   : > { %14134 = vst [vmem:[#allocation32_spill] sm:$0xff] %v11862_v0  ;;  %14136 = vst [vmem:[#allocation55_spill] sm:$0xff] %v11868_v3  ;;  %v4800_v54 = vpack.c.bf16 %v11862_v0, %v11859_v6  ;;  %v4799_v25 = vpack.c.bf16 %v11868_v3, %v11865_v23  ;;  %v11894_v3 = vrot.slane %v5433_v15, %v14138_v9 }
 0x906   : > { %5079 = vmatprep.mubr.bf16.mxu1 %v4800_v54  ;;  %5272 = vmatprep.mubr.bf16.mxu0 %v4800_v54  ;;  %v4931_v21 = vpop.f32.mrf.mxu1  ;;  %v5124_v32 = vpop.f32.mrf.mxu0  ;;  %v11890_v54 = vrot.slane %v5433_v15, %v14137_v60 }
 0x907   : > { %5080 = vmatmul.mubr.bf16.gmra.mxu1 %v4799_v25  ;;  %5273 = vmatmul.mubr.bf16.gmra.mxu0 %v4799_v25  ;;  %v5305_v23 = vmul.f32 %v11882_v34, %v4931_v21  ;;  %v5307_v57 = vmul.f32 %v11885_v40, %v5124_v32 }
 0x908   : > { %v4933_v41 = vpop.f32.mrf.mxu1  ;;  %v5126_v39 = vpop.f32.mrf.mxu0 }
 0x909   : > { %v5306_v45 = vmul.f32 %v11876_v52, %v4933_v41  ;;  %v5308_v0 = vmul.f32 %v11879_v14, %v5126_v39  ;;  %v5455_v48 = vadd.f32 %v11898_v4, %v5305_v23  ;;  %v5457_v15 = vadd.f32 %v11902_v26, %v5307_v57 }
 0x90a   : > { %v4935_v25 = vpop.f32.mrf.mxu1  ;;  %v5128_v6 = vpop.f32.mrf.mxu0 }
 0x90b   : > { %v5309_v41 = vmul.f32 %v11882_v34, %v4935_v25  ;;  %v5311_v50 = vmul.f32 %v11885_v40, %v5128_v6  ;;  %v5456_v21 = vadd.f32 %v11890_v54, %v5306_v45  ;;  %v5458_v46 = vadd.f32 %v11894_v3, %v5308_v0 }
 0x90c   : > { %v4937_v39 = vpop.f32.mrf.mxu1  ;;  %v5130_v38 = vpop.f32.mrf.mxu0  ;;  %v5583_v28 = vmax.f32 %v5455_v48, 0.0  ;;  %v5585_v57 = vmax.f32 %v5457_v15, 0.0 }
 0x90d   : > { %v5310_v9 = vmul.f32 %v11876_v52, %v4937_v39  ;;  %v5312_v43 = vmul.f32 %v11879_v14, %v5130_v38  ;;  %v5459_v13 = vadd.f32 %v11898_v4, %v5309_v41  ;;  %v5461_v32 = vadd.f32 %v11902_v26, %v5311_v50 }
 0x90e   : > { %v5584_v55 = vmax.f32 %v5456_v21, 0.0  ;;  %v5586_v50 = vmax.f32 %v5458_v46, 0.0 }
 0x90f   : > { %v5460_v6 = vadd.f32 %v11890_v54, %v5310_v9  ;;  %v5462_v25 = vadd.f32 %v11894_v3, %v5312_v43  ;;  %v5587_v10 = vmax.f32 %v5459_v13, 0.0  ;;  %v5589_v39 = vmax.f32 %v5461_v32, 0.0  ;;  %v4941_v17 = vpop.f32.mrf.mxu1  ;;  %v5134_v38 = vpop.f32.mrf.mxu0 }
 0x910   : > { %v5313_v0 = vmul.f32 %v11882_v34, %v4941_v17  ;;  %v5315_v41 = vmul.f32 %v11885_v40, %v5134_v38 }
 0x911   : > { %v5588_v44 = vmax.f32 %v5460_v6, 0.0  ;;  %v5590_v45 = vmax.f32 %v5462_v25, 0.0  ;;  %v4943_v36 = vpop.f32.mrf.mxu1  ;;  %v5136_v23 = vpop.f32.mrf.mxu0  ;;  %v5711_v6 = vpack.c.bf16 %v5587_v10, %v5583_v28  ;;  %v5713_v25 = vpack.c.bf16 %v5589_v39, %v5585_v57 }
 0x912   : > { %v5314_v9 = vmul.f32 %v11876_v52, %v4943_v36  ;;  %v5316_v43 = vmul.f32 %v11879_v14, %v5136_v23  ;;  %v5463_v17 = vadd.f32 %v11898_v4, %v5313_v0  ;;  %v5465_v38 = vadd.f32 %v11902_v26, %v5315_v41 }
 0x913   : > { %v4945_v13 = vpop.f32.mrf.mxu1  ;;  %v5138_v32 = vpop.f32.mrf.mxu0  ;;  %v5712_v18 = vpack.c.bf16 %v5588_v44, %v5584_v55  ;;  %v5714_v53 = vpack.c.bf16 %v5590_v45, %v5586_v50 }
 0x914   : > { %v5464_v46 = vadd.f32 %v11890_v54, %v5314_v9  ;;  %v5317_v21 = vmul.f32 %v11882_v34, %v4945_v13  ;;  %v5319_v48 = vmul.f32 %v11885_v40, %v5138_v32  ;;  %v5466_v23 = vadd.f32 %v11894_v3, %v5316_v43 }
 0x915   : > { %v4947_v15 = vpop.f32.mrf.mxu1  ;;  %v5140_v36 = vpop.f32.mrf.mxu0  ;;  %5903 = vmatprep.mubr.bf16.mxu1 %v5712_v18  ;;  %6096 = vmatprep.mubr.bf16.mxu0 %v5714_v53  ;;  %v5591_v18 = vmax.f32 %v5463_v17, 0.0  ;;  %v5593_v53 = vmax.f32 %v5465_v38, 0.0 }
 0x916   : > { %v5318_v55 = vmul.f32 %v11876_v52, %v4947_v15  ;;  %v5320_v28 = vmul.f32 %v11879_v14, %v5140_v36  ;;  %5904 = vmatmul.mubr.bf16.vlgmr.msra.gmra.mxu1 %v5711_v6  ;;  %6097 = vmatmul.mubr.bf16.vlgmr.msra.gmra.mxu0 %v5713_v25  ;;  %v5467_v44 = vadd.f32 %v11898_v4, %v5317_v21  ;;  %v5592_v13 = vmax.f32 %v5464_v46, 0.0 }
 0x917   : > { %v5469_v10 = vadd.f32 %v11902_v26, %v5319_v48  ;;  %v5594_v32 = vmax.f32 %v5466_v23, 0.0 }
 0x918   : > { %v4951_v39 = vpop.f32.mrf.mxu1  ;;  %v5144_v45 = vpop.f32.mrf.mxu0  ;;  %v5468_v0 = vadd.f32 %v11890_v54, %v5318_v55  ;;  %v5470_v41 = vadd.f32 %v11894_v3, %v5320_v28  ;;  %v5595_v50 = vmax.f32 %v5467_v44, 0.0 }
 0x919   : > { %v5597_v57 = vmax.f32 %v5469_v10, 0.0  ;;  %v5321_v21 = vmul.f32 %v11882_v34, %v4951_v39  ;;  %v5323_v48 = vmul.f32 %v11885_v40, %v5144_v45 }
 0x91a   : > { %v4953_v9 = vpop.f32.mrf.mxu1  ;;  %v5146_v43 = vpop.f32.mrf.mxu0  ;;  %v5596_v6 = vmax.f32 %v5468_v0, 0.0  ;;  %v5598_v25 = vmax.f32 %v5470_v41, 0.0  ;;  %v5715_v17 = vpack.c.bf16 %v5595_v50, %v5591_v18 }
 0x91b   : > { %v5322_v15 = vmul.f32 %v11876_v52, %v4953_v9  ;;  %v5324_v36 = vmul.f32 %v11879_v14, %v5146_v43  ;;  %v5717_v38 = vpack.c.bf16 %v5597_v57, %v5593_v53  ;;  %v5471_v53 = vadd.f32 %v11898_v4, %v5321_v21 }
 0x91c   : > { %v4955_v55 = vpop.f32.mrf.mxu1  ;;  %v5148_v28 = vpop.f32.mrf.mxu0  ;;  %v5716_v41 = vpack.c.bf16 %v5596_v6, %v5592_v13  ;;  %v5718_v45 = vpack.c.bf16 %v5598_v25, %v5594_v32  ;;  %v5473_v50 = vadd.f32 %v11902_v26, %v5323_v48 }
 0x91d   : > { %v5325_v44 = vmul.f32 %v11882_v34, %v4955_v55  ;;  %v5327_v10 = vmul.f32 %v11885_v40, %v5148_v28  ;;  %v5472_v46 = vadd.f32 %v11890_v54, %v5322_v15  ;;  %v5474_v23 = vadd.f32 %v11894_v3, %v5324_v36 }
 0x91e   : > { %v4957_v0 = vpop.f32.mrf.mxu1  ;;  %v5150_v39 = vpop.f32.mrf.mxu0  ;;  %5913 = vmatprep.mubr.bf16.mxu1 %v5716_v41  ;;  %6106 = vmatprep.mubr.bf16.mxu0 %v5718_v45 }
 0x91f   : > { %v5475_v9 = vadd.f32 %v11898_v4, %v5325_v44  ;;  %v5477_v43 = vadd.f32 %v11902_v26, %v5327_v10  ;;  %v5326_v31 = vmul.f32 %v11876_v52, %v4957_v0  ;;  %v5328_v18 = vmul.f32 %v11879_v14, %v5150_v39  ;;  %5914 = vmatmul.mubr.bf16.gmra.mxu1 %v5715_v17 }
 0x920   : > { %6107 = vmatmul.mubr.bf16.gmra.mxu0 %v5717_v38  ;;  %v5600_v6 = vmax.f32 %v5472_v46, 0.0  ;;  %v5602_v28 = vmax.f32 %v5474_v23, 0.0  ;;  %v5599_v39 = vmax.f32 %v5471_v53, 0.0 }
 0x921   : > { %v5476_v57 = vadd.f32 %v11890_v54, %v5326_v31  ;;  %v5478_v15 = vadd.f32 %v11894_v3, %v5328_v18  ;;  %v4961_v13 = vpop.f32.mrf.mxu1  ;;  %v5154_v32 = vpop.f32.mrf.mxu0  ;;  %v5603_v25 = vmax.f32 %v5475_v9, 0.0  ;;  %v5605_v36 = vmax.f32 %v5477_v43, 0.0 }
 0x922   : > { %v5329_v55 = vmul.f32 %v11882_v34, %v4961_v13  ;;  %v5331_v48 = vmul.f32 %v11885_v40, %v5154_v32  ;;  %v5601_v31 = vmax.f32 %v5473_v50, 0.0 }
 0x923   : > { %v5604_v44 = vmax.f32 %v5476_v57, 0.0  ;;  %v5606_v21 = vmax.f32 %v5478_v15, 0.0  ;;  %v4963_v10 = vpop.f32.mrf.mxu1  ;;  %v5156_v0 = vpop.f32.mrf.mxu0  ;;  %v5719_v43 = vpack.c.bf16 %v5603_v25, %v5599_v39 }
 0x924   : > { %v5330_v41 = vmul.f32 %v11876_v52, %v4963_v10  ;;  %v5332_v45 = vmul.f32 %v11879_v14, %v5156_v0  ;;  %v5721_v18 = vpack.c.bf16 %v5605_v36, %v5601_v31  ;;  %v5479_v23 = vadd.f32 %v11898_v4, %v5329_v55 }
 0x925   : > { %v4965_v17 = vpop.f32.mrf.mxu1  ;;  %v5158_v38 = vpop.f32.mrf.mxu0  ;;  %v5720_v46 = vpack.c.bf16 %v5604_v44, %v5600_v6  ;;  %v5722_v9 = vpack.c.bf16 %v5606_v21, %v5602_v28  ;;  %v5481_v57 = vadd.f32 %v11902_v26, %v5331_v48 }
 0x926   : > { %v5333_v15 = vmul.f32 %v11882_v34, %v4965_v17  ;;  %v5335_v13 = vmul.f32 %v11885_v40, %v5158_v38  ;;  %v5480_v32 = vadd.f32 %v11890_v54, %v5330_v41  ;;  %v5482_v10 = vadd.f32 %v11894_v3, %v5332_v45 }
 0x927   : > { %v4967_v53 = vpop.f32.mrf.mxu1  ;;  %v5160_v50 = vpop.f32.mrf.mxu0  ;;  %5923 = vmatprep.mubr.bf16.mxu1 %v5720_v46  ;;  %6116 = vmatprep.mubr.bf16.mxu0 %v5722_v9  ;;  %v5607_v31 = vmax.f32 %v5479_v23, 0.0  ;;  %v5609_v41 = vmax.f32 %v5481_v57, 0.0 }
 0x928   : > { %v5334_v6 = vmul.f32 %v11876_v52, %v4967_v53  ;;  %v5336_v25 = vmul.f32 %v11879_v14, %v5160_v50  ;;  %v5483_v36 = vadd.f32 %v11898_v4, %v5333_v15  ;;  %v5485_v55 = vadd.f32 %v11902_v26, %v5335_v13  ;;  %5924 = vmatmul.mubr.bf16.gmra.mxu1 %v5719_v43 }
 0x929   : > { %v4971_v28 = vpop.f32.mrf.mxu1  ;;  %6117 = vmatmul.mubr.bf16.gmra.mxu0 %v5721_v18  ;;  %v5608_v9 = vmax.f32 %v5480_v32, 0.0  ;;  %v5610_v15 = vmax.f32 %v5482_v10, 0.0 }
 0x92a   : > { %v5164_v44 = vpop.f32.mrf.mxu0  ;;  %v5484_v21 = vadd.f32 %v11890_v54, %v5334_v6  ;;  %v5486_v48 = vadd.f32 %v11894_v3, %v5336_v25  ;;  %v5337_v0 = vmul.f32 %v11882_v34, %v4971_v28  ;;  %v5611_v45 = vmax.f32 %v5483_v36, 0.0 }
 0x92b   : > { %v5339_v39 = vmul.f32 %v11885_v40, %v5164_v44  ;;  %v5613_v17 = vmax.f32 %v5485_v55, 0.0  ;;  %v4973_v38 = vpop.f32.mrf.mxu1 }
 0x92c   : > { %v5166_v46 = vpop.f32.mrf.mxu0  ;;  %v5612_v13 = vmax.f32 %v5484_v21, 0.0  ;;  %v5614_v53 = vmax.f32 %v5486_v48, 0.0  ;;  %v5487_v43 = vadd.f32 %v11898_v4, %v5337_v0  ;;  %v5338_v50 = vmul.f32 %v11876_v52, %v4973_v38 }
 0x92d   : > { %v5489_v18 = vadd.f32 %v11902_v26, %v5339_v39  ;;  %v5340_v6 = vmul.f32 %v11879_v14, %v5166_v46  ;;  %v4975_v25 = vpop.f32.mrf.mxu1  ;;  %v5723_v23 = vpack.c.bf16 %v5611_v45, %v5607_v31  ;;  %v5725_v57 = vpack.c.bf16 %v5613_v17, %v5609_v41 }
 0x92e   : > { %v5168_v28 = vpop.f32.mrf.mxu0  ;;  %v5341_v36 = vmul.f32 %v11882_v34, %v4975_v25  ;;  %v5488_v32 = vadd.f32 %v11890_v54, %v5338_v50  ;;  %v5724_v48 = vpack.c.bf16 %v5612_v13, %v5608_v9  ;;  %v5726_v0 = vpack.c.bf16 %v5614_v53, %v5610_v15 }
 0x92f   : > { %v5343_v55 = vmul.f32 %v11885_v40, %v5168_v28  ;;  %v5490_v10 = vadd.f32 %v11894_v3, %v5340_v6  ;;  %v4977_v44 = vpop.f32.mrf.mxu1  ;;  %v5615_v9 = vmax.f32 %v5487_v43, 0.0  ;;  %v5617_v15 = vmax.f32 %v5489_v18, 0.0 }
 0x930   : > { %v5170_v21 = vpop.f32.mrf.mxu0  ;;  %v5491_v39 = vadd.f32 %v11898_v4, %v5341_v36  ;;  %v5342_v46 = vmul.f32 %v11876_v52, %v4977_v44  ;;  %5933 = vmatprep.mubr.bf16.mxu1 %v5724_v48  ;;  %6126 = vmatprep.mubr.bf16.mxu0 %v5726_v0 }
 0x931   : > { %v5493_v38 = vadd.f32 %v11902_v26, %v5343_v55  ;;  %v5344_v31 = vmul.f32 %v11879_v14, %v5170_v21  ;;  %v4981_v41 = vpop.f32.mrf.mxu1  ;;  %5934 = vmatmul.mubr.bf16.gmra.mxu1 %v5723_v23  ;;  %6127 = vmatmul.mubr.bf16.gmra.mxu0 %v5725_v57  ;;  %v5616_v55 = vmax.f32 %v5488_v32, 0.0  ;;  %v5618_v44 = vmax.f32 %v5490_v10, 0.0 }
 0x932   : > { %v5174_v45 = vpop.f32.mrf.mxu0  ;;  %v5619_v17 = vmax.f32 %v5491_v39, 0.0  ;;  %v5492_v6 = vadd.f32 %v11890_v54, %v5342_v46  ;;  %v5345_v13 = vmul.f32 %v11882_v34, %v4981_v41 }
 0x933   : > { %v5621_v50 = vmax.f32 %v5493_v38, 0.0  ;;  %v5494_v25 = vadd.f32 %v11894_v3, %v5344_v31  ;;  %v5347_v53 = vmul.f32 %v11885_v40, %v5174_v45  ;;  %v4983_v28 = vpop.f32.mrf.mxu1 }
 0x934   : > { %v5176_v36 = vpop.f32.mrf.mxu0  ;;  %v5620_v21 = vmax.f32 %v5492_v6, 0.0  ;;  %v5727_v0 = vpack.c.bf16 %v5619_v17, %v5615_v9  ;;  %v5346_v38 = vmul.f32 %v11876_v52, %v4983_v28  ;;  %v5495_v45 = vadd.f32 %v11898_v4, %v5345_v13 }
 0x935   : > { %v5622_v48 = vmax.f32 %v5494_v25, 0.0  ;;  %v5729_v39 = vpack.c.bf16 %v5621_v50, %v5617_v15  ;;  %v5348_v46 = vmul.f32 %v11879_v14, %v5176_v36  ;;  %v4985_v23 = vpop.f32.mrf.mxu1  ;;  %v5497_v32 = vadd.f32 %v11902_v26, %v5347_v53 }
 0x936   : > { %v5178_v57 = vpop.f32.mrf.mxu0  ;;  %v5349_v43 = vmul.f32 %v11882_v34, %v4985_v23  ;;  %v5728_v31 = vpack.c.bf16 %v5620_v21, %v5616_v55  ;;  %v5496_v10 = vadd.f32 %v11890_v54, %v5346_v38 }
 0x937   : > { %v5351_v18 = vmul.f32 %v11885_v40, %v5178_v57  ;;  %v5730_v41 = vpack.c.bf16 %v5622_v48, %v5618_v44  ;;  %v5498_v17 = vadd.f32 %v11894_v3, %v5348_v46  ;;  %v4987_v50 = vpop.f32.mrf.mxu1  ;;  %v5623_v48 = vmax.f32 %v5495_v45, 0.0 }
 0x938   : > { %v5180_v6 = vpop.f32.mrf.mxu0  ;;  %v5499_v25 = vadd.f32 %v11898_v4, %v5349_v43  ;;  %v5350_v15 = vmul.f32 %v11876_v52, %v4987_v50  ;;  %5943 = vmatprep.mubr.bf16.mxu1 %v5728_v31  ;;  %v5625_v38 = vmax.f32 %v5497_v32, 0.0 }
 0x939   : > { %v5501_v9 = vadd.f32 %v11902_v26, %v5351_v18  ;;  %v5352_v28 = vmul.f32 %v11879_v14, %v5180_v6  ;;  %6136 = vmatprep.mubr.bf16.mxu0 %v5730_v41  ;;  %v4991_v36 = vpop.f32.mrf.mxu1  ;;  %5944 = vmatmul.mubr.bf16.gmra.mxu1 %v5727_v0  ;;  %v5624_v18 = vmax.f32 %v5496_v10, 0.0  ;;  %v5626_v31 = vmax.f32 %v5498_v17, 0.0 }
 0x93a   : > { %v5184_v13 = vpop.f32.mrf.mxu0  ;;  %v5627_v55 = vmax.f32 %v5499_v25, 0.0  ;;  %v5500_v44 = vadd.f32 %v11890_v54, %v5350_v15  ;;  %6137 = vmatmul.mubr.bf16.gmra.mxu0 %v5729_v39  ;;  %v5353_v46 = vmul.f32 %v11882_v34, %v4991_v36 }
 0x93b   : > { %v5629_v53 = vmax.f32 %v5501_v9, 0.0  ;;  %v5502_v21 = vadd.f32 %v11894_v3, %v5352_v28  ;;  %v5355_v23 = vmul.f32 %v11885_v40, %v5184_v13  ;;  %v4993_v57 = vpop.f32.mrf.mxu1 }
 0x93c   : > { %v5186_v43 = vpop.f32.mrf.mxu0  ;;  %v5628_v41 = vmax.f32 %v5500_v44, 0.0  ;;  %v5731_v6 = vpack.c.bf16 %v5627_v55, %v5623_v48  ;;  %v5354_v9 = vmul.f32 %v11876_v52, %v4993_v57  ;;  %v5503_v13 = vadd.f32 %v11898_v4, %v5353_v46 }
 0x93d   : > { %v5630_v50 = vmax.f32 %v5502_v21, 0.0  ;;  %v5733_v25 = vpack.c.bf16 %v5629_v53, %v5625_v38  ;;  %v5356_v15 = vmul.f32 %v11879_v14, %v5186_v43  ;;  %v4995_v0 = vpop.f32.mrf.mxu1  ;;  %v5505_v10 = vadd.f32 %v11902_v26, %v5355_v23 }
 0x93e   : > { %v5188_v39 = vpop.f32.mrf.mxu0  ;;  %v5357_v45 = vmul.f32 %v11882_v34, %v4995_v0  ;;  %v5732_v28 = vpack.c.bf16 %v5628_v41, %v5624_v18  ;;  %v5504_v17 = vadd.f32 %v11890_v54, %v5354_v9 }
 0x93f   : > { %v5359_v32 = vmul.f32 %v11885_v40, %v5188_v39  ;;  %v5734_v36 = vpack.c.bf16 %v5630_v50, %v5626_v31  ;;  %v5506_v55 = vadd.f32 %v11894_v3, %v5356_v15  ;;  %v4997_v53 = vpop.f32.mrf.mxu1  ;;  %v5631_v50 = vmax.f32 %v5503_v13, 0.0 }
 0x940   : > { %v5190_v44 = vpop.f32.mrf.mxu0  ;;  %v5507_v21 = vadd.f32 %v11898_v4, %v5357_v45  ;;  %v5358_v38 = vmul.f32 %v11876_v52, %v4997_v53  ;;  %5953 = vmatprep.mubr.bf16.mxu1 %v5732_v28  ;;  %v5633_v9 = vmax.f32 %v5505_v10, 0.0 }
 0x941   : > { %v5509_v48 = vadd.f32 %v11902_v26, %v5359_v32  ;;  %v5360_v57 = vmul.f32 %v11879_v14, %v5190_v44  ;;  %6146 = vmatprep.mubr.bf16.mxu0 %v5734_v36  ;;  %v5001_v43 = vpop.f32.mrf.mxu1  ;;  %5954 = vmatmul.mubr.bf16.gmra.mxu1 %v5731_v6  ;;  %v5632_v32 = vmax.f32 %v5504_v17, 0.0  ;;  %v5634_v28 = vmax.f32 %v5506_v55, 0.0 }
 0x942   : > { %v5194_v46 = vpop.f32.mrf.mxu0  ;;  %v5635_v18 = vmax.f32 %v5507_v21, 0.0  ;;  %v5508_v31 = vadd.f32 %v11890_v54, %v5358_v38  ;;  %6147 = vmatmul.mubr.bf16.gmra.mxu0 %v5733_v25  ;;  %v5361_v15 = vmul.f32 %v11882_v34, %v5001_v43 }
 0x943   : > { %v5637_v23 = vmax.f32 %v5509_v48, 0.0  ;;  %v5510_v41 = vadd.f32 %v11894_v3, %v5360_v57  ;;  %v5363_v0 = vmul.f32 %v11885_v40, %v5194_v46  ;;  %v5003_v39 = vpop.f32.mrf.mxu1 }
 0x944   : > { %v5196_v45 = vpop.f32.mrf.mxu0  ;;  %v5636_v36 = vmax.f32 %v5508_v31, 0.0  ;;  %v5735_v44 = vpack.c.bf16 %v5635_v18, %v5631_v50  ;;  %v5362_v48 = vmul.f32 %v11876_v52, %v5003_v39  ;;  %v5511_v46 = vadd.f32 %v11898_v4, %v5361_v15 }
 0x945   : > { %v5638_v53 = vmax.f32 %v5510_v41, 0.0  ;;  %v5737_v21 = vpack.c.bf16 %v5637_v23, %v5633_v9  ;;  %v5364_v38 = vmul.f32 %v11879_v14, %v5196_v45  ;;  %v5005_v6 = vpop.f32.mrf.mxu1  ;;  %v5513_v17 = vadd.f32 %v11902_v26, %v5363_v0 }
 0x946   : > { %v5198_v25 = vpop.f32.mrf.mxu0  ;;  %v5365_v13 = vmul.f32 %v11882_v34, %v5005_v6  ;;  %v5736_v57 = vpack.c.bf16 %v5636_v36, %v5632_v32  ;;  %v5512_v55 = vadd.f32 %v11890_v54, %v5362_v48 }
 0x947   : > { %v5367_v10 = vmul.f32 %v11885_v40, %v5198_v25  ;;  %v5738_v43 = vpack.c.bf16 %v5638_v53, %v5634_v28  ;;  %v5514_v18 = vadd.f32 %v11894_v3, %v5364_v38  ;;  %v5007_v23 = vpop.f32.mrf.mxu1  ;;  %v5639_v53 = vmax.f32 %v5511_v46, 0.0 }
 0x948   : > { %v5200_v31 = vpop.f32.mrf.mxu0  ;;  %v5515_v41 = vadd.f32 %v11898_v4, %v5365_v13  ;;  %v5366_v9 = vmul.f32 %v11876_v52, %v5007_v23  ;;  %5963 = vmatprep.mubr.bf16.mxu1 %v5736_v57  ;;  %v5641_v48 = vmax.f32 %v5513_v17, 0.0 }
 0x949   : > { %v5517_v50 = vadd.f32 %v11902_v26, %v5367_v10  ;;  %v5368_v39 = vmul.f32 %v11879_v14, %v5200_v31  ;;  %6156 = vmatprep.mubr.bf16.mxu0 %v5738_v43  ;;  %v5011_v45 = vpop.f32.mrf.mxu1  ;;  %5964 = vmatmul.mubr.bf16.gmra.mxu1 %v5735_v44  ;;  %v5640_v10 = vmax.f32 %v5512_v55, 0.0  ;;  %v5642_v57 = vmax.f32 %v5514_v18, 0.0 }
 0x94a   : > { %v5204_v15 = vpop.f32.mrf.mxu0  ;;  %v5643_v32 = vmax.f32 %v5515_v41, 0.0  ;;  %v5516_v28 = vadd.f32 %v11890_v54, %v5366_v9  ;;  %6157 = vmatmul.mubr.bf16.gmra.mxu0 %v5737_v21  ;;  %v5369_v38 = vmul.f32 %v11882_v34, %v5011_v45 }
 0x94b   : > { %v5645_v0 = vmax.f32 %v5517_v50, 0.0  ;;  %v5518_v36 = vadd.f32 %v11894_v3, %v5368_v39  ;;  %v5371_v6 = vmul.f32 %v11885_v40, %v5204_v15  ;;  %v5013_v25 = vpop.f32.mrf.mxu1 }
 0x94c   : > { %v5206_v13 = vpop.f32.mrf.mxu0  ;;  %v5644_v43 = vmax.f32 %v5516_v28, 0.0  ;;  %v5739_v31 = vpack.c.bf16 %v5643_v32, %v5639_v53  ;;  %v5370_v50 = vmul.f32 %v11876_v52, %v5013_v25  ;;  %v5519_v15 = vadd.f32 %v11898_v4, %v5369_v38 }
 0x94d   : > { %v5646_v23 = vmax.f32 %v5518_v36, 0.0  ;;  %v5741_v41 = vpack.c.bf16 %v5645_v0, %v5641_v48  ;;  %v5372_v9 = vmul.f32 %v11879_v14, %v5206_v13  ;;  %v5015_v44 = vpop.f32.mrf.mxu1  ;;  %v5521_v55 = vadd.f32 %v11902_v26, %v5371_v6 }
 0x94e   : > { %v5208_v21 = vpop.f32.mrf.mxu0  ;;  %v5373_v46 = vmul.f32 %v11882_v34, %v5015_v44  ;;  %v5740_v39 = vpack.c.bf16 %v5644_v43, %v5640_v10  ;;  %v5520_v18 = vadd.f32 %v11890_v54, %v5370_v50 }
 0x94f   : > { %v5375_v17 = vmul.f32 %v11885_v40, %v5208_v21  ;;  %v5742_v45 = vpack.c.bf16 %v5646_v23, %v5642_v57  ;;  %v5522_v32 = vadd.f32 %v11894_v3, %v5372_v9  ;;  %v5017_v0 = vpop.f32.mrf.mxu1  ;;  %v5647_v57 = vmax.f32 %v5519_v15, 0.0 }
 0x950   : > { %v5210_v28 = vpop.f32.mrf.mxu0  ;;  %v5523_v36 = vadd.f32 %v11898_v4, %v5373_v46  ;;  %v5374_v48 = vmul.f32 %v11876_v52, %v5017_v0  ;;  %5973 = vmatprep.mubr.bf16.mxu1 %v5740_v39  ;;  %v5649_v43 = vmax.f32 %v5521_v55, 0.0  ;;  %v5648_v21 = vmax.f32 %v5520_v18, 0.0 }
 0x951   : > { %v5525_v53 = vadd.f32 %v11902_v26, %v5375_v17  ;;  %v5376_v25 = vmul.f32 %v11879_v14, %v5210_v28  ;;  %6166 = vmatprep.mubr.bf16.mxu0 %v5742_v45  ;;  %v5021_v13 = vpop.f32.mrf.mxu1  ;;  %5974 = vmatmul.mubr.bf16.gmra.mxu1 %v5739_v31  ;;  %v5650_v46 = vmax.f32 %v5522_v32, 0.0 }
 0x952   : > { %v5214_v38 = vpop.f32.mrf.mxu0  ;;  %v5524_v6 = vadd.f32 %v11890_v54, %v5374_v48  ;;  %6167 = vmatmul.mubr.bf16.gmra.mxu0 %v5741_v41  ;;  %v5651_v23 = vmax.f32 %v5523_v36, 0.0  ;;  %v5377_v39 = vmul.f32 %v11882_v34, %v5021_v13 }
 0x953   : > { %v5526_v10 = vadd.f32 %v11894_v3, %v5376_v25  ;;  %v5653_v50 = vmax.f32 %v5525_v53, 0.0  ;;  %v5023_v9 = vpop.f32.mrf.mxu1  ;;  %v5379_v45 = vmul.f32 %v11885_v40, %v5214_v38 }
 0x954   : > { %v5216_v44 = vpop.f32.mrf.mxu0  ;;  %v5652_v17 = vmax.f32 %v5524_v6, 0.0  ;;  %v5378_v28 = vmul.f32 %v11876_v52, %v5023_v9  ;;  %v5743_v18 = vpack.c.bf16 %v5651_v23, %v5647_v57 }
 0x955   : > { %v5654_v0 = vmax.f32 %v5526_v10, 0.0  ;;  %v5380_v48 = vmul.f32 %v11879_v14, %v5216_v44  ;;  %v5025_v31 = vpop.f32.mrf.mxu1  ;;  %v5745_v32 = vpack.c.bf16 %v5653_v50, %v5649_v43  ;;  %v5529_v57 = vadd.f32 %v11902_v26, %v5379_v45 }
 0x956   : > { %v5218_v41 = vpop.f32.mrf.mxu0  ;;  %v5381_v15 = vmul.f32 %v11882_v34, %v5025_v31  ;;  %v5744_v36 = vpack.c.bf16 %v5652_v17, %v5648_v21  ;;  %v5528_v25 = vadd.f32 %v11890_v54, %v5378_v28  ;;  %v5527_v21 = vadd.f32 %v11898_v4, %v5377_v39 }
 0x957   : > { %v5383_v55 = vmul.f32 %v11885_v40, %v5218_v41  ;;  %v5746_v53 = vpack.c.bf16 %v5654_v0, %v5650_v46  ;;  %v5530_v13 = vadd.f32 %v11894_v3, %v5380_v48  ;;  %v5027_v6 = vpop.f32.mrf.mxu1 }
 0x958   : > { %v5220_v38 = vpop.f32.mrf.mxu0  ;;  %v5531_v10 = vadd.f32 %v11898_v4, %v5381_v15  ;;  %v5382_v44 = vmul.f32 %v11876_v52, %v5027_v6  ;;  %5983 = vmatprep.mubr.bf16.mxu1 %v5744_v36  ;;  %v5656_v50 = vmax.f32 %v5528_v25, 0.0  ;;  %v5655_v41 = vmax.f32 %v5527_v21, 0.0 }
 0x959   : > { %v5533_v9 = vadd.f32 %v11902_v26, %v5383_v55  ;;  %v5384_v31 = vmul.f32 %v11879_v14, %v5220_v38  ;;  %6176 = vmatprep.mubr.bf16.mxu0 %v5746_v53  ;;  %5984 = vmatmul.mubr.bf16.gmra.mxu1 %v5743_v18  ;;  %v5658_v46 = vmax.f32 %v5530_v13, 0.0  ;;  %v5657_v15 = vmax.f32 %v5529_v57, 0.0 }
 0x95a   : > { %v5532_v43 = vadd.f32 %v11890_v54, %v5382_v44  ;;  %6177 = vmatmul.mubr.bf16.gmra.mxu0 %v5745_v32  ;;  %v5659_v17 = vmax.f32 %v5531_v10, 0.0 }
 0x95b   : > { %v5534_v23 = vadd.f32 %v11894_v3, %v5384_v31  ;;  %v5661_v0 = vmax.f32 %v5533_v9, 0.0 }
 0x95c   : > { %v5660_v28 = vmax.f32 %v5532_v43, 0.0  ;;  %v5747_v39 = vpack.c.bf16 %v5659_v17, %v5655_v41 }
 0x95d   : > { %v5662_v48 = vmax.f32 %v5534_v23, 0.0  ;;  %v5749_v53 = vpack.c.bf16 %v5661_v0, %v5657_v15 }
 0x95e   : > { %v5748_v55 = vpack.c.bf16 %v5660_v28, %v5656_v50 }
 0x95f   : > { %v5750_v36 = vpack.c.bf16 %v5662_v48, %v5658_v46 }
 0x960   : > { %5993 = vmatprep.mubr.bf16.mxu1 %v5748_v55 }
 0x961   : > { %6186 = vmatprep.mubr.bf16.mxu0 %v5750_v36  ;;  %5994 = vmatmul.mubr.bf16.gmra.mxu1 %v5747_v39 }
 0x962   : > { %6187 = vmatmul.mubr.bf16.gmra.mxu0 %v5749_v53 }
 0x99b   : > { %v5031_v45 = vpop.f32.mrf.mxu1  ;;  %v5224_v6 = vpop.f32.mrf.mxu0 }
 0x99c   : > { %v5385_v9 = vmul.f32 %v11882_v34, %v5031_v45  ;;  %v5387_v44 = vmul.f32 %v11885_v40, %v5224_v6 }
 0x99d   : > { %v5033_v18 = vpop.f32.mrf.mxu1  ;;  %v5226_v32 = vpop.f32.mrf.mxu0 }
 0x99e   : > { %v5386_v25 = vmul.f32 %v11876_v52, %v5033_v18  ;;  %v5388_v13 = vmul.f32 %v11879_v14, %v5226_v32  ;;  %v5535_v48 = vadd.f32 %v11898_v4, %v5385_v9  ;;  %v5537_v41 = vadd.f32 %v11902_v26, %v5387_v44 }
 0x99f   : > { %v5035_v38 = vpop.f32.mrf.mxu1  ;;  %v5228_v10 = vpop.f32.mrf.mxu0 }
 0x9a0   : > { %v5389_v31 = vmul.f32 %v11882_v34, %v5035_v38  ;;  %v5391_v21 = vmul.f32 %v11885_v40, %v5228_v10  ;;  %v5536_v46 = vadd.f32 %v11890_v54, %v5386_v25  ;;  %v5538_v17 = vadd.f32 %v11894_v3, %v5388_v13 }
 0x9a1   : > { %v5037_v57 = vpop.f32.mrf.mxu1  ;;  %v5230_v43 = vpop.f32.mrf.mxu0  ;;  %v5665_v44 = vmax.f32 %v5537_v41, 0.0 }
 0x9a2   : > { %v5390_v23 = vmul.f32 %v11876_v52, %v5037_v57  ;;  %v5392_v50 = vmul.f32 %v11879_v14, %v5230_v43  ;;  %v5539_v0 = vadd.f32 %v11898_v4, %v5389_v31  ;;  %v5541_v28 = vadd.f32 %v11902_v26, %v5391_v21 }
 0x9a3   : > { %v5664_v13 = vmax.f32 %v5536_v46, 0.0  ;;  %v5666_v38 = vmax.f32 %v5538_v17, 0.0  ;;  %v5663_v31 = vmax.f32 %v5535_v48, 0.0 }
 0x9a4   : > { %v5540_v15 = vadd.f32 %v11890_v54, %v5390_v23  ;;  %v5542_v55 = vadd.f32 %v11894_v3, %v5392_v50  ;;  %v5667_v36 = vmax.f32 %v5539_v0, 0.0  ;;  %v5669_v39 = vmax.f32 %v5541_v28, 0.0 }
 0x9a5   : > { %v5041_v53 = vpop.f32.mrf.mxu1  ;;  %v5234_v45 = vpop.f32.mrf.mxu0 }
 0x9a6   : > { %v5668_v6 = vmax.f32 %v5540_v15, 0.0  ;;  %v5670_v18 = vmax.f32 %v5542_v55, 0.0  ;;  %v5393_v32 = vmul.f32 %v11882_v34, %v5041_v53  ;;  %v5395_v25 = vmul.f32 %v11885_v40, %v5234_v45 }
 0x9a7   : > { %v5043_v10 = vpop.f32.mrf.mxu1  ;;  %v5236_v9 = vpop.f32.mrf.mxu0  ;;  %v5751_v28 = vpack.c.bf16 %v5667_v36, %v5663_v31  ;;  %v5753_v15 = vpack.c.bf16 %v5669_v39, %v5665_v44 }
 0x9a8   : > { %v5394_v21 = vmul.f32 %v11876_v52, %v5043_v10  ;;  %v5396_v57 = vmul.f32 %v11879_v14, %v5236_v9  ;;  %v5752_v50 = vpack.c.bf16 %v5668_v6, %v5664_v13  ;;  %v5754_v0 = vpack.c.bf16 %v5670_v18, %v5666_v38 }
 0x9a9   : > { %v5045_v43 = vpop.f32.mrf.mxu1  ;;  %v5238_v23 = vpop.f32.mrf.mxu0  ;;  %v5543_v55 = vadd.f32 %v11898_v4, %v5393_v32  ;;  %v5545_v53 = vadd.f32 %v11902_v26, %v5395_v25 }
 0x9aa   : > { %v5544_v46 = vadd.f32 %v11890_v54, %v5394_v21  ;;  %v5397_v17 = vmul.f32 %v11882_v34, %v5045_v43  ;;  %v5399_v48 = vmul.f32 %v11885_v40, %v5238_v23  ;;  %6003 = vmatprep.mubr.bf16.mxu1 %v5752_v50  ;;  %6196 = vmatprep.mubr.bf16.mxu0 %v5754_v0 }
 0x9ab   : > { %v5047_v41 = vpop.f32.mrf.mxu1  ;;  %v5240_v45 = vpop.f32.mrf.mxu0  ;;  %v5546_v10 = vadd.f32 %v11894_v3, %v5396_v57  ;;  %6004 = vmatmul.mubr.bf16.gmra.mxu1 %v5751_v28  ;;  %6197 = vmatmul.mubr.bf16.gmra.mxu0 %v5753_v15  ;;  %v5671_v44 = vmax.f32 %v5543_v55, 0.0  ;;  %v5673_v21 = vmax.f32 %v5545_v53, 0.0 }
 0x9ac   : > { %v5398_v6 = vmul.f32 %v11876_v52, %v5047_v41  ;;  %v5400_v36 = vmul.f32 %v11879_v14, %v5240_v45  ;;  %v5547_v39 = vadd.f32 %v11898_v4, %v5397_v17  ;;  %v5549_v18 = vadd.f32 %v11902_v26, %v5399_v48 }
 0x9ad   : > { %v5672_v0 = vmax.f32 %v5544_v46, 0.0  ;;  %v5674_v28 = vmax.f32 %v5546_v10, 0.0 }
 0x9ae   : > { %v5051_v32 = vpop.f32.mrf.mxu1  ;;  %v5244_v25 = vpop.f32.mrf.mxu0  ;;  %v5548_v13 = vadd.f32 %v11890_v54, %v5398_v6  ;;  %v5550_v38 = vadd.f32 %v11894_v3, %v5400_v36  ;;  %v5675_v57 = vmax.f32 %v5547_v39, 0.0  ;;  %v5677_v43 = vmax.f32 %v5549_v18, 0.0 }
 0x9af   : > { %v5401_v9 = vmul.f32 %v11882_v34, %v5051_v32  ;;  %v5403_v31 = vmul.f32 %v11885_v40, %v5244_v25 }
 0x9b0   : > { %v5053_v23 = vpop.f32.mrf.mxu1  ;;  %v5246_v50 = vpop.f32.mrf.mxu0  ;;  %v5676_v15 = vmax.f32 %v5548_v13, 0.0  ;;  %v5678_v17 = vmax.f32 %v5550_v38, 0.0  ;;  %v5755_v55 = vpack.c.bf16 %v5675_v57, %v5671_v44  ;;  %v5757_v53 = vpack.c.bf16 %v5677_v43, %v5673_v21 }
 0x9b1   : > { %v5551_v48 = vadd.f32 %v11898_v4, %v5401_v9  ;;  %v5553_v41 = vadd.f32 %v11902_v26, %v5403_v31  ;;  %v5402_v45 = vmul.f32 %v11876_v52, %v5053_v23  ;;  %v5404_v6 = vmul.f32 %v11879_v14, %v5246_v50 }
 0x9b2   : > { %v5055_v36 = vpop.f32.mrf.mxu1  ;;  %v5248_v32 = vpop.f32.mrf.mxu0  ;;  %v5756_v38 = vpack.c.bf16 %v5676_v15, %v5672_v0  ;;  %v5758_v9 = vpack.c.bf16 %v5678_v17, %v5674_v28 }
 0x9b3   : > { %v5405_v39 = vmul.f32 %v11882_v34, %v5055_v36  ;;  %v5407_v18 = vmul.f32 %v11885_v40, %v5248_v32  ;;  %v5552_v46 = vadd.f32 %v11890_v54, %v5402_v45  ;;  %v5554_v10 = vadd.f32 %v11894_v3, %v5404_v6 }
 0x9b4   : > { %v5057_v25 = vpop.f32.mrf.mxu1  ;;  %v5250_v13 = vpop.f32.mrf.mxu0  ;;  %6013 = vmatprep.mubr.bf16.mxu1 %v5756_v38  ;;  %6206 = vmatprep.mubr.bf16.mxu0 %v5758_v9  ;;  %v5679_v0 = vmax.f32 %v5551_v48, 0.0  ;;  %v5681_v28 = vmax.f32 %v5553_v41, 0.0 }
 0x9b5   : > { %v5555_v31 = vadd.f32 %v11898_v4, %v5405_v39  ;;  %v5557_v23 = vadd.f32 %v11902_v26, %v5407_v18  ;;  %v5406_v50 = vmul.f32 %v11876_v52, %v5057_v25  ;;  %v5408_v44 = vmul.f32 %v11879_v14, %v5250_v13  ;;  %6014 = vmatmul.mubr.bf16.gmra.mxu1 %v5755_v55 }
 0x9b6   : > { %v5061_v21 = vpop.f32.mrf.mxu1  ;;  %v5254_v57 = vpop.f32.mrf.mxu0  ;;  %6207 = vmatmul.mubr.bf16.gmra.mxu0 %v5757_v53  ;;  %v5680_v18 = vmax.f32 %v5552_v46, 0.0  ;;  %v5682_v25 = vmax.f32 %v5554_v10, 0.0 }
 0x9b7   : > { %v5683_v43 = vmax.f32 %v5555_v31, 0.0  ;;  %v5685_v45 = vmax.f32 %v5557_v23, 0.0  ;;  %v5556_v6 = vadd.f32 %v11890_v54, %v5406_v50  ;;  %v5558_v36 = vadd.f32 %v11894_v3, %v5408_v44 }
 0x9b8   : > { %v5409_v15 = vmul.f32 %v11882_v34, %v5061_v21  ;;  %v5411_v17 = vmul.f32 %v11885_v40, %v5254_v57  ;;  %v5063_v32 = vpop.f32.mrf.mxu1  ;;  %v5256_v39 = vpop.f32.mrf.mxu0 }
 0x9b9   : > { %v5684_v13 = vmax.f32 %v5556_v6, 0.0  ;;  %v5686_v38 = vmax.f32 %v5558_v36, 0.0  ;;  %v5759_v9 = vpack.c.bf16 %v5683_v43, %v5679_v0  ;;  %v5761_v31 = vpack.c.bf16 %v5685_v45, %v5681_v28 }
 0x9ba   : > { %v5410_v23 = vmul.f32 %v11876_v52, %v5063_v32  ;;  %v5412_v50 = vmul.f32 %v11879_v14, %v5256_v39  ;;  %v5065_v55 = vpop.f32.mrf.mxu1  ;;  %v5258_v53 = vpop.f32.mrf.mxu0  ;;  %v5559_v57 = vadd.f32 %v11898_v4, %v5409_v15  ;;  %v5561_v46 = vadd.f32 %v11902_v26, %v5411_v17 }
 0x9bb   : > { %v5413_v48 = vmul.f32 %v11882_v34, %v5065_v55  ;;  %v5415_v41 = vmul.f32 %v11885_v40, %v5258_v53  ;;  %v5760_v44 = vpack.c.bf16 %v5684_v13, %v5680_v18  ;;  %v5762_v21 = vpack.c.bf16 %v5686_v38, %v5682_v25 }
 0x9bc   : > { %v5560_v10 = vadd.f32 %v11890_v54, %v5410_v23  ;;  %v5562_v43 = vadd.f32 %v11894_v3, %v5412_v50  ;;  %v5067_v45 = vpop.f32.mrf.mxu1  ;;  %v5260_v6 = vpop.f32.mrf.mxu0  ;;  %v5687_v25 = vmax.f32 %v5559_v57, 0.0  ;;  %v5689_v13 = vmax.f32 %v5561_v46, 0.0 }
 0x9bd   : > { %v5563_v36 = vadd.f32 %v11898_v4, %v5413_v48  ;;  %v5565_v0 = vadd.f32 %v11902_v26, %v5415_v41  ;;  %v5414_v28 = vmul.f32 %v11876_v52, %v5067_v45  ;;  %v5416_v32 = vmul.f32 %v11879_v14, %v5260_v6  ;;  %6023 = vmatprep.mubr.bf16.mxu1 %v5760_v44 }
 0x9be   : > { %6216 = vmatprep.mubr.bf16.mxu0 %v5762_v21  ;;  %v5071_v39 = vpop.f32.mrf.mxu1  ;;  %v5264_v15 = vpop.f32.mrf.mxu0  ;;  %6024 = vmatmul.mubr.bf16.gmra.mxu1 %v5759_v9  ;;  %v5688_v53 = vmax.f32 %v5560_v10, 0.0  ;;  %v5690_v48 = vmax.f32 %v5562_v43, 0.0 }
 0x9bf   : > { %v5564_v17 = vadd.f32 %v11890_v54, %v5414_v28  ;;  %v5566_v18 = vadd.f32 %v11894_v3, %v5416_v32  ;;  %6217 = vmatmul.mubr.bf16.gmra.mxu0 %v5761_v31  ;;  %v5691_v38 = vmax.f32 %v5563_v36, 0.0  ;;  %v5693_v23 = vmax.f32 %v5565_v0, 0.0 }
 0x9c0   : > { %v5073_v50 = vpop.f32.mrf.mxu1  ;;  %v5266_v55 = vpop.f32.mrf.mxu0  ;;  %v5417_v44 = vmul.f32 %v11882_v34, %v5071_v39  ;;  %v5419_v21 = vmul.f32 %v11885_v40, %v5264_v15 }
 0x9c1   : > { %v5692_v41 = vmax.f32 %v5564_v17, 0.0  ;;  %v5694_v45 = vmax.f32 %v5566_v18, 0.0  ;;  %v5418_v6 = vmul.f32 %v11876_v52, %v5073_v50  ;;  %v5420_v28 = vmul.f32 %v11879_v14, %v5266_v55 }
 0x9c2   : > { %v5075_v9 = vpop.f32.mrf.mxu1  ;;  %v5268_v31 = vpop.f32.mrf.mxu0  ;;  %v5763_v10 = vpack.c.bf16 %v5691_v38, %v5687_v25  ;;  %v5765_v43 = vpack.c.bf16 %v5693_v23, %v5689_v13  ;;  %v5569_v25 = vadd.f32 %v11902_v26, %v5419_v21 }
 0x9c3   : > { %v5421_v57 = vmul.f32 %v11882_v34, %v5075_v9  ;;  %v5423_v46 = vmul.f32 %v11885_v40, %v5268_v31  ;;  %v5764_v36 = vpack.c.bf16 %v5692_v41, %v5688_v53  ;;  %v5766_v0 = vpack.c.bf16 %v5694_v45, %v5690_v48 }
 0x9c4   : > { %v5568_v32 = vadd.f32 %v11890_v54, %v5418_v6  ;;  %v5570_v39 = vadd.f32 %v11894_v3, %v5420_v28  ;;  %v5077_v17 = vpop.f32.mrf.mxu1  ;;  %v5270_v15 = vpop.f32.mrf.mxu0  ;;  %v5567_v53 = vadd.f32 %v11898_v4, %v5417_v44 }
 0x9c5   : > { %v5571_v18 = vadd.f32 %v11898_v4, %v5421_v57  ;;  %v5573_v50 = vadd.f32 %v11902_v26, %v5423_v46  ;;  %v5422_v55 = vmul.f32 %v11876_v52, %v5077_v17  ;;  %v5424_v9 = vmul.f32 %v11879_v14, %v5270_v15  ;;  %6033 = vmatprep.mubr.bf16.mxu1 %v5764_v36 }
 0x9c6   : > { %6226 = vmatprep.mubr.bf16.mxu0 %v5766_v0  ;;  %6034 = vmatmul.mubr.bf16.gmra.mxu1 %v5763_v10  ;;  %v5696_v41 = vmax.f32 %v5568_v32, 0.0  ;;  %v5698_v28 = vmax.f32 %v5570_v39, 0.0  ;;  %v5695_v21 = vmax.f32 %v5567_v53, 0.0  ;;  %v5697_v0 = vmax.f32 %v5569_v25, 0.0 }
 0x9c7   : > { %v5572_v13 = vadd.f32 %v11890_v54, %v5422_v55  ;;  %v5574_v38 = vadd.f32 %v11894_v3, %v5424_v9  ;;  %v5081_v23 = vpop.f32.mrf.mxu1  ;;  %v5274_v48 = vpop.f32.mrf.mxu0  ;;  %6227 = vmatmul.mubr.bf16.gmra.mxu0 %v5765_v43  ;;  %v5699_v45 = vmax.f32 %v5571_v18, 0.0  ;;  %v5701_v6 = vmax.f32 %v5573_v50, 0.0 }
 0x9c8   : > { %v5425_v46 = vmul.f32 %v11882_v34, %v5081_v23  ;;  %v5427_v55 = vmul.f32 %v11885_v40, %v5274_v48 }
 0x9c9   : > { %v5700_v31 = vmax.f32 %v5572_v13, 0.0  ;;  %v5702_v57 = vmax.f32 %v5574_v38, 0.0  ;;  %v5083_v44 = vpop.f32.mrf.mxu1  ;;  %v5276_v36 = vpop.f32.mrf.mxu0  ;;  %v5767_v50 = vpack.c.bf16 %v5699_v45, %v5695_v21  ;;  %v5769_v39 = vpack.c.bf16 %v5701_v6, %v5697_v0 }
 0x9ca   : > { %v5426_v17 = vmul.f32 %v11876_v52, %v5083_v44  ;;  %v5428_v15 = vmul.f32 %v11879_v14, %v5276_v36  ;;  %v5575_v9 = vadd.f32 %v11898_v4, %v5425_v46  ;;  %v5577_v45 = vadd.f32 %v11902_v26, %v5427_v55 }
 0x9cb   : > { %v5085_v10 = vpop.f32.mrf.mxu1  ;;  %v5278_v43 = vpop.f32.mrf.mxu0  ;;  %v5768_v32 = vpack.c.bf16 %v5700_v31, %v5696_v41  ;;  %v5770_v18 = vpack.c.bf16 %v5702_v57, %v5698_v28 }
 0x9cc   : > { %v5429_v13 = vmul.f32 %v11882_v34, %v5085_v10  ;;  %v5431_v38 = vmul.f32 %v11885_v40, %v5278_v43  ;;  %v5576_v23 = vadd.f32 %v11890_v54, %v5426_v17  ;;  %v5578_v48 = vadd.f32 %v11894_v3, %v5428_v15 }
 0x9cd   : > { %v5087_v53 = vpop.f32.mrf.mxu1  ;;  %v5280_v25 = vpop.f32.mrf.mxu0  ;;  %6043 = vmatprep.mubr.bf16.mxu1 %v5768_v32  ;;  %6236 = vmatprep.mubr.bf16.mxu0 %v5770_v18  ;;  %v5703_v21 = vmax.f32 %v5575_v9, 0.0  ;;  %v5705_v0 = vmax.f32 %v5577_v45, 0.0 }
 0x9ce   : > { %v5430_v44 = vmul.f32 %v11876_v52, %v5087_v53  ;;  %v5432_v41 = vmul.f32 %v11879_v14, %v5280_v25  ;;  %v5579_v6 = vadd.f32 %v11898_v4, %v5429_v13  ;;  %v5581_v34 = vadd.f32 %v11902_v26, %v5431_v38  ;;  %6044 = vmatmul.mubr.bf16.gmra.mxu1 %v5767_v50  ;;  %v6257_v26 = vld [vmem:[%s686_s26] sm:$0x3]  ;;  %s14278_s26 = sld [smem:[#allocation104_spill]] (!%p7627_p5) }
 0x9cf   : > { %6237 = vmatmul.mubr.bf16.gmra.mxu0 %v5769_v39  ;;  %v5704_v46 = vmax.f32 %v5576_v23, 0.0  ;;  %v5706_v52 = vmax.f32 %v5578_v48, 0.0  ;;  %v12173_v50 = vrot.slane %v6257_v26, %v14137_v60 }
 0x9d0   : > { %v5580_v40 = vadd.f32 %v11890_v54, %v5430_v44  ;;  %v5582_v28 = vadd.f32 %v11894_v3, %v5432_v41  ;;  %v5707_v31 = vmax.f32 %v5579_v6, 0.0  ;;  %v5709_v57 = vmax.f32 %v5581_v34, 0.0  ;;  %v6333_v3 = vld [vmem:[%s690_s1] sm:$0x3] }
 0x9d1   : > { %v12167_v54 = vrot.slane %v6257_v26, %v14139_v16  ;;  %v12170_v18 = vrot.slane %v6333_v3, %v14139_v16  ;;  %v12177_v53 = vrot.slane %v6333_v3, %v14137_v60 }
 0x9d2   : > { %v5708_v36 = vmax.f32 %v5580_v40, 0.0  ;;  %v5710_v14 = vmax.f32 %v5582_v28, 0.0  ;;  %v5771_v15 = vpack.c.bf16 %v5707_v31, %v5703_v21  ;;  %v5773_v55 = vpack.c.bf16 %v5709_v57, %v5705_v0 }
 0x9d4   : > { %v5772_v4 = vpack.c.bf16 %v5708_v36, %v5704_v46  ;;  %v5774_v17 = vpack.c.bf16 %v5710_v14, %v5706_v52  ;;  %v14141_v46 = vld [vmem:[#allocation46_spill] sm:$0xff]  ;;  %v14142_v36 = vld [vmem:[#allocation65_spill] sm:$0xff] }
 0x9d6   : > { %6053 = vmatprep.mubr.bf16.mxu1 %v5772_v4  ;;  %6246 = vmatprep.mubr.bf16.mxu0 %v5774_v17  ;;  %v5905_v10 = vpop.f32.mrf.mxu1  ;;  %v6098_v43 = vpop.f32.mrf.mxu0 }
 0x9d7   : > { %6054 = vmatmul.mubr.bf16.gmra.mxu1 %v5771_v15  ;;  %6247 = vmatmul.mubr.bf16.gmra.mxu0 %v5773_v55  ;;  %v6099_v32 = vadd.f32 %v6098_v43, %v5905_v10  ;;  %v14143_v43 = vld [vmem:[#allocation70_spill] sm:$0xff] }
 0x9d8   : > { %v5907_v39 = vpop.f32.mrf.mxu1  ;;  %v6100_v9 = vpop.f32.mrf.mxu0 }
 0x9d9   : > { %v6269_v13 = vmul.f32 %v12167_v54, %v6099_v32  ;;  %v6101_v38 = vadd.f32 %v6100_v9, %v5907_v39  ;;  %v14144_v39 = vld [vmem:[#allocation64_spill] sm:$0xff] }
 0x9da   : > { %v5909_v25 = vpop.f32.mrf.mxu1  ;;  %v6102_v23 = vpop.f32.mrf.mxu0 }
 0x9db   : > { %v6345_v48 = vadd.f32 %v12170_v18, %v6269_v13  ;;  %v6270_v44 = vmul.f32 %v12173_v50, %v6101_v38  ;;  %v6103_v41 = vadd.f32 %v6102_v23, %v5909_v25 }
 0x9dc   : > { %v5911_v45 = vpop.f32.mrf.mxu1  ;;  %v6104_v6 = vpop.f32.mrf.mxu0 }
 0x9dd   : > { %v6346_v34 = vadd.f32 %v12177_v53, %v6270_v44  ;;  %v6271_v40 = vmul.f32 %v12167_v54, %v6103_v41  ;;  %v6105_v28 = vadd.f32 %v6104_v6, %v5911_v45  ;;  %v12186_v52 = vadd.f32 %v6345_v48, %v14141_v46 }
 0x9df   : > { %v6347_v31 = vadd.f32 %v12170_v18, %v6271_v40  ;;  %v6272_v57 = vmul.f32 %v12173_v50, %v6105_v28  ;;  %v12189_v14 = vadd.f32 %v6346_v34, %v14142_v36  ;;  %v5915_v21 = vpop.f32.mrf.mxu1 }
 0x9e0   : > { %v6108_v0 = vpop.f32.mrf.mxu0 }
 0x9e1   : > { %v6348_v26 = vadd.f32 %v12177_v53, %v6272_v57  ;;  %v6109_v4 = vadd.f32 %v6108_v0, %v5915_v21  ;;  %v6477_v17 = vadd.f32 %v12189_v14, %v12186_v52  ;;  %v5917_v15 = vpop.f32.mrf.mxu1  ;;  %v12196_v32 = vadd.f32 %v6347_v31, %v14143_v43  ;;  %v14145_v57 = vld [vmem:[#allocation68_spill] sm:$0xff] }
 0x9e2   : > { %v6110_v55 = vpop.f32.mrf.mxu0 }
 0x9e3   : > { %v6273_v3 = vmul.f32 %v12167_v54, %v6109_v4  ;;  %v6111_v10 = vadd.f32 %v6110_v55, %v5917_v15  ;;  %6478 = vadd.xlane.f32.xlu0 %v6477_v17  ;;  %v12199_v9 = vadd.f32 %v6348_v26, %v14144_v39  ;;  %v5919_v13 = vpop.f32.mrf.mxu1  ;;  %v14146_v26 = vld [vmem:[#allocation69_spill] sm:$0xff] }
 0x9e4   : > { %v6112_v38 = vpop.f32.mrf.mxu0 }
 0x9e5   : > { %v6349_v25 = vadd.f32 %v12170_v18, %v6273_v3  ;;  %v6274_v23 = vmul.f32 %v12173_v50, %v6111_v10  ;;  %v6113_v48 = vadd.f32 %v6112_v38, %v5919_v13  ;;  %v6480_v44 = vadd.f32 %v12199_v9, %v12196_v32  ;;  %v5921_v41 = vpop.f32.mrf.mxu1  ;;  %v14147_v38 = vld [vmem:[#allocation80_spill] sm:$0xff] }
 0x9e6   : > { %v6114_v45 = vpop.f32.mrf.mxu0 }
 0x9e7   : > { %v6350_v6 = vadd.f32 %v12177_v53, %v6274_v23  ;;  %v6275_v34 = vmul.f32 %v12167_v54, %v6113_v48  ;;  %v6115_v40 = vadd.f32 %v6114_v45, %v5921_v41  ;;  %6481 = vadd.xlane.f32.xlu1 %v6480_v44  ;;  %v12208_v46 = vadd.f32 %v6349_v25, %v14145_v57  ;;  %v14148_v41 = vld [vmem:[#allocation74_spill] sm:$0xff] }
 0x9e8   : > { %v5925_v28 = vpop.f32.mrf.mxu1 }
 0x9e9   : > { %v6118_v31 = vpop.f32.mrf.mxu0  ;;  %v6351_v36 = vadd.f32 %v12170_v18, %v6275_v34  ;;  %v6276_v21 = vmul.f32 %v12173_v50, %v6115_v40  ;;  %v12213_v4 = vadd.f32 %v6350_v6, %v14146_v26 }
 0x9ea   : > { %v6119_v0 = vadd.f32 %v6118_v31, %v5925_v28  ;;  %v5927_v17 = vpop.f32.mrf.mxu1 }
 0x9eb   : > { %v6120_v15 = vpop.f32.mrf.mxu0  ;;  %v6352_v55 = vadd.f32 %v12177_v53, %v6276_v21  ;;  %v6483_v43 = vadd.f32 %v12213_v4, %v12208_v46  ;;  %v12220_v25 = vadd.f32 %v6351_v36, %v14147_v38 }
 0x9ec   : > { %v6277_v3 = vmul.f32 %v12167_v54, %v6119_v0  ;;  %v6121_v10 = vadd.f32 %v6120_v15, %v5927_v17  ;;  %v5929_v39 = vpop.f32.mrf.mxu1  ;;  %v14149_v17 = vld [vmem:[#allocation87_spill] sm:$0xff] }
 0x9ed   : > { %v6122_v13 = vpop.f32.mrf.mxu0  ;;  %6484 = vadd.xlane.f32.xlu0 %v6483_v43  ;;  %v12225_v45 = vadd.f32 %v6352_v55, %v14148_v41  ;;  %v14150_v55 = vld [vmem:[#allocation72_spill] sm:$0xff] }
 0x9ee   : > { %v6353_v23 = vadd.f32 %v12170_v18, %v6277_v3  ;;  %v6278_v48 = vmul.f32 %v12173_v50, %v6121_v10  ;;  %v6123_v44 = vadd.f32 %v6122_v13, %v5929_v39  ;;  %v5931_v6 = vpop.f32.mrf.mxu1 }
 0x9ef   : > { %v6124_v34 = vpop.f32.mrf.mxu0  ;;  %v6486_v57 = vadd.f32 %v12225_v45, %v12220_v25 }
 0x9f0   : > { %v6354_v40 = vadd.f32 %v12177_v53, %v6278_v48  ;;  %v6279_v28 = vmul.f32 %v12167_v54, %v6123_v44  ;;  %v6125_v31 = vadd.f32 %v6124_v34, %v5931_v6  ;;  %v12234_v15 = vadd.f32 %v6353_v23, %v14149_v17  ;;  %v14151_v34 = vld [vmem:[#allocation77_spill] sm:$0xff] }
 0x9f1   : > { %v5935_v0 = vpop.f32.mrf.mxu1  ;;  %v6128_v26 = vpop.f32.mrf.mxu0  ;;  %6487 = vadd.xlane.f32.xlu1 %v6486_v57 }
 0x9f2   : > { %v6355_v36 = vadd.f32 %v12170_v18, %v6279_v28  ;;  %v6280_v21 = vmul.f32 %v12173_v50, %v6125_v31  ;;  %v12237_v3 = vadd.f32 %v6354_v40, %v14150_v55  ;;  %v6129_v10 = vadd.f32 %v6128_v26, %v5935_v0  ;;  %v14152_v28 = vld [vmem:[#allocation79_spill] sm:$0xff] }
 0x9f3   : > { %v5937_v39 = vpop.f32.mrf.mxu1  ;;  %v6130_v13 = vpop.f32.mrf.mxu0 }
 0x9f4   : > { %v6356_v43 = vadd.f32 %v12177_v53, %v6280_v21  ;;  %v6489_v38 = vadd.f32 %v12237_v3, %v12234_v15  ;;  %v6281_v48 = vmul.f32 %v12167_v54, %v6129_v10  ;;  %v6131_v44 = vadd.f32 %v6130_v13, %v5937_v39 }
 0x9f5   : > { %v5939_v41 = vpop.f32.mrf.mxu1  ;;  %v6132_v6 = vpop.f32.mrf.mxu0  ;;  %v12244_v23 = vadd.f32 %v6355_v36, %v14151_v34 }
 0x9f6   : > { %6490 = vadd.xlane.f32.xlu0 %v6489_v38  ;;  %v12247_v40 = vadd.f32 %v6356_v43, %v14152_v28  ;;  %v6357_v31 = vadd.f32 %v12170_v18, %v6281_v48  ;;  %v6282_v57 = vmul.f32 %v12173_v50, %v6131_v44  ;;  %v6133_v21 = vadd.f32 %v6132_v6, %v5939_v41  ;;  %v14153_v43 = vld [vmem:[#allocation81_spill] sm:$0xff]  ;;  %v14154_v6 = vld [vmem:[#allocation83_spill] sm:$0xff] }
 0x9f7   : > { %v5941_v0 = vpop.f32.mrf.mxu1  ;;  %v6134_v26 = vpop.f32.mrf.mxu0 }
 0x9f8   : > { %v6492_v17 = vadd.f32 %v12247_v40, %v12244_v23  ;;  %v6358_v55 = vadd.f32 %v12177_v53, %v6282_v57  ;;  %v6283_v10 = vmul.f32 %v12167_v54, %v6133_v21  ;;  %v6135_v39 = vadd.f32 %v6134_v26, %v5941_v0 }
 0x9f9   : > { %v5945_v36 = vpop.f32.mrf.mxu1  ;;  %v12256_v38 = vadd.f32 %v6357_v31, %v14153_v43  ;;  %v14156_v43 = vld [vmem:[#allocation89_spill] sm:$0xff] }
 0x9fa   : > { %v6138_v13 = vpop.f32.mrf.mxu0  ;;  %6493 = vadd.xlane.f32.xlu1 %v6492_v17  ;;  %v6359_v48 = vadd.f32 %v12170_v18, %v6283_v10  ;;  %v6284_v44 = vmul.f32 %v12173_v50, %v6135_v39  ;;  %v12261_v34 = vadd.f32 %v6358_v55, %v14154_v6 }
 0x9fb   : > { %v6139_v41 = vadd.f32 %v6138_v13, %v5945_v36  ;;  %v5947_v28 = vpop.f32.mrf.mxu1  ;;  %v14157_v13 = vld [vmem:[#allocation82_spill] sm:$0xff] }
 0x9fc   : > { %14155 = vst [vmem:[#allocation33_spill] sm:$0xff] %v12261_v34  ;;  %v6140_v60 = vpop.f32.mrf.mxu0  ;;  %v6360_v57 = vadd.f32 %v12177_v53, %v6284_v44  ;;  %v6495_v26 = vadd.f32 %v12261_v34, %v12256_v38  ;;  %v12268_v10 = vadd.f32 %v6359_v48, %v14156_v43 }
 0x9fd   : > { %v6285_v21 = vmul.f32 %v12167_v54, %v6139_v41  ;;  %v6141_v0 = vadd.f32 %v6140_v60, %v5947_v28  ;;  %v5949_v31 = vpop.f32.mrf.mxu1 }
 0x9fe   : > { %v6142_v17 = vpop.f32.mrf.mxu0  ;;  %6496 = vadd.xlane.f32.xlu0 %v6495_v26  ;;  %v12273_v6 = vadd.f32 %v6360_v57, %v14157_v13 }
 0x9ff   : > { %v6361_v39 = vadd.f32 %v12170_v18, %v6285_v21  ;;  %v6286_v55 = vmul.f32 %v12173_v50, %v6141_v0  ;;  %v6143_v36 = vadd.f32 %v6142_v17, %v5949_v31  ;;  %v5951_v44 = vpop.f32.mrf.mxu1 }
 0xa00   : > { %v6144_v41 = vpop.f32.mrf.mxu0  ;;  %v6498_v48 = vadd.f32 %v12273_v6, %v12268_v10 }
 0xa01   : > { %v6362_v60 = vadd.f32 %v12177_v53, %v6286_v55  ;;  %v6287_v28 = vmul.f32 %v12167_v54, %v6143_v36  ;;  %v6145_v16 = vadd.f32 %v6144_v41, %v5951_v44  ;;  %v5955_v43 = vpop.f32.mrf.mxu1  ;;  %v12280_v21 = vadd.f32 %v6361_v39, %v11554_v51 }
 0xa02   : > { %v6148_v34 = vpop.f32.mrf.mxu0  ;;  %6499 = vadd.xlane.f32.xlu1 %v6498_v48 }
 0xa03   : > { %v6363_v0 = vadd.f32 %v12170_v18, %v6287_v28  ;;  %v6288_v57 = vmul.f32 %v12173_v50, %v6145_v16  ;;  %v6149_v26 = vadd.f32 %v6148_v34, %v5955_v43  ;;  %v12285_v31 = vadd.f32 %v6362_v60, %v11542_v33  ;;  %v5957_v17 = vpop.f32.mrf.mxu1  ;;  %v14159_v60 = vld [vmem:[#allocation88_spill] sm:$0xff] }
 0xa04   : > { %v6150_v55 = vpop.f32.mrf.mxu0 }
 0xa05   : > { %14158 = vst [vmem:[#allocation93_spill] sm:$0xff] %v12285_v31  ;;  %v6364_v36 = vadd.f32 %v12177_v53, %v6288_v57  ;;  %v6289_v13 = vmul.f32 %v12167_v54, %v6149_v26  ;;  %v6151_v44 = vadd.f32 %v6150_v55, %v5957_v17  ;;  %v6501_v51 = vadd.f32 %v12285_v31, %v12280_v21  ;;  %v5959_v39 = vpop.f32.mrf.mxu1 }
 0xa06   : > { %v6152_v41 = vpop.f32.mrf.mxu0  ;;  %v12292_v28 = vadd.f32 %v6363_v0, %v11560_v61 }
 0xa07   : > { %v6365_v16 = vadd.f32 %v12170_v18, %v6289_v13  ;;  %v6290_v33 = vmul.f32 %v12173_v50, %v6151_v44  ;;  %v6153_v34 = vadd.f32 %v6152_v41, %v5959_v39  ;;  %6502 = vadd.xlane.f32.xlu0 %v6501_v51  ;;  %v12297_v48 = vadd.f32 %v6364_v36, %v14159_v60  ;;  %v5961_v43 = vpop.f32.mrf.mxu1 }
 0xa08   : > { %v6154_v57 = vpop.f32.mrf.mxu0 }
 0xa09   : > { %v6366_v26 = vadd.f32 %v12177_v53, %v6290_v33  ;;  %v6291_v17 = vmul.f32 %v12167_v54, %v6153_v34  ;;  %v6155_v55 = vadd.f32 %v6154_v57, %v5961_v43  ;;  %v6504_v61 = vadd.f32 %v12297_v48, %v12292_v28  ;;  %v5965_v0 = vpop.f32.mrf.mxu1 }
 0xa0a   : > { %v6158_v31 = vpop.f32.mrf.mxu0  ;;  %v12304_v13 = vadd.f32 %v6365_v16, %v11596_v35 }
 0xa0b   : > { %v6367_v44 = vadd.f32 %v12170_v18, %v6291_v17  ;;  %v6292_v36 = vmul.f32 %v12173_v50, %v6155_v55  ;;  %v6159_v51 = vadd.f32 %v6158_v31, %v5965_v0  ;;  %6505 = vadd.xlane.f32.xlu1 %v6504_v61  ;;  %v12309_v39 = vadd.f32 %v6366_v26, %v11585_v19  ;;  %v5967_v41 = vpop.f32.mrf.mxu1 }
 0xa0c   : > { %v6160_v33 = vpop.f32.mrf.mxu0 }
 0xa0d   : > { %v6368_v34 = vadd.f32 %v12177_v53, %v6292_v36  ;;  %v6293_v60 = vmul.f32 %v12167_v54, %v6159_v51  ;;  %v6161_v43 = vadd.f32 %v6160_v33, %v5967_v41  ;;  %v6507_v35 = vadd.f32 %v12309_v39, %v12304_v13  ;;  %v5969_v16 = vpop.f32.mrf.mxu1 }
 0xa0e   : > { %v6162_v57 = vpop.f32.mrf.mxu0  ;;  %v12316_v17 = vadd.f32 %v6367_v44, %v11591_v59 }
 0xa0f   : > { %v6369_v31 = vadd.f32 %v12170_v18, %v6293_v60  ;;  %v6294_v19 = vmul.f32 %v12173_v50, %v6161_v43  ;;  %v6163_v26 = vadd.f32 %v6162_v57, %v5969_v16  ;;  %6508 = vadd.xlane.f32.xlu0 %v6507_v35  ;;  %v12321_v55 = vadd.f32 %v6368_v34, %v11588_v27  ;;  %v5971_v61 = vpop.f32.mrf.mxu1 }
 0xa10   : > { %v6164_v0 = vpop.f32.mrf.mxu0 }
 0xa11   : > { %v6370_v36 = vadd.f32 %v12177_v53, %v6294_v19  ;;  %v6295_v51 = vmul.f32 %v12167_v54, %v6163_v26  ;;  %v6165_v41 = vadd.f32 %v6164_v0, %v5971_v61  ;;  %v6510_v59 = vadd.f32 %v12321_v55, %v12316_v17  ;;  %v5975_v44 = vpop.f32.mrf.mxu1 }
 0xa12   : > { %v6168_v33 = vpop.f32.mrf.mxu0  ;;  %v12328_v60 = vadd.f32 %v6369_v31, %v11632_v5 }
 0xa13   : > { %v6371_v43 = vadd.f32 %v12170_v18, %v6295_v51  ;;  %v6296_v27 = vmul.f32 %v12173_v50, %v6165_v41  ;;  %v6169_v34 = vadd.f32 %v6168_v33, %v5975_v44  ;;  %6511 = vadd.xlane.f32.xlu1 %v6510_v59  ;;  %v12333_v35 = vadd.f32 %v6370_v36, %v11618_v58  ;;  %v5977_v16 = vpop.f32.mrf.mxu1 }
 0xa14   : > { %v6170_v57 = vpop.f32.mrf.mxu0 }
 0xa15   : > { %v6372_v19 = vadd.f32 %v12177_v53, %v6296_v27  ;;  %v6297_v26 = vmul.f32 %v12167_v54, %v6169_v34  ;;  %v6171_v61 = vadd.f32 %v6170_v57, %v5977_v16  ;;  %v6513_v5 = vadd.f32 %v12333_v35, %v12328_v60  ;;  %v5979_v31 = vpop.f32.mrf.mxu1 }
 0xa16   : > { %v6172_v0 = vpop.f32.mrf.mxu0  ;;  %v12340_v51 = vadd.f32 %v6371_v43, %v11627_v1 }
 0xa17   : > { %v6373_v41 = vadd.f32 %v12170_v18, %v6297_v26  ;;  %v6298_v58 = vmul.f32 %v12173_v50, %v6171_v61  ;;  %v6173_v36 = vadd.f32 %v6172_v0, %v5979_v31  ;;  %6514 = vadd.xlane.f32.xlu0 %v6513_v5  ;;  %v12345_v59 = vadd.f32 %v6372_v19, %v11624_v62  ;;  %v5981_v44 = vpop.f32.mrf.mxu1 }
 0xa18   : > { %v6174_v33 = vpop.f32.mrf.mxu0 }
 0xa19   : > { %v6374_v27 = vadd.f32 %v12177_v53, %v6298_v58  ;;  %v6299_v34 = vmul.f32 %v12167_v54, %v6173_v36  ;;  %v6175_v16 = vadd.f32 %v6174_v33, %v5981_v44  ;;  %v6516_v1 = vadd.f32 %v12345_v59, %v12340_v51  ;;  %v5985_v43 = vpop.f32.mrf.mxu1 }
 0xa1a   : > { %v6178_v57 = vpop.f32.mrf.mxu0  ;;  %v12352_v26 = vadd.f32 %v6373_v41, %v11662_v47 }
 0xa1b   : > { %v6375_v61 = vadd.f32 %v12170_v18, %v6299_v34  ;;  %v6300_v62 = vmul.f32 %v12173_v50, %v6175_v16  ;;  %v6179_v19 = vadd.f32 %v6178_v57, %v5985_v43  ;;  %6517 = vadd.xlane.f32.xlu1 %v6516_v1  ;;  %v12357_v5 = vadd.f32 %v6374_v27, %v11652_v49  ;;  %v5987_v31 = vpop.f32.mrf.mxu1 }
 0xa1c   : > { %v6180_v0 = vpop.f32.mrf.mxu0 }
 0xa1d   : > { %v6376_v58 = vadd.f32 %v12177_v53, %v6300_v62  ;;  %v6301_v36 = vmul.f32 %v12167_v54, %v6179_v19  ;;  %v6181_v44 = vadd.f32 %v6180_v0, %v5987_v31  ;;  %v6519_v47 = vadd.f32 %v12357_v5, %v12352_v26  ;;  %v5989_v41 = vpop.f32.mrf.mxu1 }
 0xa1e   : > { %v6182_v33 = vpop.f32.mrf.mxu0  ;;  %v12364_v34 = vadd.f32 %v6375_v61, %v11658_v11 }
 0xa1f   : > { %v6377_v16 = vadd.f32 %v12170_v18, %v6301_v36  ;;  %v6302_v49 = vmul.f32 %v12173_v50, %v6181_v44  ;;  %v6183_v27 = vadd.f32 %v6182_v33, %v5989_v41  ;;  %6520 = vadd.xlane.f32.xlu0 %v6519_v47  ;;  %v12369_v1 = vadd.f32 %v6376_v58, %v11655_v20  ;;  %v5991_v43 = vpop.f32.mrf.mxu1 }
 0xa20   : > { %v6184_v57 = vpop.f32.mrf.mxu0 }
 0xa21   : > { %v6378_v62 = vadd.f32 %v12177_v53, %v6302_v49  ;;  %v6303_v19 = vmul.f32 %v12167_v54, %v6183_v27  ;;  %v6185_v31 = vadd.f32 %v6184_v57, %v5991_v43  ;;  %v6522_v11 = vadd.f32 %v12369_v1, %v12364_v34  ;;  %v5995_v61 = vpop.f32.mrf.mxu1 }
 0xa22   : > { %v6188_v0 = vpop.f32.mrf.mxu0  ;;  %v12376_v36 = vadd.f32 %v6377_v16, %v11690_v2 }
 0xa23   : > { %v6379_v44 = vadd.f32 %v12170_v18, %v6303_v19  ;;  %v6304_v20 = vmul.f32 %v12173_v50, %v6185_v31  ;;  %v6189_v58 = vadd.f32 %v6188_v0, %v5995_v61  ;;  %6523 = vadd.xlane.f32.xlu1 %v6522_v11  ;;  %v12381_v47 = vadd.f32 %v6378_v62, %v11680_v29  ;;  %v5997_v41 = vpop.f32.mrf.mxu1 }
 0xa24   : > { %v6190_v33 = vpop.f32.mrf.mxu0 }
 0xa25   : > { %v6380_v49 = vadd.f32 %v12177_v53, %v6304_v20  ;;  %v6305_v27 = vmul.f32 %v12167_v54, %v6189_v58  ;;  %v6191_v43 = vadd.f32 %v6190_v33, %v5997_v41  ;;  %v6525_v2 = vadd.f32 %v12381_v47, %v12376_v36  ;;  %v5999_v16 = vpop.f32.mrf.mxu1 }
 0xa26   : > { %v6192_v57 = vpop.f32.mrf.mxu0  ;;  %v12388_v19 = vadd.f32 %v6379_v44, %v11686_v24 }
 0xa27   : > { %v6381_v31 = vadd.f32 %v12170_v18, %v6305_v27  ;;  %v6306_v29 = vmul.f32 %v12173_v50, %v6191_v43  ;;  %v6193_v62 = vadd.f32 %v6192_v57, %v5999_v16  ;;  %6526 = vadd.xlane.f32.xlu0 %v6525_v2  ;;  %v12393_v11 = vadd.f32 %v6380_v49, %v11683_v63  ;;  %v6001_v61 = vpop.f32.mrf.mxu1 }
 0xa28   : > { %v6194_v0 = vpop.f32.mrf.mxu0 }
 0xa29   : > { %v6382_v20 = vadd.f32 %v12177_v53, %v6306_v29  ;;  %v6307_v58 = vmul.f32 %v12167_v54, %v6193_v62  ;;  %v6195_v41 = vadd.f32 %v6194_v0, %v6001_v61  ;;  %v6528_v24 = vadd.f32 %v12393_v11, %v12388_v19 }
 0xa2a   : > { %v12402_v27 = vadd.f32 %v6381_v31, %v11717_v42 }
 0xa2b   : > { %v6383_v44 = vadd.f32 %v12170_v18, %v6307_v58  ;;  %v6308_v33 = vmul.f32 %v12173_v50, %v6195_v41  ;;  %6529 = vadd.xlane.f32.xlu1 %v6528_v24  ;;  %v12405_v63 = vadd.f32 %v6382_v20, %v11707_v56 }
 0xa2d   : > { %14160 = vst [vmem:[#allocation58_spill] sm:$0xff] %v12405_v63  ;;  %v6384_v49 = vadd.f32 %v12177_v53, %v6308_v33  ;;  %v6531_v43 = vadd.f32 %v12405_v63, %v12402_v27  ;;  %v12411_v2 = vadd.f32 %v6383_v44, %v11713_v37 }
 0xa2f   : > { %6532 = vadd.xlane.f32.xlu0 %v6531_v43  ;;  %14161 = vst [vmem:[#allocation95_spill] sm:$0xff] %v12411_v2  ;;  %v12414_v16 = vadd.f32 %v6384_v49, %v11710_v30 }
 0xa31   : > { %14162 = vst [vmem:[#allocation53_spill] sm:$0xff] %v12414_v16  ;;  %v6534_v57 = vadd.f32 %v12414_v16, %v12411_v2 }
 0xa33   : > { %6535 = vadd.xlane.f32.xlu1 %v6534_v57 }
 0xa6b   : > { %v6198_v42 = vpop.f32.mrf.mxu0  ;;  %v6005_v31 = vpop.f32.mrf.mxu1 }
 0xa6c   : > { %v6199_v56 = vadd.f32 %v6198_v42, %v6005_v31 }
 0xa6d   : > { %v6200_v29 = vpop.f32.mrf.mxu0  ;;  %v6007_v62 = vpop.f32.mrf.mxu1 }
 0xa6e   : > { %v6309_v61 = vmul.f32 %v12167_v54, %v6199_v56  ;;  %v6201_v0 = vadd.f32 %v6200_v29, %v6007_v62 }
 0xa6f   : > { %v6202_v20 = vpop.f32.mrf.mxu0  ;;  %v6009_v58 = vpop.f32.mrf.mxu1 }
 0xa70   : > { %v6385_v37 = vadd.f32 %v12170_v18, %v6309_v61  ;;  %v6310_v41 = vmul.f32 %v12173_v50, %v6201_v0  ;;  %v6203_v30 = vadd.f32 %v6202_v20, %v6009_v58 }
 0xa71   : > { %v6204_v24 = vpop.f32.mrf.mxu0  ;;  %v6011_v44 = vpop.f32.mrf.mxu1 }
 0xa72   : > { %v6386_v33 = vadd.f32 %v12177_v53, %v6310_v41  ;;  %v6311_v49 = vmul.f32 %v12167_v54, %v6203_v30  ;;  %v6205_v43 = vadd.f32 %v6204_v24, %v6011_v44  ;;  %v12426_v56 = vadd.f32 %v6385_v37, %v11745_v12 }
 0xa74   : > { %v6387_v57 = vadd.f32 %v12170_v18, %v6311_v49  ;;  %v6312_v42 = vmul.f32 %v12173_v50, %v6205_v43  ;;  %14163 = vst [vmem:[#allocation59_spill] sm:$0xff] %v12426_v56  ;;  %v12429_v29 = vadd.f32 %v6386_v33, %v11739_v22 }
 0xa75   : > { %v6015_v62 = vpop.f32.mrf.mxu1 }
 0xa76   : > { %v6208_v31 = vpop.f32.mrf.mxu0  ;;  %14164 = vst [vmem:[#allocation94_spill] sm:$0xff] %v12429_v29  ;;  %v6388_v61 = vadd.f32 %v12177_v53, %v6312_v42  ;;  %v6537_v58 = vadd.f32 %v12429_v29, %v12426_v56  ;;  %v12436_v12 = vadd.f32 %v6387_v57, %v11748_v7  ;;  %v6479_v56 = vpop.xlane.xlu0 %6478 }
 0xa77   : > { %v6209_v0 = vadd.f32 %v6208_v31, %v6015_v62  ;;  %v6017_v41 = vpop.f32.mrf.mxu1 }
 0xa78   : > { %v6210_v20 = vpop.f32.mrf.mxu0  ;;  %6538 = vadd.xlane.f32.xlu0 %v6537_v58  ;;  %14165 = vst [vmem:[#allocation36_spill] sm:$0xff] %v12436_v12  ;;  %v12439_v22 = vadd.f32 %v6388_v61, %v11742_v8  ;;  %v14167_v61 = vld [vmem:[#allocation84_spill] sm:$0xff] }
 0xa79   : > { %v6313_v30 = vmul.f32 %v12167_v54, %v6209_v0  ;;  %v6211_v24 = vadd.f32 %v6210_v20, %v6017_v41  ;;  %v6019_v37 = vpop.f32.mrf.mxu1 }
 0xa7a   : > { %v6212_v44 = vpop.f32.mrf.mxu0  ;;  %14166 = vst [vmem:[#allocation35_spill] sm:$0xff] %v12439_v22  ;;  %v6540_v31 = vadd.f32 %v12439_v22, %v12436_v12 }
 0xa7b   : > { %v6389_v33 = vadd.f32 %v12170_v18, %v6313_v30  ;;  %v6314_v49 = vmul.f32 %v12173_v50, %v6211_v24  ;;  %v6213_v43 = vadd.f32 %v6212_v44, %v6019_v37  ;;  %v6021_v62 = vpop.f32.mrf.mxu1  ;;  %v14169_v37 = vld [vmem:[#allocation51_spill] sm:$0xff] }
 0xa7c   : > { %v6214_v42 = vpop.f32.mrf.mxu0  ;;  %6541 = vadd.xlane.f32.xlu1 %v6540_v31 }
 0xa7d   : > { %v6390_v0 = vadd.f32 %v12177_v53, %v6314_v49  ;;  %v6315_v20 = vmul.f32 %v12167_v54, %v6213_v43  ;;  %v6215_v7 = vadd.f32 %v6214_v42, %v6021_v62  ;;  %v12448_v58 = vadd.f32 %v6389_v33, %v14167_v61 }
 0xa7e   : > { %v6025_v8 = vpop.f32.mrf.mxu1 }
 0xa7f   : > { %v6218_v57 = vpop.f32.mrf.mxu0  ;;  %14168 = vst [vmem:[#allocation62_spill] sm:$0xff] %v12448_v58  ;;  %v6391_v41 = vadd.f32 %v12170_v18, %v6315_v20  ;;  %v6316_v30 = vmul.f32 %v12173_v50, %v6215_v7  ;;  %v12453_v22 = vadd.f32 %v6390_v0, %v14169_v37  ;;  %v14173_v0 = vld [vmem:[#allocation39_spill] sm:$0xff] }
 0xa80   : > { %v6219_v24 = vadd.f32 %v6218_v57, %v6025_v8  ;;  %v6027_v12 = vpop.f32.mrf.mxu1  ;;  %v14171_v57 = vld [vmem:[#allocation40_spill] sm:$0xff] }
 0xa81   : > { %v6220_v44 = vpop.f32.mrf.mxu0  ;;  %14170 = vst [vmem:[#allocation63_spill] sm:$0xff] %v12453_v22  ;;  %v6392_v49 = vadd.f32 %v12177_v53, %v6316_v30  ;;  %v6543_v33 = vadd.f32 %v12453_v22, %v12448_v58  ;;  %v12461_v8 = vadd.f32 %v6391_v41, %v14171_v57 }
 0xa82   : > { %v6317_v43 = vmul.f32 %v12167_v54, %v6219_v24  ;;  %v6221_v42 = vadd.f32 %v6220_v44, %v6027_v12  ;;  %v6029_v62 = vpop.f32.mrf.mxu1 }
 0xa83   : > { %v6222_v31 = vpop.f32.mrf.mxu0  ;;  %6544 = vadd.xlane.f32.xlu0 %v6543_v33  ;;  %14172 = vst [vmem:[#allocation92_spill] sm:$0xff] %v12461_v8  ;;  %v12464_v37 = vadd.f32 %v6392_v49, %v14173_v0 }
 0xa84   : > { %v6318_v20 = vmul.f32 %v12173_v50, %v6221_v42  ;;  %v6223_v61 = vadd.f32 %v6222_v31, %v6029_v62  ;;  %v6393_v30 = vadd.f32 %v12170_v18, %v6317_v43  ;;  %v6031_v24 = vpop.f32.mrf.mxu1  ;;  %v14175_v43 = vld [vmem:[#allocation43_spill] sm:$0xff] }
 0xa85   : > { %v6224_v7 = vpop.f32.mrf.mxu0  ;;  %14174 = vst [vmem:[#allocation57_spill] sm:$0xff] %v12464_v37  ;;  %v6546_v42 = vadd.f32 %v12464_v37, %v12461_v8 }
 0xa86   : > { %v6394_v12 = vadd.f32 %v12177_v53, %v6318_v20  ;;  %v6319_v44 = vmul.f32 %v12167_v54, %v6223_v61  ;;  %v6225_v22 = vadd.f32 %v6224_v7, %v6031_v24  ;;  %v6035_v31 = vpop.f32.mrf.mxu1  ;;  %v12474_v0 = vadd.f32 %v6393_v30, %v14175_v43  ;;  %v14177_v20 = vld [vmem:[#allocation54_spill] sm:$0xff] }
 0xa87   : > { %v6228_v58 = vpop.f32.mrf.mxu0  ;;  %6547 = vadd.xlane.f32.xlu1 %v6546_v42 }
 0xa88   : > { %v6395_v33 = vadd.f32 %v12170_v18, %v6319_v44  ;;  %v6320_v41 = vmul.f32 %v12173_v50, %v6225_v22  ;;  %v6229_v62 = vadd.f32 %v6228_v58, %v6035_v31  ;;  %v6037_v57 = vpop.f32.mrf.mxu1  ;;  %14176 = vst [vmem:[#allocation37_spill] sm:$0xff] %v12474_v0  ;;  %v12477_v29 = vadd.f32 %v6394_v12, %v14177_v20  ;;  %v14179_v44 = vld [vmem:[#allocation44_spill] sm:$0xff] }
 0xa89   : > { %v6230_v49 = vpop.f32.mrf.mxu0 }
 0xa8a   : > { %14178 = vst [vmem:[#allocation38_spill] sm:$0xff] %v12477_v29  ;;  %v6396_v61 = vadd.f32 %v12177_v53, %v6320_v41  ;;  %v6321_v7 = vmul.f32 %v12167_v54, %v6229_v62  ;;  %v6231_v37 = vadd.f32 %v6230_v49, %v6037_v57  ;;  %v6039_v8 = vpop.f32.mrf.mxu1  ;;  %v6549_v22 = vadd.f32 %v12477_v29, %v12474_v0  ;;  %v14181_v41 = vld [vmem:[#allocation85_spill] sm:$0xff] }
 0xa8b   : > { %v6232_v24 = vpop.f32.mrf.mxu0  ;;  %v12484_v42 = vadd.f32 %v6395_v33, %v14179_v44 }
 0xa8c   : > { %v6397_v30 = vadd.f32 %v12170_v18, %v6321_v7  ;;  %v6322_v31 = vmul.f32 %v12173_v50, %v6231_v37  ;;  %v6233_v12 = vadd.f32 %v6232_v24, %v6039_v8  ;;  %6550 = vadd.xlane.f32.xlu0 %v6549_v22  ;;  %v6041_v43 = vpop.f32.mrf.mxu1  ;;  %v12489_v20 = vadd.f32 %v6396_v61, %v14181_v41  ;;  %v14183_v61 = vld [vmem:[#allocation50_spill] sm:$0xff] }
 0xa8d   : > { %v6234_v58 = vpop.f32.mrf.mxu0  ;;  %14180 = vst [vmem:[#allocation56_spill] sm:$0xff] %v12484_v42 }
 0xa8e   : > { %14182 = vst [vmem:[#allocation41_spill] sm:$0xff] %v12489_v20  ;;  %v6235_v62 = vadd.f32 %v6234_v58, %v6041_v43  ;;  %v6398_v57 = vadd.f32 %v12177_v53, %v6322_v31  ;;  %v6323_v29 = vmul.f32 %v12167_v54, %v6233_v12  ;;  %v6045_v0 = vpop.f32.mrf.mxu1  ;;  %v6552_v33 = vadd.f32 %v12489_v20, %v12484_v42  ;;  %v14185_v58 = vld [vmem:[#allocation47_spill] sm:$0xff] }
 0xa8f   : > { %v6238_v49 = vpop.f32.mrf.mxu0  ;;  %v12498_v22 = vadd.f32 %v6397_v30, %v14183_v61 }
 0xa90   : > { %v6324_v7 = vmul.f32 %v12173_v50, %v6235_v62  ;;  %v6399_v8 = vadd.f32 %v12170_v18, %v6323_v29  ;;  %v6239_v37 = vadd.f32 %v6238_v49, %v6045_v0  ;;  %6553 = vadd.xlane.f32.xlu1 %v6552_v33  ;;  %v6047_v24 = vpop.f32.mrf.mxu1  ;;  %v12501_v43 = vadd.f32 %v6398_v57, %v14185_v58  ;;  %v14187_v57 = vld [vmem:[#allocation28_spill] sm:$0xff] }
 0xa91   : > { %v6240_v44 = vpop.f32.mrf.mxu0  ;;  %14184 = vst [vmem:[#allocation67_spill] sm:$0xff] %v12498_v22 }
 0xa92   : > { %14186 = vst [vmem:[#allocation61_spill] sm:$0xff] %v12501_v43  ;;  %v6400_v31 = vadd.f32 %v12177_v53, %v6324_v7  ;;  %v6241_v12 = vadd.f32 %v6240_v44, %v6047_v24  ;;  %v6325_v20 = vmul.f32 %v12167_v54, %v6239_v37  ;;  %v6049_v42 = vpop.f32.mrf.mxu1  ;;  %v6555_v62 = vadd.f32 %v12501_v43, %v12498_v22  ;;  %v14189_v7 = vld [vmem:[#allocation48_spill] sm:$0xff] }
 0xa93   : > { %v6242_v41 = vpop.f32.mrf.mxu0  ;;  %v12510_v61 = vadd.f32 %v6399_v8, %v14187_v57 }
 0xa94   : > { %v6326_v29 = vmul.f32 %v12173_v50, %v6241_v12  ;;  %v6401_v49 = vadd.f32 %v12170_v18, %v6325_v20  ;;  %v6243_v30 = vadd.f32 %v6242_v41, %v6049_v42  ;;  %6556 = vadd.xlane.f32.xlu0 %v6555_v62  ;;  %v6051_v33 = vpop.f32.mrf.mxu1  ;;  %v12513_v44 = vadd.f32 %v6400_v31, %v14189_v7  ;;  %v6482_v62 = vpop.xlane.xlu1 %6481  ;;  %v14191_v7 = vld [vmem:[#allocation31_spill] sm:$0xff] }
 0xa95   : > { %v6244_v0 = vpop.f32.mrf.mxu0  ;;  %14188 = vst [vmem:[#allocation42_spill] sm:$0xff] %v12510_v61 }
 0xa96   : > { %14190 = vst [vmem:[#allocation60_spill] sm:$0xff] %v12513_v44  ;;  %v6402_v37 = vadd.f32 %v12177_v53, %v6326_v29  ;;  %v6245_v24 = vadd.f32 %v6244_v0, %v6051_v33  ;;  %v6327_v43 = vmul.f32 %v12167_v54, %v6243_v30  ;;  %v6558_v20 = vadd.f32 %v12513_v44, %v12510_v61  ;;  %v14192_v0 = vld [vmem:[#allocation29_spill] sm:$0xff]  ;;  %v6485_v61 = vpop.xlane.xlu0 %6484 }
 0xa97   : > { %v6248_v58 = vpop.f32.mrf.mxu0  ;;  %v6055_v12 = vpop.f32.mrf.mxu1  ;;  %v12522_v29 = vadd.f32 %v6401_v49, %v14191_v7  ;;  %v6573_v44 = vmul.f32 0.00390625, %v6479_v56  ;;  %v14195_v56 = vld [vmem:[#allocation30_spill] sm:$0xff] }
 0xa98   : > { %v6328_v42 = vmul.f32 %v12173_v50, %v6245_v24  ;;  %v6403_v8 = vadd.f32 %v12170_v18, %v6327_v43  ;;  %v6249_v57 = vadd.f32 %v6248_v58, %v6055_v12  ;;  %6559 = vadd.xlane.f32.xlu1 %v6558_v20  ;;  %v12525_v33 = vadd.f32 %v6402_v37, %v14192_v0  ;;  %v6488_v0 = vpop.xlane.xlu1 %6487 }
 0xa99   : > { %v6250_v41 = vpop.f32.mrf.mxu0  ;;  %v6057_v31 = vpop.f32.mrf.mxu1  ;;  %v6574_v58 = vmul.f32 0.00390625, %v6482_v62  ;;  %v12541_v62 = vsub.f32 %v12186_v52, %v6573_v44 }
 0xa9a   : > { %14193 = vst [vmem:[#allocation71_spill] sm:$0xff] %v12525_v33  ;;  %v6404_v30 = vadd.f32 %v12177_v53, %v6328_v42  ;;  %v6251_v22 = vadd.f32 %v6250_v41, %v6057_v31  ;;  %v6329_v24 = vmul.f32 %v12167_v54, %v6249_v57  ;;  %v6561_v43 = vadd.f32 %v12525_v33, %v12522_v29  ;;  %v14194_v42 = vld [vmem:[#allocation91_spill] sm:$0xff] }
 0xa9b   : > { %v6252_v16 = vpop.f32.mrf.mxu0  ;;  %v6059_v2 = vpop.f32.mrf.mxu1  ;;  %v12534_v41 = vadd.f32 %v6403_v8, %v14194_v42  ;;  %v6575_v57 = vmul.f32 0.00390625, %v6485_v61  ;;  %v12553_v61 = vsub.f32 %v12199_v9, %v6574_v58 }
 0xa9c   : > { %v6330_v12 = vmul.f32 %v12173_v50, %v6251_v22  ;;  %v6405_v20 = vadd.f32 %v12170_v18, %v6329_v24  ;;  %v6253_v37 = vadd.f32 %v6252_v16, %v6059_v2  ;;  %6562 = vadd.xlane.f32.xlu0 %v6561_v43  ;;  %v12537_v31 = vadd.f32 %v6404_v30, %v14195_v56  ;;  %v6491_v2 = vpop.xlane.xlu0 %6490  ;;  %v6494_v9 = vpop.xlane.xlu1 %6493 }
 0xa9d   : > { %v6254_v49 = vpop.f32.mrf.mxu0  ;;  %v6061_v7 = vpop.f32.mrf.mxu1  ;;  %v12544_v22 = vsub.f32 %v12189_v14, %v6573_v44  ;;  %v12550_v30 = vsub.f32 %v12196_v32, %v6574_v58  ;;  %v6576_v43 = vmul.f32 0.00390625, %v6488_v0  ;;  %v14196_v14 = vld [vmem:[#allocation96_spill] sm:$0xff]  ;;  %v12567_v32 = vsub.f32 %v12213_v4, %v6575_v57 }
 0xa9e   : > { %v6406_v63 = vadd.f32 %v12177_v53, %v6330_v12  ;;  %v6255_v33 = vadd.f32 %v6254_v49, %v6061_v7  ;;  %v6331_v16 = vmul.f32 %v12167_v54, %v6253_v37  ;;  %v6564_v8 = vadd.f32 %v12537_v31, %v12534_v41  ;;  %v14197_v12 = vld [vmem:[#allocation34_spill] sm:$0xff]  ;;  %v14198_v37 = vld [vmem:[#allocation55_spill] sm:$0xff]  ;;  %v14199_v7 = vld [vmem:[#allocation32_spill] sm:$0xff] }
 0xa9f   : > { %v12558_v44 = vadd.f32 %v6405_v20, %v14196_v14  ;;  %v12564_v49 = vsub.f32 %v12208_v46, %v6575_v57  ;;  %v6672_v42 = vmul.f32 %v12553_v61, %v12553_v61  ;;  %v12587_v56 = vsub.f32 %v12220_v25, %v6576_v43 }
 0xaa0   : > { %v6332_v24 = vmul.f32 %v12173_v50, %v6255_v33  ;;  %v6407_v52 = vadd.f32 %v12170_v18, %v6331_v16  ;;  %6565 = vadd.xlane.f32.xlu1 %v6564_v8  ;;  %v12561_v54 = vadd.f32 %v6406_v63, %v14197_v12  ;;  %v6669_v50 = vmul.f32 %v12541_v62, %v12541_v62  ;;  %v6497_v20 = vpop.xlane.xlu0 %6496  ;;  %v6500_v8 = vpop.xlane.xlu1 %6499 }
 0xaa1   : > { %v6670_v18 = vmul.f32 %v12544_v22, %v12544_v22  ;;  %v6577_v33 = vmul.f32 0.00390625, %v6491_v2  ;;  %v12590_v57 = vsub.f32 %v12225_v45, %v6576_v43  ;;  %v6673_v0 = vmul.f32 %v12564_v49, %v12564_v49 }
 0xaa2   : > { %v6408_v58 = vadd.f32 %v12177_v53, %v6332_v24  ;;  %v6567_v63 = vadd.f32 %v12561_v54, %v12558_v44  ;;  %v12577_v46 = vadd.f32 %v6407_v52, %v14198_v37  ;;  %v6671_v53 = vmul.f32 %v12550_v30, %v12550_v30 }
 0xaa3   : > { %v6674_v2 = vmul.f32 %v12567_v32, %v12567_v32  ;;  %v6578_v16 = vmul.f32 0.00390625, %v6494_v9  ;;  %v12599_v52 = vsub.f32 %v12234_v15, %v6577_v33  ;;  %v12602_v25 = vsub.f32 %v12237_v3, %v6577_v33 }
 0xaa4   : > { %v12580_v4 = vadd.f32 %v6408_v58, %v14199_v7  ;;  %6568 = vadd.xlane.f32.xlu0 %v6567_v63  ;;  %v6579_v45 = vmul.f32 0.00390625, %v6497_v20  ;;  %v6503_v43 = vpop.xlane.xlu0 %6502  ;;  %v6733_v14 = vadd.f32 %v6670_v18, %v6669_v50  ;;  %v6675_v12 = vmul.f32 %v12587_v56, %v12587_v56  ;;  %v6506_v33 = vpop.xlane.xlu1 %6505 }
 0xaa5   : > { %v6676_v9 = vmul.f32 %v12590_v57, %v12590_v57  ;;  %v6580_v58 = vmul.f32 0.00390625, %v6500_v8  ;;  %v6736_v63 = vadd.f32 %v6672_v42, %v6671_v53  ;;  %v12609_v37 = vsub.f32 %v12244_v23, %v6578_v16  ;;  %v14200_v8 = vld [vmem:[#allocation33_spill] sm:$0xff] }
 0xaa6   : > { %v6570_v24 = vadd.f32 %v12580_v4, %v12577_v46  ;;  %v12612_v15 = vsub.f32 %v12247_v40, %v6578_v16  ;;  %v6581_v3 = vmul.f32 0.00390625, %v6503_v43  ;;  %v6739_v20 = vadd.f32 %v6674_v2, %v6673_v0 }
 0xaa7   : > { %v6677_v50 = vmul.f32 %v12599_v52, %v12599_v52  ;;  %v6678_v18 = vmul.f32 %v12602_v25, %v12602_v25  ;;  %v12619_v7 = vsub.f32 %v12256_v38, %v6579_v45  ;;  %v12622_v53 = vsub.f32 %v14200_v8, %v6579_v45  ;;  %v14202_v45 = vld [vmem:[#allocation93_spill] sm:$0xff] }
 0xaa8   : > { %6571 = vadd.xlane.f32.xlu1 %v6570_v24  ;;  %6734 = vadd.xlane.f32.xlu0 %v6733_v14  ;;  %v6509_v23 = vpop.xlane.xlu0 %6508  ;;  %v12625_v40 = vsub.f32 %v12268_v10, %v6580_v58  ;;  %v12628_v42 = vsub.f32 %v12273_v6, %v6580_v58  ;;  %v6582_v0 = vmul.f32 0.00390625, %v6506_v33  ;;  %v6742_v2 = vadd.f32 %v6676_v9, %v6675_v12  ;;  %v6512_v10 = vpop.xlane.xlu1 %6511 }
 0xaa9   : > { %v6679_v16 = vmul.f32 %v12609_v37, %v12609_v37  ;;  %v6680_v38 = vmul.f32 %v12612_v15, %v12612_v15  ;;  %v12635_v24 = vsub.f32 %v12280_v21, %v6581_v3  ;;  %v12638_v43 = vsub.f32 %v14202_v45, %v6581_v3 }
 0xaaa   : > { %14201 = vst [vmem:[#allocation66_spill] sm:$0xff] %v12628_v42  ;;  %v6681_v6 = vmul.f32 %v12619_v7, %v12619_v7  ;;  %v6682_v14 = vmul.f32 %v12622_v53, %v12622_v53  ;;  %v6583_v12 = vmul.f32 0.00390625, %v6509_v23  ;;  %v6745_v58 = vadd.f32 %v6678_v18, %v6677_v50 }
 0xaab   : > { %14203 = vst [vmem:[#allocation45_spill] sm:$0xff] %v12638_v43  ;;  %v6684_v21 = vmul.f32 %v12628_v42, %v12628_v42  ;;  %v12649_v3 = vsub.f32 %v12292_v28, %v6582_v0  ;;  %v12652_v33 = vsub.f32 %v12297_v48, %v6582_v0  ;;  %v6686_v50 = vmul.f32 %v12638_v43, %v12638_v43 }
 0xaac   : > { %6737 = vadd.xlane.f32.xlu1 %v6736_v63  ;;  %6740 = vadd.xlane.f32.xlu0 %v6739_v20  ;;  %v6515_v9 = vpop.xlane.xlu0 %6514  ;;  %v6683_v63 = vmul.f32 %v12625_v40, %v12625_v40  ;;  %v6685_v20 = vmul.f32 %v12635_v24, %v12635_v24  ;;  %v6584_v18 = vmul.f32 0.00390625, %v6512_v10  ;;  %v6518_v8 = vpop.xlane.xlu1 %6517  ;;  %v6748_v23 = vadd.f32 %v6680_v38, %v6679_v16 }
 0xaad   : > { %v12662_v45 = vsub.f32 %v12309_v39, %v6583_v12  ;;  %v6585_v28 = vmul.f32 0.00390625, %v6515_v9  ;;  %v6751_v48 = vadd.f32 %v6682_v14, %v6681_v6  ;;  %v6687_v0 = vmul.f32 %v12649_v3, %v12649_v3 }
 0xaae   : > { %v6586_v43 = vmul.f32 0.00390625, %v6518_v8  ;;  %v6754_v10 = vadd.f32 %v6684_v21, %v6683_v63  ;;  %v12669_v16 = vsub.f32 %v12316_v17, %v6584_v18 }
 0xaaf   : > { %v6690_v14 = vmul.f32 %v12662_v45, %v12662_v45  ;;  %v12679_v9 = vsub.f32 %v12328_v60, %v6585_v28  ;;  %v12682_v63 = vsub.f32 %v12333_v35, %v6585_v28 }
 0xab0   : > { %6743 = vadd.xlane.f32.xlu1 %v6742_v2  ;;  %6746 = vadd.xlane.f32.xlu0 %v6745_v58  ;;  %v12659_v2 = vsub.f32 %v12304_v13, %v6583_v12  ;;  %v6521_v42 = vpop.xlane.xlu0 %6520  ;;  %v6688_v58 = vmul.f32 %v12652_v33, %v12652_v33  ;;  %v12672_v13 = vsub.f32 %v12321_v55, %v6584_v18  ;;  %v6524_v38 = vpop.xlane.xlu1 %6523 }
 0xab1   : > { %v6587_v39 = vmul.f32 0.00390625, %v6521_v42  ;;  %v6757_v12 = vadd.f32 %v6686_v50, %v6685_v20  ;;  %v12685_v55 = vsub.f32 %v12340_v51, %v6586_v43  ;;  %v12688_v42 = vsub.f32 %v12345_v59, %v6586_v43 }
 0xab2   : > { %v6689_v6 = vmul.f32 %v12659_v2, %v12659_v2  ;;  %v6588_v21 = vmul.f32 0.00390625, %v6524_v38  ;;  %v6760_v20 = vadd.f32 %v6688_v58, %v6687_v0  ;;  %v6691_v50 = vmul.f32 %v12669_v16, %v12669_v16 }
 0xab3   : > { %v6692_v60 = vmul.f32 %v12672_v13, %v12672_v13  ;;  %v12695_v35 = vsub.f32 %v12352_v26, %v6587_v39  ;;  %v12698_v18 = vsub.f32 %v12357_v5, %v6587_v39  ;;  %v6693_v51 = vmul.f32 %v12679_v9, %v12679_v9 }
 0xab4   : > { %6749 = vadd.xlane.f32.xlu1 %v6748_v23  ;;  %6752 = vadd.xlane.f32.xlu0 %v6751_v48  ;;  %v6527_v17 = vpop.xlane.xlu0 %6526  ;;  %v6694_v59 = vmul.f32 %v12682_v63, %v12682_v63  ;;  %v6530_v8 = vpop.xlane.xlu1 %6529  ;;  %v6763_v23 = vadd.f32 %v6690_v14, %v6689_v6  ;;  %v6695_v48 = vmul.f32 %v12685_v55, %v12685_v55 }
 0xab5   : > { %v6589_v43 = vmul.f32 0.00390625, %v6527_v17  ;;  %v6696_v26 = vmul.f32 %v12688_v42, %v12688_v42  ;;  %v12709_v5 = vsub.f32 %v12364_v34, %v6588_v21  ;;  %v12712_v0 = vsub.f32 %v12369_v1, %v6588_v21 }
 0xab6   : > { %v6697_v58 = vmul.f32 %v12695_v35, %v12695_v35  ;;  %v6590_v39 = vmul.f32 0.00390625, %v6530_v8  ;;  %v6766_v38 = vadd.f32 %v6692_v60, %v6691_v50  ;;  %v6769_v17 = vadd.f32 %v6694_v59, %v6693_v51  ;;  %v14204_v8 = vld [vmem:[#allocation58_spill] sm:$0xff] }
 0xab7   : > { %v12722_v6 = vsub.f32 %v12381_v47, %v6589_v43  ;;  %v6699_v1 = vmul.f32 %v12709_v5, %v12709_v5  ;;  %v6700_v21 = vmul.f32 %v12712_v0, %v12712_v0 }
 0xab8   : > { %6755 = vadd.xlane.f32.xlu1 %v6754_v10  ;;  %6758 = vadd.xlane.f32.xlu0 %v6757_v12  ;;  %v6533_v28 = vpop.xlane.xlu0 %6532  ;;  %v6698_v10 = vmul.f32 %v12698_v18, %v12698_v18  ;;  %v12719_v12 = vsub.f32 %v12376_v36, %v6589_v43  ;;  %v12729_v50 = vsub.f32 %v12388_v19, %v6590_v39 }
 0xab9   : > { %v6591_v34 = vmul.f32 0.00390625, %v6533_v28  ;;  %v12732_v36 = vsub.f32 %v12393_v11, %v6590_v39  ;;  %v6702_v59 = vmul.f32 %v12722_v6, %v12722_v6  ;;  %v6778_v19 = vadd.f32 %v6700_v21, %v6699_v1 }
 0xaba   : > { %v6775_v60 = vadd.f32 %v6698_v10, %v6697_v58  ;;  %v6701_v51 = vmul.f32 %v12719_v12, %v12719_v12  ;;  %v6703_v11 = vmul.f32 %v12729_v50, %v12729_v50  ;;  %v14206_v58 = vld [vmem:[#allocation53_spill] sm:$0xff] }
 0xabb   : > { %v12739_v43 = vsub.f32 %v12402_v27, %v6591_v34  ;;  %v6704_v28 = vmul.f32 %v12732_v36, %v12732_v36 }
 0xabc   : > { %6761 = vadd.xlane.f32.xlu1 %v6760_v20  ;;  %6764 = vadd.xlane.f32.xlu0 %v6763_v23  ;;  %v6536_v14 = vpop.xlane.xlu1 %6535  ;;  %v6772_v20 = vadd.f32 %v6696_v26, %v6695_v48  ;;  %v12742_v23 = vsub.f32 %v14204_v8, %v6591_v34  ;;  %v14205_v48 = vld [vmem:[#allocation95_spill] sm:$0xff] }
 0xabd   : > { %v6592_v47 = vmul.f32 0.00390625, %v6536_v14  ;;  %v6705_v27 = vmul.f32 %v12739_v43, %v12739_v43 }
 0xabe   : > { %v6706_v39 = vmul.f32 %v12742_v23, %v12742_v23 }
 0xabf   : > { %v12749_v26 = vsub.f32 %v14205_v48, %v6592_v47  ;;  %v12752_v10 = vsub.f32 %v14206_v58, %v6592_v47  ;;  %v14209_v58 = vld [vmem:[#allocation36_spill] sm:$0xff] }
 0xac0   : > { %6767 = vadd.xlane.f32.xlu1 %v6766_v38  ;;  %6770 = vadd.xlane.f32.xlu0 %v6769_v17  ;;  %v6781_v38 = vadd.f32 %v6702_v59, %v6701_v51  ;;  %v6784_v17 = vadd.f32 %v6704_v28, %v6703_v11  ;;  %v6787_v1 = vadd.f32 %v6706_v39, %v6705_v27  ;;  %v14208_v51 = vld [vmem:[#allocation94_spill] sm:$0xff]  ;;  %v14211_v39 = vld [vmem:[#allocation35_spill] sm:$0xff] }
 0xac1   : > { %v6707_v34 = vmul.f32 %v12749_v26, %v12749_v26  ;;  %v6708_v14 = vmul.f32 %v12752_v10, %v12752_v10 }
 0xac3   : > { %v6790_v21 = vadd.f32 %v6708_v14, %v6707_v34 }
 0xac4   : > { %6773 = vadd.xlane.f32.xlu1 %v6772_v20  ;;  %6776 = vadd.xlane.f32.xlu0 %v6775_v60  ;;  %v14207_v60 = vld [vmem:[#allocation59_spill] sm:$0xff] }
 0xac8   : > { %6779 = vadd.xlane.f32.xlu1 %v6778_v19  ;;  %6782 = vadd.xlane.f32.xlu0 %v6781_v38 }
 0xacc   : > { %6785 = vadd.xlane.f32.xlu1 %v6784_v17  ;;  %6788 = vadd.xlane.f32.xlu0 %v6787_v1 }
 0xad0   : > { %6791 = vadd.xlane.f32.xlu1 %v6790_v21 }
 0xb01   : > { %v6539_v20 = vpop.xlane.xlu0 %6538 }
 0xb02   : > { %v6593_v47 = vmul.f32 0.00390625, %v6539_v20 }
 0xb04   : > { %v12763_v8 = vsub.f32 %v14207_v60, %v6593_v47  ;;  %v12766_v59 = vsub.f32 %v14208_v51, %v6593_v47  ;;  %v14213_v47 = vld [vmem:[#allocation62_spill] sm:$0xff]  ;;  %v14215_v51 = vld [vmem:[#allocation63_spill] sm:$0xff] }
 0xb05   : > { %v6542_v19 = vpop.xlane.xlu1 %6541 }
 0xb06   : > { %v6709_v48 = vmul.f32 %v12763_v8, %v12763_v8  ;;  %v6710_v11 = vmul.f32 %v12766_v59, %v12766_v59  ;;  %v6594_v28 = vmul.f32 0.00390625, %v6542_v19 }
 0xb08   : > { %v12773_v27 = vsub.f32 %v14209_v58, %v6594_v28  ;;  %v12776_v38 = vsub.f32 %v14211_v39, %v6594_v28  ;;  %v6793_v34 = vadd.f32 %v6710_v11, %v6709_v48  ;;  %v14217_v39 = vld [vmem:[#allocation92_spill] sm:$0xff] }
 0xb0a   : > { %14210 = vst [vmem:[#allocation49_spill] sm:$0xff] %v12773_v27  ;;  %14212 = vst [vmem:[#allocation75_spill] sm:$0xff] %v12776_v38  ;;  %v6711_v14 = vmul.f32 %v12773_v27, %v12773_v27  ;;  %v6712_v17 = vmul.f32 %v12776_v38, %v12776_v38  ;;  %6794 = vadd.xlane.f32.xlu0 %v6793_v34  ;;  %v14221_v38 = vld [vmem:[#allocation37_spill] sm:$0xff] }
 0xb0c   : > { %v6545_v1 = vpop.xlane.xlu0 %6544  ;;  %v6796_v20 = vadd.f32 %v6712_v17, %v6711_v14 }
 0xb0d   : > { %v6595_v21 = vmul.f32 0.00390625, %v6545_v1  ;;  %v14219_v1 = vld [vmem:[#allocation57_spill] sm:$0xff] }
 0xb0e   : > { %6797 = vadd.xlane.f32.xlu1 %v6796_v20 }
 0xb0f   : > { %v12783_v60 = vsub.f32 %v14213_v47, %v6595_v21  ;;  %v12786_v19 = vsub.f32 %v14215_v51, %v6595_v21 }
 0xb10   : > { %v6548_v28 = vpop.xlane.xlu1 %6547 }
 0xb11   : > { %14214 = vst [vmem:[#allocation73_spill] sm:$0xff] %v12783_v60  ;;  %14216 = vst [vmem:[#allocation76_spill] sm:$0xff] %v12786_v19  ;;  %v6713_v48 = vmul.f32 %v12783_v60, %v12783_v60  ;;  %v6714_v11 = vmul.f32 %v12786_v19, %v12786_v19  ;;  %v6596_v58 = vmul.f32 0.00390625, %v6548_v28  ;;  %v14223_v28 = vld [vmem:[#allocation38_spill] sm:$0xff] }
 0xb13   : > { %v12793_v34 = vsub.f32 %v14217_v39, %v6596_v58  ;;  %v12796_v14 = vsub.f32 %v14219_v1, %v6596_v58  ;;  %v6799_v17 = vadd.f32 %v6714_v11, %v6713_v48  ;;  %v14225_v1 = vld [vmem:[#allocation56_spill] sm:$0xff] }
 0xb15   : > { %14218 = vst [vmem:[#allocation90_spill] sm:$0xff] %v12793_v34  ;;  %14220 = vst [vmem:[#allocation86_spill] sm:$0xff] %v12796_v14  ;;  %v6715_v21 = vmul.f32 %v12793_v34, %v12793_v34  ;;  %v6716_v20 = vmul.f32 %v12796_v14, %v12796_v14  ;;  %v6551_v47 = vpop.xlane.xlu0 %6550  ;;  %6800 = vadd.xlane.f32.xlu0 %v6799_v17  ;;  %v14227_v17 = vld [vmem:[#allocation41_spill] sm:$0xff] }
 0xb16   : > { %v6597_v51 = vmul.f32 0.00390625, %v6551_v47 }
 0xb17   : > { %v6802_v60 = vadd.f32 %v6716_v20, %v6715_v21 }
 0xb18   : > { %v12803_v19 = vsub.f32 %v14221_v38, %v6597_v51  ;;  %v12806_v39 = vsub.f32 %v14223_v28, %v6597_v51  ;;  %v14229_v28 = vld [vmem:[#allocation67_spill] sm:$0xff] }
 0xb19   : > { %v6554_v27 = vpop.xlane.xlu1 %6553  ;;  %6803 = vadd.xlane.f32.xlu1 %v6802_v60 }
 0xb1a   : > { %14222 = vst [vmem:[#allocation46_spill] sm:$0xff] %v12803_v19  ;;  %14224 = vst [vmem:[#allocation65_spill] sm:$0xff] %v12806_v39  ;;  %v6717_v48 = vmul.f32 %v12803_v19, %v12803_v19  ;;  %v6718_v11 = vmul.f32 %v12806_v39, %v12806_v39  ;;  %v6598_v58 = vmul.f32 0.00390625, %v6554_v27  ;;  %v14230_v27 = vld [vmem:[#allocation61_spill] sm:$0xff] }
 0xb1c   : > { %v12813_v14 = vsub.f32 %v14225_v1, %v6598_v58  ;;  %v12816_v21 = vsub.f32 %v14227_v17, %v6598_v58  ;;  %v6805_v38 = vadd.f32 %v6718_v11, %v6717_v48  ;;  %v14232_v17 = vld [vmem:[#allocation42_spill] sm:$0xff] }
 0xb1d   : > { %v6557_v20 = vpop.xlane.xlu0 %6556 }
 0xb1e   : > { %14226 = vst [vmem:[#allocation70_spill] sm:$0xff] %v12813_v14  ;;  %14228 = vst [vmem:[#allocation64_spill] sm:$0xff] %v12816_v21  ;;  %v6719_v47 = vmul.f32 %v12813_v14, %v12813_v14  ;;  %v6720_v60 = vmul.f32 %v12816_v21, %v12816_v21  ;;  %v6599_v51 = vmul.f32 0.00390625, %v6557_v20  ;;  %6806 = vadd.xlane.f32.xlu0 %v6805_v38  ;;  %v14233_v38 = vld [vmem:[#allocation60_spill] sm:$0xff] }
 0xb20   : > { %v12823_v19 = vsub.f32 %v14229_v28, %v6599_v51  ;;  %v12826_v39 = vsub.f32 %v14230_v27, %v6599_v51  ;;  %v6808_v1 = vadd.f32 %v6720_v60, %v6719_v47 }
 0xb21   : > { %v6560_v34 = vpop.xlane.xlu1 %6559 }
 0xb22   : > { %14231 = vst [vmem:[#allocation68_spill] sm:$0xff] %v12826_v39  ;;  %v6721_v48 = vmul.f32 %v12823_v19, %v12823_v19  ;;  %v6722_v11 = vmul.f32 %v12826_v39, %v12826_v39  ;;  %v6600_v58 = vmul.f32 0.00390625, %v6560_v34  ;;  %6809 = vadd.xlane.f32.xlu1 %v6808_v1  ;;  %v14234_v34 = vld [vmem:[#allocation71_spill] sm:$0xff] }
 0xb24   : > { %v12833_v21 = vsub.f32 %v14232_v17, %v6600_v58  ;;  %v12836_v20 = vsub.f32 %v14233_v38, %v6600_v58  ;;  %v6811_v28 = vadd.f32 %v6722_v11, %v6721_v48 }
 0xb25   : > { %v6563_v14 = vpop.xlane.xlu0 %6562 }
 0xb26   : > { %v6723_v47 = vmul.f32 %v12833_v21, %v12833_v21  ;;  %v6724_v60 = vmul.f32 %v12836_v20, %v12836_v20  ;;  %v6601_v51 = vmul.f32 0.00390625, %v6563_v14  ;;  %6812 = vadd.xlane.f32.xlu0 %v6811_v28 }
 0xb28   : > { %v12843_v27 = vsub.f32 %v12522_v29, %v6601_v51  ;;  %v12846_v1 = vsub.f32 %v14234_v34, %v6601_v51  ;;  %v6814_v17 = vadd.f32 %v6724_v60, %v6723_v47 }
 0xb29   : > { %v6566_v39 = vpop.xlane.xlu1 %6565 }
 0xb2a   : > { %14235 = vst [vmem:[#allocation69_spill] sm:$0xff] %v12846_v1  ;;  %v6725_v48 = vmul.f32 %v12843_v27, %v12843_v27  ;;  %v6726_v11 = vmul.f32 %v12846_v1, %v12846_v1  ;;  %v6602_v58 = vmul.f32 0.00390625, %v6566_v39  ;;  %6815 = vadd.xlane.f32.xlu1 %v6814_v17 }
 0xb2c   : > { %v12853_v38 = vsub.f32 %v12534_v41, %v6602_v58  ;;  %v12856_v14 = vsub.f32 %v12537_v31, %v6602_v58  ;;  %v6817_v29 = vadd.f32 %v6726_v11, %v6725_v48 }
 0xb2d   : > { %v6569_v28 = vpop.xlane.xlu0 %6568 }
 0xb2e   : > { %14236 = vst [vmem:[#allocation80_spill] sm:$0xff] %v12853_v38  ;;  %14237 = vst [vmem:[#allocation74_spill] sm:$0xff] %v12856_v14  ;;  %v6727_v47 = vmul.f32 %v12853_v38, %v12853_v38  ;;  %v6728_v60 = vmul.f32 %v12856_v14, %v12856_v14  ;;  %v6603_v51 = vmul.f32 0.00390625, %v6569_v28  ;;  %6818 = vadd.xlane.f32.xlu0 %v6817_v29 }
 0xb30   : > { %v12863_v34 = vsub.f32 %v12558_v44, %v6603_v51  ;;  %v12866_v39 = vsub.f32 %v12561_v54, %v6603_v51  ;;  %v6820_v17 = vadd.f32 %v6728_v60, %v6727_v47 }
 0xb31   : > { %v6572_v41 = vpop.xlane.xlu1 %6571  ;;  %v6735_v31 = vpop.xlane.xlu0 %6734 }
 0xb32   : > { %14238 = vst [vmem:[#allocation87_spill] sm:$0xff] %v12863_v34  ;;  %14239 = vst [vmem:[#allocation72_spill] sm:$0xff] %v12866_v39  ;;  %v6604_v58 = vmul.f32 0.00390625, %v6572_v41  ;;  %v6729_v48 = vmul.f32 %v12863_v34, %v12863_v34  ;;  %v6730_v11 = vmul.f32 %v12866_v39, %v12866_v39  ;;  %v6829_v38 = vmul.f32 0.00390625, %v6735_v31  ;;  %6821 = vadd.xlane.f32.xlu1 %v6820_v17 }
 0xb34   : > { %v12873_v29 = vsub.f32 %v12577_v46, %v6604_v58  ;;  %v12876_v44 = vsub.f32 %v12580_v4, %v6604_v58  ;;  %v6861_v54 = vadd.f32 1e-05, %v6829_v38  ;;  %v6823_v51 = vadd.f32 %v6730_v11, %v6729_v48 }
 0xb35   : > { %v6738_v28 = vpop.xlane.xlu1 %6737  ;;  %v6741_v41 = vpop.xlane.xlu0 %6740 }
 0xb36   : > { %14240 = vst [vmem:[#allocation77_spill] sm:$0xff] %v12873_v29  ;;  %14241 = vst [vmem:[#allocation79_spill] sm:$0xff] %v12876_v44  ;;  %v6731_v47 = vmul.f32 %v12873_v29, %v12873_v29  ;;  %v6732_v60 = vmul.f32 %v12876_v44, %v12876_v44  ;;  %v6830_v34 = vmul.f32 0.00390625, %v6738_v28  ;;  %7997 = vrsqrt.f32 %v6861_v54  ;;  %6824 = vadd.xlane.f32.xlu0 %v6823_v51 }
 0xb37   : > { %v6831_v31 = vmul.f32 0.00390625, %v6741_v41 }
 0xb38   : > { %v6862_v17 = vadd.f32 1e-05, %v6830_v34  ;;  %v6826_v46 = vadd.f32 %v6732_v60, %v6731_v47  ;;  %v7625_v34 = vld [vmem:[%s8289_s23 + $0x2] ss:$4 sm:$0x3] }
 0xb39   : > { %v6863_v39 = vadd.f32 1e-05, %v6831_v31  ;;  %v6744_v4 = vpop.xlane.xlu1 %6743  ;;  %v6747_v38 = vpop.xlane.xlu0 %6746  ;;  %v7626_v60 = vld [vmem:[%s8289_s23 + $0x3] ss:$4 sm:$0x3] }
 0xb3a   : > { %7999 = vrsqrt.f32 %v6862_v17  ;;  %v6832_v58 = vmul.f32 0.00390625, %v6744_v4  ;;  %6827 = vadd.xlane.f32.xlu1 %v6826_v46  ;;  %v6833_v48 = vmul.f32 0.00390625, %v6747_v38  ;;  %v14242_v4 = vld [vmem:[#allocation52_spill] sm:$0xff] }
 0xb3b   : > { %8001 = vrsqrt.f32 %v6863_v39  ;;  %v12885_v46 = vrot.slane %v7625_v34, %v14242_v4  ;;  %v14243_v39 = vld [vmem:[#allocation78_spill] sm:$0xff] }
 0xb3c   : > { %v6864_v11 = vadd.f32 1e-05, %v6832_v58  ;;  %v6865_v29 = vadd.f32 1e-05, %v6833_v48  ;;  %v12888_v38 = vrot.slane %v7625_v34, %v14243_v39 }
 0xb3d   : > { %v6750_v44 = vpop.xlane.xlu1 %6749  ;;  %v6753_v28 = vpop.xlane.xlu0 %6752 }
 0xb3e   : > { %8003 = vrsqrt.f32 %v6864_v11  ;;  %v6834_v54 = vmul.f32 0.00390625, %v6750_v44  ;;  %v6835_v51 = vmul.f32 0.00390625, %v6753_v28  ;;  %v12894_v11 = vrot.slane %v7626_v60, %v14243_v39 }
 0xb3f   : > { %8005 = vrsqrt.f32 %v6865_v29  ;;  %v12891_v29 = vrot.slane %v7626_v60, %v14242_v4 }
 0xb40   : > { %v6866_v47 = vadd.f32 1e-05, %v6834_v54  ;;  %v6867_v41 = vadd.f32 1e-05, %v6835_v51 }
 0xb41   : > { %v6756_v31 = vpop.xlane.xlu1 %6755  ;;  %v6759_v17 = vpop.xlane.xlu0 %6758 }
 0xb42   : > { %8007 = vrsqrt.f32 %v6866_v47  ;;  %v6836_v14 = vmul.f32 0.00390625, %v6756_v31  ;;  %v6837_v58 = vmul.f32 0.00390625, %v6759_v17 }
 0xb43   : > { %8009 = vrsqrt.f32 %v6867_v41  ;;  %v7998_v48 = vpop.eup %7997 }
 0xb44   : > { %v6868_v44 = vadd.f32 1e-05, %v6836_v14  ;;  %v6925_v28 = vmul.f32 %v7998_v48, %v12541_v62  ;;  %v6926_v54 = vmul.f32 %v7998_v48, %v12544_v22  ;;  %v6869_v51 = vadd.f32 1e-05, %v6837_v58 }
 0xb45   : > { %v6762_v47 = vpop.xlane.xlu1 %6761  ;;  %v6765_v31 = vpop.xlane.xlu0 %6764 }
 0xb46   : > { %8011 = vrsqrt.f32 %v6868_v44  ;;  %v6838_v34 = vmul.f32 0.00390625, %v6762_v47  ;;  %v7000_v41 = vmul.f32 %v12885_v46, %v6925_v28  ;;  %v7001_v17 = vmul.f32 %v12888_v38, %v6926_v54 }
 0xb47   : > { %v8000_v1 = vpop.eup %7999  ;;  %8013 = vrsqrt.f32 %v6869_v51  ;;  %v6839_v4 = vmul.f32 0.00390625, %v6765_v31 }
 0xb48   : > { %v8002_v14 = vpop.eup %8001  ;;  %v6927_v60 = vmul.f32 %v8000_v1, %v12550_v30  ;;  %v6928_v39 = vmul.f32 %v8000_v1, %v12553_v61  ;;  %v6870_v62 = vadd.f32 1e-05, %v6838_v34  ;;  %v12903_v22 = vadd.f32 %v12891_v29, %v7000_v41 }
 0xb49   : > { %v12906_v58 = vadd.f32 %v12894_v11, %v7001_v17  ;;  %v6929_v48 = vmul.f32 %v8002_v14, %v12564_v49  ;;  %v6930_v44 = vmul.f32 %v8002_v14, %v12567_v32  ;;  %v6768_v28 = vpop.xlane.xlu1 %6767  ;;  %v6871_v47 = vadd.f32 1e-05, %v6839_v4  ;;  %v6771_v30 = vpop.xlane.xlu0 %6770 }
 0xb4a   : > { %v7002_v54 = vmul.f32 %v12885_v46, %v6927_v60  ;;  %v7003_v51 = vmul.f32 %v12888_v38, %v6928_v39  ;;  %8015 = vrsqrt.f32 %v6870_v62  ;;  %7139 = vst [vmem:[#allocation2 + $0xb0] sm:$0xff] %v12903_v22  ;;  %v6841_v49 = vmul.f32 0.00390625, %v6771_v30 }
 0xb4b   : > { %v8004_v61 = vpop.eup %8003  ;;  %7140 = vst [vmem:[#allocation2 + $0x1b0] sm:$0xff] %v12906_v58  ;;  %v7004_v1 = vmul.f32 %v12885_v46, %v6929_v48  ;;  %v7005_v31 = vmul.f32 %v12888_v38, %v6930_v44  ;;  %v6840_v34 = vmul.f32 0.00390625, %v6768_v28  ;;  %8017 = vrsqrt.f32 %v6871_v47 }
 0xb4c   : > { %v8006_v32 = vpop.eup %8005  ;;  %v12917_v41 = vadd.f32 %v12891_v29, %v7002_v54  ;;  %v12920_v17 = vadd.f32 %v12894_v11, %v7003_v51  ;;  %v6931_v4 = vmul.f32 %v8004_v61, %v12587_v56  ;;  %v6932_v14 = vmul.f32 %v8004_v61, %v12590_v57 }
 0xb4d   : > { %v12925_v60 = vadd.f32 %v12891_v29, %v7004_v1  ;;  %v12928_v39 = vadd.f32 %v12894_v11, %v7005_v31  ;;  %v6933_v62 = vmul.f32 %v8006_v32, %v12599_v52  ;;  %v6934_v48 = vmul.f32 %v8006_v32, %v12602_v25  ;;  %v6774_v44 = vpop.xlane.xlu1 %6773  ;;  %v6777_v54 = vpop.xlane.xlu0 %6776 }
 0xb4e   : > { %7141 = vst [vmem:[#allocation2 + $0xd8] sm:$0xff] %v12917_v41  ;;  %7142 = vst [vmem:[#allocation2 + $0x18] sm:$0xff] %v12920_v17  ;;  %v7006_v28 = vmul.f32 %v12885_v46, %v6931_v4  ;;  %v7007_v56 = vmul.f32 %v12888_v38, %v6932_v14  ;;  %v6873_v57 = vadd.f32 1e-05, %v6841_v49  ;;  %v6872_v30 = vadd.f32 1e-05, %v6840_v34 }
 0xb4f   : > { %v8008_v51 = vpop.eup %8007  ;;  %7143 = vst [vmem:[#allocation2 + $0x50] sm:$0xff] %v12925_v60  ;;  %7144 = vst [vmem:[#allocation2 + $0x168] sm:$0xff] %v12928_v39  ;;  %v7008_v52 = vmul.f32 %v12885_v46, %v6933_v62  ;;  %v7009_v25 = vmul.f32 %v12888_v38, %v6934_v48  ;;  %v6843_v61 = vmul.f32 0.00390625, %v6777_v54 }
 0xb50   : > { %v8010_v1 = vpop.eup %8009  ;;  %v12941_v31 = vadd.f32 %v12891_v29, %v7006_v28  ;;  %v12944_v32 = vadd.f32 %v12894_v11, %v7007_v56  ;;  %v6935_v47 = vmul.f32 %v8008_v51, %v12609_v37  ;;  %v6936_v49 = vmul.f32 %v8008_v51, %v12612_v15 }
 0xb51   : > { %v12949_v4 = vadd.f32 %v12891_v29, %v7008_v52  ;;  %v12952_v14 = vadd.f32 %v12894_v11, %v7009_v25  ;;  %v6937_v34 = vmul.f32 %v8010_v1, %v12619_v7  ;;  %v6938_v62 = vmul.f32 %v8010_v1, %v12622_v53  ;;  %v6780_v48 = vpop.xlane.xlu1 %6779  ;;  %v6783_v56 = vpop.xlane.xlu0 %6782 }
 0xb52   : > { %7145 = vst [vmem:[#allocation2 + $0x130] sm:$0xff] %v12941_v31  ;;  %7146 = vst [vmem:[#allocation2 + $0x48] sm:$0xff] %v12944_v32  ;;  %v7010_v28 = vmul.f32 %v12885_v46, %v6935_v47  ;;  %v7011_v37 = vmul.f32 %v12888_v38, %v6936_v49  ;;  %8019 = vrsqrt.f32 %v6873_v57  ;;  %v6875_v15 = vadd.f32 1e-05, %v6843_v61  ;;  %v14245_v61 = vld [vmem:[#allocation66_spill] sm:$0xff] }
 0xb53   : > { %14244 = vst [vmem:[#allocation81_spill] sm:$0xff] %v12952_v14  ;;  %v8012_v54 = vpop.eup %8011  ;;  %7147 = vst [vmem:[#allocation2 + $0x180] sm:$0xff] %v12949_v4  ;;  %v7012_v7 = vmul.f32 %v12885_v46, %v6937_v34  ;;  %v7013_v53 = vmul.f32 %v12888_v38, %v6938_v62  ;;  %8021 = vrsqrt.f32 %v6872_v30  ;;  %v6842_v51 = vmul.f32 0.00390625, %v6774_v44  ;;  %v14246_v44 = vld [vmem:[#allocation45_spill] sm:$0xff] }
 0xb54   : > { %7148 = vst [vmem:[#allocation2 + $0x110] sm:$0xff] %v12952_v14  ;;  %v8014_v52 = vpop.eup %8013  ;;  %v12965_v25 = vadd.f32 %v12891_v29, %v7010_v28  ;;  %v12968_v1 = vadd.f32 %v12894_v11, %v7011_v37  ;;  %v6939_v57 = vmul.f32 %v8012_v54, %v12625_v40  ;;  %v6940_v47 = vmul.f32 %v8012_v54, %v14245_v61 }
 0xb55   : > { %v12973_v49 = vadd.f32 %v12891_v29, %v7012_v7  ;;  %v12976_v34 = vadd.f32 %v12894_v11, %v7013_v53  ;;  %v6941_v30 = vmul.f32 %v8014_v52, %v12635_v24  ;;  %v6942_v62 = vmul.f32 %v8014_v52, %v14246_v44  ;;  %v6786_v14 = vpop.xlane.xlu1 %6785  ;;  %v6789_v61 = vpop.xlane.xlu0 %6788 }
 0xb56   : > { %7149 = vst [vmem:[#allocation2 + $0x118] sm:$0xff] %v12965_v25  ;;  %7150 = vst [vmem:[#allocation2 + $0x98] sm:$0xff] %v12968_v1  ;;  %v7014_v28 = vmul.f32 %v12885_v46, %v6939_v57  ;;  %v7015_v40 = vmul.f32 %v12888_v38, %v6940_v47  ;;  %8023 = vrsqrt.f32 %v6875_v15  ;;  %v6874_v37 = vadd.f32 1e-05, %v6842_v51 }
 0xb57   : > { %v8016_v54 = vpop.eup %8015  ;;  %7151 = vst [vmem:[#allocation2 + $0x120] sm:$0xff] %v12973_v49  ;;  %7152 = vst [vmem:[#allocation2 + $0x150] sm:$0xff] %v12976_v34  ;;  %v7016_v24 = vmul.f32 %v12885_v46, %v6941_v30  ;;  %v7017_v7 = vmul.f32 %v12888_v38, %v6942_v62  ;;  %v6845_v53 = vmul.f32 0.00390625, %v6783_v56  ;;  %v6844_v52 = vmul.f32 0.00390625, %v6780_v48 }
 0xb58   : > { %v12989_v44 = vadd.f32 %v12891_v29, %v7014_v28  ;;  %v12992_v57 = vadd.f32 %v12894_v11, %v7015_v40  ;;  %v6943_v15 = vmul.f32 %v8016_v54, %v12649_v3  ;;  %v6944_v51 = vmul.f32 %v8016_v54, %v12652_v33  ;;  %v8018_v33 = vpop.eup %8017 }
 0xb59   : > { %v12997_v47 = vadd.f32 %v12891_v29, %v7016_v24  ;;  %v13000_v30 = vadd.f32 %v12894_v11, %v7017_v7  ;;  %8025 = vrsqrt.f32 %v6874_v37  ;;  %v6877_v56 = vadd.f32 1e-05, %v6845_v53  ;;  %v6792_v48 = vpop.xlane.xlu1 %6791 }
 0xb5a   : > { %7153 = vst [vmem:[#allocation2 + $0x108] sm:$0xff] %v12989_v44  ;;  %7154 = vst [vmem:[#allocation2 + $0x60] sm:$0xff] %v12992_v57  ;;  %v7018_v62 = vmul.f32 %v12885_v46, %v6943_v15  ;;  %v7019_v28 = vmul.f32 %v12888_v38, %v6944_v51  ;;  %v6876_v3 = vadd.f32 1e-05, %v6844_v52  ;;  %v6847_v40 = vmul.f32 0.00390625, %v6789_v61 }
 0xb5b   : > { %14247 = vst [vmem:[#allocation83_spill] sm:$0xff] %v13000_v30  ;;  %7155 = vst [vmem:[#allocation2 + $0xe0] sm:$0xff] %v12997_v47  ;;  %8027 = vrsqrt.f32 %v6877_v56  ;;  %v6846_v54 = vmul.f32 0.00390625, %v6786_v14  ;;  %v6848_v37 = vmul.f32 0.00390625, %v6792_v48  ;;  %v6945_v24 = vmul.f32 %v8018_v33, %v12659_v2 }
 0xb5c   : > { %7156 = vst [vmem:[#allocation2 + $0x188] sm:$0xff] %v13000_v30  ;;  %v6946_v7 = vmul.f32 %v8018_v33, %v12662_v45  ;;  %v13011_v53 = vadd.f32 %v12891_v29, %v7018_v62  ;;  %v13014_v15 = vadd.f32 %v12894_v11, %v7019_v28  ;;  %8029 = vrsqrt.f32 %v6876_v3 }
 0xb5d   : > { %v6879_v52 = vadd.f32 1e-05, %v6847_v40  ;;  %v6878_v61 = vadd.f32 1e-05, %v6846_v54  ;;  %v7020_v51 = vmul.f32 %v12885_v46, %v6945_v24  ;;  %v6880_v2 = vadd.f32 1e-05, %v6848_v37 }
 0xb5e   : > { %v7021_v30 = vmul.f32 %v12888_v38, %v6946_v7  ;;  %7157 = vst [vmem:[#allocation2 + $0x138] sm:$0xff] %v13011_v53  ;;  %7158 = vst [vmem:[#allocation2 + $0x140] sm:$0xff] %v13014_v15 }
 0xb5f   : > { %v8020_v14 = vpop.eup %8019  ;;  %8031 = vrsqrt.f32 %v6879_v52  ;;  %v13021_v56 = vadd.f32 %v12891_v29, %v7020_v51 }
 0xb60   : > { %v8022_v45 = vpop.eup %8021  ;;  %v13024_v48 = vadd.f32 %v12894_v11, %v7021_v30  ;;  %v6949_v62 = vmul.f32 %v8020_v14, %v12679_v9  ;;  %v6950_v28 = vmul.f32 %v8020_v14, %v12682_v63  ;;  %8033 = vrsqrt.f32 %v6878_v61 }
 0xb61   : > { %v6947_v3 = vmul.f32 %v8022_v45, %v12669_v16  ;;  %v6948_v40 = vmul.f32 %v8022_v45, %v12672_v13  ;;  %7159 = vst [vmem:[#allocation2 + $0x80] sm:$0xff] %v13021_v56  ;;  %8035 = vrsqrt.f32 %v6880_v2 }
 0xb62   : > { %7160 = vst [vmem:[#allocation2 + $0x1a8] sm:$0xff] %v13024_v48  ;;  %v7024_v33 = vmul.f32 %v12885_v46, %v6949_v62  ;;  %v7025_v54 = vmul.f32 %v12888_v38, %v6950_v28 }
 0xb63   : > { %v8024_v30 = vpop.eup %8023  ;;  %v7022_v37 = vmul.f32 %v12885_v46, %v6947_v3  ;;  %v7023_v9 = vmul.f32 %v12888_v38, %v6948_v40 }
 0xb64   : > { %v13037_v63 = vadd.f32 %v12891_v29, %v7024_v33  ;;  %v13040_v16 = vadd.f32 %v12894_v11, %v7025_v54  ;;  %v6953_v13 = vmul.f32 %v8024_v30, %v12695_v35  ;;  %v6954_v24 = vmul.f32 %v8024_v30, %v12698_v18 }
 0xb65   : > { %v13045_v7 = vadd.f32 %v12891_v29, %v7022_v37  ;;  %v13048_v52 = vadd.f32 %v12894_v11, %v7023_v9 }
 0xb66   : > { %v8026_v61 = vpop.eup %8025  ;;  %7163 = vst [vmem:[#allocation2 + $0x1e8] sm:$0xff] %v13037_v63  ;;  %7164 = vst [vmem:[#allocation2 + $0xf8] sm:$0xff] %v13040_v16  ;;  %v7028_v51 = vmul.f32 %v12885_v46, %v6953_v13  ;;  %v7029_v2 = vmul.f32 %v12888_v38, %v6954_v24 }
 0xb67   : > { %7161 = vst [vmem:[#allocation2 + $0x1b8] sm:$0xff] %v13045_v7  ;;  %7162 = vst [vmem:[#allocation2 + $0x28] sm:$0xff] %v13048_v52  ;;  %v6951_v35 = vmul.f32 %v8026_v61, %v12685_v55  ;;  %v6952_v18 = vmul.f32 %v8026_v61, %v12688_v42 }
 0xb68   : > { %v8028_v14 = vpop.eup %8027  ;;  %v13059_v45 = vadd.f32 %v12891_v29, %v7028_v51  ;;  %v13062_v62 = vadd.f32 %v12894_v11, %v7029_v2 }
 0xb69   : > { %v7026_v28 = vmul.f32 %v12885_v46, %v6951_v35  ;;  %v7027_v3 = vmul.f32 %v12888_v38, %v6952_v18  ;;  %v6957_v40 = vmul.f32 %v8028_v14, %v12719_v12  ;;  %v6958_v33 = vmul.f32 %v8028_v14, %v12722_v6  ;;  %v8030_v54 = vpop.eup %8029 }
 0xb6a   : > { %7167 = vst [vmem:[#allocation2 + $0x1e0] sm:$0xff] %v13059_v45  ;;  %7168 = vst [vmem:[#allocation2] sm:$0xff] %v13062_v62  ;;  %v6955_v12 = vmul.f32 %v8030_v54, %v12709_v5  ;;  %v6956_v6 = vmul.f32 %v8030_v54, %v12712_v0 }
 0xb6b   : > { %v13071_v55 = vadd.f32 %v12891_v29, %v7026_v28  ;;  %v13074_v42 = vadd.f32 %v12894_v11, %v7027_v3  ;;  %v7032_v30 = vmul.f32 %v12885_v46, %v6957_v40  ;;  %v7033_v37 = vmul.f32 %v12888_v38, %v6958_v33 }
 0xb6c   : > { %v8032_v9 = vpop.eup %8031  ;;  %v7030_v35 = vmul.f32 %v12885_v46, %v6955_v12  ;;  %v7031_v5 = vmul.f32 %v12888_v38, %v6956_v6 }
 0xb6d   : > { %7165 = vst [vmem:[#allocation2 + $0x160] sm:$0xff] %v13071_v55  ;;  %7166 = vst [vmem:[#allocation2 + $0x30] sm:$0xff] %v13074_v42  ;;  %v13083_v13 = vadd.f32 %v12891_v29, %v7032_v30  ;;  %v13086_v24 = vadd.f32 %v12894_v11, %v7033_v37  ;;  %v6961_v61 = vmul.f32 %v8032_v9, %v12739_v43  ;;  %v8034_v2 = vpop.eup %8033 }
 0xb6e   : > { %v6962_v51 = vmul.f32 %v8032_v9, %v12742_v23  ;;  %v8036_v0 = vpop.eup %8035  ;;  %v6959_v28 = vmul.f32 %v8034_v2, %v12729_v50  ;;  %v6960_v43 = vmul.f32 %v8034_v2, %v12732_v36  ;;  %v13099_v23 = vadd.f32 %v12891_v29, %v7030_v35 }
 0xb6f   : > { %7171 = vst [vmem:[#allocation2 + $0x148] sm:$0xff] %v13083_v13  ;;  %7172 = vst [vmem:[#allocation2 + $0x1d0] sm:$0xff] %v13086_v24  ;;  %v7036_v18 = vmul.f32 %v12885_v46, %v6961_v61  ;;  %v13102_v3 = vadd.f32 %v12894_v11, %v7031_v5  ;;  %v6963_v40 = vmul.f32 %v8036_v0, %v12749_v26 }
 0xb70   : > { %v7037_v14 = vmul.f32 %v12888_v38, %v6962_v51  ;;  %v6964_v33 = vmul.f32 %v8036_v0, %v12752_v10  ;;  %v7034_v50 = vmul.f32 %v12885_v46, %v6959_v28  ;;  %v7035_v36 = vmul.f32 %v12888_v38, %v6960_v43  ;;  %7169 = vst [vmem:[#allocation2 + $0xf0] sm:$0xff] %v13099_v23 }
 0xb71   : > { %v13107_v54 = vadd.f32 %v12891_v29, %v7036_v18  ;;  %7170 = vst [vmem:[#allocation2 + $0x8] sm:$0xff] %v13102_v3  ;;  %v7038_v37 = vmul.f32 %v12885_v46, %v6963_v40 }
 0xb72   : > { %v13110_v30 = vadd.f32 %v12894_v11, %v7037_v14  ;;  %v7039_v26 = vmul.f32 %v12888_v38, %v6964_v33  ;;  %v13121_v10 = vadd.f32 %v12891_v29, %v7034_v50  ;;  %v13124_v9 = vadd.f32 %v12894_v11, %v7035_v36 }
 0xb73   : > { %7175 = vst [vmem:[#allocation2 + $0x40] sm:$0xff] %v13107_v54  ;;  %v13127_v12 = vadd.f32 %v12891_v29, %v7038_v37 }
 0xb74   : > { %7176 = vst [vmem:[#allocation2 + $0x1f8] sm:$0xff] %v13110_v30  ;;  %v13130_v6 = vadd.f32 %v12894_v11, %v7039_v26  ;;  %7173 = vst [vmem:[#allocation2 + $0x100] sm:$0xff] %v13121_v10 }
 0xb75   : > { %7174 = vst [vmem:[#allocation2 + $0xc8] sm:$0xff] %v13124_v9  ;;  %7177 = vst [vmem:[#allocation2 + $0x20] sm:$0xff] %v13127_v12 }
 0xb76   : > { %7178 = vst [vmem:[#allocation2 + $0x128] sm:$0xff] %v13130_v6 }
 0xb93   : > { %v6795_v61 = vpop.xlane.xlu0 %6794 }
 0xb94   : > { %v6849_v51 = vmul.f32 0.00390625, %v6795_v61 }
 0xb96   : > { %v6881_v2 = vadd.f32 1e-05, %v6849_v51 }
 0xb97   : > { %v6798_v35 = vpop.xlane.xlu1 %6797 }
 0xb98   : > { %8037 = vrsqrt.f32 %v6881_v2  ;;  %v6850_v5 = vmul.f32 0.00390625, %v6798_v35 }
 0xb9a   : > { %v6882_v0 = vadd.f32 1e-05, %v6850_v5 }
 0xb9c   : > { %8039 = vrsqrt.f32 %v6882_v0 }
 0xb9e   : > { %v6801_v18 = vpop.xlane.xlu0 %6800 }
 0xb9f   : > { %v6851_v14 = vmul.f32 0.00390625, %v6801_v18 }
 0xba1   : > { %v6883_v28 = vadd.f32 1e-05, %v6851_v14  ;;  %v14249_v14 = vld [vmem:[#allocation49_spill] sm:$0xff] }
 0xba2   : > { %v6804_v43 = vpop.xlane.xlu1 %6803 }
 0xba3   : > { %8041 = vrsqrt.f32 %v6883_v28  ;;  %v6852_v40 = vmul.f32 0.00390625, %v6804_v43 }
 0xba5   : > { %v6884_v33 = vadd.f32 1e-05, %v6852_v40  ;;  %v8038_v50 = vpop.eup %8037 }
 0xba6   : > { %v6965_v36 = vmul.f32 %v8038_v50, %v12763_v8  ;;  %v6966_v37 = vmul.f32 %v8038_v50, %v12766_v59  ;;  %v14250_v8 = vld [vmem:[#allocation75_spill] sm:$0xff] }
 0xba7   : > { %8043 = vrsqrt.f32 %v6884_v33  ;;  %v6807_v26 = vpop.xlane.xlu0 %6806 }
 0xba8   : > { %v6853_v61 = vmul.f32 0.00390625, %v6807_v26  ;;  %v7040_v51 = vmul.f32 %v12885_v46, %v6965_v36  ;;  %v7041_v2 = vmul.f32 %v12888_v38, %v6966_v37 }
 0xba9   : > { %v8040_v35 = vpop.eup %8039 }
 0xbaa   : > { %v6885_v5 = vadd.f32 1e-05, %v6853_v61  ;;  %v13141_v0 = vadd.f32 %v12891_v29, %v7040_v51  ;;  %v13144_v18 = vadd.f32 %v12894_v11, %v7041_v2  ;;  %v6967_v28 = vmul.f32 %v8040_v35, %v14249_v14  ;;  %v14254_v14 = vld [vmem:[#allocation76_spill] sm:$0xff] }
 0xbab   : > { %v6968_v43 = vmul.f32 %v8040_v35, %v14250_v8  ;;  %v6810_v59 = vpop.xlane.xlu1 %6809  ;;  %v14253_v35 = vld [vmem:[#allocation73_spill] sm:$0xff] }
 0xbac   : > { %14248 = vst [vmem:[#allocation89_spill] sm:$0xff] %v13144_v18  ;;  %8045 = vrsqrt.f32 %v6885_v5  ;;  %v6854_v40 = vmul.f32 0.00390625, %v6810_v59  ;;  %7179 = vst [vmem:[#allocation2 + $0x1a0] sm:$0xff] %v13141_v0  ;;  %v7042_v33 = vmul.f32 %v12885_v46, %v6967_v28 }
 0xbad   : > { %7180 = vst [vmem:[#allocation2 + $0x1f0] sm:$0xff] %v13144_v18  ;;  %v7043_v50 = vmul.f32 %v12888_v38, %v6968_v43 }
 0xbae   : > { %v6886_v36 = vadd.f32 1e-05, %v6854_v40  ;;  %v13153_v37 = vadd.f32 %v12891_v29, %v7042_v33 }
 0xbaf   : > { %v13156_v26 = vadd.f32 %v12894_v11, %v7043_v50  ;;  %v6813_v61 = vpop.xlane.xlu0 %6812 }
 0xbb0   : > { %14251 = vst [vmem:[#allocation82_spill] sm:$0xff] %v13153_v37  ;;  %v8042_v51 = vpop.eup %8041  ;;  %8047 = vrsqrt.f32 %v6886_v36  ;;  %v6855_v2 = vmul.f32 0.00390625, %v6813_v61  ;;  %7181 = vst [vmem:[#allocation2 + $0xe8] sm:$0xff] %v13153_v37 }
 0xbb1   : > { %14252 = vst [vmem:[#allocation88_spill] sm:$0xff] %v13156_v26  ;;  %7182 = vst [vmem:[#allocation2 + $0x78] sm:$0xff] %v13156_v26  ;;  %v6969_v5 = vmul.f32 %v8042_v51, %v14253_v35  ;;  %v6970_v28 = vmul.f32 %v8042_v51, %v14254_v14  ;;  %v14256_v26 = vld [vmem:[#allocation90_spill] sm:$0xff] }
 0xbb2   : > { %v6887_v8 = vadd.f32 1e-05, %v6855_v2  ;;  %v14257_v35 = vld [vmem:[#allocation86_spill] sm:$0xff] }
 0xbb3   : > { %v7044_v43 = vmul.f32 %v12885_v46, %v6969_v5  ;;  %v7045_v59 = vmul.f32 %v12888_v38, %v6970_v28  ;;  %v6816_v40 = vpop.xlane.xlu1 %6815 }
 0xbb4   : > { %v8044_v33 = vpop.eup %8043  ;;  %8049 = vrsqrt.f32 %v6887_v8  ;;  %v6856_v50 = vmul.f32 0.00390625, %v6816_v40 }
 0xbb5   : > { %v13165_v36 = vadd.f32 %v12891_v29, %v7044_v43  ;;  %v13168_v61 = vadd.f32 %v12894_v11, %v7045_v59  ;;  %v6971_v37 = vmul.f32 %v8044_v33, %v14256_v26  ;;  %v6972_v18 = vmul.f32 %v8044_v33, %v14257_v35  ;;  %v14260_v59 = vld [vmem:[#allocation46_spill] sm:$0xff]  ;;  %v14261_v33 = vld [vmem:[#allocation65_spill] sm:$0xff] }
 0xbb6   : > { %v6888_v51 = vadd.f32 1e-05, %v6856_v50 }
 0xbb7   : > { %14255 = vst [vmem:[#allocation84_spill] sm:$0xff] %v13168_v61  ;;  %7183 = vst [vmem:[#allocation2 + $0x70] sm:$0xff] %v13165_v36  ;;  %v7046_v2 = vmul.f32 %v12885_v46, %v6971_v37  ;;  %v7047_v5 = vmul.f32 %v12888_v38, %v6972_v18  ;;  %v6819_v14 = vpop.xlane.xlu0 %6818 }
 0xbb8   : > { %7184 = vst [vmem:[#allocation2 + $0x90] sm:$0xff] %v13168_v61  ;;  %8051 = vrsqrt.f32 %v6888_v51  ;;  %v6857_v28 = vmul.f32 0.00390625, %v6819_v14 }
 0xbb9   : > { %v8046_v8 = vpop.eup %8045  ;;  %v13177_v43 = vadd.f32 %v12891_v29, %v7046_v2  ;;  %v13180_v26 = vadd.f32 %v12894_v11, %v7047_v5 }
 0xbba   : > { %v6973_v40 = vmul.f32 %v8046_v8, %v14260_v59  ;;  %v6974_v50 = vmul.f32 %v8046_v8, %v14261_v33  ;;  %v6889_v35 = vadd.f32 1e-05, %v6857_v28  ;;  %v14264_v8 = vld [vmem:[#allocation70_spill] sm:$0xff]  ;;  %v14265_v33 = vld [vmem:[#allocation64_spill] sm:$0xff] }
 0xbbb   : > { %14258 = vst [vmem:[#allocation51_spill] sm:$0xff] %v13177_v43  ;;  %14259 = vst [vmem:[#allocation40_spill] sm:$0xff] %v13180_v26  ;;  %v6822_v18 = vpop.xlane.xlu1 %6821 }
 0xbbc   : > { %7185 = vst [vmem:[#allocation2 + $0x1d8] sm:$0xff] %v13177_v43  ;;  %7186 = vst [vmem:[#allocation2 + $0xd0] sm:$0xff] %v13180_v26  ;;  %v7048_v37 = vmul.f32 %v12885_v46, %v6973_v40  ;;  %v7049_v51 = vmul.f32 %v12888_v38, %v6974_v50  ;;  %8053 = vrsqrt.f32 %v6889_v35  ;;  %v6858_v2 = vmul.f32 0.00390625, %v6822_v18 }
 0xbbd   : > { %v8048_v14 = vpop.eup %8047 }
 0xbbe   : > { %v13189_v5 = vadd.f32 %v12891_v29, %v7048_v37  ;;  %v13192_v59 = vadd.f32 %v12894_v11, %v7049_v51  ;;  %v6975_v28 = vmul.f32 %v8048_v14, %v14264_v8  ;;  %v6976_v43 = vmul.f32 %v8048_v14, %v14265_v33  ;;  %v14266_v14 = vld [vmem:[#allocation68_spill] sm:$0xff] }
 0xbbf   : > { %v6890_v61 = vadd.f32 1e-05, %v6858_v2  ;;  %v6825_v26 = vpop.xlane.xlu0 %6824 }
 0xbc0   : > { %14262 = vst [vmem:[#allocation39_spill] sm:$0xff] %v13189_v5  ;;  %14263 = vst [vmem:[#allocation43_spill] sm:$0xff] %v13192_v59  ;;  %v7050_v40 = vmul.f32 %v12885_v46, %v6975_v28  ;;  %v7051_v50 = vmul.f32 %v12888_v38, %v6976_v43  ;;  %v6859_v35 = vmul.f32 0.00390625, %v6825_v26 }
 0xbc1   : > { %7187 = vst [vmem:[#allocation2 + $0xb8] sm:$0xff] %v13189_v5  ;;  %7188 = vst [vmem:[#allocation2 + $0x88] sm:$0xff] %v13192_v59  ;;  %v8050_v18 = vpop.eup %8049  ;;  %8055 = vrsqrt.f32 %v6890_v61 }
 0xbc2   : > { %v13201_v37 = vadd.f32 %v12891_v29, %v7050_v40  ;;  %v13204_v51 = vadd.f32 %v12894_v11, %v7051_v50  ;;  %v6977_v2 = vmul.f32 %v8050_v18, %v12823_v19  ;;  %v6978_v8 = vmul.f32 %v8050_v18, %v14266_v14 }
 0xbc3   : > { %v6828_v33 = vpop.xlane.xlu1 %6827  ;;  %v6891_v5 = vadd.f32 1e-05, %v6859_v35 }
 0xbc4   : > { %v6860_v59 = vmul.f32 0.00390625, %v6828_v33  ;;  %7189 = vst [vmem:[#allocation2 + $0xa8] sm:$0xff] %v13201_v37  ;;  %7190 = vst [vmem:[#allocation2 + $0x1c8] sm:$0xff] %v13204_v51  ;;  %v7052_v43 = vmul.f32 %v12885_v46, %v6977_v2  ;;  %v7053_v61 = vmul.f32 %v12888_v38, %v6978_v8  ;;  %v14268_v8 = vld [vmem:[#allocation69_spill] sm:$0xff] }
 0xbc5   : > { %v8052_v26 = vpop.eup %8051  ;;  %8057 = vrsqrt.f32 %v6891_v5 }
 0xbc6   : > { %v6892_v28 = vadd.f32 1e-05, %v6860_v59  ;;  %v13213_v40 = vadd.f32 %v12891_v29, %v7052_v43  ;;  %v13216_v19 = vadd.f32 %v12894_v11, %v7053_v61  ;;  %v6979_v50 = vmul.f32 %v8052_v26, %v12833_v21 }
 0xbc7   : > { %v6980_v35 = vmul.f32 %v8052_v26, %v12836_v20 }
 0xbc8   : > { %8059 = vrsqrt.f32 %v6892_v28  ;;  %7191 = vst [vmem:[#allocation2 + $0x170] sm:$0xff] %v13213_v40  ;;  %7192 = vst [vmem:[#allocation2 + $0x178] sm:$0xff] %v13216_v19  ;;  %v7054_v18 = vmul.f32 %v12885_v46, %v6979_v50  ;;  %v14271_v50 = vld [vmem:[#allocation80_spill] sm:$0xff] }
 0xbc9   : > { %v7055_v5 = vmul.f32 %v12888_v38, %v6980_v35  ;;  %v8054_v59 = vpop.eup %8053 }
 0xbca   : > { %v13225_v2 = vadd.f32 %v12891_v29, %v7054_v18  ;;  %v6981_v21 = vmul.f32 %v8054_v59, %v12843_v27  ;;  %v6982_v20 = vmul.f32 %v8054_v59, %v14268_v8  ;;  %v14272_v27 = vld [vmem:[#allocation74_spill] sm:$0xff] }
 0xbcb   : > { %v13228_v14 = vadd.f32 %v12894_v11, %v7055_v5 }
 0xbcc   : > { %7193 = vst [vmem:[#allocation2 + $0x68] sm:$0xff] %v13225_v2  ;;  %v7056_v33 = vmul.f32 %v12885_v46, %v6981_v21  ;;  %v7057_v43 = vmul.f32 %v12888_v38, %v6982_v20 }
 0xbcd   : > { %14267 = vst [vmem:[#allocation54_spill] sm:$0xff] %v13228_v14  ;;  %7194 = vst [vmem:[#allocation2 + $0x190] sm:$0xff] %v13228_v14 }
 0xbce   : > { %v8056_v61 = vpop.eup %8055  ;;  %v13237_v26 = vadd.f32 %v12891_v29, %v7056_v33  ;;  %v13240_v28 = vadd.f32 %v12894_v11, %v7057_v43  ;;  %v14273_v33 = vld [vmem:[#allocation87_spill] sm:$0xff] }
 0xbcf   : > { %v6983_v35 = vmul.f32 %v8056_v61, %v14271_v50  ;;  %v6984_v18 = vmul.f32 %v8056_v61, %v14272_v27  ;;  %v14274_v50 = vld [vmem:[#allocation72_spill] sm:$0xff] }
 0xbd0   : > { %14269 = vst [vmem:[#allocation44_spill] sm:$0xff] %v13237_v26  ;;  %14270 = vst [vmem:[#allocation85_spill] sm:$0xff] %v13240_v28 }
 0xbd1   : > { %7195 = vst [vmem:[#allocation2 + $0x198] sm:$0xff] %v13237_v26  ;;  %7196 = vst [vmem:[#allocation2 + $0x38] sm:$0xff] %v13240_v28  ;;  %v7058_v5 = vmul.f32 %v12885_v46, %v6983_v35  ;;  %v7059_v59 = vmul.f32 %v12888_v38, %v6984_v18  ;;  %v14275_v18 = vld [vmem:[#allocation77_spill] sm:$0xff] }
 0xbd2   : > { %v8058_v21 = vpop.eup %8057 }
 0xbd3   : > { %v13249_v8 = vadd.f32 %v12891_v29, %v7058_v5  ;;  %v13252_v20 = vadd.f32 %v12894_v11, %v7059_v59  ;;  %v6985_v43 = vmul.f32 %v8058_v21, %v14273_v33  ;;  %v6986_v14 = vmul.f32 %v8058_v21, %v14274_v50  ;;  %v14276_v5 = vld [vmem:[#allocation79_spill] sm:$0xff] }
 0xbd5   : > { %v8060_v61 = vpop.eup %8059  ;;  %7197 = vst [vmem:[#allocation2 + $0xc0] sm:$0xff] %v13249_v8  ;;  %7198 = vst [vmem:[#allocation2 + $0x1c0] sm:$0xff] %v13252_v20  ;;  %v7060_v35 = vmul.f32 %v12885_v46, %v6985_v43  ;;  %v7061_v27 = vmul.f32 %v12888_v38, %v6986_v14 }
 0xbd6   : > { %v6987_v28 = vmul.f32 %v8060_v61, %v14275_v18  ;;  %v6988_v26 = vmul.f32 %v8060_v61, %v14276_v5 }
 0xbd7   : > { %v13263_v59 = vadd.f32 %v12891_v29, %v7060_v35  ;;  %v13266_v33 = vadd.f32 %v12894_v11, %v7061_v27 }
 0xbd8   : > { %v7062_v21 = vmul.f32 %v12885_v46, %v6987_v28  ;;  %v7063_v50 = vmul.f32 %v12888_v38, %v6988_v26  ;;  %7206 = sbr.rel (%p7627_p5) target bundleno = 3055 (0xbef), region = 88 }
 0xbd9   : > { %7199 = vst [vmem:[#allocation2 + $0x158] sm:$0xff] %v13263_v59  ;;  %7200 = vst [vmem:[#allocation2 + $0x10] sm:$0xff] %v13266_v33 }
 0xbda   : > { %v13273_v14 = vadd.f32 %v12891_v29, %v7062_v21  ;;  %v13276_v43 = vadd.f32 %v12894_v11, %v7063_v50 }
 0xbdc   : > { %7201 = vst [vmem:[#allocation2 + $0x58] sm:$0xff] %v13273_v14  ;;  %7202 = vst [vmem:[#allocation2 + $0xa0] sm:$0xff] %v13276_v43 }
 0xbdd   : > { %v7666_v46 = vpack.c.bf16 %v12906_v58, %v12903_v22  ;;  %v7667_v38 = vpack.c.bf16 %v12920_v17, %v12917_v41  ;;  %v7668_v29 = vpack.c.bf16 %v12928_v39, %v12925_v60  ;;  %v7669_v11 = vpack.c.bf16 %v12944_v32, %v12941_v31  ;;  %v14277_v26 = vld [vmem:[#allocation81_spill] sm:$0xff]  ;;  %v14279_v58 = vld [vmem:[#allocation83_spill] sm:$0xff] }
 0xbde   : > { %v7670_v28 = vpack.c.bf16 %v14277_v26, %v12949_v4  ;;  %v7671_v61 = vpack.c.bf16 %v12968_v1, %v12965_v25  ;;  %v7672_v35 = vpack.c.bf16 %v12976_v34, %v12973_v49  ;;  %v7673_v22 = vpack.c.bf16 %v12992_v57, %v12989_v44  ;;  %v14280_v57 = vld [vmem:[#allocation89_spill] sm:$0xff] }
 0xbdf   : > { %7399 = vst [vmem:[%s14278_s26] sm:$0xff] %v7666_v46  ;;  %7400 = vst [vmem:[%s14278_s26 + $0x8] sm:$0xff] %v7667_v38  ;;  %v7674_v41 = vpack.c.bf16 %v14279_v58, %v12997_v47  ;;  %v7675_v17 = vpack.c.bf16 %v13014_v15, %v13011_v53  ;;  %v7676_v60 = vpack.c.bf16 %v13024_v48, %v13021_v56  ;;  %v14281_v53 = vld [vmem:[#allocation82_spill] sm:$0xff]  ;;  %v14282_v15 = vld [vmem:[#allocation88_spill] sm:$0xff] }
 0xbe0   : > { %7401 = vst [vmem:[%s14278_s26 + $0x10] sm:$0xff] %v7668_v29  ;;  %7402 = vst [vmem:[%s14278_s26 + $0x18] sm:$0xff] %v7669_v11  ;;  %v7677_v39 = vpack.c.bf16 %v13048_v52, %v13045_v7  ;;  %v7678_v31 = vpack.c.bf16 %v13040_v16, %v13037_v63  ;;  %v7679_v32 = vpack.c.bf16 %v13074_v42, %v13071_v55  ;;  %v14283_v48 = vld [vmem:[#allocation84_spill] sm:$0xff]  ;;  %v14284_v16 = vld [vmem:[#allocation51_spill] sm:$0xff] }
 0xbe1   : > { %7403 = vst [vmem:[%s14278_s26 + $0x20] sm:$0xff] %v7670_v28  ;;  %7404 = vst [vmem:[%s14278_s26 + $0x28] sm:$0xff] %v7671_v61  ;;  %v7680_v4 = vpack.c.bf16 %v13062_v62, %v13059_v45  ;;  %v7681_v25 = vpack.c.bf16 %v13102_v3, %v13099_v23  ;;  %v7682_v1 = vpack.c.bf16 %v13086_v24, %v13083_v13  ;;  %v14285_v7 = vld [vmem:[#allocation40_spill] sm:$0xff]  ;;  %v14286_v45 = vld [vmem:[#allocation39_spill] sm:$0xff] }
 0xbe2   : > { %7405 = vst [vmem:[%s14278_s26 + $0x30] sm:$0xff] %v7672_v35  ;;  %7406 = vst [vmem:[%s14278_s26 + $0x38] sm:$0xff] %v7673_v22  ;;  %v7683_v49 = vpack.c.bf16 %v13124_v9, %v13121_v10  ;;  %v7684_v34 = vpack.c.bf16 %v13110_v30, %v13107_v54  ;;  %v7685_v44 = vpack.c.bf16 %v13130_v6, %v13127_v12  ;;  %v14287_v62 = vld [vmem:[#allocation43_spill] sm:$0xff]  ;;  %v14288_v24 = vld [vmem:[#allocation54_spill] sm:$0xff] }
 0xbe3   : > { %7407 = vst [vmem:[%s14278_s26 + $0x40] sm:$0xff] %v7674_v41  ;;  %7408 = vst [vmem:[%s14278_s26 + $0x48] sm:$0xff] %v7675_v17  ;;  %v7686_v47 = vpack.c.bf16 %v14280_v57, %v13141_v0  ;;  %v7687_v56 = vpack.c.bf16 %v14282_v15, %v14281_v53  ;;  %v7688_v63 = vpack.c.bf16 %v14283_v48, %v13165_v36  ;;  %v14289_v3 = vld [vmem:[#allocation44_spill] sm:$0xff]  ;;  %v14290_v54 = vld [vmem:[#allocation85_spill] sm:$0xff] }
 0xbe4   : > { %7409 = vst [vmem:[%s14278_s26 + $0x50] sm:$0xff] %v7676_v60  ;;  %7410 = vst [vmem:[%s14278_s26 + $0x58] sm:$0xff] %v7677_v39  ;;  %v7689_v52 = vpack.c.bf16 %v14285_v7, %v14284_v16  ;;  %v7690_v55 = vpack.c.bf16 %v14287_v62, %v14286_v45  ;;  %v7691_v42 = vpack.c.bf16 %v13204_v51, %v13201_v37 }
 0xbe5   : > { %7411 = vst [vmem:[%s14278_s26 + $0x60] sm:$0xff] %v7678_v31  ;;  %7412 = vst [vmem:[%s14278_s26 + $0x68] sm:$0xff] %v7679_v32  ;;  %v7692_v13 = vpack.c.bf16 %v13216_v19, %v13213_v40  ;;  %v7693_v23 = vpack.c.bf16 %v14288_v24, %v13225_v2  ;;  %v7694_v30 = vpack.c.bf16 %v14290_v54, %v14289_v3 }
 0xbe6   : > { %7413 = vst [vmem:[%s14278_s26 + $0x70] sm:$0xff] %v7680_v4  ;;  %7414 = vst [vmem:[%s14278_s26 + $0x78] sm:$0xff] %v7681_v25  ;;  %v7695_v10 = vpack.c.bf16 %v13252_v20, %v13249_v8  ;;  %v7696_v9 = vpack.c.bf16 %v13266_v33, %v13263_v59  ;;  %v7697_v12 = vpack.c.bf16 %v13276_v43, %v13273_v14 }
 0xbe7   : > { %7415 = vst [vmem:[%s14278_s26 + $0x80] sm:$0xff] %v7682_v1  ;;  %7416 = vst [vmem:[%s14278_s26 + $0x88] sm:$0xff] %v7683_v49 }
 0xbe8   : > { %7417 = vst [vmem:[%s14278_s26 + $0x90] sm:$0xff] %v7684_v34  ;;  %7418 = vst [vmem:[%s14278_s26 + $0x98] sm:$0xff] %v7685_v44 }
 0xbe9   : > { %7419 = vst [vmem:[%s14278_s26 + $0xa0] sm:$0xff] %v7686_v47  ;;  %7420 = vst [vmem:[%s14278_s26 + $0xa8] sm:$0xff] %v7687_v56 }
 0xbea   : > { %7421 = vst [vmem:[%s14278_s26 + $0xb0] sm:$0xff] %v7688_v63  ;;  %7422 = vst [vmem:[%s14278_s26 + $0xb8] sm:$0xff] %v7689_v52 }
 0xbeb   : > { %7423 = vst [vmem:[%s14278_s26 + $0xc0] sm:$0xff] %v7690_v55  ;;  %7424 = vst [vmem:[%s14278_s26 + $0xc8] sm:$0xff] %v7691_v42 }
 0xbec   : > { %7425 = vst [vmem:[%s14278_s26 + $0xd0] sm:$0xff] %v7692_v13  ;;  %7426 = vst [vmem:[%s14278_s26 + $0xd8] sm:$0xff] %v7693_v23 }
 0xbed   : > { %7427 = vst [vmem:[%s14278_s26 + $0xe0] sm:$0xff] %v7694_v30  ;;  %7428 = vst [vmem:[%s14278_s26 + $0xe8] sm:$0xff] %v7695_v10 }
 0xbee   : > { %7429 = vst [vmem:[%s14278_s26 + $0xf0] sm:$0xff] %v7696_v9  ;;  %7430 = vst [vmem:[%s14278_s26 + $0xf8] sm:$0xff] %v7697_v12 }
 0xbef PF: > { %s14291_s30 = sld [smem:[#allocation3_spill]] }
 0xbf5   : > { %s25_s18 = sadd.s32 1, %s14291_s30  }
 0xbf6   : > { %p22_p6 = scmp.ge.s32.totalorder %s25_s18, 6  }
 0xbf8   :  { %24 = sbr.rel (!%p22_p6) target bundleno = 9 (0x9), region = 154 }

</bundles_post_ra>
